<compile_context>
chip_gen: v5e
topology: v5e:2x2
jax: 0.10.0
libtpu: 0.0.40
codegen_flags: <defaults>
</compile_context>

<pallas_src>
import jax
import jax.numpy as jnp
from jax.experimental import pallas as pl
from jax.experimental.pallas import tpu as pltpu

# Hyper-parameters hard-coded by get_backbone_eegnetv4(k_width=1, in_chans=16,
# input_window_samples=400, ...)
F1, D, F2 = 8, 2, 16
IN_CHANS = 16
T_IN = 400
KLEN = 64            # temporal kernel length
K_SEP = 16           # separable depthwise kernel length
N_OUT_TIME = 12      # final_conv_length (hard-coded in Backbone_EEGNetv4)
N_POOL1 = 100        # length after MaxPool(1,4) on 401 samples
BN_EPS = 1e-3

# In-kernel lane layout (time on lanes everywhere, one batch element per step).
M_LANE = 32                      # left zero margin = (K_SEP//2) * pool4 stride
TP_IN = 640                      # padded input width (>= M_LANE + 464), mult of 128
W2 = 512                         # post spatial+temporal conv slab width
W4 = 448                         # dilated pool-4 slab width
W5 = 384                         # dilated separable-conv slab width
W6 = 356                         # dilated pool-8 slab width (feature m at lane 32*m)


# ------------------------------ fused kernel -------------------------------

def _eegnet_fused_kernel(x_ref, wsp_ref, wt_ref, sh1_ref, w1_ref, w2_ref,
                         sh2_ref, wmask_ref, bfc_ref, o_ref,
                         u_s, z2_s, m4_s, z4_s):
    # ---- stage 1: grouped spatial conv (Conv2dWithConstraint, BN1 scale folded)
    # Commuted in front of the temporal conv: u[oc, L] = sum_e Wsp[oc,e]*xpad[e,L].
    u_s[...] = jnp.dot(wsp_ref[...], x_ref[0],
                       preferred_element_type=jnp.float32)          # (16, 640)

    # ---- stage 2: 64-tap temporal conv (depthwise over the 16 rows) + BN1 shift + ELU
    acc = jnp.zeros((F1 * D, W2), jnp.float32)
    for k in range(KLEN):                                            # unrolled, static slices
        acc = acc + wt_ref[:, k:k + 1] * u_s[:, k:k + W2]
    acc = acc + sh1_ref[...]
    # ELU(alpha=1).  exp() of the unselected (positive) branch may overflow to
    # inf; jnp.where is a select so that is harmless -- do not "optimize" into
    # an arithmetic blend.
    z2_s[...] = jnp.where(acc > 0.0, acc, jnp.exp(acc) - 1.0)        # (16, 512)

    # ---- stage 3: MaxPool(1,4), kept dilated (pooled sample jj at lane 32+4*jj)
    m4 = z2_s[:, 0:W4]
    for d in (1, 2, 3):
        m4 = jnp.maximum(m4, z2_s[:, d:d + W4])
    lane = jax.lax.broadcasted_iota(jnp.int32, (F1 * D, W4), 1)
    # zero outside the valid pooled range -> gives the (0,8) zero padding the
    # separable conv needs (left margin + right tail).
    m4_s[...] = jnp.where((lane >= M_LANE) & (lane < M_LANE + 4 * N_POOL1),
                          m4, 0.0)                                   # (16, 448)

    # ---- stage 4: depthwise separable conv (1,16), dilated by 4 along lanes
    od = jnp.zeros((F1 * D, W5), jnp.float32)
    for k in range(K_SEP):
        od = od + w1_ref[:, k:k + 1] * m4_s[:, 4 * k:4 * k + W5]     # (16, 384)

    # ---- stage 5: 1x1 conv (BN2 folded) + ReLU
    z4 = jnp.dot(w2_ref[...], od, preferred_element_type=jnp.float32) + sh2_ref[...]
    z4_s[...] = jnp.maximum(z4, 0.0)                                 # (16, 384)

    # ---- stage 6: MaxPool(1,8), kept dilated (output sample m at lane 32*m)
    m8 = z4_s[:, 0:W6]
    for r in range(1, 8):
        m8 = jnp.maximum(m8, z4_s[:, 4 * r:4 * r + W6])              # (16, 356)

    # ---- stage 7: flatten + Linear, as a masked reduction over the dilated map
    n_classes = o_ref.shape[-1]
    col = jax.lax.broadcasted_iota(jnp.int32, (1, n_classes), 1)
    row = bfc_ref[...]                                               # (1, n_classes)
    for n in range(n_classes):
        prod = wmask_ref[n] * m8                                     # (16, 356)
        s = jnp.sum(jnp.sum(prod, axis=1, keepdims=True), axis=0, keepdims=True)
        row = row + jnp.where(col == n, s, 0.0)
    o_ref[0] = row


def _linear_kernel(x_ref, w_ref, b_ref, o_ref):
    # bare classifier head (used only when classifier_indices == [])
    o_ref[...] = (jnp.dot(x_ref[...], w_ref[...],
                          preferred_element_type=jnp.float32) + b_ref[...])


# ------------------------------- parameters --------------------------------

def init_params(key, n_classes, ch_out):
    ks = jax.random.split(key, 5)

    def conv_init(k, shape, fan_in):      # stand-in for torch Conv2d default init
        bound = float(fan_in) ** -0.5
        return jax.random.uniform(k, shape, jnp.float32, -bound, bound)

    p = {}
    p['w_temporal'] = conv_init(ks[0], (F1, KLEN), KLEN)             # Conv2d(1,F1,(1,64))
    p['w_spatial'] = conv_init(ks[1], (F1 * D, IN_CHANS), IN_CHANS)  # Conv2dWithConstraint
    p['bn1_gamma'] = jnp.ones((F1 * D,), jnp.float32)
    p['bn1_beta'] = jnp.zeros((F1 * D,), jnp.float32)
    p['bn1_mean'] = jnp.zeros((F1 * D,), jnp.float32)
    p['bn1_var'] = jnp.ones((F1 * D,), jnp.float32)
    p['w_sep1'] = conv_init(ks[2], (F1 * D, K_SEP), K_SEP)           # depthwise (1,16), [chan, tap]
    p['w_sep2'] = conv_init(ks[3], (F2, F1 * D), F1 * D)             # 1x1 conv
    p['bn2_gamma'] = jnp.ones((F2,), jnp.float32)
    p['bn2_beta'] = jnp.zeros((F2,), jnp.float32)
    p['bn2_mean'] = jnp.zeros((F2,), jnp.float32)
    p['bn2_var'] = jnp.ones((F2,), jnp.float32)
    # classifier: get_fc -> kaiming_normal_ weight, zero bias
    std = (2.0 / ch_out) ** 0.5
    p['w_fc'] = std * jax.random.normal(ks[4], (n_classes, ch_out), jnp.float32)
    p['b_fc'] = jnp.zeros((n_classes,), jnp.float32)
    return p


def _fold_params(p):
    """Fold renorm + eval-mode BN into the conv weights (runs inside jit)."""
    n_classes = p['w_fc'].shape[0]
    # Conv2dWithConstraint: torch.renorm(p=2, dim=0, maxnorm=1)
    w_sp = p['w_spatial']
    norm = jnp.sqrt(jnp.sum(w_sp * w_sp, axis=1, keepdims=True))
    w_sp = w_sp * jnp.where(norm > 1.0, 1.0 / (norm + 1e-7), 1.0)
    scale1 = p['bn1_gamma'] * jax.lax.rsqrt(p['bn1_var'] + BN_EPS)
    shift1 = p['bn1_beta'] - p['bn1_mean'] * scale1
    wsp_scaled = w_sp * scale1[:, None]                              # (16, 16)
    wt_rep = jnp.repeat(p['w_temporal'], D, axis=0)                  # (16, 64), row oc uses filter oc//2
    scale2 = p['bn2_gamma'] * jax.lax.rsqrt(p['bn2_var'] + BN_EPS)
    shift2 = p['bn2_beta'] - p['bn2_mean'] * scale2
    w2s = p['w_sep2'] * scale2[:, None]                              # (16, 16)
    # classifier weights scattered onto the dilated lane grid (feature m -> lane 32*m)
    wfc3 = p['w_fc'].reshape(n_classes, F2, N_OUT_TIME)
    wmask = jnp.zeros((n_classes, F2, W6), jnp.float32)
    wmask = wmask.at[:, :, 0:32 * (N_OUT_TIME - 1) + 1:32].set(wfc3)
    bfc2d = p['b_fc'].reshape(1, n_classes)
    return (wsp_scaled, wt_rep, shift1.reshape(F1 * D, 1), p['w_sep1'],
            w2s, shift2.reshape(F2, 1), wmask, bfc2d)


# -------------------------------- forwards ---------------------------------

@jax.jit
def _backbone_forward(params, x):
    """x: (B, 16, 400) float32 -> scores (B, n_classes)."""
    B = x.shape[0]
    assert x.shape[1] == IN_CHANS and x.shape[2] == T_IN
    n_classes = params['w_fc'].shape[0]
    (wsp_scaled, wt_rep, shift1, w_sep1, w2s, shift2, wmask, bfc2d) = _fold_params(params)

    pad_l = M_LANE + KLEN // 2                                       # 64
    xpad = jnp.pad(x.astype(jnp.float32),
                   ((0, 0), (0, 0), (pad_l, TP_IN - pad_l - T_IN)))  # (B, 16, 640)

    out = pl.pallas_call(
        _eegnet_fused_kernel,
        out_shape=jax.ShapeDtypeStruct((B, 1, n_classes), jnp.float32),
        grid=(B,),
        in_specs=[
            pl.BlockSpec((1, IN_CHANS, TP_IN), lambda b: (b, 0, 0)),
            pl.BlockSpec((F1 * D, IN_CHANS), lambda b: (0, 0)),
            pl.BlockSpec((F1 * D, KLEN), lambda b: (0, 0)),
            pl.BlockSpec((F1 * D, 1), lambda b: (0, 0)),
            pl.BlockSpec((F1 * D, K_SEP), lambda b: (0, 0)),
            pl.BlockSpec((F2, F1 * D), lambda b: (0, 0)),
            pl.BlockSpec((F2, 1), lambda b: (0, 0)),
            pl.BlockSpec((n_classes, F2, W6), lambda b: (0, 0, 0)),
            pl.BlockSpec((1, n_classes), lambda b: (0, 0)),
        ],
        out_specs=pl.BlockSpec((1, 1, n_classes), lambda b: (b, 0, 0)),
        scratch_shapes=[
            pltpu.VMEM((F1 * D, TP_IN), jnp.float32),   # u   (spatially mixed input)
            pltpu.VMEM((F1 * D, W2), jnp.float32),      # z2  (post temporal conv + ELU)
            pltpu.VMEM((F1 * D, W4), jnp.float32),      # m4z (dilated pool-4, zero-masked)
            pltpu.VMEM((F2, W5), jnp.float32),          # z4  (post 1x1 conv + ReLU)
        ],
        compiler_params=pltpu.CompilerParams(dimension_semantics=("parallel",)),
    )(xpad, wsp_scaled, wt_rep, shift1, w_sep1, w2s, shift2, wmask, bfc2d)
    return out[:, 0, :]


@jax.jit
def _head_forward(params, x):
    """Bare linear head path (classifier_indices == [])."""
    B, cin = x.shape
    n = params['w_fc'].shape[0]
    return pl.pallas_call(
        _linear_kernel,
        out_shape=jax.ShapeDtypeStruct((B, n), jnp.float32),
        grid=(1,),
        in_specs=[pl.BlockSpec((B, cin), lambda i: (0, 0)),
                  pl.BlockSpec((cin, n), lambda i: (0, 0)),
                  pl.BlockSpec((1, n), lambda i: (0, 0))],
        out_specs=pl.BlockSpec((B, n), lambda i: (0, 0)),
    )(x.astype(jnp.float32), params['w_fc'].T, params['b_fc'].reshape(1, n))


class ClassifierSharedPallas:
    """Pallas port of Classifier_Shared."""

    def __init__(self, ch_out, n_classes, dropout_1_prob, stage_1_is_shared,
                 classifier_indices, key):
        # only the configurations actually constructed by the PyTorch module are
        # supported: full EEGNetv4 backbone ([0,1,2,3]) or bare linear head ([]).
        assert classifier_indices in ([], [0, 1, 2, 3])
        if classifier_indices:
            assert ch_out == F2 * N_OUT_TIME, "ch_out must equal F2 * final_conv_length (192)"
        self.ch_out = ch_out
        self.n_classes = n_classes
        self.dropout_1_prob = dropout_1_prob      # identity at inference
        self.stage_1_is_shared = stage_1_is_shared
        self.classifier_indices = classifier_indices
        self.params = init_params(key, n_classes, ch_out)

    def _classify(self, x):
        if self.classifier_indices:
            return _backbone_forward(self.params, x)
        return _head_forward(self.params, x)

    def __call__(self, x_dict):
        assert isinstance(x_dict, dict), "Input should be a dictionary."
        x = x_dict['x']
        if self.stage_1_is_shared:
            scores = self._classify(x)
        else:
            scores = jnp.stack([self._classify(x[:, s]) for s in range(x.shape[1])], axis=1)
        return {'scores': scores}


if __name__ == "__main__":
    key = jax.random.PRNGKey(0)
    kx, kp = jax.random.split(key)
    # Backbone hard-codes in_chans=16, input_window_samples=400 -> x: (B, 16, 400)
    x = jax.random.normal(kx, (2, IN_CHANS, T_IN), jnp.float32)

    model = ClassifierSharedPallas(ch_out=F2 * N_OUT_TIME, n_classes=2,
                                   dropout_1_prob=0.0, stage_1_is_shared=True,
                                   classifier_indices=[0, 1, 2, 3], key=kp)
    out = model({'x': x})
    scores = jax.block_until_ready(out['scores'])
    assert scores.shape == (2, 2) and scores.dtype == jnp.float32
    print("KERNEL_OK")
</pallas_src>

<mosaic_0001>
module attributes {stable_mosaic.version = 11 : i64} {
  func.func @_eegnet_fused_kernel(%arg0: i32, %arg1: memref<1x16x640xf32, #tpu.memory_space<vmem>>, %arg2: memref<16x16xf32, #tpu.memory_space<vmem>>, %arg3: memref<16x64xf32, #tpu.memory_space<vmem>>, %arg4: memref<16x1xf32, #tpu.memory_space<vmem>>, %arg5: memref<16x16xf32, #tpu.memory_space<vmem>>, %arg6: memref<16x16xf32, #tpu.memory_space<vmem>>, %arg7: memref<16x1xf32, #tpu.memory_space<vmem>>, %arg8: memref<2x16x356xf32, #tpu.memory_space<vmem>>, %arg9: memref<1x2xf32, #tpu.memory_space<vmem>>, %arg10: memref<1x1x2xf32, #tpu.memory_space<vmem>>, %arg11: memref<16x640xf32, #tpu.memory_space<vmem>>, %arg12: memref<16x512xf32, #tpu.memory_space<vmem>>, %arg13: memref<16x448xf32, #tpu.memory_space<vmem>>, %arg14: memref<16x384xf32, #tpu.memory_space<vmem>>) attributes {dimension_semantics = [#tpu.dimension_semantics<parallel>], iteration_bounds = array<i64: 2>, scalar_prefetch = 0 : i64, scratch_operands = 4 : i64, tpu.core_type = #tpu.core_type<tc>, window_params = [{transform_indices = @transform_0, window_bounds = array<i64: 1, 16, 640>}, {pipeline_mode = #tpu.pipeline_mode<synchronous>, transform_indices = @transform_1, window_bounds = array<i64: 16, 16>}, {pipeline_mode = #tpu.pipeline_mode<synchronous>, transform_indices = @transform_2, window_bounds = array<i64: 16, 64>}, {pipeline_mode = #tpu.pipeline_mode<synchronous>, transform_indices = @transform_3, window_bounds = array<i64: 16, 1>}, {pipeline_mode = #tpu.pipeline_mode<synchronous>, transform_indices = @transform_4, window_bounds = array<i64: 16, 16>}, {pipeline_mode = #tpu.pipeline_mode<synchronous>, transform_indices = @transform_5, window_bounds = array<i64: 16, 16>}, {pipeline_mode = #tpu.pipeline_mode<synchronous>, transform_indices = @transform_6, window_bounds = array<i64: 16, 1>}, {pipeline_mode = #tpu.pipeline_mode<synchronous>, transform_indices = @transform_7, window_bounds = array<i64: 2, 16, 356>}, {pipeline_mode = #tpu.pipeline_mode<synchronous>, transform_indices = @transform_8, window_bounds = array<i64: 1, 2>}, {transform_indices = @transform_9, window_bounds = array<i64: 1, 1, 2>}]} {
    %c0 = arith.constant 0 : index
    %c0_0 = arith.constant 0 : index
    %0 = vector.load %arg2[%c0, %c0_0] : memref<16x16xf32, #tpu.memory_space<vmem>>, vector<16x16xf32>
    %c0_1 = arith.constant 0 : index
    %c0_2 = arith.constant 0 : index
    %c0_3 = arith.constant 0 : index
    %1 = vector.load %arg1[%c0_1, %c0_2, %c0_3] : memref<1x16x640xf32, #tpu.memory_space<vmem>>, vector<1x16x640xf32>
    %2 = vector.shape_cast %1 : vector<1x16x640xf32> to vector<16x640xf32>
    %cst = arith.constant dense<0.000000e+00> : vector<16x640xf32>
    %3 = tpu.matmul %0, %2, %cst {dimension_numbers = #tpu.dot_dimension_numbers<[1], [0], [0], [1], [0, 0, 1, 1], [], []>} : vector<16x16xf32>, vector<16x640xf32>, vector<16x640xf32> -> vector<16x640xf32>
    %c0_4 = arith.constant 0 : index
    %c0_5 = arith.constant 0 : index
    %4 = vector.load %arg11[%c0_4, %c0_5] : memref<16x640xf32, #tpu.memory_space<vmem>>, vector<16x640xf32>
    tpu.vector_store %arg11[%c0_4, %c0_5], %3 {strides = array<i32>} : memref<16x640xf32, #tpu.memory_space<vmem>>, vector<16x640xf32>,
    %cst_6 = arith.constant 0.000000e+00 : f32
    %5 = vector.broadcast %cst_6 : f32 to vector<16x512xf32>
    %c0_7 = arith.constant 0 : index
    %c0_8 = arith.constant 0 : index
    %6 = vector.load %arg3[%c0_7, %c0_8] : memref<16x64xf32, #tpu.memory_space<vmem>>, vector<16x1xf32>
    %c0_9 = arith.constant 0 : index
    %c0_10 = arith.constant 0 : index
    %7 = vector.load %arg11[%c0_9, %c0_10] : memref<16x640xf32, #tpu.memory_space<vmem>>, vector<16x512xf32>
    %8 = vector.broadcast %6 : vector<16x1xf32> to vector<16x512xf32>
    %9 = arith.mulf %8, %7 : vector<16x512xf32>
    %10 = arith.addf %5, %9 : vector<16x512xf32>
    %c0_11 = arith.constant 0 : index
    %c1 = arith.constant 1 : index
    %11 = vector.load %arg3[%c0_11, %c1] : memref<16x64xf32, #tpu.memory_space<vmem>>, vector<16x1xf32>
    %c0_12 = arith.constant 0 : index
    %c1_13 = arith.constant 1 : index
    %12 = vector.load %arg11[%c0_12, %c1_13] : memref<16x640xf32, #tpu.memory_space<vmem>>, vector<16x512xf32>
    %13 = vector.broadcast %11 : vector<16x1xf32> to vector<16x512xf32>
    %14 = arith.mulf %13, %12 : vector<16x512xf32>
    %15 = arith.addf %10, %14 : vector<16x512xf32>
    %c0_14 = arith.constant 0 : index
    %c2 = arith.constant 2 : index
    %16 = vector.load %arg3[%c0_14, %c2] : memref<16x64xf32, #tpu.memory_space<vmem>>, vector<16x1xf32>
    %c0_15 = arith.constant 0 : index
    %c2_16 = arith.constant 2 : index
    %17 = vector.load %arg11[%c0_15, %c2_16] : memref<16x640xf32, #tpu.memory_space<vmem>>, vector<16x512xf32>
    %18 = vector.broadcast %16 : vector<16x1xf32> to vector<16x512xf32>
    %19 = arith.mulf %18, %17 : vector<16x512xf32>
    %20 = arith.addf %15, %19 : vector<16x512xf32>
    %c0_17 = arith.constant 0 : index
    %c3 = arith.constant 3 : index
    %21 = vector.load %arg3[%c0_17, %c3] : memref<16x64xf32, #tpu.memory_space<vmem>>, vector<16x1xf32>
    %c0_18 = arith.constant 0 : index
    %c3_19 = arith.constant 3 : index
    %22 = vector.load %arg11[%c0_18, %c3_19] : memref<16x640xf32, #tpu.memory_space<vmem>>, vector<16x512xf32>
    %23 = vector.broadcast %21 : vector<16x1xf32> to vector<16x512xf32>
    %24 = arith.mulf %23, %22 : vector<16x512xf32>
    %25 = arith.addf %20, %24 : vector<16x512xf32>
    %c0_20 = arith.constant 0 : index
    %c4 = arith.constant 4 : index
    %26 = vector.load %arg3[%c0_20, %c4] : memref<16x64xf32, #tpu.memory_space<vmem>>, vector<16x1xf32>
    %c0_21 = arith.constant 0 : index
    %c4_22 = arith.constant 4 : index
    %27 = vector.load %arg11[%c0_21, %c4_22] : memref<16x640xf32, #tpu.memory_space<vmem>>, vector<16x512xf32>
    %28 = vector.broadcast %26 : vector<16x1xf32> to vector<16x512xf32>
    %29 = arith.mulf %28, %27 : vector<16x512xf32>
    %30 = arith.addf %25, %29 : vector<16x512xf32>
    %c0_23 = arith.constant 0 : index
    %c5 = arith.constant 5 : index
    %31 = vector.load %arg3[%c0_23, %c5] : memref<16x64xf32, #tpu.memory_space<vmem>>, vector<16x1xf32>
    %c0_24 = arith.constant 0 : index
    %c5_25 = arith.constant 5 : index
    %32 = vector.load %arg11[%c0_24, %c5_25] : memref<16x640xf32, #tpu.memory_space<vmem>>, vector<16x512xf32>
    %33 = vector.broadcast %31 : vector<16x1xf32> to vector<16x512xf32>
    %34 = arith.mulf %33, %32 : vector<16x512xf32>
    %35 = arith.addf %30, %34 : vector<16x512xf32>
    %c0_26 = arith.constant 0 : index
    %c6 = arith.constant 6 : index
    %36 = vector.load %arg3[%c0_26, %c6] : memref<16x64xf32, #tpu.memory_space<vmem>>, vector<16x1xf32>
    %c0_27 = arith.constant 0 : index
    %c6_28 = arith.constant 6 : index
    %37 = vector.load %arg11[%c0_27, %c6_28] : memref<16x640xf32, #tpu.memory_space<vmem>>, vector<16x512xf32>
    %38 = vector.broadcast %36 : vector<16x1xf32> to vector<16x512xf32>
    %39 = arith.mulf %38, %37 : vector<16x512xf32>
    %40 = arith.addf %35, %39 : vector<16x512xf32>
    %c0_29 = arith.constant 0 : index
    %c7 = arith.constant 7 : index
    %41 = vector.load %arg3[%c0_29, %c7] : memref<16x64xf32, #tpu.memory_space<vmem>>, vector<16x1xf32>
    %c0_30 = arith.constant 0 : index
    %c7_31 = arith.constant 7 : index
    %42 = vector.load %arg11[%c0_30, %c7_31] : memref<16x640xf32, #tpu.memory_space<vmem>>, vector<16x512xf32>
    %43 = vector.broadcast %41 : vector<16x1xf32> to vector<16x512xf32>
    %44 = arith.mulf %43, %42 : vector<16x512xf32>
    %45 = arith.addf %40, %44 : vector<16x512xf32>
    %c0_32 = arith.constant 0 : index
    %c8 = arith.constant 8 : index
    %46 = vector.load %arg3[%c0_32, %c8] : memref<16x64xf32, #tpu.memory_space<vmem>>, vector<16x1xf32>
    %c0_33 = arith.constant 0 : index
    %c8_34 = arith.constant 8 : index
    %47 = vector.load %arg11[%c0_33, %c8_34] : memref<16x640xf32, #tpu.memory_space<vmem>>, vector<16x512xf32>
    %48 = vector.broadcast %46 : vector<16x1xf32> to vector<16x512xf32>
    %49 = arith.mulf %48, %47 : vector<16x512xf32>
    %50 = arith.addf %45, %49 : vector<16x512xf32>
    %c0_35 = arith.constant 0 : index
    %c9 = arith.constant 9 : index
    %51 = vector.load %arg3[%c0_35, %c9] : memref<16x64xf32, #tpu.memory_space<vmem>>, vector<16x1xf32>
    %c0_36 = arith.constant 0 : index
    %c9_37 = arith.constant 9 : index
    %52 = vector.load %arg11[%c0_36, %c9_37] : memref<16x640xf32, #tpu.memory_space<vmem>>, vector<16x512xf32>
    %53 = vector.broadcast %51 : vector<16x1xf32> to vector<16x512xf32>
    %54 = arith.mulf %53, %52 : vector<16x512xf32>
    %55 = arith.addf %50, %54 : vector<16x512xf32>
    %c0_38 = arith.constant 0 : index
    %c10 = arith.constant 10 : index
    %56 = vector.load %arg3[%c0_38, %c10] : memref<16x64xf32, #tpu.memory_space<vmem>>, vector<16x1xf32>
    %c0_39 = arith.constant 0 : index
    %c10_40 = arith.constant 10 : index
    %57 = vector.load %arg11[%c0_39, %c10_40] : memref<16x640xf32, #tpu.memory_space<vmem>>, vector<16x512xf32>
    %58 = vector.broadcast %56 : vector<16x1xf32> to vector<16x512xf32>
    %59 = arith.mulf %58, %57 : vector<16x512xf32>
    %60 = arith.addf %55, %59 : vector<16x512xf32>
    %c0_41 = arith.constant 0 : index
    %c11 = arith.constant 11 : index
    %61 = vector.load %arg3[%c0_41, %c11] : memref<16x64xf32, #tpu.memory_space<vmem>>, vector<16x1xf32>
    %c0_42 = arith.constant 0 : index
    %c11_43 = arith.constant 11 : index
    %62 = vector.load %arg11[%c0_42, %c11_43] : memref<16x640xf32, #tpu.memory_space<vmem>>, vector<16x512xf32>
    %63 = vector.broadcast %61 : vector<16x1xf32> to vector<16x512xf32>
    %64 = arith.mulf %63, %62 : vector<16x512xf32>
    %65 = arith.addf %60, %64 : vector<16x512xf32>
    %c0_44 = arith.constant 0 : index
    %c12 = arith.constant 12 : index
    %66 = vector.load %arg3[%c0_44, %c12] : memref<16x64xf32, #tpu.memory_space<vmem>>, vector<16x1xf32>
    %c0_45 = arith.constant 0 : index
    %c12_46 = arith.constant 12 : index
    %67 = vector.load %arg11[%c0_45, %c12_46] : memref<16x640xf32, #tpu.memory_space<vmem>>, vector<16x512xf32>
    %68 = vector.broadcast %66 : vector<16x1xf32> to vector<16x512xf32>
    %69 = arith.mulf %68, %67 : vector<16x512xf32>
    %70 = arith.addf %65, %69 : vector<16x512xf32>
    %c0_47 = arith.constant 0 : index
    %c13 = arith.constant 13 : index
    %71 = vector.load %arg3[%c0_47, %c13] : memref<16x64xf32, #tpu.memory_space<vmem>>, vector<16x1xf32>
    %c0_48 = arith.constant 0 : index
    %c13_49 = arith.constant 13 : index
    %72 = vector.load %arg11[%c0_48, %c13_49] : memref<16x640xf32, #tpu.memory_space<vmem>>, vector<16x512xf32>
    %73 = vector.broadcast %71 : vector<16x1xf32> to vector<16x512xf32>
    %74 = arith.mulf %73, %72 : vector<16x512xf32>
    %75 = arith.addf %70, %74 : vector<16x512xf32>
    %c0_50 = arith.constant 0 : index
    %c14 = arith.constant 14 : index
    %76 = vector.load %arg3[%c0_50, %c14] : memref<16x64xf32, #tpu.memory_space<vmem>>, vector<16x1xf32>
    %c0_51 = arith.constant 0 : index
    %c14_52 = arith.constant 14 : index
    %77 = vector.load %arg11[%c0_51, %c14_52] : memref<16x640xf32, #tpu.memory_space<vmem>>, vector<16x512xf32>
    %78 = vector.broadcast %76 : vector<16x1xf32> to vector<16x512xf32>
    %79 = arith.mulf %78, %77 : vector<16x512xf32>
    %80 = arith.addf %75, %79 : vector<16x512xf32>
    %c0_53 = arith.constant 0 : index
    %c15 = arith.constant 15 : index
    %81 = vector.load %arg3[%c0_53, %c15] : memref<16x64xf32, #tpu.memory_space<vmem>>, vector<16x1xf32>
    %c0_54 = arith.constant 0 : index
    %c15_55 = arith.constant 15 : index
    %82 = vector.load %arg11[%c0_54, %c15_55] : memref<16x640xf32, #tpu.memory_space<vmem>>, vector<16x512xf32>
    %83 = vector.broadcast %81 : vector<16x1xf32> to vector<16x512xf32>
    %84 = arith.mulf %83, %82 : vector<16x512xf32>
    %85 = arith.addf %80, %84 : vector<16x512xf32>
    %c0_56 = arith.constant 0 : index
    %c16 = arith.constant 16 : index
    %86 = vector.load %arg3[%c0_56, %c16] : memref<16x64xf32, #tpu.memory_space<vmem>>, vector<16x1xf32>
    %c0_57 = arith.constant 0 : index
    %c16_58 = arith.constant 16 : index
    %87 = vector.load %arg11[%c0_57, %c16_58] : memref<16x640xf32, #tpu.memory_space<vmem>>, vector<16x512xf32>
    %88 = vector.broadcast %86 : vector<16x1xf32> to vector<16x512xf32>
    %89 = arith.mulf %88, %87 : vector<16x512xf32>
    %90 = arith.addf %85, %89 : vector<16x512xf32>
    %c0_59 = arith.constant 0 : index
    %c17 = arith.constant 17 : index
    %91 = vector.load %arg3[%c0_59, %c17] : memref<16x64xf32, #tpu.memory_space<vmem>>, vector<16x1xf32>
    %c0_60 = arith.constant 0 : index
    %c17_61 = arith.constant 17 : index
    %92 = vector.load %arg11[%c0_60, %c17_61] : memref<16x640xf32, #tpu.memory_space<vmem>>, vector<16x512xf32>
    %93 = vector.broadcast %91 : vector<16x1xf32> to vector<16x512xf32>
    %94 = arith.mulf %93, %92 : vector<16x512xf32>
    %95 = arith.addf %90, %94 : vector<16x512xf32>
    %c0_62 = arith.constant 0 : index
    %c18 = arith.constant 18 : index
    %96 = vector.load %arg3[%c0_62, %c18] : memref<16x64xf32, #tpu.memory_space<vmem>>, vector<16x1xf32>
    %c0_63 = arith.constant 0 : index
    %c18_64 = arith.constant 18 : index
    %97 = vector.load %arg11[%c0_63, %c18_64] : memref<16x640xf32, #tpu.memory_space<vmem>>, vector<16x512xf32>
    %98 = vector.broadcast %96 : vector<16x1xf32> to vector<16x512xf32>
    %99 = arith.mulf %98, %97 : vector<16x512xf32>
    %100 = arith.addf %95, %99 : vector<16x512xf32>
    %c0_65 = arith.constant 0 : index
    %c19 = arith.constant 19 : index
    %101 = vector.load %arg3[%c0_65, %c19] : memref<16x64xf32, #tpu.memory_space<vmem>>, vector<16x1xf32>
    %c0_66 = arith.constant 0 : index
    %c19_67 = arith.constant 19 : index
    %102 = vector.load %arg11[%c0_66, %c19_67] : memref<16x640xf32, #tpu.memory_space<vmem>>, vector<16x512xf32>
    %103 = vector.broadcast %101 : vector<16x1xf32> to vector<16x512xf32>
    %104 = arith.mulf %103, %102 : vector<16x512xf32>
    %105 = arith.addf %100, %104 : vector<16x512xf32>
    %c0_68 = arith.constant 0 : index
    %c20 = arith.constant 20 : index
    %106 = vector.load %arg3[%c0_68, %c20] : memref<16x64xf32, #tpu.memory_space<vmem>>, vector<16x1xf32>
    %c0_69 = arith.constant 0 : index
    %c20_70 = arith.constant 20 : index
    %107 = vector.load %arg11[%c0_69, %c20_70] : memref<16x640xf32, #tpu.memory_space<vmem>>, vector<16x512xf32>
    %108 = vector.broadcast %106 : vector<16x1xf32> to vector<16x512xf32>
    %109 = arith.mulf %108, %107 : vector<16x512xf32>
    %110 = arith.addf %105, %109 : vector<16x512xf32>
    %c0_71 = arith.constant 0 : index
    %c21 = arith.constant 21 : index
    %111 = vector.load %arg3[%c0_71, %c21] : memref<16x64xf32, #tpu.memory_space<vmem>>, vector<16x1xf32>
    %c0_72 = arith.constant 0 : index
    %c21_73 = arith.constant 21 : index
    %112 = vector.load %arg11[%c0_72, %c21_73] : memref<16x640xf32, #tpu.memory_space<vmem>>, vector<16x512xf32>
    %113 = vector.broadcast %111 : vector<16x1xf32> to vector<16x512xf32>
    %114 = arith.mulf %113, %112 : vector<16x512xf32>
    %115 = arith.addf %110, %114 : vector<16x512xf32>
    %c0_74 = arith.constant 0 : index
    %c22 = arith.constant 22 : index
    %116 = vector.load %arg3[%c0_74, %c22] : memref<16x64xf32, #tpu.memory_space<vmem>>, vector<16x1xf32>
    %c0_75 = arith.constant 0 : index
    %c22_76 = arith.constant 22 : index
    %117 = vector.load %arg11[%c0_75, %c22_76] : memref<16x640xf32, #tpu.memory_space<vmem>>, vector<16x512xf32>
    %118 = vector.broadcast %116 : vector<16x1xf32> to vector<16x512xf32>
    %119 = arith.mulf %118, %117 : vector<16x512xf32>
    %120 = arith.addf %115, %119 : vector<16x512xf32>
    %c0_77 = arith.constant 0 : index
    %c23 = arith.constant 23 : index
    %121 = vector.load %arg3[%c0_77, %c23] : memref<16x64xf32, #tpu.memory_space<vmem>>, vector<16x1xf32>
    %c0_78 = arith.constant 0 : index
    %c23_79 = arith.constant 23 : index
    %122 = vector.load %arg11[%c0_78, %c23_79] : memref<16x640xf32, #tpu.memory_space<vmem>>, vector<16x512xf32>
    %123 = vector.broadcast %121 : vector<16x1xf32> to vector<16x512xf32>
    %124 = arith.mulf %123, %122 : vector<16x512xf32>
    %125 = arith.addf %120, %124 : vector<16x512xf32>
    %c0_80 = arith.constant 0 : index
    %c24 = arith.constant 24 : index
    %126 = vector.load %arg3[%c0_80, %c24] : memref<16x64xf32, #tpu.memory_space<vmem>>, vector<16x1xf32>
    %c0_81 = arith.constant 0 : index
    %c24_82 = arith.constant 24 : index
    %127 = vector.load %arg11[%c0_81, %c24_82] : memref<16x640xf32, #tpu.memory_space<vmem>>, vector<16x512xf32>
    %128 = vector.broadcast %126 : vector<16x1xf32> to vector<16x512xf32>
    %129 = arith.mulf %128, %127 : vector<16x512xf32>
    %130 = arith.addf %125, %129 : vector<16x512xf32>
    %c0_83 = arith.constant 0 : index
    %c25 = arith.constant 25 : index
    %131 = vector.load %arg3[%c0_83, %c25] : memref<16x64xf32, #tpu.memory_space<vmem>>, vector<16x1xf32>
    %c0_84 = arith.constant 0 : index
    %c25_85 = arith.constant 25 : index
    %132 = vector.load %arg11[%c0_84, %c25_85] : memref<16x640xf32, #tpu.memory_space<vmem>>, vector<16x512xf32>
    %133 = vector.broadcast %131 : vector<16x1xf32> to vector<16x512xf32>
    %134 = arith.mulf %133, %132 : vector<16x512xf32>
    %135 = arith.addf %130, %134 : vector<16x512xf32>
    %c0_86 = arith.constant 0 : index
    %c26 = arith.constant 26 : index
    %136 = vector.load %arg3[%c0_86, %c26] : memref<16x64xf32, #tpu.memory_space<vmem>>, vector<16x1xf32>
    %c0_87 = arith.constant 0 : index
    %c26_88 = arith.constant 26 : index
    %137 = vector.load %arg11[%c0_87, %c26_88] : memref<16x640xf32, #tpu.memory_space<vmem>>, vector<16x512xf32>
    %138 = vector.broadcast %136 : vector<16x1xf32> to vector<16x512xf32>
    %139 = arith.mulf %138, %137 : vector<16x512xf32>
    %140 = arith.addf %135, %139 : vector<16x512xf32>
    %c0_89 = arith.constant 0 : index
    %c27 = arith.constant 27 : index
    %141 = vector.load %arg3[%c0_89, %c27] : memref<16x64xf32, #tpu.memory_space<vmem>>, vector<16x1xf32>
    %c0_90 = arith.constant 0 : index
    %c27_91 = arith.constant 27 : index
    %142 = vector.load %arg11[%c0_90, %c27_91] : memref<16x640xf32, #tpu.memory_space<vmem>>, vector<16x512xf32>
    %143 = vector.broadcast %141 : vector<16x1xf32> to vector<16x512xf32>
    %144 = arith.mulf %143, %142 : vector<16x512xf32>
    %145 = arith.addf %140, %144 : vector<16x512xf32>
    %c0_92 = arith.constant 0 : index
    %c28 = arith.constant 28 : index
    %146 = vector.load %arg3[%c0_92, %c28] : memref<16x64xf32, #tpu.memory_space<vmem>>, vector<16x1xf32>
    %c0_93 = arith.constant 0 : index
    %c28_94 = arith.constant 28 : index
    %147 = vector.load %arg11[%c0_93, %c28_94] : memref<16x640xf32, #tpu.memory_space<vmem>>, vector<16x512xf32>
    %148 = vector.broadcast %146 : vector<16x1xf32> to vector<16x512xf32>
    %149 = arith.mulf %148, %147 : vector<16x512xf32>
    %150 = arith.addf %145, %149 : vector<16x512xf32>
    %c0_95 = arith.constant 0 : index
    %c29 = arith.constant 29 : index
    %151 = vector.load %arg3[%c0_95, %c29] : memref<16x64xf32, #tpu.memory_space<vmem>>, vector<16x1xf32>
    %c0_96 = arith.constant 0 : index
    %c29_97 = arith.constant 29 : index
    %152 = vector.load %arg11[%c0_96, %c29_97] : memref<16x640xf32, #tpu.memory_space<vmem>>, vector<16x512xf32>
    %153 = vector.broadcast %151 : vector<16x1xf32> to vector<16x512xf32>
    %154 = arith.mulf %153, %152 : vector<16x512xf32>
    %155 = arith.addf %150, %154 : vector<16x512xf32>
    %c0_98 = arith.constant 0 : index
    %c30 = arith.constant 30 : index
    %156 = vector.load %arg3[%c0_98, %c30] : memref<16x64xf32, #tpu.memory_space<vmem>>, vector<16x1xf32>
    %c0_99 = arith.constant 0 : index
    %c30_100 = arith.constant 30 : index
    %157 = vector.load %arg11[%c0_99, %c30_100] : memref<16x640xf32, #tpu.memory_space<vmem>>, vector<16x512xf32>
    %158 = vector.broadcast %156 : vector<16x1xf32> to vector<16x512xf32>
    %159 = arith.mulf %158, %157 : vector<16x512xf32>
    %160 = arith.addf %155, %159 : vector<16x512xf32>
    %c0_101 = arith.constant 0 : index
    %c31 = arith.constant 31 : index
    %161 = vector.load %arg3[%c0_101, %c31] : memref<16x64xf32, #tpu.memory_space<vmem>>, vector<16x1xf32>
    %c0_102 = arith.constant 0 : index
    %c31_103 = arith.constant 31 : index
    %162 = vector.load %arg11[%c0_102, %c31_103] : memref<16x640xf32, #tpu.memory_space<vmem>>, vector<16x512xf32>
    %163 = vector.broadcast %161 : vector<16x1xf32> to vector<16x512xf32>
    %164 = arith.mulf %163, %162 : vector<16x512xf32>
    %165 = arith.addf %160, %164 : vector<16x512xf32>
    %c0_104 = arith.constant 0 : index
    %c32 = arith.constant 32 : index
    %166 = vector.load %arg3[%c0_104, %c32] : memref<16x64xf32, #tpu.memory_space<vmem>>, vector<16x1xf32>
    %c0_105 = arith.constant 0 : index
    %c32_106 = arith.constant 32 : index
    %167 = vector.load %arg11[%c0_105, %c32_106] : memref<16x640xf32, #tpu.memory_space<vmem>>, vector<16x512xf32>
    %168 = vector.broadcast %166 : vector<16x1xf32> to vector<16x512xf32>
    %169 = arith.mulf %168, %167 : vector<16x512xf32>
    %170 = arith.addf %165, %169 : vector<16x512xf32>
    %c0_107 = arith.constant 0 : index
    %c33 = arith.constant 33 : index
    %171 = vector.load %arg3[%c0_107, %c33] : memref<16x64xf32, #tpu.memory_space<vmem>>, vector<16x1xf32>
    %c0_108 = arith.constant 0 : index
    %c33_109 = arith.constant 33 : index
    %172 = vector.load %arg11[%c0_108, %c33_109] : memref<16x640xf32, #tpu.memory_space<vmem>>, vector<16x512xf32>
    %173 = vector.broadcast %171 : vector<16x1xf32> to vector<16x512xf32>
    %174 = arith.mulf %173, %172 : vector<16x512xf32>
    %175 = arith.addf %170, %174 : vector<16x512xf32>
    %c0_110 = arith.constant 0 : index
    %c34 = arith.constant 34 : index
    %176 = vector.load %arg3[%c0_110, %c34] : memref<16x64xf32, #tpu.memory_space<vmem>>, vector<16x1xf32>
    %c0_111 = arith.constant 0 : index
    %c34_112 = arith.constant 34 : index
    %177 = vector.load %arg11[%c0_111, %c34_112] : memref<16x640xf32, #tpu.memory_space<vmem>>, vector<16x512xf32>
    %178 = vector.broadcast %176 : vector<16x1xf32> to vector<16x512xf32>
    %179 = arith.mulf %178, %177 : vector<16x512xf32>
    %180 = arith.addf %175, %179 : vector<16x512xf32>
    %c0_113 = arith.constant 0 : index
    %c35 = arith.constant 35 : index
    %181 = vector.load %arg3[%c0_113, %c35] : memref<16x64xf32, #tpu.memory_space<vmem>>, vector<16x1xf32>
    %c0_114 = arith.constant 0 : index
    %c35_115 = arith.constant 35 : index
    %182 = vector.load %arg11[%c0_114, %c35_115] : memref<16x640xf32, #tpu.memory_space<vmem>>, vector<16x512xf32>
    %183 = vector.broadcast %181 : vector<16x1xf32> to vector<16x512xf32>
    %184 = arith.mulf %183, %182 : vector<16x512xf32>
    %185 = arith.addf %180, %184 : vector<16x512xf32>
    %c0_116 = arith.constant 0 : index
    %c36 = arith.constant 36 : index
    %186 = vector.load %arg3[%c0_116, %c36] : memref<16x64xf32, #tpu.memory_space<vmem>>, vector<16x1xf32>
    %c0_117 = arith.constant 0 : index
    %c36_118 = arith.constant 36 : index
    %187 = vector.load %arg11[%c0_117, %c36_118] : memref<16x640xf32, #tpu.memory_space<vmem>>, vector<16x512xf32>
    %188 = vector.broadcast %186 : vector<16x1xf32> to vector<16x512xf32>
    %189 = arith.mulf %188, %187 : vector<16x512xf32>
    %190 = arith.addf %185, %189 : vector<16x512xf32>
    %c0_119 = arith.constant 0 : index
    %c37 = arith.constant 37 : index
    %191 = vector.load %arg3[%c0_119, %c37] : memref<16x64xf32, #tpu.memory_space<vmem>>, vector<16x1xf32>
    %c0_120 = arith.constant 0 : index
    %c37_121 = arith.constant 37 : index
    %192 = vector.load %arg11[%c0_120, %c37_121] : memref<16x640xf32, #tpu.memory_space<vmem>>, vector<16x512xf32>
    %193 = vector.broadcast %191 : vector<16x1xf32> to vector<16x512xf32>
    %194 = arith.mulf %193, %192 : vector<16x512xf32>
    %195 = arith.addf %190, %194 : vector<16x512xf32>
    %c0_122 = arith.constant 0 : index
    %c38 = arith.constant 38 : index
    %196 = vector.load %arg3[%c0_122, %c38] : memref<16x64xf32, #tpu.memory_space<vmem>>, vector<16x1xf32>
    %c0_123 = arith.constant 0 : index
    %c38_124 = arith.constant 38 : index
    %197 = vector.load %arg11[%c0_123, %c38_124] : memref<16x640xf32, #tpu.memory_space<vmem>>, vector<16x512xf32>
    %198 = vector.broadcast %196 : vector<16x1xf32> to vector<16x512xf32>
    %199 = arith.mulf %198, %197 : vector<16x512xf32>
    %200 = arith.addf %195, %199 : vector<16x512xf32>
    %c0_125 = arith.constant 0 : index
    %c39 = arith.constant 39 : index
    %201 = vector.load %arg3[%c0_125, %c39] : memref<16x64xf32, #tpu.memory_space<vmem>>, vector<16x1xf32>
    %c0_126 = arith.constant 0 : index
    %c39_127 = arith.constant 39 : index
    %202 = vector.load %arg11[%c0_126, %c39_127] : memref<16x640xf32, #tpu.memory_space<vmem>>, vector<16x512xf32>
    %203 = vector.broadcast %201 : vector<16x1xf32> to vector<16x512xf32>
    %204 = arith.mulf %203, %202 : vector<16x512xf32>
    %205 = arith.addf %200, %204 : vector<16x512xf32>
    %c0_128 = arith.constant 0 : index
    %c40 = arith.constant 40 : index
    %206 = vector.load %arg3[%c0_128, %c40] : memref<16x64xf32, #tpu.memory_space<vmem>>, vector<16x1xf32>
    %c0_129 = arith.constant 0 : index
    %c40_130 = arith.constant 40 : index
    %207 = vector.load %arg11[%c0_129, %c40_130] : memref<16x640xf32, #tpu.memory_space<vmem>>, vector<16x512xf32>
    %208 = vector.broadcast %206 : vector<16x1xf32> to vector<16x512xf32>
    %209 = arith.mulf %208, %207 : vector<16x512xf32>
    %210 = arith.addf %205, %209 : vector<16x512xf32>
    %c0_131 = arith.constant 0 : index
    %c41 = arith.constant 41 : index
    %211 = vector.load %arg3[%c0_131, %c41] : memref<16x64xf32, #tpu.memory_space<vmem>>, vector<16x1xf32>
    %c0_132 = arith.constant 0 : index
    %c41_133 = arith.constant 41 : index
    %212 = vector.load %arg11[%c0_132, %c41_133] : memref<16x640xf32, #tpu.memory_space<vmem>>, vector<16x512xf32>
    %213 = vector.broadcast %211 : vector<16x1xf32> to vector<16x512xf32>
    %214 = arith.mulf %213, %212 : vector<16x512xf32>
    %215 = arith.addf %210, %214 : vector<16x512xf32>
    %c0_134 = arith.constant 0 : index
    %c42 = arith.constant 42 : index
    %216 = vector.load %arg3[%c0_134, %c42] : memref<16x64xf32, #tpu.memory_space<vmem>>, vector<16x1xf32>
    %c0_135 = arith.constant 0 : index
    %c42_136 = arith.constant 42 : index
    %217 = vector.load %arg11[%c0_135, %c42_136] : memref<16x640xf32, #tpu.memory_space<vmem>>, vector<16x512xf32>
    %218 = vector.broadcast %216 : vector<16x1xf32> to vector<16x512xf32>
    %219 = arith.mulf %218, %217 : vector<16x512xf32>
    %220 = arith.addf %215, %219 : vector<16x512xf32>
    %c0_137 = arith.constant 0 : index
    %c43 = arith.constant 43 : index
    %221 = vector.load %arg3[%c0_137, %c43] : memref<16x64xf32, #tpu.memory_space<vmem>>, vector<16x1xf32>
    %c0_138 = arith.constant 0 : index
    %c43_139 = arith.constant 43 : index
    %222 = vector.load %arg11[%c0_138, %c43_139] : memref<16x640xf32, #tpu.memory_space<vmem>>, vector<16x512xf32>
    %223 = vector.broadcast %221 : vector<16x1xf32> to vector<16x512xf32>
    %224 = arith.mulf %223, %222 : vector<16x512xf32>
    %225 = arith.addf %220, %224 : vector<16x512xf32>
    %c0_140 = arith.constant 0 : index
    %c44 = arith.constant 44 : index
    %226 = vector.load %arg3[%c0_140, %c44] : memref<16x64xf32, #tpu.memory_space<vmem>>, vector<16x1xf32>
    %c0_141 = arith.constant 0 : index
    %c44_142 = arith.constant 44 : index
    %227 = vector.load %arg11[%c0_141, %c44_142] : memref<16x640xf32, #tpu.memory_space<vmem>>, vector<16x512xf32>
    %228 = vector.broadcast %226 : vector<16x1xf32> to vector<16x512xf32>
    %229 = arith.mulf %228, %227 : vector<16x512xf32>
    %230 = arith.addf %225, %229 : vector<16x512xf32>
    %c0_143 = arith.constant 0 : index
    %c45 = arith.constant 45 : index
    %231 = vector.load %arg3[%c0_143, %c45] : memref<16x64xf32, #tpu.memory_space<vmem>>, vector<16x1xf32>
    %c0_144 = arith.constant 0 : index
    %c45_145 = arith.constant 45 : index
    %232 = vector.load %arg11[%c0_144, %c45_145] : memref<16x640xf32, #tpu.memory_space<vmem>>, vector<16x512xf32>
    %233 = vector.broadcast %231 : vector<16x1xf32> to vector<16x512xf32>
    %234 = arith.mulf %233, %232 : vector<16x512xf32>
    %235 = arith.addf %230, %234 : vector<16x512xf32>
    %c0_146 = arith.constant 0 : index
    %c46 = arith.constant 46 : index
    %236 = vector.load %arg3[%c0_146, %c46] : memref<16x64xf32, #tpu.memory_space<vmem>>, vector<16x1xf32>
    %c0_147 = arith.constant 0 : index
    %c46_148 = arith.constant 46 : index
    %237 = vector.load %arg11[%c0_147, %c46_148] : memref<16x640xf32, #tpu.memory_space<vmem>>, vector<16x512xf32>
    %238 = vector.broadcast %236 : vector<16x1xf32> to vector<16x512xf32>
    %239 = arith.mulf %238, %237 : vector<16x512xf32>
    %240 = arith.addf %235, %239 : vector<16x512xf32>
    %c0_149 = arith.constant 0 : index
    %c47 = arith.constant 47 : index
    %241 = vector.load %arg3[%c0_149, %c47] : memref<16x64xf32, #tpu.memory_space<vmem>>, vector<16x1xf32>
    %c0_150 = arith.constant 0 : index
    %c47_151 = arith.constant 47 : index
    %242 = vector.load %arg11[%c0_150, %c47_151] : memref<16x640xf32, #tpu.memory_space<vmem>>, vector<16x512xf32>
    %243 = vector.broadcast %241 : vector<16x1xf32> to vector<16x512xf32>
    %244 = arith.mulf %243, %242 : vector<16x512xf32>
    %245 = arith.addf %240, %244 : vector<16x512xf32>
    %c0_152 = arith.constant 0 : index
    %c48 = arith.constant 48 : index
    %246 = vector.load %arg3[%c0_152, %c48] : memref<16x64xf32, #tpu.memory_space<vmem>>, vector<16x1xf32>
    %c0_153 = arith.constant 0 : index
    %c48_154 = arith.constant 48 : index
    %247 = vector.load %arg11[%c0_153, %c48_154] : memref<16x640xf32, #tpu.memory_space<vmem>>, vector<16x512xf32>
    %248 = vector.broadcast %246 : vector<16x1xf32> to vector<16x512xf32>
    %249 = arith.mulf %248, %247 : vector<16x512xf32>
    %250 = arith.addf %245, %249 : vector<16x512xf32>
    %c0_155 = arith.constant 0 : index
    %c49 = arith.constant 49 : index
    %251 = vector.load %arg3[%c0_155, %c49] : memref<16x64xf32, #tpu.memory_space<vmem>>, vector<16x1xf32>
    %c0_156 = arith.constant 0 : index
    %c49_157 = arith.constant 49 : index
    %252 = vector.load %arg11[%c0_156, %c49_157] : memref<16x640xf32, #tpu.memory_space<vmem>>, vector<16x512xf32>
    %253 = vector.broadcast %251 : vector<16x1xf32> to vector<16x512xf32>
    %254 = arith.mulf %253, %252 : vector<16x512xf32>
    %255 = arith.addf %250, %254 : vector<16x512xf32>
    %c0_158 = arith.constant 0 : index
    %c50 = arith.constant 50 : index
    %256 = vector.load %arg3[%c0_158, %c50] : memref<16x64xf32, #tpu.memory_space<vmem>>, vector<16x1xf32>
    %c0_159 = arith.constant 0 : index
    %c50_160 = arith.constant 50 : index
    %257 = vector.load %arg11[%c0_159, %c50_160] : memref<16x640xf32, #tpu.memory_space<vmem>>, vector<16x512xf32>
    %258 = vector.broadcast %256 : vector<16x1xf32> to vector<16x512xf32>
    %259 = arith.mulf %258, %257 : vector<16x512xf32>
    %260 = arith.addf %255, %259 : vector<16x512xf32>
    %c0_161 = arith.constant 0 : index
    %c51 = arith.constant 51 : index
    %261 = vector.load %arg3[%c0_161, %c51] : memref<16x64xf32, #tpu.memory_space<vmem>>, vector<16x1xf32>
    %c0_162 = arith.constant 0 : index
    %c51_163 = arith.constant 51 : index
    %262 = vector.load %arg11[%c0_162, %c51_163] : memref<16x640xf32, #tpu.memory_space<vmem>>, vector<16x512xf32>
    %263 = vector.broadcast %261 : vector<16x1xf32> to vector<16x512xf32>
    %264 = arith.mulf %263, %262 : vector<16x512xf32>
    %265 = arith.addf %260, %264 : vector<16x512xf32>
    %c0_164 = arith.constant 0 : index
    %c52 = arith.constant 52 : index
    %266 = vector.load %arg3[%c0_164, %c52] : memref<16x64xf32, #tpu.memory_space<vmem>>, vector<16x1xf32>
    %c0_165 = arith.constant 0 : index
    %c52_166 = arith.constant 52 : index
    %267 = vector.load %arg11[%c0_165, %c52_166] : memref<16x640xf32, #tpu.memory_space<vmem>>, vector<16x512xf32>
    %268 = vector.broadcast %266 : vector<16x1xf32> to vector<16x512xf32>
    %269 = arith.mulf %268, %267 : vector<16x512xf32>
    %270 = arith.addf %265, %269 : vector<16x512xf32>
    %c0_167 = arith.constant 0 : index
    %c53 = arith.constant 53 : index
    %271 = vector.load %arg3[%c0_167, %c53] : memref<16x64xf32, #tpu.memory_space<vmem>>, vector<16x1xf32>
    %c0_168 = arith.constant 0 : index
    %c53_169 = arith.constant 53 : index
    %272 = vector.load %arg11[%c0_168, %c53_169] : memref<16x640xf32, #tpu.memory_space<vmem>>, vector<16x512xf32>
    %273 = vector.broadcast %271 : vector<16x1xf32> to vector<16x512xf32>
    %274 = arith.mulf %273, %272 : vector<16x512xf32>
    %275 = arith.addf %270, %274 : vector<16x512xf32>
    %c0_170 = arith.constant 0 : index
    %c54 = arith.constant 54 : index
    %276 = vector.load %arg3[%c0_170, %c54] : memref<16x64xf32, #tpu.memory_space<vmem>>, vector<16x1xf32>
    %c0_171 = arith.constant 0 : index
    %c54_172 = arith.constant 54 : index
    %277 = vector.load %arg11[%c0_171, %c54_172] : memref<16x640xf32, #tpu.memory_space<vmem>>, vector<16x512xf32>
    %278 = vector.broadcast %276 : vector<16x1xf32> to vector<16x512xf32>
    %279 = arith.mulf %278, %277 : vector<16x512xf32>
    %280 = arith.addf %275, %279 : vector<16x512xf32>
    %c0_173 = arith.constant 0 : index
    %c55 = arith.constant 55 : index
    %281 = vector.load %arg3[%c0_173, %c55] : memref<16x64xf32, #tpu.memory_space<vmem>>, vector<16x1xf32>
    %c0_174 = arith.constant 0 : index
    %c55_175 = arith.constant 55 : index
    %282 = vector.load %arg11[%c0_174, %c55_175] : memref<16x640xf32, #tpu.memory_space<vmem>>, vector<16x512xf32>
    %283 = vector.broadcast %281 : vector<16x1xf32> to vector<16x512xf32>
    %284 = arith.mulf %283, %282 : vector<16x512xf32>
    %285 = arith.addf %280, %284 : vector<16x512xf32>
    %c0_176 = arith.constant 0 : index
    %c56 = arith.constant 56 : index
    %286 = vector.load %arg3[%c0_176, %c56] : memref<16x64xf32, #tpu.memory_space<vmem>>, vector<16x1xf32>
    %c0_177 = arith.constant 0 : index
    %c56_178 = arith.constant 56 : index
    %287 = vector.load %arg11[%c0_177, %c56_178] : memref<16x640xf32, #tpu.memory_space<vmem>>, vector<16x512xf32>
    %288 = vector.broadcast %286 : vector<16x1xf32> to vector<16x512xf32>
    %289 = arith.mulf %288, %287 : vector<16x512xf32>
    %290 = arith.addf %285, %289 : vector<16x512xf32>
    %c0_179 = arith.constant 0 : index
    %c57 = arith.constant 57 : index
    %291 = vector.load %arg3[%c0_179, %c57] : memref<16x64xf32, #tpu.memory_space<vmem>>, vector<16x1xf32>
    %c0_180 = arith.constant 0 : index
    %c57_181 = arith.constant 57 : index
    %292 = vector.load %arg11[%c0_180, %c57_181] : memref<16x640xf32, #tpu.memory_space<vmem>>, vector<16x512xf32>
    %293 = vector.broadcast %291 : vector<16x1xf32> to vector<16x512xf32>
    %294 = arith.mulf %293, %292 : vector<16x512xf32>
    %295 = arith.addf %290, %294 : vector<16x512xf32>
    %c0_182 = arith.constant 0 : index
    %c58 = arith.constant 58 : index
    %296 = vector.load %arg3[%c0_182, %c58] : memref<16x64xf32, #tpu.memory_space<vmem>>, vector<16x1xf32>
    %c0_183 = arith.constant 0 : index
    %c58_184 = arith.constant 58 : index
    %297 = vector.load %arg11[%c0_183, %c58_184] : memref<16x640xf32, #tpu.memory_space<vmem>>, vector<16x512xf32>
    %298 = vector.broadcast %296 : vector<16x1xf32> to vector<16x512xf32>
    %299 = arith.mulf %298, %297 : vector<16x512xf32>
    %300 = arith.addf %295, %299 : vector<16x512xf32>
    %c0_185 = arith.constant 0 : index
    %c59 = arith.constant 59 : index
    %301 = vector.load %arg3[%c0_185, %c59] : memref<16x64xf32, #tpu.memory_space<vmem>>, vector<16x1xf32>
    %c0_186 = arith.constant 0 : index
    %c59_187 = arith.constant 59 : index
    %302 = vector.load %arg11[%c0_186, %c59_187] : memref<16x640xf32, #tpu.memory_space<vmem>>, vector<16x512xf32>
    %303 = vector.broadcast %301 : vector<16x1xf32> to vector<16x512xf32>
    %304 = arith.mulf %303, %302 : vector<16x512xf32>
    %305 = arith.addf %300, %304 : vector<16x512xf32>
    %c0_188 = arith.constant 0 : index
    %c60 = arith.constant 60 : index
    %306 = vector.load %arg3[%c0_188, %c60] : memref<16x64xf32, #tpu.memory_space<vmem>>, vector<16x1xf32>
    %c0_189 = arith.constant 0 : index
    %c60_190 = arith.constant 60 : index
    %307 = vector.load %arg11[%c0_189, %c60_190] : memref<16x640xf32, #tpu.memory_space<vmem>>, vector<16x512xf32>
    %308 = vector.broadcast %306 : vector<16x1xf32> to vector<16x512xf32>
    %309 = arith.mulf %308, %307 : vector<16x512xf32>
    %310 = arith.addf %305, %309 : vector<16x512xf32>
    %c0_191 = arith.constant 0 : index
    %c61 = arith.constant 61 : index
    %311 = vector.load %arg3[%c0_191, %c61] : memref<16x64xf32, #tpu.memory_space<vmem>>, vector<16x1xf32>
    %c0_192 = arith.constant 0 : index
    %c61_193 = arith.constant 61 : index
    %312 = vector.load %arg11[%c0_192, %c61_193] : memref<16x640xf32, #tpu.memory_space<vmem>>, vector<16x512xf32>
    %313 = vector.broadcast %311 : vector<16x1xf32> to vector<16x512xf32>
    %314 = arith.mulf %313, %312 : vector<16x512xf32>
    %315 = arith.addf %310, %314 : vector<16x512xf32>
    %c0_194 = arith.constant 0 : index
    %c62 = arith.constant 62 : index
    %316 = vector.load %arg3[%c0_194, %c62] : memref<16x64xf32, #tpu.memory_space<vmem>>, vector<16x1xf32>
    %c0_195 = arith.constant 0 : index
    %c62_196 = arith.constant 62 : index
    %317 = vector.load %arg11[%c0_195, %c62_196] : memref<16x640xf32, #tpu.memory_space<vmem>>, vector<16x512xf32>
    %318 = vector.broadcast %316 : vector<16x1xf32> to vector<16x512xf32>
    %319 = arith.mulf %318, %317 : vector<16x512xf32>
    %320 = arith.addf %315, %319 : vector<16x512xf32>
    %c0_197 = arith.constant 0 : index
    %c63 = arith.constant 63 : index
    %321 = vector.load %arg3[%c0_197, %c63] : memref<16x64xf32, #tpu.memory_space<vmem>>, vector<16x1xf32>
    %c0_198 = arith.constant 0 : index
    %c63_199 = arith.constant 63 : index
    %322 = vector.load %arg11[%c0_198, %c63_199] : memref<16x640xf32, #tpu.memory_space<vmem>>, vector<16x512xf32>
    %323 = vector.broadcast %321 : vector<16x1xf32> to vector<16x512xf32>
    %324 = arith.mulf %323, %322 : vector<16x512xf32>
    %325 = arith.addf %320, %324 : vector<16x512xf32>
    %c0_200 = arith.constant 0 : index
    %c0_201 = arith.constant 0 : index
    %326 = vector.load %arg4[%c0_200, %c0_201] : memref<16x1xf32, #tpu.memory_space<vmem>>, vector<16x1xf32>
    %327 = vector.broadcast %326 : vector<16x1xf32> to vector<16x512xf32>
    %328 = arith.addf %325, %327 : vector<16x512xf32>
    %cst_202 = arith.constant 0.000000e+00 : f32
    %329 = vector.broadcast %cst_202 : f32 to vector<16x512xf32>
    %330 = arith.cmpf ogt, %328, %329 : vector<16x512xf32>
    %331 = math.exp %328 : vector<16x512xf32>
    %cst_203 = arith.constant 1.000000e+00 : f32
    %332 = vector.broadcast %cst_203 : f32 to vector<16x512xf32>
    %333 = arith.subf %331, %332 : vector<16x512xf32>
    %334 = arith.select %330, %328, %333 : vector<16x512xi1>, vector<16x512xf32>
    %c0_204 = arith.constant 0 : index
    %c0_205 = arith.constant 0 : index
    %335 = vector.load %arg12[%c0_204, %c0_205] : memref<16x512xf32, #tpu.memory_space<vmem>>, vector<16x512xf32>
    tpu.vector_store %arg12[%c0_204, %c0_205], %334 {strides = array<i32>} : memref<16x512xf32, #tpu.memory_space<vmem>>, vector<16x512xf32>,
    %c0_206 = arith.constant 0 : index
    %c0_207 = arith.constant 0 : index
    %336 = vector.load %arg12[%c0_206, %c0_207] : memref<16x512xf32, #tpu.memory_space<vmem>>, vector<16x448xf32>
    %c0_208 = arith.constant 0 : index
    %c1_209 = arith.constant 1 : index
    %337 = vector.load %arg12[%c0_208, %c1_209] : memref<16x512xf32, #tpu.memory_space<vmem>>, vector<16x448xf32>
    %338 = arith.maximumf %336, %337 : vector<16x448xf32>
    %c0_210 = arith.constant 0 : index
    %c2_211 = arith.constant 2 : index
    %339 = vector.load %arg12[%c0_210, %c2_211] : memref<16x512xf32, #tpu.memory_space<vmem>>, vector<16x448xf32>
    %340 = arith.maximumf %338, %339 : vector<16x448xf32>
    %c0_212 = arith.constant 0 : index
    %c3_213 = arith.constant 3 : index
    %341 = vector.load %arg12[%c0_212, %c3_213] : memref<16x512xf32, #tpu.memory_space<vmem>>, vector<16x448xf32>
    %342 = arith.maximumf %340, %341 : vector<16x448xf32>
    %343 = tpu.iota {dimensions = array<i32: 1>} : vector<16x448xi32>
    %c32_i32 = arith.constant 32 : i32
    %344 = vector.broadcast %c32_i32 : i32 to vector<16x448xi32>
    %345 = arith.cmpi sge, %343, %344 : vector<16x448xi32>
    %c432_i32 = arith.constant 432 : i32
    %346 = vector.broadcast %c432_i32 : i32 to vector<16x448xi32>
    %347 = arith.cmpi slt, %343, %346 : vector<16x448xi32>
    %348 = arith.andi %345, %347 : vector<16x448xi1>
    %cst_214 = arith.constant 0.000000e+00 : f32
    %349 = vector.broadcast %cst_214 : f32 to vector<16x448xf32>
    %350 = arith.select %348, %342, %349 : vector<16x448xi1>, vector<16x448xf32>
    %c0_215 = arith.constant 0 : index
    %c0_216 = arith.constant 0 : index
    %351 = vector.load %arg13[%c0_215, %c0_216] : memref<16x448xf32, #tpu.memory_space<vmem>>, vector<16x448xf32>
    tpu.vector_store %arg13[%c0_215, %c0_216], %350 {strides = array<i32>} : memref<16x448xf32, #tpu.memory_space<vmem>>, vector<16x448xf32>,
    %cst_217 = arith.constant 0.000000e+00 : f32
    %352 = vector.broadcast %cst_217 : f32 to vector<16x384xf32>
    %c0_218 = arith.constant 0 : index
    %c0_219 = arith.constant 0 : index
    %353 = vector.load %arg5[%c0_218, %c0_219] : memref<16x16xf32, #tpu.memory_space<vmem>>, vector<16x1xf32>
    %c0_220 = arith.constant 0 : index
    %c0_221 = arith.constant 0 : index
    %354 = vector.load %arg13[%c0_220, %c0_221] : memref<16x448xf32, #tpu.memory_space<vmem>>, vector<16x384xf32>
    %355 = vector.broadcast %353 : vector<16x1xf32> to vector<16x384xf32>
    %356 = arith.mulf %355, %354 : vector<16x384xf32>
    %357 = arith.addf %352, %356 : vector<16x384xf32>
    %c0_222 = arith.constant 0 : index
    %c1_223 = arith.constant 1 : index
    %358 = vector.load %arg5[%c0_222, %c1_223] : memref<16x16xf32, #tpu.memory_space<vmem>>, vector<16x1xf32>
    %c0_224 = arith.constant 0 : index
    %c4_225 = arith.constant 4 : index
    %359 = vector.load %arg13[%c0_224, %c4_225] : memref<16x448xf32, #tpu.memory_space<vmem>>, vector<16x384xf32>
    %360 = vector.broadcast %358 : vector<16x1xf32> to vector<16x384xf32>
    %361 = arith.mulf %360, %359 : vector<16x384xf32>
    %362 = arith.addf %357, %361 : vector<16x384xf32>
    %c0_226 = arith.constant 0 : index
    %c2_227 = arith.constant 2 : index
    %363 = vector.load %arg5[%c0_226, %c2_227] : memref<16x16xf32, #tpu.memory_space<vmem>>, vector<16x1xf32>
    %c0_228 = arith.constant 0 : index
    %c8_229 = arith.constant 8 : index
    %364 = vector.load %arg13[%c0_228, %c8_229] : memref<16x448xf32, #tpu.memory_space<vmem>>, vector<16x384xf32>
    %365 = vector.broadcast %363 : vector<16x1xf32> to vector<16x384xf32>
    %366 = arith.mulf %365, %364 : vector<16x384xf32>
    %367 = arith.addf %362, %366 : vector<16x384xf32>
    %c0_230 = arith.constant 0 : index
    %c3_231 = arith.constant 3 : index
    %368 = vector.load %arg5[%c0_230, %c3_231] : memref<16x16xf32, #tpu.memory_space<vmem>>, vector<16x1xf32>
    %c0_232 = arith.constant 0 : index
    %c12_233 = arith.constant 12 : index
    %369 = vector.load %arg13[%c0_232, %c12_233] : memref<16x448xf32, #tpu.memory_space<vmem>>, vector<16x384xf32>
    %370 = vector.broadcast %368 : vector<16x1xf32> to vector<16x384xf32>
    %371 = arith.mulf %370, %369 : vector<16x384xf32>
    %372 = arith.addf %367, %371 : vector<16x384xf32>
    %c0_234 = arith.constant 0 : index
    %c4_235 = arith.constant 4 : index
    %373 = vector.load %arg5[%c0_234, %c4_235] : memref<16x16xf32, #tpu.memory_space<vmem>>, vector<16x1xf32>
    %c0_236 = arith.constant 0 : index
    %c16_237 = arith.constant 16 : index
    %374 = vector.load %arg13[%c0_236, %c16_237] : memref<16x448xf32, #tpu.memory_space<vmem>>, vector<16x384xf32>
    %375 = vector.broadcast %373 : vector<16x1xf32> to vector<16x384xf32>
    %376 = arith.mulf %375, %374 : vector<16x384xf32>
    %377 = arith.addf %372, %376 : vector<16x384xf32>
    %c0_238 = arith.constant 0 : index
    %c5_239 = arith.constant 5 : index
    %378 = vector.load %arg5[%c0_238, %c5_239] : memref<16x16xf32, #tpu.memory_space<vmem>>, vector<16x1xf32>
    %c0_240 = arith.constant 0 : index
    %c20_241 = arith.constant 20 : index
    %379 = vector.load %arg13[%c0_240, %c20_241] : memref<16x448xf32, #tpu.memory_space<vmem>>, vector<16x384xf32>
    %380 = vector.broadcast %378 : vector<16x1xf32> to vector<16x384xf32>
    %381 = arith.mulf %380, %379 : vector<16x384xf32>
    %382 = arith.addf %377, %381 : vector<16x384xf32>
    %c0_242 = arith.constant 0 : index
    %c6_243 = arith.constant 6 : index
    %383 = vector.load %arg5[%c0_242, %c6_243] : memref<16x16xf32, #tpu.memory_space<vmem>>, vector<16x1xf32>
    %c0_244 = arith.constant 0 : index
    %c24_245 = arith.constant 24 : index
    %384 = vector.load %arg13[%c0_244, %c24_245] : memref<16x448xf32, #tpu.memory_space<vmem>>, vector<16x384xf32>
    %385 = vector.broadcast %383 : vector<16x1xf32> to vector<16x384xf32>
    %386 = arith.mulf %385, %384 : vector<16x384xf32>
    %387 = arith.addf %382, %386 : vector<16x384xf32>
    %c0_246 = arith.constant 0 : index
    %c7_247 = arith.constant 7 : index
    %388 = vector.load %arg5[%c0_246, %c7_247] : memref<16x16xf32, #tpu.memory_space<vmem>>, vector<16x1xf32>
    %c0_248 = arith.constant 0 : index
    %c28_249 = arith.constant 28 : index
    %389 = vector.load %arg13[%c0_248, %c28_249] : memref<16x448xf32, #tpu.memory_space<vmem>>, vector<16x384xf32>
    %390 = vector.broadcast %388 : vector<16x1xf32> to vector<16x384xf32>
    %391 = arith.mulf %390, %389 : vector<16x384xf32>
    %392 = arith.addf %387, %391 : vector<16x384xf32>
    %c0_250 = arith.constant 0 : index
    %c8_251 = arith.constant 8 : index
    %393 = vector.load %arg5[%c0_250, %c8_251] : memref<16x16xf32, #tpu.memory_space<vmem>>, vector<16x1xf32>
    %c0_252 = arith.constant 0 : index
    %c32_253 = arith.constant 32 : index
    %394 = vector.load %arg13[%c0_252, %c32_253] : memref<16x448xf32, #tpu.memory_space<vmem>>, vector<16x384xf32>
    %395 = vector.broadcast %393 : vector<16x1xf32> to vector<16x384xf32>
    %396 = arith.mulf %395, %394 : vector<16x384xf32>
    %397 = arith.addf %392, %396 : vector<16x384xf32>
    %c0_254 = arith.constant 0 : index
    %c9_255 = arith.constant 9 : index
    %398 = vector.load %arg5[%c0_254, %c9_255] : memref<16x16xf32, #tpu.memory_space<vmem>>, vector<16x1xf32>
    %c0_256 = arith.constant 0 : index
    %c36_257 = arith.constant 36 : index
    %399 = vector.load %arg13[%c0_256, %c36_257] : memref<16x448xf32, #tpu.memory_space<vmem>>, vector<16x384xf32>
    %400 = vector.broadcast %398 : vector<16x1xf32> to vector<16x384xf32>
    %401 = arith.mulf %400, %399 : vector<16x384xf32>
    %402 = arith.addf %397, %401 : vector<16x384xf32>
    %c0_258 = arith.constant 0 : index
    %c10_259 = arith.constant 10 : index
    %403 = vector.load %arg5[%c0_258, %c10_259] : memref<16x16xf32, #tpu.memory_space<vmem>>, vector<16x1xf32>
    %c0_260 = arith.constant 0 : index
    %c40_261 = arith.constant 40 : index
    %404 = vector.load %arg13[%c0_260, %c40_261] : memref<16x448xf32, #tpu.memory_space<vmem>>, vector<16x384xf32>
    %405 = vector.broadcast %403 : vector<16x1xf32> to vector<16x384xf32>
    %406 = arith.mulf %405, %404 : vector<16x384xf32>
    %407 = arith.addf %402, %406 : vector<16x384xf32>
    %c0_262 = arith.constant 0 : index
    %c11_263 = arith.constant 11 : index
    %408 = vector.load %arg5[%c0_262, %c11_263] : memref<16x16xf32, #tpu.memory_space<vmem>>, vector<16x1xf32>
    %c0_264 = arith.constant 0 : index
    %c44_265 = arith.constant 44 : index
    %409 = vector.load %arg13[%c0_264, %c44_265] : memref<16x448xf32, #tpu.memory_space<vmem>>, vector<16x384xf32>
    %410 = vector.broadcast %408 : vector<16x1xf32> to vector<16x384xf32>
    %411 = arith.mulf %410, %409 : vector<16x384xf32>
    %412 = arith.addf %407, %411 : vector<16x384xf32>
    %c0_266 = arith.constant 0 : index
    %c12_267 = arith.constant 12 : index
    %413 = vector.load %arg5[%c0_266, %c12_267] : memref<16x16xf32, #tpu.memory_space<vmem>>, vector<16x1xf32>
    %c0_268 = arith.constant 0 : index
    %c48_269 = arith.constant 48 : index
    %414 = vector.load %arg13[%c0_268, %c48_269] : memref<16x448xf32, #tpu.memory_space<vmem>>, vector<16x384xf32>
    %415 = vector.broadcast %413 : vector<16x1xf32> to vector<16x384xf32>
    %416 = arith.mulf %415, %414 : vector<16x384xf32>
    %417 = arith.addf %412, %416 : vector<16x384xf32>
    %c0_270 = arith.constant 0 : index
    %c13_271 = arith.constant 13 : index
    %418 = vector.load %arg5[%c0_270, %c13_271] : memref<16x16xf32, #tpu.memory_space<vmem>>, vector<16x1xf32>
    %c0_272 = arith.constant 0 : index
    %c52_273 = arith.constant 52 : index
    %419 = vector.load %arg13[%c0_272, %c52_273] : memref<16x448xf32, #tpu.memory_space<vmem>>, vector<16x384xf32>
    %420 = vector.broadcast %418 : vector<16x1xf32> to vector<16x384xf32>
    %421 = arith.mulf %420, %419 : vector<16x384xf32>
    %422 = arith.addf %417, %421 : vector<16x384xf32>
    %c0_274 = arith.constant 0 : index
    %c14_275 = arith.constant 14 : index
    %423 = vector.load %arg5[%c0_274, %c14_275] : memref<16x16xf32, #tpu.memory_space<vmem>>, vector<16x1xf32>
    %c0_276 = arith.constant 0 : index
    %c56_277 = arith.constant 56 : index
    %424 = vector.load %arg13[%c0_276, %c56_277] : memref<16x448xf32, #tpu.memory_space<vmem>>, vector<16x384xf32>
    %425 = vector.broadcast %423 : vector<16x1xf32> to vector<16x384xf32>
    %426 = arith.mulf %425, %424 : vector<16x384xf32>
    %427 = arith.addf %422, %426 : vector<16x384xf32>
    %c0_278 = arith.constant 0 : index
    %c15_279 = arith.constant 15 : index
    %428 = vector.load %arg5[%c0_278, %c15_279] : memref<16x16xf32, #tpu.memory_space<vmem>>, vector<16x1xf32>
    %c0_280 = arith.constant 0 : index
    %c60_281 = arith.constant 60 : index
    %429 = vector.load %arg13[%c0_280, %c60_281] : memref<16x448xf32, #tpu.memory_space<vmem>>, vector<16x384xf32>
    %430 = vector.broadcast %428 : vector<16x1xf32> to vector<16x384xf32>
    %431 = arith.mulf %430, %429 : vector<16x384xf32>
    %432 = arith.addf %427, %431 : vector<16x384xf32>
    %c0_282 = arith.constant 0 : index
    %c0_283 = arith.constant 0 : index
    %433 = vector.load %arg6[%c0_282, %c0_283] : memref<16x16xf32, #tpu.memory_space<vmem>>, vector<16x16xf32>
    %cst_284 = arith.constant dense<0.000000e+00> : vector<16x384xf32>
    %434 = tpu.matmul %433, %432, %cst_284 {dimension_numbers = #tpu.dot_dimension_numbers<[1], [0], [0], [1], [0, 0, 1, 1], [], []>} : vector<16x16xf32>, vector<16x384xf32>, vector<16x384xf32> -> vector<16x384xf32>
    %c0_285 = arith.constant 0 : index
    %c0_286 = arith.constant 0 : index
    %435 = vector.load %arg7[%c0_285, %c0_286] : memref<16x1xf32, #tpu.memory_space<vmem>>, vector<16x1xf32>
    %436 = vector.broadcast %435 : vector<16x1xf32> to vector<16x384xf32>
    %437 = arith.addf %434, %436 : vector<16x384xf32>
    %cst_287 = arith.constant 0.000000e+00 : f32
    %438 = vector.broadcast %cst_287 : f32 to vector<16x384xf32>
    %439 = arith.maximumf %437, %438 : vector<16x384xf32>
    %c0_288 = arith.constant 0 : index
    %c0_289 = arith.constant 0 : index
    %440 = vector.load %arg14[%c0_288, %c0_289] : memref<16x384xf32, #tpu.memory_space<vmem>>, vector<16x384xf32>
    tpu.vector_store %arg14[%c0_288, %c0_289], %439 {strides = array<i32>} : memref<16x384xf32, #tpu.memory_space<vmem>>, vector<16x384xf32>,
    %c0_290 = arith.constant 0 : index
    %c0_291 = arith.constant 0 : index
    %441 = vector.load %arg14[%c0_290, %c0_291] : memref<16x384xf32, #tpu.memory_space<vmem>>, vector<16x356xf32>
    %c0_292 = arith.constant 0 : index
    %c4_293 = arith.constant 4 : index
    %442 = vector.load %arg14[%c0_292, %c4_293] : memref<16x384xf32, #tpu.memory_space<vmem>>, vector<16x356xf32>
    %443 = arith.maximumf %441, %442 : vector<16x356xf32>
    %c0_294 = arith.constant 0 : index
    %c8_295 = arith.constant 8 : index
    %444 = vector.load %arg14[%c0_294, %c8_295] : memref<16x384xf32, #tpu.memory_space<vmem>>, vector<16x356xf32>
    %445 = arith.maximumf %443, %444 : vector<16x356xf32>
    %c0_296 = arith.constant 0 : index
    %c12_297 = arith.constant 12 : index
    %446 = vector.load %arg14[%c0_296, %c12_297] : memref<16x384xf32, #tpu.memory_space<vmem>>, vector<16x356xf32>
    %447 = arith.maximumf %445, %446 : vector<16x356xf32>
    %c0_298 = arith.constant 0 : index
    %c16_299 = arith.constant 16 : index
    %448 = vector.load %arg14[%c0_298, %c16_299] : memref<16x384xf32, #tpu.memory_space<vmem>>, vector<16x356xf32>
    %449 = arith.maximumf %447, %448 : vector<16x356xf32>
    %c0_300 = arith.constant 0 : index
    %c20_301 = arith.constant 20 : index
    %450 = vector.load %arg14[%c0_300, %c20_301] : memref<16x384xf32, #tpu.memory_space<vmem>>, vector<16x356xf32>
    %451 = arith.maximumf %449, %450 : vector<16x356xf32>
    %c0_302 = arith.constant 0 : index
    %c24_303 = arith.constant 24 : index
    %452 = vector.load %arg14[%c0_302, %c24_303] : memref<16x384xf32, #tpu.memory_space<vmem>>, vector<16x356xf32>
    %453 = arith.maximumf %451, %452 : vector<16x356xf32>
    %c0_304 = arith.constant 0 : index
    %c28_305 = arith.constant 28 : index
    %454 = vector.load %arg14[%c0_304, %c28_305] : memref<16x384xf32, #tpu.memory_space<vmem>>, vector<16x356xf32>
    %455 = arith.maximumf %453, %454 : vector<16x356xf32>
    %456 = tpu.iota {dimensions = array<i32: 1>} : vector<1x2xi32>
    %c0_306 = arith.constant 0 : index
    %c0_307 = arith.constant 0 : index
    %457 = vector.load %arg9[%c0_306, %c0_307] : memref<1x2xf32, #tpu.memory_space<vmem>>, vector<1x2xf32>
    %c0_308 = arith.constant 0 : index
    %c0_309 = arith.constant 0 : index
    %c0_310 = arith.constant 0 : index
    %458 = vector.load %arg8[%c0_308, %c0_309, %c0_310] : memref<2x16x356xf32, #tpu.memory_space<vmem>>, vector<1x16x356xf32>
    %459 = vector.shape_cast %458 : vector<1x16x356xf32> to vector<16x356xf32>
    %460 = arith.mulf %459, %455 : vector<16x356xf32>
    %cst_311 = arith.constant dense<0.000000e+00> : vector<16xf32>
    %461 = vector.multi_reduction <add>, %460, %cst_311 [1] : vector<16x356xf32> to vector<16xf32>
    %462 = vector.shape_cast %461 : vector<16xf32> to vector<16x1xf32>
    %cst_312 = arith.constant dense<0.000000e+00> : vector<1xf32>
    %463 = vector.multi_reduction <add>, %462, %cst_312 [0] : vector<16x1xf32> to vector<1xf32>
    %464 = vector.shape_cast %463 : vector<1xf32> to vector<1x1xf32>
    %c0_i32 = arith.constant 0 : i32
    %465 = vector.broadcast %c0_i32 : i32 to vector<1x2xi32>
    %466 = arith.cmpi eq, %456, %465 : vector<1x2xi32>
    %cst_313 = arith.constant 0.000000e+00 : f32
    %467 = vector.shape_cast %464 : vector<1x1xf32> to vector<1x1xf32>
    %468 = vector.broadcast %467 : vector<1x1xf32> to vector<1x2xf32>
    %469 = vector.broadcast %cst_313 : f32 to vector<1x2xf32>
    %470 = arith.select %466, %468, %469 : vector<1x2xi1>, vector<1x2xf32>
    %471 = arith.addf %457, %470 : vector<1x2xf32>
    %c1_314 = arith.constant 1 : index
    %c0_315 = arith.constant 0 : index
    %c0_316 = arith.constant 0 : index
    %472 = vector.load %arg8[%c1_314, %c0_315, %c0_316] : memref<2x16x356xf32, #tpu.memory_space<vmem>>, vector<1x16x356xf32>
    %473 = vector.shape_cast %472 : vector<1x16x356xf32> to vector<16x356xf32>
    %474 = arith.mulf %473, %455 : vector<16x356xf32>
    %cst_317 = arith.constant dense<0.000000e+00> : vector<16xf32>
    %475 = vector.multi_reduction <add>, %474, %cst_317 [1] : vector<16x356xf32> to vector<16xf32>
    %476 = vector.shape_cast %475 : vector<16xf32> to vector<16x1xf32>
    %cst_318 = arith.constant dense<0.000000e+00> : vector<1xf32>
    %477 = vector.multi_reduction <add>, %476, %cst_318 [0] : vector<16x1xf32> to vector<1xf32>
    %478 = vector.shape_cast %477 : vector<1xf32> to vector<1x1xf32>
    %c1_i32 = arith.constant 1 : i32
    %479 = vector.broadcast %c1_i32 : i32 to vector<1x2xi32>
    %480 = arith.cmpi eq, %456, %479 : vector<1x2xi32>
    %cst_319 = arith.constant 0.000000e+00 : f32
    %481 = vector.shape_cast %478 : vector<1x1xf32> to vector<1x1xf32>
    %482 = vector.broadcast %481 : vector<1x1xf32> to vector<1x2xf32>
    %483 = vector.broadcast %cst_319 : f32 to vector<1x2xf32>
    %484 = arith.select %480, %482, %483 : vector<1x2xi1>, vector<1x2xf32>
    %485 = arith.addf %471, %484 : vector<1x2xf32>
    %c0_320 = arith.constant 0 : index
    %c0_321 = arith.constant 0 : index
    %c0_322 = arith.constant 0 : index
    %486 = vector.load %arg10[%c0_320, %c0_321, %c0_322] : memref<1x1x2xf32, #tpu.memory_space<vmem>>, vector<1x1x2xf32>
    %487 = vector.shape_cast %486 : vector<1x1x2xf32> to vector<1x2xf32>
    %488 = vector.shape_cast %485 : vector<1x2xf32> to vector<1x1x2xf32>
    tpu.vector_store %arg10[%c0_320, %c0_321, %c0_322], %488 {strides = array<i32>} : memref<1x1x2xf32, #tpu.memory_space<vmem>>, vector<1x1x2xf32>,
    return
  }
  func.func @transform_0(%arg0: i32) -> (i32, i32, i32) {
    %c0_i32 = arith.constant 0 : i32
    %c0_i32_0 = arith.constant 0 : i32
    %c0_i32_1 = arith.constant 0 : i32
    return %arg0, %c0_i32, %c0_i32_0 : i32, i32, i32
  }
  func.func @transform_1(%arg0: i32) -> (i32, i32) {
    %c0_i32 = arith.constant 0 : i32
    %c0_i32_0 = arith.constant 0 : i32
    %c0_i32_1 = arith.constant 0 : i32
    return %c0_i32, %c0_i32_0 : i32, i32
  }
  func.func @transform_2(%arg0: i32) -> (i32, i32) {
    %c0_i32 = arith.constant 0 : i32
    %c0_i32_0 = arith.constant 0 : i32
    %c0_i32_1 = arith.constant 0 : i32
    return %c0_i32, %c0_i32_0 : i32, i32
  }
  func.func @transform_3(%arg0: i32) -> (i32, i32) {
    %c0_i32 = arith.constant 0 : i32
    %c0_i32_0 = arith.constant 0 : i32
    %c0_i32_1 = arith.constant 0 : i32
    return %c0_i32, %c0_i32_0 : i32, i32
  }
  func.func @transform_4(%arg0: i32) -> (i32, i32) {
    %c0_i32 = arith.constant 0 : i32
    %c0_i32_0 = arith.constant 0 : i32
    %c0_i32_1 = arith.constant 0 : i32
    return %c0_i32, %c0_i32_0 : i32, i32
  }
  func.func @transform_5(%arg0: i32) -> (i32, i32) {
    %c0_i32 = arith.constant 0 : i32
    %c0_i32_0 = arith.constant 0 : i32
    %c0_i32_1 = arith.constant 0 : i32
    return %c0_i32, %c0_i32_0 : i32, i32
  }
  func.func @transform_6(%arg0: i32) -> (i32, i32) {
    %c0_i32 = arith.constant 0 : i32
    %c0_i32_0 = arith.constant 0 : i32
    %c0_i32_1 = arith.constant 0 : i32
    return %c0_i32, %c0_i32_0 : i32, i32
  }
  func.func @transform_7(%arg0: i32) -> (i32, i32, i32) {
    %c0_i32 = arith.constant 0 : i32
    %c0_i32_0 = arith.constant 0 : i32
    %c0_i32_1 = arith.constant 0 : i32
    %c0_i32_2 = arith.constant 0 : i32
    return %c0_i32, %c0_i32_0, %c0_i32_1 : i32, i32, i32
  }
  func.func @transform_8(%arg0: i32) -> (i32, i32) {
    %c0_i32 = arith.constant 0 : i32
    %c0_i32_0 = arith.constant 0 : i32
    %c0_i32_1 = arith.constant 0 : i32
    return %c0_i32, %c0_i32_0 : i32, i32
  }
  func.func @transform_9(%arg0: i32) -> (i32, i32, i32) {
    %c0_i32 = arith.constant 0 : i32
    %c0_i32_0 = arith.constant 0 : i32
    %c0_i32_1 = arith.constant 0 : i32
    return %arg0, %c0_i32, %c0_i32_0 : i32, i32, i32
  }
}

</mosaic_0001>

<bundles_post_ra>
// kernel: _backbone_forward.1
= control target key start
LH: loop header
LB: loop body
LE: loop exit
PB: predicated region body
PF: predicated region fallthrough
CT: control target
= control target key end

     0   :  { %14 = vsyncpa [#allocation7], 0  ;;  %s12374_s0 = inlined_call_operand.vmem [shape: f32[2,16,640], index: 0, kind: input, shape index: {}]   ;;  %s12375_s1 = inlined_call_operand.vmem [shape: f32[16,16], index: 1, kind: input, shape index: {}]   ;;  %s12376_s2 = inlined_call_operand.vmem [shape: f32[16,64], index: 2, kind: input, shape index: {}]   ;;  %s12377_s3 = inlined_call_operand.vmem [shape: f32[16,1], index: 3, kind: input, shape index: {}]   ;;  %s12378_s4 = inlined_call_operand.vmem [shape: f32[16,16], index: 4, kind: input, shape index: {}]   ;;  %s12379_s5 = inlined_call_operand.vmem [shape: f32[16,16], index: 5, kind: input, shape index: {}]   ;;  %s12380_s6 = inlined_call_operand.vmem [shape: f32[16,1], index: 6, kind: input, shape index: {}]   ;;  %s12381_s7 = inlined_call_operand.vmem [shape: f32[2,16,356], index: 7, kind: input, shape index: {}]   ;;  %s12382_s8 = inlined_call_operand.vmem [shape: f32[1,2], index: 8, kind: input, shape index: {}]   ;;  %s12383_s9 = inlined_call_operand.hbm [shape: f32[2,1,2], index: 9, kind: output, shape index: {}]  }
   0x1   :  { %16 = vsyncpa [#allocation7 + $0x1], 0  ;;  %s7337_s30 = smov 0   ;;  %s7339_s10 = smov 0  }
   0x2   :  { %s7341_s11 = smov 0   ;;  %s7343_s12 = smov 0  }
   0x3 LB: > { %s7358_s13 = sadd.s32 4294967295, %s7158_s12   ;;  %s6704_s14 = sadd.s32 4294967294, %s7158_s12   ;;  %s7158_s12 = sphi %s7343_s12, %s13967_s12   ;;  %s7154_s11 = sphi %s7341_s11, %s13966_s11   ;;  %s7150_s10 = sphi %s7339_s10, %s13965_s10   ;;  %s7146_s30 = sphi %s7337_s30, %s13964_s30  }
   0x4   : > { %s7362_s15 = sadd.s32 1, %s7158_s12   ;;  %s223_s16 = sadd.s32 1, %s7154_s11 }
   0x5   : > { %s220_s17 = ssub.s32 %s7158_s12, %s7362_s15  ;;  %p233_p0 = scmp.ne.s32.totalorder %s7154_s11, %s7150_s10 }
   0x6   : > { %p221_p1 = scmp.eq.s32.totalorder %s220_s17, 0  ;;  %p234_p2 = scmp.eq.s32.totalorder %s7358_s13, 1 }
   0x7   : > { %p239_p3 = scmp.ne.s32.totalorder %s7150_s10, %s7146_s30  ;;  %p240_p4 = scmp.eq.s32.totalorder %s6704_s14, 1 }
   0x8   : > { %s7373_s18 = scalar_select %p221_p1, %s7154_s11, %s223_s16  }
   0x9   : > { %p7375_p5 = por %p234_p2, %p233_p0  ;;  %p7379_p6 = por %p240_p4, %p239_p3 }
   0xa   : > { %p6707_p7 = scmp.ge.s32.totalorder %s7158_s12, 1  ;;  %p290_p8 = scmp.lt.s32.totalorder %s7158_s12, 3 }
   0xc   : > { %p291_p9 = pnand %p6707_p7, %p290_p8 }
   0xe   : > { %294 = sbr.rel (%p291_p9) target bundleno = 10826 (0x2a4a), region = 56 }
  0x13   : > { %v7388_v0 = vld [vmem:[%s12376_s2] sm:$0xff]  ;;  %p325_p10 = scmp.lt.s32.totalorder %s7358_s13, 1  ;;  %v12397_v1 = vmov 1   ;;  %v12399_v2 = vmov 0   ;;  %v12395_v3 = vmov 2   ;;  %v7404_v4 = vld [vmem:[%s12376_s2 + $0x8] sm:$0xff] }
  0x14   : > { %6909 = vset.pattern.permute.xlu1 %v12397_v1  ;;  %6908 = vset.pattern.permute.xlu0 %v12399_v2  ;;  %v330_v13 = vld [vmem:[%s12375_s1] sm:$0xff]  ;;  %vm12770_vm0 = vcmask 130048   ;;  %v12390_v16 = vmov 4   ;;  %v12392_v17 = vmov 3   ;;  %v331_v18 = vld [vmem:[%s12375_s1 + $0x8] sm:$0xff]  ;;  %v12388_v19 = vmov 5  }
  0x15   : > { %521 = vperm.xlu1 %6909, %v7388_v0   ;;  %486 = vperm.xlu0 %6908, %v7388_v0   ;;  %s326_s23 = scalar_select %p325_p10, %s7358_s13, 1  ;;  %vm568_vm1 = vcmask 1039360   ;;  %vm641_vm2 = vcmask 1031168   ;;  %vm714_vm3 = vcmask 1022976   ;;  %vm787_vm4 = vcmask 1014784  }
  0x16   : > { %6910 = vset.pattern.permute.xlu2 %v12395_v3  ;;  %s7166_s22 = smov 126   ;;  %s7169_s25 = smov 125   ;;  %vm860_vm5 = vcmask 1006592   ;;  %vm933_vm6 = vcmask 998400   ;;  %vm1006_vm7 = vcmask 990208   ;;  %vm1079_vm8 = vcmask 982016  }
  0x17   : > { %s6741_s24 = smul.u32 80, %s326_s23  ;;  %594 = vperm.xlu2 %6910, %v7388_v0   ;;  %s7167_s23 = smov 127   ;;  %vm1152_vm9 = vcmask 973824   ;;  %vm1225_vm10 = vcmask 965632   ;;  %vm1298_vm11 = vcmask 957440   ;;  %vm1371_vm12 = vcmask 949248  }
  0x18   : > { %s7170_s26 = smov 123   ;;  %s7175_s28 = smov 121   ;;  %vm1444_vm13 = vcmask 941056   ;;  %vm1517_vm14 = vcmask 932864   ;;  %vm1590_vm15 = vcmask 924672  }
  0x19   : > { %s329_s27 = scalar_lea.vmem %s12374_s0, %s6741_s24  ;;  %s7168_s24 = smov 124  }
  0x1a   : > { %v337_v5 = vld [vmem:[%s329_s27 + $0x28] sm:$0xff]  ;;  %v338_v6 = vld [vmem:[%s329_s27 + $0x30] sm:$0xff]  ;;  %v339_v7 = vld [vmem:[%s329_s27 + $0x38] sm:$0xff]  ;;  %s7177_s29 = smov 120   ;;  %s7179_s14 = smov 119  }
  0x1b   : > { %363 = vmatpush.msra.mxu0 %v337_v5  ;;  %386 = vmatpush.msra.mxu1 %v338_v6  ;;  %v340_v8 = vld [vmem:[%s329_s27 + $0x40] sm:$0xff]  ;;  %v333_v10 = vld [vmem:[%s329_s27 + $0x8] sm:$0xff]  ;;  %v334_v11 = vld [vmem:[%s329_s27 + $0x10] sm:$0xff]  ;;  %s7181_s16 = smov 118   ;;  %s7183_s17 = smov 117  }
  0x1c   : > { %v332_v9 = vld [vmem:[%s329_s27] sm:$0xff]  ;;  %409 = vmatpush.msra.mxu2 %v339_v7  ;;  %432 = vmatpush.msra.mxu3 %v340_v8  ;;  %v335_v12 = vld [vmem:[%s329_s27 + $0x18] sm:$0xff]  ;;  %v341_v14 = vld [vmem:[%s329_s27 + $0x48] sm:$0xff]  ;;  %s7185_s21 = smov 116  }
  0x1d   : > { %525 = vperm.xlu1 %6909, %v7404_v4   ;;  %491 = vperm.xlu0 %6908, %v7404_v4   ;;  %v336_v15 = vld [vmem:[%s329_s27 + $0x20] sm:$0xff]  ;;  %s7173_s27 = smov 122  }
  0x1e   : > { %364 = vmatpush.msra.mxu0 %v332_v9  ;;  %387 = vmatpush.msra.mxu1 %v333_v10 }
  0x1f   : > { %410 = vmatpush.msra.mxu2 %v334_v11  ;;  %433 = vmatpush.msra.mxu3 %v335_v12 }
  0x20   : > { %6709 = vmatmul.msk.f32.vlgmr.msra.gmra.mxu0 %vm12770_vm0, %v330_v13  ;;  %6711 = vmatmul.msk.f32.vlgmr.msra.gmra.mxu1 %vm12770_vm0, %v330_v13 }
  0x21   : > { %6713 = vmatmul.msk.f32.vlgmr.msra.gmra.mxu2 %vm12770_vm0, %v330_v13  ;;  %6715 = vmatmul.msk.f32.vlgmr.msra.gmra.mxu3 %vm12770_vm0, %v330_v13 }
  0x22   : > { %455 = vmatpush.msrb.mxu0 %v341_v14  ;;  %6915 = vset.pattern.permute.xlu2 %v12390_v16 }
  0x23   : > { %744 = vperm.xlu2 %6915, %v7404_v4  }
  0x24   : > { %456 = vmatpush.msrb.mxu0 %v336_v15 }
  0x25   : > { %6913 = vset.pattern.permute.xlu1 %v12392_v17  ;;  %6911 = vset.pattern.permute.xlu0 %v12395_v3 }
  0x26   : > { %671 = vperm.xlu1 %6913, %v7404_v4   ;;  %598 = vperm.xlu0 %6911, %v7404_v4  }
  0x28   : > { %6710 = vmatmul.msk.f32.gmra.mxu0 %vm12770_vm0, %v331_v18  ;;  %6712 = vmatmul.msk.f32.gmra.mxu1 %vm12770_vm0, %v331_v18 }
  0x29   : > { %6714 = vmatmul.msk.f32.gmra.mxu2 %vm12770_vm0, %v331_v18  ;;  %6716 = vmatmul.msk.f32.gmra.mxu3 %vm12770_vm0, %v331_v18 }
  0x2b   : > { %6917 = vset.pattern.permute.xlu2 %v12388_v19 }
  0x2c   : > { %817 = vperm.xlu2 %6917, %v7404_v4  }
  0x2e   : > { %6914 = vset.pattern.permute.xlu1 %v12390_v16  ;;  %6912 = vset.pattern.permute.xlu0 %v12392_v17 }
  0x2f   : > { %740 = vperm.xlu1 %6914, %v7388_v0   ;;  %667 = vperm.xlu0 %6912, %v7388_v0  }
  0x30   : > { %6717 = vmatmul.msk.f32.vlgmr.msrb.gmra.mxu0 %vm12770_vm0, %v330_v13 }
  0x37   : > { %6916 = vset.pattern.permute.xlu1 %v12388_v19 }
  0x38   : > { %6718 = vmatmul.msk.f32.gmra.mxu0 %vm12770_vm0, %v331_v18  ;;  %813 = vperm.xlu1 %6916, %v7388_v0   ;;  %vm3634_vm0 = vcmask 695296  }
  0x71   : > { %v7450_v26 = vpop.permute.xlu2 %594 }
  0x7d   : > { %v745_v61 = vpop.permute.xlu2 %744 }
  0x86   : > { %v818_v9 = vpop.permute.xlu2 %817 }
  0x87   : > { %v7438_v20 = vpop.permute.xlu0 %486  ;;  %v7440_v21 = vpop.permute.xlu1 %521 }
  0x8f   : > { %v7442_v22 = vpop.permute.xlu1 %525  ;;  %v7444_v23 = vpop.permute.xlu0 %491 }
  0x98   : > { %v7446_v24 = vpop.permute.xlu1 %671  ;;  %v7448_v25 = vpop.permute.xlu0 %598 }
  0x9d   : > { %v7452_v27 = vpop.f32.mrf.mxu0  ;;  %v7464_v32 = vpop.f32.mrf.mxu1 }
  0x9e   : > { %v601_v28 = vmul.f32 %v7450_v26, %v7452_v27  ;;  %v528_v29 = vmul.f32 %v7440_v21, %v7452_v27  ;;  %v529_v35 = vmul.f32 %v7440_v21, %v7464_v32  ;;  %v602_v39 = vmul.f32 %v7450_v26, %v7464_v32 }
  0xa0   : > { %621 = vrot.lane.b32.xlu1 %v601_v28, %s7166_s22  ;;  %548 = vrot.lane.b32.xlu2 %v528_v29, %s7167_s23 }
  0xa1   : > { %v7460_v30 = vpop.permute.xlu1 %740  ;;  %v7466_v33 = vpop.permute.xlu0 %667 }
  0xa2   : > { %v747_v31 = vmul.f32 %v7460_v30, %v7452_v27  ;;  %v675_v34 = vmul.f32 %v7466_v33, %v7464_v32  ;;  %v748_v38 = vmul.f32 %v7460_v30, %v7464_v32  ;;  %v674_v43 = vmul.f32 %v7466_v33, %v7452_v27 }
  0xa4   : > { %767 = vrot.lane.b32.xlu0 %v747_v31, %s7168_s24  ;;  %v7484_v40 = vpop.f32.mrf.mxu2  ;;  %v7497_v44 = vpop.f32.mrf.mxu3  ;;  %v12386_v31 = vmov 6  }
  0xa5   : > { %v530_v41 = vmul.f32 %v7440_v21, %v7484_v40  ;;  %v677_v45 = vmul.f32 %v7466_v33, %v7497_v44  ;;  %v531_v46 = vmul.f32 %v7440_v21, %v7497_v44  ;;  %v604_v47 = vmul.f32 %v7450_v26, %v7497_v44  ;;  %v7517_v51 = vpop.f32.mrf.mxu1  ;;  %v7526_v55 = vpop.f32.mrf.mxu0  ;;  %6918 = vset.pattern.permute.xlu1 %v12386_v31 }
  0xa6   : > { %v750_v48 = vmul.f32 %v7460_v30, %v7497_v44  ;;  %v603_v49 = vmul.f32 %v7450_v26, %v7484_v40  ;;  %v676_v50 = vmul.f32 %v7466_v33, %v7484_v40  ;;  %v534_v53 = vmul.f32 %v7442_v22, %v7517_v51  ;;  %6919 = vset.pattern.permute.xlu2 %v12386_v31 }
  0xa7   : > { %v749_v54 = vmul.f32 %v7460_v30, %v7484_v40  ;;  %v533_v56 = vmul.f32 %v7442_v22, %v7526_v55  ;;  %v606_v58 = vmul.f32 %v7448_v25, %v7526_v55  ;;  %v680_v60 = vmul.f32 %v7446_v24, %v7517_v51 }
  0xa8   : > { %696 = vrot.lane.b32.xlu1 %v675_v34, %s7169_s25  ;;  %550 = vrot.lane.b32.xlu2 %v529_v35, %s7167_s23  ;;  %v607_v62 = vmul.f32 %v7448_v25, %v7517_v51  ;;  %v753_v6 = vmul.f32 %v745_v61, %v7517_v51  ;;  %v679_v7 = vmul.f32 %v7446_v24, %v7526_v55 }
  0xa9   : > { %v826_v10 = vmul.f32 %v818_v9, %v7517_v51  ;;  %v752_v11 = vmul.f32 %v745_v61, %v7526_v55  ;;  %v825_v14 = vmul.f32 %v818_v9, %v7526_v55 }
  0xaa   : > { %v7475_v36 = vpop.permute.xlu1 %813 }
  0xab   : > { %v820_v37 = vmul.f32 %v7475_v36, %v7452_v27  ;;  %v821_v42 = vmul.f32 %v7475_v36, %v7464_v32  ;;  %v823_v52 = vmul.f32 %v7475_v36, %v7497_v44  ;;  %v822_v57 = vmul.f32 %v7475_v36, %v7484_v40 }
  0xac   : > { %v7539_v59 = vpop.f32.mrf.mxu3  ;;  %v7550_v5 = vpop.f32.mrf.mxu2 }
  0xad   : > { %840 = vrot.lane.b32.xlu0 %v820_v37, %s7170_s26  ;;  %v609_v63 = vmul.f32 %v7448_v25, %v7539_v59  ;;  %v681_v8 = vmul.f32 %v7446_v24, %v7550_v5  ;;  %v754_v12 = vmul.f32 %v745_v61, %v7550_v5  ;;  %v536_v13 = vmul.f32 %v7442_v22, %v7539_v59  ;;  %v7575_v28 = vpop.f32.mrf.mxu0 }
  0xae   : > { %v827_v15 = vmul.f32 %v818_v9, %v7550_v5  ;;  %v608_v29 = vmul.f32 %v7448_v25, %v7550_v5  ;;  %v535_v34 = vmul.f32 %v7442_v22, %v7550_v5  ;;  %v678_v35 = vmul.f32 %v7466_v33, %v7575_v28 }
  0xb0   : > { %769 = vrot.lane.b32.xlu1 %v748_v38, %s7168_s24  ;;  %623 = vrot.lane.b32.xlu2 %v602_v39, %s7166_s22  ;;  %v605_v38 = vmul.f32 %v7450_v26, %v7575_v28  ;;  %v682_v39 = vmul.f32 %v7446_v24, %v7539_v59  ;;  %v755_v26 = vmul.f32 %v745_v61, %v7539_v59 }
  0xb5   : > { %552 = vrot.lane.b32.xlu0 %v530_v41, %s7167_s23  ;;  %v751_v41 = vmul.f32 %v7460_v30, %v7575_v28  ;;  %v7597_v33 = vpop.f32.mrf.mxu0 }
  0xb8   : > { %842 = vrot.lane.b32.xlu1 %v821_v42, %s7170_s26  ;;  %694 = vrot.lane.b32.xlu2 %v674_v43, %s7169_s25  ;;  %v683_v43 = vmul.f32 %v7446_v24, %v7597_v33  ;;  %v828_v24 = vmul.f32 %v818_v9, %v7539_v59 }
  0xbd   : > { %700 = vrot.lane.b32.xlu0 %v677_v45, %s7169_s25  ;;  %v824_v45 = vmul.f32 %v7475_v36, %v7575_v28 }
  0xc0   : > { %554 = vrot.lane.b32.xlu1 %v531_v46, %s7167_s23  ;;  %627 = vrot.lane.b32.xlu2 %v604_v47, %s7166_s22  ;;  %v756_v47 = vmul.f32 %v745_v61, %v7597_v33 }
  0xc5   : > { %773 = vrot.lane.b32.xlu0 %v750_v48, %s7168_s24  ;;  %v537_v48 = vmul.f32 %v7442_v22, %v7597_v33 }
  0xc8   : > { %625 = vrot.lane.b32.xlu1 %v603_v49, %s7166_s22  ;;  %698 = vrot.lane.b32.xlu2 %v676_v50, %s7169_s25  ;;  %v829_v50 = vmul.f32 %v818_v9, %v7597_v33 }
  0xcd   : > { %846 = vrot.lane.b32.xlu0 %v823_v52, %s7170_s26  ;;  %v532_v52 = vmul.f32 %v7440_v21, %v7575_v28 }
  0xd0   : > { %560 = vrot.lane.b32.xlu1 %v534_v53, %s7167_s23  ;;  %771 = vrot.lane.b32.xlu2 %v749_v54, %s7168_s24  ;;  %v610_v54 = vmul.f32 %v7448_v25, %v7597_v33 }
  0xd5   : > { %558 = vrot.lane.b32.xlu0 %v533_v56, %s7167_s23 }
  0xd8   : > { %844 = vrot.lane.b32.xlu2 %v822_v57, %s7170_s26  ;;  %631 = vrot.lane.b32.xlu1 %v606_v58, %s7166_s22 }
  0xdd   : > { %706 = vrot.lane.b32.xlu0 %v680_v60, %s7169_s25 }
  0xe0   : > { %633 = vrot.lane.b32.xlu2 %v607_v62, %s7166_s22  ;;  %637 = vrot.lane.b32.xlu1 %v609_v63, %s7166_s22 }
  0xe5   : > { %779 = vrot.lane.b32.xlu0 %v753_v6, %s7168_s24 }
  0xe8   : > { %704 = vrot.lane.b32.xlu2 %v679_v7, %s7169_s25  ;;  %708 = vrot.lane.b32.xlu1 %v681_v8, %s7169_s25 }
  0xed   : > { %852 = vrot.lane.b32.xlu0 %v826_v10, %s7170_s26 }
  0xf0   : > { %777 = vrot.lane.b32.xlu2 %v752_v11, %s7168_s24  ;;  %781 = vrot.lane.b32.xlu1 %v754_v12, %s7168_s24 }
  0xf5   : > { %564 = vrot.lane.b32.xlu0 %v536_v13, %s7167_s23 }
  0xf8   : > { %850 = vrot.lane.b32.xlu2 %v825_v14, %s7170_s26  ;;  %854 = vrot.lane.b32.xlu1 %v827_v15, %s7170_s26 }
  0xfa   : > { %v7573_v18 = vpop.permute.xlu2 %548 }
  0xfd   : > { %635 = vrot.lane.b32.xlu0 %v608_v29, %s7166_s22 }
 0x100   : > { %562 = vrot.lane.b32.xlu2 %v535_v34, %s7167_s23  ;;  %702 = vrot.lane.b32.xlu1 %v678_v35, %s7169_s25 }
 0x102   : > { %v7588_v37 = vpop.permute.xlu2 %550 }
 0x105   : > { %629 = vrot.lane.b32.xlu0 %v605_v38, %s7166_s22 }
 0x108   : > { %710 = vrot.lane.b32.xlu2 %v682_v39, %s7169_s25  ;;  %775 = vrot.lane.b32.xlu1 %v751_v41, %s7168_s24  ;;  %v12384_v39 = vmov 7  }
 0x10a   : > { %v7601_v42 = vpop.permute.xlu2 %623 }
 0x10d   : > { %712 = vrot.lane.b32.xlu0 %v683_v43, %s7169_s25 }
 0x110   : > { %783 = vrot.lane.b32.xlu2 %v755_v26, %s7168_s24  ;;  %848 = vrot.lane.b32.xlu1 %v824_v45, %s7170_s26 }
 0x112   : > { %v7611_v30 = vpop.permute.xlu1 %621  ;;  %v7613_v46 = vpop.permute.xlu2 %694 }
 0x115   : > { %785 = vrot.lane.b32.xlu0 %v756_v47, %s7168_s24 }
 0x118   : > { %856 = vrot.lane.b32.xlu2 %v828_v24, %s7170_s26  ;;  %566 = vrot.lane.b32.xlu1 %v537_v48, %s7167_s23 }
 0x11a   : > { %v7622_v36 = vpop.permute.xlu1 %696  ;;  %v7624_v49 = vpop.permute.xlu2 %627 }
 0x11d   : > { %858 = vrot.lane.b32.xlu0 %v829_v50, %s7170_s26  ;;  %s7187_s26 = smov 115  }
 0x120   : > { %556 = vrot.lane.b32.xlu2 %v532_v52, %s7167_s23  ;;  %886 = vperm.xlu1 %6918, %v7388_v0  }
 0x122   : > { %v7632_v22 = vpop.permute.xlu1 %769  ;;  %v7634_v53 = vpop.permute.xlu2 %698 }
 0x128   : > { %639 = vrot.lane.b32.xlu2 %v610_v54, %s7166_s22  ;;  %6920 = vset.pattern.permute.xlu1 %v12384_v39 }
 0x12a   : > { %v7639_v56 = vpop.permute.xlu1 %842  ;;  %v7641_v57 = vpop.permute.xlu2 %771 }
 0x130   : > { %890 = vperm.xlu2 %6919, %v7404_v4  }
 0x132   : > { %v7644_v21 = vpop.permute.xlu1 %554  ;;  %v7646_v58 = vpop.permute.xlu2 %844 }
 0x133   : > { %12784 = vst [vmem:[#allocation9_spill] sm:$0xff] %v7646_v58 }
 0x138   : > { %6921 = vset.pattern.permute.xlu2 %v12384_v39 }
 0x13a   : > { %v7648_v60 = vpop.permute.xlu1 %625  ;;  %v7650_v61 = vpop.permute.xlu2 %633 }
 0x142   : > { %v7652_v62 = vpop.permute.xlu1 %560  ;;  %v7654_v63 = vpop.permute.xlu2 %704 }
 0x14a   : > { %v7656_v25 = vpop.permute.xlu2 %777  ;;  %v7658_v6 = vpop.permute.xlu1 %631 }
 0x152   : > { %v7660_v7 = vpop.permute.xlu2 %850  ;;  %v7662_v8 = vpop.permute.xlu1 %637 }
 0x153   : > { %12785 = vst [vmem:[#allocation10_spill] sm:$0xff] %v7660_v7 }
 0x15a   : > { %v7664_v9 = vpop.permute.xlu1 %708  ;;  %v7666_v10 = vpop.permute.xlu2 %562 }
 0x162   : > { %v7668_v11 = vpop.permute.xlu1 %781  ;;  %v7670_v12 = vpop.permute.xlu2 %710 }
 0x163   : > { %12786 = vst [vmem:[#allocation11_spill] sm:$0xff] %v7668_v11 }
 0x16a   : > { %v7672_v13 = vpop.permute.xlu1 %854  ;;  %v7674_v14 = vpop.permute.xlu2 %783 }
 0x16b   : > { %12787 = vst [vmem:[#allocation12_spill] sm:$0xff] %v7672_v13 }
 0x16c   : > { %12788 = vst [vmem:[#allocation13_spill] sm:$0xff] %v7674_v14 }
 0x172   : > { %v7676_v15 = vpop.permute.xlu1 %702  ;;  %v7678_v29 = vpop.permute.xlu2 %856 }
 0x173   : > { %12789 = vst [vmem:[#allocation14_spill] sm:$0xff] %v7678_v29 }
 0x17a   : > { %v7680_v34 = vpop.permute.xlu1 %775  ;;  %v7684_v38 = vpop.permute.xlu2 %556 }
 0x17b   : > { %12790 = vst [vmem:[#allocation15_spill] sm:$0xff] %v7680_v34 }
 0x182   : > { %v7682_v35 = vpop.permute.xlu1 %848  ;;  %v7690_v43 = vpop.permute.xlu2 %639 }
 0x183   : > { %12791 = vst [vmem:[#allocation16_spill] sm:$0xff] %v7682_v35 }
 0x18a   : > { %v7688_v41 = vpop.permute.xlu1 %566  ;;  %v891_v48 = vpop.permute.xlu2 %890 }
 0x18b   : > { %v898_v50 = vmul.f32 %v891_v48, %v7526_v55  ;;  %v901_v39 = vmul.f32 %v891_v48, %v7539_v59  ;;  %v900_v31 = vmul.f32 %v891_v48, %v7550_v5  ;;  %v899_v19 = vmul.f32 %v891_v48, %v7517_v51 }
 0x192   : > { %v887_v26 = vpop.permute.xlu1 %886 }
 0x193   : > { %v895_v45 = vmul.f32 %v887_v26, %v7484_v40  ;;  %v894_v47 = vmul.f32 %v887_v26, %v7464_v32  ;;  %v893_v24 = vmul.f32 %v887_v26, %v7452_v27  ;;  %v897_v52 = vmul.f32 %v887_v26, %v7575_v28 }
 0x194   : > { %v896_v54 = vmul.f32 %v887_v26, %v7497_v44 }
 0x195   : > { %917 = vrot.lane.b32.xlu2 %v895_v45, %s7173_s27  ;;  %915 = vrot.lane.b32.xlu1 %v894_v47, %s7173_s27  ;;  %v902_v45 = vmul.f32 %v891_v48, %v7597_v33 }
 0x196   : > { %913 = vrot.lane.b32.xlu0 %v893_v24, %s7173_s27 }
 0x19d   : > { %923 = vrot.lane.b32.xlu2 %v898_v50, %s7173_s27  ;;  %921 = vrot.lane.b32.xlu1 %v897_v52, %s7173_s27  ;;  %v12393_v52 = vmov 8  }
 0x19e   : > { %919 = vrot.lane.b32.xlu0 %v896_v54, %s7173_s27 }
 0x1a5   : > { %929 = vrot.lane.b32.xlu2 %v901_v39, %s7173_s27  ;;  %927 = vrot.lane.b32.xlu1 %v900_v31, %s7173_s27 }
 0x1a6   : > { %925 = vrot.lane.b32.xlu0 %v899_v19, %s7173_s27 }
 0x1ad   : > { %963 = vperm.xlu2 %6921, %v7404_v4   ;;  %959 = vperm.xlu1 %6920, %v7388_v0  }
 0x1ae   : > { %931 = vrot.lane.b32.xlu0 %v902_v45, %s7173_s27  ;;  %s7189_s27 = smov 114  }
 0x1b5   : > { %6923 = vset.pattern.permute.xlu2 %v12393_v52  ;;  %6922 = vset.pattern.permute.xlu1 %v12393_v52 }
 0x1ef   : > { %v7704_v26 = vpop.permute.xlu2 %917 }
 0x1f0   : > { %12792 = vst [vmem:[#allocation17_spill] sm:$0xff] %v7704_v26 }
 0x1f7   : > { %v7710_v50 = vpop.permute.xlu2 %923 }
 0x1f8   : > { %12795 = vst [vmem:[#allocation20_spill] sm:$0xff] %v7710_v50 }
 0x1ff   : > { %v7716_v31 = vpop.permute.xlu2 %929 }
 0x200   : > { %12797 = vst [vmem:[#allocation22_spill] sm:$0xff] %v7716_v31 }
 0x207   : > { %v7706_v47 = vpop.permute.xlu1 %915  ;;  %v964_v16 = vpop.permute.xlu2 %963 }
 0x208   : > { %12793 = vst [vmem:[#allocation18_spill] sm:$0xff] %v7706_v47  ;;  %v971_v17 = vmul.f32 %v964_v16, %v7526_v55  ;;  %v974_v1 = vmul.f32 %v964_v16, %v7539_v59  ;;  %v973_v2 = vmul.f32 %v964_v16, %v7550_v5  ;;  %v972_v50 = vmul.f32 %v964_v16, %v7517_v51 }
 0x20f   : > { %v7708_v24 = vpop.permute.xlu1 %921 }
 0x210   : > { %12794 = vst [vmem:[#allocation19_spill] sm:$0xff] %v7708_v24 }
 0x217   : > { %v7714_v19 = vpop.permute.xlu1 %927 }
 0x218   : > { %12796 = vst [vmem:[#allocation21_spill] sm:$0xff] %v7714_v19 }
 0x21f   : > { %v960_v39 = vpop.permute.xlu1 %959 }
 0x220   : > { %v968_v48 = vmul.f32 %v960_v39, %v7484_v40  ;;  %v967_v54 = vmul.f32 %v960_v39, %v7464_v32  ;;  %v966_v45 = vmul.f32 %v960_v39, %v7452_v27  ;;  %v970_v52 = vmul.f32 %v960_v39, %v7575_v28 }
 0x221   : > { %v969_v3 = vmul.f32 %v960_v39, %v7497_v44 }
 0x222   : > { %990 = vrot.lane.b32.xlu2 %v968_v48, %s7175_s28  ;;  %988 = vrot.lane.b32.xlu1 %v967_v54, %s7175_s28  ;;  %v975_v48 = vmul.f32 %v964_v16, %v7597_v33  ;;  %v12401_v54 = vmov 9  }
 0x223   : > { %986 = vrot.lane.b32.xlu0 %v966_v45, %s7175_s28 }
 0x22a   : > { %996 = vrot.lane.b32.xlu2 %v971_v17, %s7175_s28  ;;  %994 = vrot.lane.b32.xlu1 %v970_v52, %s7175_s28 }
 0x22b   : > { %992 = vrot.lane.b32.xlu0 %v969_v3, %s7175_s28 }
 0x232   : > { %1002 = vrot.lane.b32.xlu2 %v974_v1, %s7175_s28  ;;  %1000 = vrot.lane.b32.xlu1 %v973_v2, %s7175_s28 }
 0x233   : > { %998 = vrot.lane.b32.xlu0 %v972_v50, %s7175_s28 }
 0x23a   : > { %1036 = vperm.xlu2 %6923, %v7404_v4   ;;  %1032 = vperm.xlu1 %6922, %v7388_v0  }
 0x23b   : > { %1004 = vrot.lane.b32.xlu0 %v975_v48, %s7175_s28  ;;  %s7195_s28 = smov 111  }
 0x242   : > { %6925 = vset.pattern.permute.xlu2 %v12401_v54  ;;  %6924 = vset.pattern.permute.xlu1 %v12401_v54 }
 0x27c   : > { %v7730_v39 = vpop.permute.xlu2 %990 }
 0x27d   : > { %12798 = vst [vmem:[#allocation23_spill] sm:$0xff] %v7730_v39 }
 0x284   : > { %v7736_v52 = vpop.permute.xlu2 %996 }
 0x285   : > { %12801 = vst [vmem:[#allocation26_spill] sm:$0xff] %v7736_v52 }
 0x28c   : > { %v7742_v2 = vpop.permute.xlu2 %1002 }
 0x28d   : > { %12803 = vst [vmem:[#allocation28_spill] sm:$0xff] %v7742_v2 }
 0x294   : > { %v7732_v17 = vpop.permute.xlu1 %988  ;;  %v1037_v52 = vpop.permute.xlu2 %1036 }
 0x295   : > { %12799 = vst [vmem:[#allocation24_spill] sm:$0xff] %v7732_v17  ;;  %v1044_v54 = vmul.f32 %v1037_v52, %v7526_v55 }
 0x29c   : > { %v7734_v3 = vpop.permute.xlu1 %994 }
 0x29d   : > { %12800 = vst [vmem:[#allocation25_spill] sm:$0xff] %v7734_v3  ;;  %v1047_v3 = vmul.f32 %v1037_v52, %v7539_v59 }
 0x2a4   : > { %v7740_v1 = vpop.permute.xlu1 %1000 }
 0x2a5   : > { %12802 = vst [vmem:[#allocation27_spill] sm:$0xff] %v7740_v1 }
 0x2ac   : > { %v1033_v16 = vpop.permute.xlu1 %1032 }
 0x2ad   : > { %v1041_v50 = vmul.f32 %v1033_v16, %v7484_v40  ;;  %v1040_v45 = vmul.f32 %v1033_v16, %v7464_v32  ;;  %v1039_v48 = vmul.f32 %v1033_v16, %v7452_v27  ;;  %v1043_v1 = vmul.f32 %v1033_v16, %v7575_v28 }
 0x2ae   : > { %v1042_v2 = vmul.f32 %v1033_v16, %v7497_v44  ;;  %v1048_v16 = vmul.f32 %v1037_v52, %v7597_v33 }
 0x2af   : > { %1063 = vrot.lane.b32.xlu2 %v1041_v50, %s7177_s29  ;;  %1061 = vrot.lane.b32.xlu1 %v1040_v45, %s7177_s29  ;;  %v1046_v50 = vmul.f32 %v1037_v52, %v7550_v5  ;;  %v1045_v45 = vmul.f32 %v1037_v52, %v7517_v51 }
 0x2b0   : > { %1059 = vrot.lane.b32.xlu0 %v1039_v48, %s7177_s29 }
 0x2b7   : > { %1069 = vrot.lane.b32.xlu2 %v1044_v54, %s7177_s29  ;;  %1067 = vrot.lane.b32.xlu1 %v1043_v1, %s7177_s29 }
 0x2b8   : > { %1065 = vrot.lane.b32.xlu0 %v1042_v2, %s7177_s29 }
 0x2bf   : > { %1075 = vrot.lane.b32.xlu2 %v1047_v3, %s7177_s29  ;;  %1073 = vrot.lane.b32.xlu1 %v1046_v50, %s7177_s29  ;;  %v12407_v3 = vmov 10  }
 0x2c0   : > { %1071 = vrot.lane.b32.xlu0 %v1045_v45, %s7177_s29 }
 0x2c7   : > { %1109 = vperm.xlu2 %6925, %v7404_v4   ;;  %1105 = vperm.xlu1 %6924, %v7388_v0  }
 0x2c8   : > { %1077 = vrot.lane.b32.xlu0 %v1048_v16, %s7177_s29 }
 0x2cf   : > { %6927 = vset.pattern.permute.xlu2 %v12407_v3  ;;  %6926 = vset.pattern.permute.xlu1 %v12407_v3 }
 0x309   : > { %v7766_v54 = vpop.permute.xlu2 %1063 }
 0x30a   : > { %12804 = vst [vmem:[#allocation29_spill] sm:$0xff] %v7766_v54 }
 0x311   : > { %v7772_v48 = vpop.permute.xlu2 %1069 }
 0x312   : > { %12807 = vst [vmem:[#allocation32_spill] sm:$0xff] %v7772_v48 }
 0x319   : > { %v7778_v50 = vpop.permute.xlu2 %1075 }
 0x31a   : > { %12809 = vst [vmem:[#allocation34_spill] sm:$0xff] %v7778_v50 }
 0x321   : > { %v7768_v1 = vpop.permute.xlu1 %1061  ;;  %v1110_v48 = vpop.permute.xlu2 %1109 }
 0x322   : > { %12805 = vst [vmem:[#allocation30_spill] sm:$0xff] %v7768_v1  ;;  %v1120_v50 = vmul.f32 %v1110_v48, %v7539_v59  ;;  %v1119_v17 = vmul.f32 %v1110_v48, %v7550_v5  ;;  %v1118_v39 = vmul.f32 %v1110_v48, %v7517_v51 }
 0x329   : > { %v7770_v2 = vpop.permute.xlu1 %1067 }
 0x32a   : > { %12806 = vst [vmem:[#allocation31_spill] sm:$0xff] %v7770_v2  ;;  %v1117_v2 = vmul.f32 %v1110_v48, %v7526_v55 }
 0x331   : > { %v7776_v52 = vpop.permute.xlu1 %1073 }
 0x332   : > { %12808 = vst [vmem:[#allocation33_spill] sm:$0xff] %v7776_v52 }
 0x339   : > { %v1106_v45 = vpop.permute.xlu1 %1105 }
 0x33a   : > { %v1114_v16 = vmul.f32 %v1106_v45, %v7484_v40  ;;  %v1113_v54 = vmul.f32 %v1106_v45, %v7464_v32  ;;  %v1112_v1 = vmul.f32 %v1106_v45, %v7452_v27  ;;  %v1116_v3 = vmul.f32 %v1106_v45, %v7575_v28 }
 0x33b   : > { %v1115_v52 = vmul.f32 %v1106_v45, %v7497_v44  ;;  %v12413_v45 = vmov 11  }
 0x33c   : > { %1136 = vrot.lane.b32.xlu2 %v1114_v16, %s7179_s14  ;;  %1134 = vrot.lane.b32.xlu1 %v1113_v54, %s7179_s14  ;;  %v1121_v54 = vmul.f32 %v1110_v48, %v7597_v33 }
 0x33d   : > { %1132 = vrot.lane.b32.xlu0 %v1112_v1, %s7179_s14 }
 0x344   : > { %1142 = vrot.lane.b32.xlu2 %v1117_v2, %s7179_s14  ;;  %1140 = vrot.lane.b32.xlu1 %v1116_v3, %s7179_s14 }
 0x345   : > { %1138 = vrot.lane.b32.xlu0 %v1115_v52, %s7179_s14 }
 0x34c   : > { %1148 = vrot.lane.b32.xlu2 %v1120_v50, %s7179_s14  ;;  %1146 = vrot.lane.b32.xlu1 %v1119_v17, %s7179_s14 }
 0x34d   : > { %1144 = vrot.lane.b32.xlu0 %v1118_v39, %s7179_s14 }
 0x354   : > { %1182 = vperm.xlu2 %6927, %v7404_v4   ;;  %1178 = vperm.xlu1 %6926, %v7388_v0  }
 0x355   : > { %1150 = vrot.lane.b32.xlu0 %v1121_v54, %s7179_s14  ;;  %s7197_s14 = smov 110  }
 0x35c   : > { %6929 = vset.pattern.permute.xlu2 %v12413_v45  ;;  %6928 = vset.pattern.permute.xlu1 %v12413_v45 }
 0x396   : > { %v7792_v1 = vpop.permute.xlu2 %1136 }
 0x397   : > { %12810 = vst [vmem:[#allocation35_spill] sm:$0xff] %v7792_v1 }
 0x39e   : > { %v7798_v52 = vpop.permute.xlu2 %1142 }
 0x39f   : > { %12813 = vst [vmem:[#allocation38_spill] sm:$0xff] %v7798_v52 }
 0x3a6   : > { %v7804_v17 = vpop.permute.xlu2 %1148 }
 0x3a7   : > { %12815 = vst [vmem:[#allocation40_spill] sm:$0xff] %v7804_v17 }
 0x3ae   : > { %v7794_v2 = vpop.permute.xlu1 %1134  ;;  %v1183_v52 = vpop.permute.xlu2 %1182 }
 0x3af   : > { %12811 = vst [vmem:[#allocation36_spill] sm:$0xff] %v7794_v2  ;;  %v1193_v17 = vmul.f32 %v1183_v52, %v7539_v59  ;;  %v1192_v2 = vmul.f32 %v1183_v52, %v7550_v5  ;;  %v1191_v1 = vmul.f32 %v1183_v52, %v7517_v51 }
 0x3b6   : > { %v7796_v3 = vpop.permute.xlu1 %1140 }
 0x3b7   : > { %12812 = vst [vmem:[#allocation37_spill] sm:$0xff] %v7796_v3  ;;  %v1190_v3 = vmul.f32 %v1183_v52, %v7526_v55 }
 0x3be   : > { %v7802_v39 = vpop.permute.xlu1 %1146 }
 0x3bf   : > { %12814 = vst [vmem:[#allocation39_spill] sm:$0xff] %v7802_v39 }
 0x3c6   : > { %v1179_v48 = vpop.permute.xlu1 %1178 }
 0x3c7   : > { %v1187_v50 = vmul.f32 %v1179_v48, %v7484_v40  ;;  %v1186_v16 = vmul.f32 %v1179_v48, %v7464_v32  ;;  %v1185_v54 = vmul.f32 %v1179_v48, %v7452_v27  ;;  %v1189_v45 = vmul.f32 %v1179_v48, %v7575_v28 }
 0x3c8   : > { %v1188_v39 = vmul.f32 %v1179_v48, %v7497_v44 }
 0x3c9   : > { %1209 = vrot.lane.b32.xlu2 %v1187_v50, %s7181_s16  ;;  %1207 = vrot.lane.b32.xlu1 %v1186_v16, %s7181_s16  ;;  %v1194_v50 = vmul.f32 %v1183_v52, %v7597_v33  ;;  %v12419_v16 = vmov 12  }
 0x3ca   : > { %1205 = vrot.lane.b32.xlu0 %v1185_v54, %s7181_s16 }
 0x3d1   : > { %1215 = vrot.lane.b32.xlu2 %v1190_v3, %s7181_s16  ;;  %1213 = vrot.lane.b32.xlu1 %v1189_v45, %s7181_s16 }
 0x3d2   : > { %1211 = vrot.lane.b32.xlu0 %v1188_v39, %s7181_s16 }
 0x3d9   : > { %1221 = vrot.lane.b32.xlu2 %v1193_v17, %s7181_s16  ;;  %1219 = vrot.lane.b32.xlu1 %v1192_v2, %s7181_s16 }
 0x3da   : > { %1217 = vrot.lane.b32.xlu0 %v1191_v1, %s7181_s16 }
 0x3e1   : > { %1255 = vperm.xlu2 %6929, %v7404_v4   ;;  %1251 = vperm.xlu1 %6928, %v7388_v0  }
 0x3e2   : > { %1223 = vrot.lane.b32.xlu0 %v1194_v50, %s7181_s16  ;;  %s7199_s16 = smov 109  }
 0x3e9   : > { %6931 = vset.pattern.permute.xlu2 %v12419_v16  ;;  %6930 = vset.pattern.permute.xlu1 %v12419_v16 }
 0x423   : > { %v7818_v48 = vpop.permute.xlu2 %1209 }
 0x424   : > { %12816 = vst [vmem:[#allocation41_spill] sm:$0xff] %v7818_v48 }
 0x42b   : > { %v7824_v39 = vpop.permute.xlu2 %1215 }
 0x42c   : > { %12819 = vst [vmem:[#allocation44_spill] sm:$0xff] %v7824_v39 }
 0x433   : > { %v7830_v2 = vpop.permute.xlu2 %1221 }
 0x434   : > { %12821 = vst [vmem:[#allocation46_spill] sm:$0xff] %v7830_v2 }
 0x43b   : > { %v7820_v3 = vpop.permute.xlu1 %1207  ;;  %v1256_v39 = vpop.permute.xlu2 %1255 }
 0x43c   : > { %12817 = vst [vmem:[#allocation42_spill] sm:$0xff] %v7820_v3  ;;  %v1266_v2 = vmul.f32 %v1256_v39, %v7539_v59  ;;  %v1265_v3 = vmul.f32 %v1256_v39, %v7550_v5  ;;  %v1264_v48 = vmul.f32 %v1256_v39, %v7517_v51 }
 0x443   : > { %v7822_v45 = vpop.permute.xlu1 %1213 }
 0x444   : > { %12818 = vst [vmem:[#allocation43_spill] sm:$0xff] %v7822_v45  ;;  %v1263_v45 = vmul.f32 %v1256_v39, %v7526_v55 }
 0x44b   : > { %v7828_v1 = vpop.permute.xlu1 %1219 }
 0x44c   : > { %12820 = vst [vmem:[#allocation45_spill] sm:$0xff] %v7828_v1 }
 0x453   : > { %v1252_v52 = vpop.permute.xlu1 %1251 }
 0x454   : > { %v1260_v17 = vmul.f32 %v1252_v52, %v7484_v40  ;;  %v1259_v54 = vmul.f32 %v1252_v52, %v7464_v32  ;;  %v1258_v50 = vmul.f32 %v1252_v52, %v7452_v27  ;;  %v1262_v16 = vmul.f32 %v1252_v52, %v7575_v28 }
 0x455   : > { %v1261_v1 = vmul.f32 %v1252_v52, %v7497_v44 }
 0x456   : > { %1282 = vrot.lane.b32.xlu2 %v1260_v17, %s7183_s17  ;;  %1280 = vrot.lane.b32.xlu1 %v1259_v54, %s7183_s17  ;;  %v1267_v17 = vmul.f32 %v1256_v39, %v7597_v33  ;;  %v12425_v54 = vmov 13  }
 0x457   : > { %1278 = vrot.lane.b32.xlu0 %v1258_v50, %s7183_s17 }
 0x45e   : > { %1288 = vrot.lane.b32.xlu2 %v1263_v45, %s7183_s17  ;;  %1286 = vrot.lane.b32.xlu1 %v1262_v16, %s7183_s17 }
 0x45f   : > { %1284 = vrot.lane.b32.xlu0 %v1261_v1, %s7183_s17 }
 0x466   : > { %1294 = vrot.lane.b32.xlu2 %v1266_v2, %s7183_s17  ;;  %1292 = vrot.lane.b32.xlu1 %v1265_v3, %s7183_s17 }
 0x467   : > { %1290 = vrot.lane.b32.xlu0 %v1264_v48, %s7183_s17 }
 0x46e   : > { %1328 = vperm.xlu2 %6931, %v7404_v4   ;;  %1324 = vperm.xlu1 %6930, %v7388_v0  }
 0x46f   : > { %1296 = vrot.lane.b32.xlu0 %v1267_v17, %s7183_s17  ;;  %s12530_s17 = smov 108  }
 0x476   : > { %6933 = vset.pattern.permute.xlu2 %v12425_v54  ;;  %6932 = vset.pattern.permute.xlu1 %v12425_v54 }
 0x4b0   : > { %v7844_v52 = vpop.permute.xlu2 %1282 }
 0x4b1   : > { %12822 = vst [vmem:[#allocation47_spill] sm:$0xff] %v7844_v52 }
 0x4b8   : > { %v7850_v1 = vpop.permute.xlu2 %1288 }
 0x4b9   : > { %12825 = vst [vmem:[#allocation50_spill] sm:$0xff] %v7850_v1 }
 0x4c0   : > { %v7856_v3 = vpop.permute.xlu2 %1294 }
 0x4c1   : > { %12827 = vst [vmem:[#allocation52_spill] sm:$0xff] %v7856_v3 }
 0x4c8   : > { %v7846_v45 = vpop.permute.xlu1 %1280  ;;  %v1329_v1 = vpop.permute.xlu2 %1328 }
 0x4c9   : > { %12823 = vst [vmem:[#allocation48_spill] sm:$0xff] %v7846_v45  ;;  %v1336_v54 = vmul.f32 %v1329_v1, %v7526_v55 }
 0x4d0   : > { %v7848_v16 = vpop.permute.xlu1 %1286 }
 0x4d1   : > { %12824 = vst [vmem:[#allocation49_spill] sm:$0xff] %v7848_v16  ;;  %v1339_v16 = vmul.f32 %v1329_v1, %v7539_v59 }
 0x4d8   : > { %v7854_v48 = vpop.permute.xlu1 %1292 }
 0x4d9   : > { %12826 = vst [vmem:[#allocation51_spill] sm:$0xff] %v7854_v48 }
 0x4e0   : > { %v1325_v39 = vpop.permute.xlu1 %1324 }
 0x4e1   : > { %v1333_v2 = vmul.f32 %v1325_v39, %v7484_v40  ;;  %v1332_v50 = vmul.f32 %v1325_v39, %v7464_v32  ;;  %v1331_v17 = vmul.f32 %v1325_v39, %v7452_v27  ;;  %v1335_v48 = vmul.f32 %v1325_v39, %v7575_v28 }
 0x4e2   : > { %v1334_v3 = vmul.f32 %v1325_v39, %v7497_v44  ;;  %v1340_v39 = vmul.f32 %v1329_v1, %v7597_v33 }
 0x4e3   : > { %1355 = vrot.lane.b32.xlu2 %v1333_v2, %s7185_s21  ;;  %1353 = vrot.lane.b32.xlu1 %v1332_v50, %s7185_s21  ;;  %v1338_v2 = vmul.f32 %v1329_v1, %v7550_v5  ;;  %v1337_v50 = vmul.f32 %v1329_v1, %v7517_v51 }
 0x4e4   : > { %1351 = vrot.lane.b32.xlu0 %v1331_v17, %s7185_s21 }
 0x4eb   : > { %1361 = vrot.lane.b32.xlu2 %v1336_v54, %s7185_s21  ;;  %1359 = vrot.lane.b32.xlu1 %v1335_v48, %s7185_s21 }
 0x4ec   : > { %1357 = vrot.lane.b32.xlu0 %v1334_v3, %s7185_s21 }
 0x4f3   : > { %1367 = vrot.lane.b32.xlu2 %v1339_v16, %s7185_s21  ;;  %1365 = vrot.lane.b32.xlu1 %v1338_v2, %s7185_s21  ;;  %v12431_v16 = vmov 14  }
 0x4f4   : > { %1363 = vrot.lane.b32.xlu0 %v1337_v50, %s7185_s21 }
 0x4fb   : > { %1401 = vperm.xlu2 %6933, %v7404_v4   ;;  %1397 = vperm.xlu1 %6932, %v7388_v0  }
 0x4fc   : > { %1369 = vrot.lane.b32.xlu0 %v1340_v39, %s7185_s21 }
 0x503   : > { %6935 = vset.pattern.permute.xlu2 %v12431_v16  ;;  %6934 = vset.pattern.permute.xlu1 %v12431_v16 }
 0x53d   : > { %v7880_v54 = vpop.permute.xlu2 %1355 }
 0x53e   : > { %12828 = vst [vmem:[#allocation53_spill] sm:$0xff] %v7880_v54 }
 0x545   : > { %v7886_v17 = vpop.permute.xlu2 %1361 }
 0x546   : > { %12831 = vst [vmem:[#allocation56_spill] sm:$0xff] %v7886_v17 }
 0x54d   : > { %v7892_v2 = vpop.permute.xlu2 %1367 }
 0x54e   : > { %12833 = vst [vmem:[#allocation58_spill] sm:$0xff] %v7892_v2 }
 0x555   : > { %v7882_v48 = vpop.permute.xlu1 %1353  ;;  %v1402_v17 = vpop.permute.xlu2 %1401 }
 0x556   : > { %12829 = vst [vmem:[#allocation54_spill] sm:$0xff] %v7882_v48  ;;  %v1412_v2 = vmul.f32 %v1402_v17, %v7539_v59  ;;  %v1411_v45 = vmul.f32 %v1402_v17, %v7550_v5  ;;  %v1410_v52 = vmul.f32 %v1402_v17, %v7517_v51 }
 0x55d   : > { %v7884_v3 = vpop.permute.xlu1 %1359 }
 0x55e   : > { %12830 = vst [vmem:[#allocation55_spill] sm:$0xff] %v7884_v3  ;;  %v1409_v3 = vmul.f32 %v1402_v17, %v7526_v55 }
 0x565   : > { %v7890_v1 = vpop.permute.xlu1 %1365 }
 0x566   : > { %12832 = vst [vmem:[#allocation57_spill] sm:$0xff] %v7890_v1 }
 0x56d   : > { %v1398_v50 = vpop.permute.xlu1 %1397 }
 0x56e   : > { %v1406_v39 = vmul.f32 %v1398_v50, %v7484_v40  ;;  %v1405_v54 = vmul.f32 %v1398_v50, %v7464_v32  ;;  %v1404_v48 = vmul.f32 %v1398_v50, %v7452_v27  ;;  %v1408_v16 = vmul.f32 %v1398_v50, %v7575_v28 }
 0x56f   : > { %v1407_v1 = vmul.f32 %v1398_v50, %v7497_v44  ;;  %v12437_v50 = vmov 15  }
 0x570   : > { %1428 = vrot.lane.b32.xlu2 %v1406_v39, %s7187_s26  ;;  %1426 = vrot.lane.b32.xlu1 %v1405_v54, %s7187_s26  ;;  %v1413_v54 = vmul.f32 %v1402_v17, %v7597_v33 }
 0x571   : > { %1424 = vrot.lane.b32.xlu0 %v1404_v48, %s7187_s26 }
 0x578   : > { %1434 = vrot.lane.b32.xlu2 %v1409_v3, %s7187_s26  ;;  %1432 = vrot.lane.b32.xlu1 %v1408_v16, %s7187_s26 }
 0x579   : > { %1430 = vrot.lane.b32.xlu0 %v1407_v1, %s7187_s26 }
 0x580   : > { %1440 = vrot.lane.b32.xlu2 %v1412_v2, %s7187_s26  ;;  %1438 = vrot.lane.b32.xlu1 %v1411_v45, %s7187_s26 }
 0x581   : > { %1436 = vrot.lane.b32.xlu0 %v1410_v52, %s7187_s26 }
 0x588   : > { %1474 = vperm.xlu2 %6935, %v7404_v4   ;;  %1470 = vperm.xlu1 %6934, %v7388_v0  }
 0x589   : > { %1442 = vrot.lane.b32.xlu0 %v1413_v54, %s7187_s26  ;;  %v7923_v54 = vpop.permute.xlu0 %767  ;;  %s7191_s26 = smov 113  }
 0x590   : > { %6937 = vset.pattern.permute.xlu2 %v12437_v50  ;;  %6936 = vset.pattern.permute.xlu1 %v12437_v50 }
 0x5ca   : > { %v7906_v48 = vpop.permute.xlu2 %1428 }
 0x5cb   : > { %12834 = vst [vmem:[#allocation59_spill] sm:$0xff] %v7906_v48 }
 0x5d2   : > { %v7912_v1 = vpop.permute.xlu2 %1434 }
 0x5d3   : > { %12837 = vst [vmem:[#allocation62_spill] sm:$0xff] %v7912_v1 }
 0x5da   : > { %v7918_v45 = vpop.permute.xlu2 %1440 }
 0x5db   : > { %12839 = vst [vmem:[#allocation64_spill] sm:$0xff] %v7918_v45 }
 0x5e2   : > { %v7908_v3 = vpop.permute.xlu1 %1426  ;;  %v1475_v39 = vpop.permute.xlu2 %1474 }
 0x5e3   : > { %12835 = vst [vmem:[#allocation60_spill] sm:$0xff] %v7908_v3  ;;  %v1482_v50 = vmul.f32 %v1475_v39, %v7526_v55  ;;  %v1485_v45 = vmul.f32 %v1475_v39, %v7539_v59  ;;  %v7930_v3 = vpop.permute.xlu0 %840 }
 0x5ea   : > { %v7910_v16 = vpop.permute.xlu1 %1432 }
 0x5eb   : > { %12836 = vst [vmem:[#allocation61_spill] sm:$0xff] %v7910_v16  ;;  %v1484_v16 = vmul.f32 %v1475_v39, %v7550_v5 }
 0x5f2   : > { %v7916_v52 = vpop.permute.xlu1 %1438 }
 0x5f3   : > { %12838 = vst [vmem:[#allocation63_spill] sm:$0xff] %v7916_v52 }
 0x5fa   : > { %v1471_v4 = vpop.permute.xlu1 %1470 }
 0x5fb   : > { %v1479_v0 = vmul.f32 %v1471_v4, %v7484_v40  ;;  %v1478_v17 = vmul.f32 %v1471_v4, %v7464_v32  ;;  %v1477_v2 = vmul.f32 %v1471_v4, %v7452_v27  ;;  %v1481_v1 = vmul.f32 %v1471_v4, %v7575_v28 }
 0x5fc   : > { %v1480_v52 = vmul.f32 %v1471_v4, %v7497_v44  ;;  %v7937_v4 = vld [vmem:[%s12376_s2 + $0x8] sm:$0xff] }
 0x5fd   : > { %1501 = vrot.lane.b32.xlu2 %v1479_v0, %s7189_s27  ;;  %1499 = vrot.lane.b32.xlu1 %v1478_v17, %s7189_s27  ;;  %v1483_v0 = vmul.f32 %v1475_v39, %v7517_v51  ;;  %v1486_v17 = vmul.f32 %v1475_v39, %v7597_v33  ;;  %v7190_v39 = vmov 16  }
 0x5fe   : > { %1497 = vrot.lane.b32.xlu0 %v1477_v2, %s7189_s27 }
 0x605   : > { %1507 = vrot.lane.b32.xlu2 %v1482_v50, %s7189_s27  ;;  %1505 = vrot.lane.b32.xlu1 %v1481_v1, %s7189_s27  ;;  %v7943_v1 = vld [vmem:[%s12376_s2] sm:$0xff]  ;;  %v7946_v50 = vpop.permute.xlu0 %552 }
 0x606   : > { %1503 = vrot.lane.b32.xlu0 %v1480_v52, %s7189_s27 }
 0x60d   : > { %1513 = vrot.lane.b32.xlu2 %v1485_v45, %s7189_s27  ;;  %1511 = vrot.lane.b32.xlu1 %v1484_v16, %s7189_s27  ;;  %v7960_v19 = vpop.permute.xlu0 %700 }
 0x60e   : > { %1509 = vrot.lane.b32.xlu0 %v1483_v0, %s7189_s27 }
 0x615   : > { %1547 = vperm.xlu2 %6937, %v7937_v4   ;;  %1543 = vperm.xlu1 %6936, %v7943_v1  }
 0x616   : > { %1515 = vrot.lane.b32.xlu0 %v1486_v17, %s7189_s27  ;;  %s7193_s27 = smov 112  }
 0x61d   : > { %6939 = vset.pattern.permute.xlu2 %v7190_v39  ;;  %6938 = vset.pattern.permute.xlu1 %v7190_v39 }
 0x657   : > { %v7948_v16 = vpop.permute.xlu2 %1501 }
 0x658   : > { %12840 = vst [vmem:[#allocation65_spill] sm:$0xff] %v7948_v16 }
 0x65f   : > { %v7954_v2 = vpop.permute.xlu2 %1507 }
 0x660   : > { %12843 = vst [vmem:[#allocation68_spill] sm:$0xff] %v7954_v2 }
 0x667   : > { %v7958_v48 = vpop.permute.xlu2 %1513 }
 0x668   : > { %12845 = vst [vmem:[#allocation70_spill] sm:$0xff] %v7958_v48 }
 0x66f   : > { %v7950_v52 = vpop.permute.xlu1 %1499  ;;  %v1548_v2 = vpop.permute.xlu2 %1547 }
 0x670   : > { %12841 = vst [vmem:[#allocation66_spill] sm:$0xff] %v7950_v52  ;;  %v1555_v39 = vmul.f32 %v1548_v2, %v7526_v55  ;;  %v1558_v24 = vmul.f32 %v1548_v2, %v7539_v59  ;;  %v1557_v47 = vmul.f32 %v1548_v2, %v7550_v5 }
 0x677   : > { %v7952_v45 = vpop.permute.xlu1 %1505 }
 0x678   : > { %12842 = vst [vmem:[#allocation67_spill] sm:$0xff] %v7952_v45  ;;  %v7965_v45 = vpop.permute.xlu0 %773 }
 0x67f   : > { %v7956_v0 = vpop.permute.xlu1 %1511 }
 0x680   : > { %12844 = vst [vmem:[#allocation69_spill] sm:$0xff] %v7956_v0  ;;  %v7972_v26 = vpop.permute.xlu0 %846 }
 0x681   : > { %12846 = vst [vmem:[#allocation71_spill] sm:$0xff] %v7972_v26 }
 0x687   : > { %v1544_v31 = vpop.permute.xlu1 %1543 }
 0x688   : > { %v1552_v17 = vmul.f32 %v1544_v31, %v7484_v40  ;;  %v1551_v16 = vmul.f32 %v1544_v31, %v7464_v32  ;;  %v1550_v52 = vmul.f32 %v1544_v31, %v7452_v27  ;;  %v1554_v0 = vmul.f32 %v1544_v31, %v7575_v28 }
 0x689   : > { %v1553_v48 = vmul.f32 %v1544_v31, %v7497_v44  ;;  %v7978_v31 = vpop.permute.xlu0 %558 }
 0x68a   : > { %1574 = vrot.lane.b32.xlu2 %v1552_v17, %s7191_s26  ;;  %1572 = vrot.lane.b32.xlu1 %v1551_v16, %s7191_s26  ;;  %v1556_v16 = vmul.f32 %v1548_v2, %v7517_v51 }
 0x68b   : > { %1570 = vrot.lane.b32.xlu0 %v1550_v52, %s7191_s26  ;;  %v1559_v52 = vmul.f32 %v1548_v2, %v7597_v33 }
 0x692   : > { %1580 = vrot.lane.b32.xlu2 %v1555_v39, %s7191_s26  ;;  %1578 = vrot.lane.b32.xlu1 %v1554_v0, %s7191_s26 }
 0x693   : > { %1576 = vrot.lane.b32.xlu0 %v1553_v48, %s7191_s26 }
 0x69a   : > { %1586 = vrot.lane.b32.xlu2 %v1558_v24, %s7191_s26  ;;  %1584 = vrot.lane.b32.xlu1 %v1557_v47, %s7191_s26  ;;  %v7192_v24 = vmov 17  }
 0x69b   : > { %1582 = vrot.lane.b32.xlu0 %v1556_v16, %s7191_s26  ;;  %v7992_v16 = vpop.permute.xlu0 %706 }
 0x6a2   : > { %1620 = vperm.xlu2 %6939, %v7937_v4   ;;  %1616 = vperm.xlu1 %6938, %v7943_v1  }
 0x6a3   : > { %1588 = vrot.lane.b32.xlu0 %v1559_v52, %s7191_s26  ;;  %s7203_s26 = smov 107  }
 0x6aa   : > { %6941 = vset.pattern.permute.xlu2 %v7192_v24  ;;  %6940 = vset.pattern.permute.xlu1 %v7192_v24 }
 0x6e4   : > { %v7980_v48 = vpop.permute.xlu2 %1574 }
 0x6e5   : > { %12847 = vst [vmem:[#allocation72_spill] sm:$0xff] %v7980_v48 }
 0x6ec   : > { %v7986_v39 = vpop.permute.xlu2 %1580 }
 0x6ed   : > { %12850 = vst [vmem:[#allocation75_spill] sm:$0xff] %v7986_v39  ;;  %v8000_v39 = vpop.permute.xlu0 %779 }
 0x6f4   : > { %v7990_v2 = vpop.permute.xlu2 %1586 }
 0x6f5   : > { %12852 = vst [vmem:[#allocation77_spill] sm:$0xff] %v7990_v2 }
 0x6fc   : > { %v7982_v0 = vpop.permute.xlu1 %1572  ;;  %v1621_v24 = vpop.permute.xlu2 %1620 }
 0x6fd   : > { %12848 = vst [vmem:[#allocation73_spill] sm:$0xff] %v7982_v0  ;;  %v1629_v35 = vmul.f32 %v1621_v24, %v7517_v51 }
 0x704   : > { %v7984_v17 = vpop.permute.xlu1 %1578 }
 0x705   : > { %12849 = vst [vmem:[#allocation74_spill] sm:$0xff] %v7984_v17 }
 0x70c   : > { %v7988_v47 = vpop.permute.xlu1 %1584 }
 0x70d   : > { %12851 = vst [vmem:[#allocation76_spill] sm:$0xff] %v7988_v47  ;;  %v1628_v47 = vmul.f32 %v1621_v24, %v7526_v55 }
 0x714   : > { %v1617_v29 = vpop.permute.xlu1 %1616 }
 0x715   : > { %v1625_v52 = vmul.f32 %v1617_v29, %v7484_v40  ;;  %v1624_v48 = vmul.f32 %v1617_v29, %v7464_v32  ;;  %v1623_v0 = vmul.f32 %v1617_v29, %v7452_v27  ;;  %v1627_v2 = vmul.f32 %v1617_v29, %v7575_v28 }
 0x716   : > { %v1626_v17 = vmul.f32 %v1617_v29, %v7497_v44  ;;  %v1632_v29 = vmul.f32 %v1621_v24, %v7597_v33 }
 0x717   : > { %1647 = vrot.lane.b32.xlu2 %v1625_v52, %s7193_s27  ;;  %1645 = vrot.lane.b32.xlu1 %v1624_v48, %s7193_s27  ;;  %v1631_v52 = vmul.f32 %v1621_v24, %v7539_v59  ;;  %v1630_v48 = vmul.f32 %v1621_v24, %v7550_v5 }
 0x718   : > { %1643 = vrot.lane.b32.xlu0 %v1623_v0, %s7193_s27  ;;  %v8010_v0 = vpop.permute.xlu0 %852 }
 0x719   : > { %12853 = vst [vmem:[#allocation78_spill] sm:$0xff] %v8010_v0 }
 0x71f   : > { %1653 = vrot.lane.b32.xlu2 %v1628_v47, %s7193_s27  ;;  %1651 = vrot.lane.b32.xlu1 %v1627_v2, %s7193_s27 }
 0x720   : > { %1649 = vrot.lane.b32.xlu0 %v1626_v17, %s7193_s27  ;;  %v8019_v17 = vpop.permute.xlu0 %564 }
 0x727   : > { %1659 = vrot.lane.b32.xlu2 %v1631_v52, %s7193_s27  ;;  %1657 = vrot.lane.b32.xlu1 %v1630_v48, %s7193_s27  ;;  %v7194_v48 = vmov 18  }
 0x728   : > { %1655 = vrot.lane.b32.xlu0 %v1629_v35, %s7193_s27  ;;  %v8034_v34 = vpop.permute.xlu0 %635 }
 0x72f   : > { %1693 = vperm.xlu2 %6941, %v7937_v4   ;;  %1689 = vperm.xlu1 %6940, %v7943_v1  }
 0x730   : > { %1661 = vrot.lane.b32.xlu0 %v1632_v29, %s7193_s27 }
 0x737   : > { %6943 = vset.pattern.permute.xlu2 %v7194_v48  ;;  %6942 = vset.pattern.permute.xlu1 %v7194_v48 }
 0x771   : > { %v8022_v47 = vpop.permute.xlu2 %1647 }
 0x772   : > { %12854 = vst [vmem:[#allocation79_spill] sm:$0xff] %v8022_v47 }
 0x779   : > { %v8028_v52 = vpop.permute.xlu2 %1653 }
 0x77a   : > { %12857 = vst [vmem:[#allocation82_spill] sm:$0xff] %v8028_v52 }
 0x781   : > { %v8032_v24 = vpop.permute.xlu2 %1659 }
 0x782   : > { %12859 = vst [vmem:[#allocation84_spill] sm:$0xff] %v8032_v24 }
 0x789   : > { %v8024_v2 = vpop.permute.xlu1 %1645  ;;  %v1694_v52 = vpop.permute.xlu2 %1693 }
 0x78a   : > { %12855 = vst [vmem:[#allocation80_spill] sm:$0xff] %v8024_v2  ;;  %v1701_v48 = vmul.f32 %v1694_v52, %v7526_v55  ;;  %v1704_v11 = vmul.f32 %v1694_v52, %v7539_v59  ;;  %v1703_v7 = vmul.f32 %v1694_v52, %v7550_v5 }
 0x791   : > { %v8026_v13 = vpop.permute.xlu1 %1651 }
 0x792   : > { %12856 = vst [vmem:[#allocation81_spill] sm:$0xff] %v8026_v13  ;;  %v8039_v13 = vpop.permute.xlu0 %629 }
 0x799   : > { %v8030_v35 = vpop.permute.xlu1 %1657 }
 0x79a   : > { %12858 = vst [vmem:[#allocation83_spill] sm:$0xff] %v8030_v35  ;;  %v8046_v0 = vpop.permute.xlu0 %712 }
 0x7a1   : > { %v1690_v14 = vpop.permute.xlu1 %1689 }
 0x7a2   : > { %v1698_v29 = vmul.f32 %v1690_v14, %v7484_v40  ;;  %v1697_v47 = vmul.f32 %v1690_v14, %v7464_v32  ;;  %v1696_v2 = vmul.f32 %v1690_v14, %v7452_v27  ;;  %v1700_v35 = vmul.f32 %v1690_v14, %v7575_v28 }
 0x7a3   : > { %v1699_v24 = vmul.f32 %v1690_v14, %v7497_v44  ;;  %v8052_v14 = vpop.permute.xlu0 %785 }
 0x7a4   : > { %1720 = vrot.lane.b32.xlu2 %v1698_v29, %s7195_s28  ;;  %1718 = vrot.lane.b32.xlu1 %v1697_v47, %s7195_s28  ;;  %v1702_v47 = vmul.f32 %v1694_v52, %v7517_v51  ;;  %12860 = vst [vmem:[#allocation85_spill] sm:$0xff] %v8052_v14 }
 0x7a5   : > { %1716 = vrot.lane.b32.xlu0 %v1696_v2, %s7195_s28  ;;  %v1705_v2 = vmul.f32 %v1694_v52, %v7597_v33 }
 0x7ac   : > { %1726 = vrot.lane.b32.xlu2 %v1701_v48, %s7195_s28  ;;  %1724 = vrot.lane.b32.xlu1 %v1700_v35, %s7195_s28 }
 0x7ad   : > { %1722 = vrot.lane.b32.xlu0 %v1699_v24, %s7195_s28 }
 0x7b4   : > { %1732 = vrot.lane.b32.xlu2 %v1704_v11, %s7195_s28  ;;  %1730 = vrot.lane.b32.xlu1 %v1703_v7, %s7195_s28  ;;  %v7196_v11 = vmov 19  }
 0x7b5   : > { %1728 = vrot.lane.b32.xlu0 %v1702_v47, %s7195_s28  ;;  %v8066_v47 = vpop.permute.xlu0 %858 }
 0x7b6   : > { %12867 = vst [vmem:[#allocation92_spill] sm:$0xff] %v8066_v47 }
 0x7bc   : > { %1766 = vperm.xlu2 %6943, %v7937_v4   ;;  %1762 = vperm.xlu1 %6942, %v7943_v1  }
 0x7bd   : > { %1734 = vrot.lane.b32.xlu0 %v1705_v2, %s7195_s28  ;;  %s7205_s28 = smov 106  }
 0x7c4   : > { %6945 = vset.pattern.permute.xlu2 %v7196_v11  ;;  %6944 = vset.pattern.permute.xlu1 %v7196_v11 }
 0x7fe   : > { %v8054_v35 = vpop.permute.xlu2 %1720 }
 0x7ff   : > { %12861 = vst [vmem:[#allocation86_spill] sm:$0xff] %v8054_v35 }
 0x806   : > { %v8060_v48 = vpop.permute.xlu2 %1726 }
 0x807   : > { %12864 = vst [vmem:[#allocation89_spill] sm:$0xff] %v8060_v48 }
 0x80e   : > { %v8064_v52 = vpop.permute.xlu2 %1732 }
 0x80f   : > { %12866 = vst [vmem:[#allocation91_spill] sm:$0xff] %v8064_v52 }
 0x816   : > { %v8056_v24 = vpop.permute.xlu1 %1718  ;;  %v1767_v48 = vpop.permute.xlu2 %1766 }
 0x817   : > { %12862 = vst [vmem:[#allocation87_spill] sm:$0xff] %v8056_v24  ;;  %v1774_v11 = vmul.f32 %v1767_v48, %v7526_v55  ;;  %v1777_v47 = vmul.f32 %v1767_v48, %v7539_v59  ;;  %v1776_v14 = vmul.f32 %v1767_v48, %v7550_v5 }
 0x81e   : > { %v8058_v29 = vpop.permute.xlu1 %1724 }
 0x81f   : > { %12863 = vst [vmem:[#allocation88_spill] sm:$0xff] %v8058_v29  ;;  %v8071_v29 = vpop.permute.xlu0 %913 }
 0x820   : > { %12868 = vst [vmem:[#allocation93_spill] sm:$0xff] %v8071_v29 }
 0x826   : > { %v8062_v7 = vpop.permute.xlu1 %1730 }
 0x827   : > { %12865 = vst [vmem:[#allocation90_spill] sm:$0xff] %v8062_v7  ;;  %v8078_v58 = vpop.permute.xlu0 %919 }
 0x828   : > { %12869 = vst [vmem:[#allocation94_spill] sm:$0xff] %v8078_v58 }
 0x82e   : > { %v1763_v26 = vpop.permute.xlu1 %1762 }
 0x82f   : > { %v1771_v2 = vmul.f32 %v1763_v26, %v7484_v40  ;;  %v1770_v35 = vmul.f32 %v1763_v26, %v7464_v32  ;;  %v1769_v24 = vmul.f32 %v1763_v26, %v7452_v27  ;;  %v1773_v7 = vmul.f32 %v1763_v26, %v7575_v28 }
 0x830   : > { %v1772_v52 = vmul.f32 %v1763_v26, %v7497_v44  ;;  %v8084_v26 = vpop.permute.xlu0 %925 }
 0x831   : > { %1793 = vrot.lane.b32.xlu2 %v1771_v2, %s7197_s14  ;;  %1791 = vrot.lane.b32.xlu1 %v1770_v35, %s7197_s14  ;;  %v1775_v35 = vmul.f32 %v1767_v48, %v7517_v51  ;;  %12870 = vst [vmem:[#allocation95_spill] sm:$0xff] %v8084_v26 }
 0x832   : > { %1789 = vrot.lane.b32.xlu0 %v1769_v24, %s7197_s14  ;;  %v1778_v24 = vmul.f32 %v1767_v48, %v7597_v33 }
 0x839   : > { %1799 = vrot.lane.b32.xlu2 %v1774_v11, %s7197_s14  ;;  %1797 = vrot.lane.b32.xlu1 %v1773_v7, %s7197_s14 }
 0x83a   : > { %1795 = vrot.lane.b32.xlu0 %v1772_v52, %s7197_s14 }
 0x841   : > { %1805 = vrot.lane.b32.xlu2 %v1777_v47, %s7197_s14  ;;  %1803 = vrot.lane.b32.xlu1 %v1776_v14, %s7197_s14  ;;  %v7198_v47 = vmov 20  }
 0x842   : > { %1801 = vrot.lane.b32.xlu0 %v1775_v35, %s7197_s14  ;;  %v8098_v35 = vpop.permute.xlu0 %931 }
 0x843   : > { %12877 = vst [vmem:[#allocation102_spill] sm:$0xff] %v8098_v35 }
 0x849   : > { %1839 = vperm.xlu2 %6945, %v7937_v4   ;;  %1835 = vperm.xlu1 %6944, %v7943_v1  }
 0x84a   : > { %1807 = vrot.lane.b32.xlu0 %v1778_v24, %s7197_s14  ;;  %s7207_s14 = smov 105  }
 0x851   : > { %6947 = vset.pattern.permute.xlu2 %v7198_v47  ;;  %6946 = vset.pattern.permute.xlu1 %v7198_v47 }
 0x88b   : > { %v8086_v7 = vpop.permute.xlu2 %1793 }
 0x88c   : > { %12871 = vst [vmem:[#allocation96_spill] sm:$0xff] %v8086_v7 }
 0x893   : > { %v8092_v11 = vpop.permute.xlu2 %1799 }
 0x894   : > { %12874 = vst [vmem:[#allocation99_spill] sm:$0xff] %v8092_v11 }
 0x89b   : > { %v8096_v48 = vpop.permute.xlu2 %1805 }
 0x89c   : > { %12876 = vst [vmem:[#allocation101_spill] sm:$0xff] %v8096_v48 }
 0x8a3   : > { %v8088_v52 = vpop.permute.xlu1 %1791  ;;  %v1840_v11 = vpop.permute.xlu2 %1839 }
 0x8a4   : > { %12872 = vst [vmem:[#allocation97_spill] sm:$0xff] %v8088_v52  ;;  %v1847_v47 = vmul.f32 %v1840_v11, %v7526_v55  ;;  %v1850_v35 = vmul.f32 %v1840_v11, %v7539_v59  ;;  %v1849_v26 = vmul.f32 %v1840_v11, %v7550_v5 }
 0x8ab   : > { %v8090_v2 = vpop.permute.xlu1 %1797 }
 0x8ac   : > { %12873 = vst [vmem:[#allocation98_spill] sm:$0xff] %v8090_v2  ;;  %v8103_v2 = vpop.permute.xlu0 %986 }
 0x8ad   : > { %12878 = vst [vmem:[#allocation103_spill] sm:$0xff] %v8103_v2 }
 0x8b3   : > { %v8094_v14 = vpop.permute.xlu1 %1803 }
 0x8b4   : > { %12875 = vst [vmem:[#allocation100_spill] sm:$0xff] %v8094_v14  ;;  %v8110_v29 = vpop.permute.xlu0 %992 }
 0x8b5   : > { %12879 = vst [vmem:[#allocation104_spill] sm:$0xff] %v8110_v29 }
 0x8bb   : > { %v1836_v58 = vpop.permute.xlu1 %1835 }
 0x8bc   : > { %v1844_v24 = vmul.f32 %v1836_v58, %v7484_v40  ;;  %v1843_v7 = vmul.f32 %v1836_v58, %v7464_v32  ;;  %v1842_v52 = vmul.f32 %v1836_v58, %v7452_v27  ;;  %v1846_v14 = vmul.f32 %v1836_v58, %v7575_v28 }
 0x8bd   : > { %v1845_v48 = vmul.f32 %v1836_v58, %v7497_v44  ;;  %v8116_v58 = vpop.permute.xlu0 %998 }
 0x8be   : > { %1866 = vrot.lane.b32.xlu2 %v1844_v24, %s7199_s16  ;;  %1864 = vrot.lane.b32.xlu1 %v1843_v7, %s7199_s16  ;;  %v1848_v7 = vmul.f32 %v1840_v11, %v7517_v51  ;;  %12880 = vst [vmem:[#allocation105_spill] sm:$0xff] %v8116_v58 }
 0x8bf   : > { %1862 = vrot.lane.b32.xlu0 %v1842_v52, %s7199_s16  ;;  %v1851_v52 = vmul.f32 %v1840_v11, %v7597_v33 }
 0x8c6   : > { %1872 = vrot.lane.b32.xlu2 %v1847_v47, %s7199_s16  ;;  %1870 = vrot.lane.b32.xlu1 %v1846_v14, %s7199_s16 }
 0x8c7   : > { %1868 = vrot.lane.b32.xlu0 %v1845_v48, %s7199_s16 }
 0x8ce   : > { %1878 = vrot.lane.b32.xlu2 %v1850_v35, %s7199_s16  ;;  %1876 = vrot.lane.b32.xlu1 %v1849_v26, %s7199_s16  ;;  %v7200_v35 = vmov 21  }
 0x8cf   : > { %1874 = vrot.lane.b32.xlu0 %v1848_v7, %s7199_s16  ;;  %v8130_v7 = vpop.permute.xlu0 %1004 }
 0x8d0   : > { %12887 = vst [vmem:[#allocation112_spill] sm:$0xff] %v8130_v7 }
 0x8d6   : > { %1912 = vperm.xlu2 %6947, %v7937_v4   ;;  %1908 = vperm.xlu1 %6946, %v7943_v1  }
 0x8d7   : > { %1880 = vrot.lane.b32.xlu0 %v1851_v52, %s7199_s16  ;;  %s12528_s16 = smov 104  }
 0x8de   : > { %6949 = vset.pattern.permute.xlu2 %v7200_v35  ;;  %6948 = vset.pattern.permute.xlu1 %v7200_v35 }
 0x918   : > { %v8118_v14 = vpop.permute.xlu2 %1866 }
 0x919   : > { %12881 = vst [vmem:[#allocation106_spill] sm:$0xff] %v8118_v14 }
 0x920   : > { %v8124_v47 = vpop.permute.xlu2 %1872 }
 0x921   : > { %12884 = vst [vmem:[#allocation109_spill] sm:$0xff] %v8124_v47  ;;  %v8138_v47 = vpop.permute.xlu0 %1059 }
 0x922   : > { %12888 = vst [vmem:[#allocation113_spill] sm:$0xff] %v8138_v47 }
 0x928   : > { %v8128_v11 = vpop.permute.xlu2 %1878 }
 0x929   : > { %12886 = vst [vmem:[#allocation111_spill] sm:$0xff] %v8128_v11 }
 0x930   : > { %v8120_v48 = vpop.permute.xlu1 %1864  ;;  %v1913_v35 = vpop.permute.xlu2 %1912 }
 0x931   : > { %12882 = vst [vmem:[#allocation107_spill] sm:$0xff] %v8120_v48  ;;  %v1921_v47 = vmul.f32 %v1913_v35, %v7517_v51 }
 0x938   : > { %v8122_v24 = vpop.permute.xlu1 %1870 }
 0x939   : > { %12883 = vst [vmem:[#allocation108_spill] sm:$0xff] %v8122_v24 }
 0x940   : > { %v8126_v26 = vpop.permute.xlu1 %1876 }
 0x941   : > { %12885 = vst [vmem:[#allocation110_spill] sm:$0xff] %v8126_v26  ;;  %v1920_v26 = vmul.f32 %v1913_v35, %v7526_v55 }
 0x948   : > { %v1909_v29 = vpop.permute.xlu1 %1908 }
 0x949   : > { %v1917_v52 = vmul.f32 %v1909_v29, %v7484_v40  ;;  %v1916_v14 = vmul.f32 %v1909_v29, %v7464_v32  ;;  %v1915_v48 = vmul.f32 %v1909_v29, %v7452_v27  ;;  %v1919_v11 = vmul.f32 %v1909_v29, %v7575_v28 }
 0x94a   : > { %v1918_v24 = vmul.f32 %v1909_v29, %v7497_v44  ;;  %v1924_v29 = vmul.f32 %v1913_v35, %v7597_v33 }
 0x94b   : > { %1939 = vrot.lane.b32.xlu2 %v1917_v52, %s12530_s17  ;;  %1937 = vrot.lane.b32.xlu1 %v1916_v14, %s12530_s17  ;;  %v1923_v52 = vmul.f32 %v1913_v35, %v7539_v59  ;;  %v1922_v14 = vmul.f32 %v1913_v35, %v7550_v5 }
 0x94c   : > { %1935 = vrot.lane.b32.xlu0 %v1915_v48, %s12530_s17  ;;  %v8148_v48 = vpop.permute.xlu0 %1065 }
 0x94d   : > { %12889 = vst [vmem:[#allocation114_spill] sm:$0xff] %v8148_v48 }
 0x953   : > { %1945 = vrot.lane.b32.xlu2 %v1920_v26, %s12530_s17  ;;  %1943 = vrot.lane.b32.xlu1 %v1919_v11, %s12530_s17 }
 0x954   : > { %1941 = vrot.lane.b32.xlu0 %v1918_v24, %s12530_s17  ;;  %v8157_v24 = vpop.permute.xlu0 %1071 }
 0x955   : > { %12890 = vst [vmem:[#allocation115_spill] sm:$0xff] %v8157_v24 }
 0x95b   : > { %1951 = vrot.lane.b32.xlu2 %v1923_v52, %s12530_s17  ;;  %1949 = vrot.lane.b32.xlu1 %v1922_v14, %s12530_s17  ;;  %v7202_v14 = vmov 22  }
 0x95c   : > { %1947 = vrot.lane.b32.xlu0 %v1921_v47, %s12530_s17  ;;  %v8172_v7 = vpop.permute.xlu0 %1077 }
 0x95d   : > { %12897 = vst [vmem:[#allocation122_spill] sm:$0xff] %v8172_v7 }
 0x963   : > { %1985 = vperm.xlu2 %6949, %v7937_v4   ;;  %1981 = vperm.xlu1 %6948, %v7943_v1  }
 0x964   : > { %1953 = vrot.lane.b32.xlu0 %v1924_v29, %s12530_s17  ;;  %s7219_s17 = smov 99  }
 0x96b   : > { %6951 = vset.pattern.permute.xlu2 %v7202_v14  ;;  %6950 = vset.pattern.permute.xlu1 %v7202_v14 }
 0x9a5   : > { %v8160_v26 = vpop.permute.xlu2 %1939 }
 0x9a6   : > { %12891 = vst [vmem:[#allocation116_spill] sm:$0xff] %v8160_v26 }
 0x9ad   : > { %v8166_v52 = vpop.permute.xlu2 %1945 }
 0x9ae   : > { %12894 = vst [vmem:[#allocation119_spill] sm:$0xff] %v8166_v52 }
 0x9b5   : > { %v8170_v35 = vpop.permute.xlu2 %1951 }
 0x9b6   : > { %12896 = vst [vmem:[#allocation121_spill] sm:$0xff] %v8170_v35 }
 0x9bd   : > { %v8162_v11 = vpop.permute.xlu1 %1937  ;;  %v1986_v52 = vpop.permute.xlu2 %1985 }
 0x9be   : > { %12892 = vst [vmem:[#allocation117_spill] sm:$0xff] %v8162_v11  ;;  %v1993_v14 = vmul.f32 %v1986_v52, %v7526_v55  ;;  %v1996_v7 = vmul.f32 %v1986_v52, %v7539_v59  ;;  %v1995_v58 = vmul.f32 %v1986_v52, %v7550_v5 }
 0x9c5   : > { %v8164_v48 = vpop.permute.xlu1 %1943 }
 0x9c6   : > { %12893 = vst [vmem:[#allocation118_spill] sm:$0xff] %v8164_v48  ;;  %v8177_v48 = vpop.permute.xlu0 %1132 }
 0x9c7   : > { %12898 = vst [vmem:[#allocation123_spill] sm:$0xff] %v8177_v48 }
 0x9cd   : > { %v8168_v47 = vpop.permute.xlu1 %1949 }
 0x9ce   : > { %12895 = vst [vmem:[#allocation120_spill] sm:$0xff] %v8168_v47  ;;  %v8184_v2 = vpop.permute.xlu0 %1138 }
 0x9cf   : > { %12899 = vst [vmem:[#allocation124_spill] sm:$0xff] %v8184_v2 }
 0x9d5   : > { %v1982_v24 = vpop.permute.xlu1 %1981 }
 0x9d6   : > { %v1990_v29 = vmul.f32 %v1982_v24, %v7484_v40  ;;  %v1989_v26 = vmul.f32 %v1982_v24, %v7464_v32  ;;  %v1988_v11 = vmul.f32 %v1982_v24, %v7452_v27  ;;  %v1992_v47 = vmul.f32 %v1982_v24, %v7575_v28 }
 0x9d7   : > { %v1991_v35 = vmul.f32 %v1982_v24, %v7497_v44  ;;  %v8190_v24 = vpop.permute.xlu0 %1144 }
 0x9d8   : > { %2012 = vrot.lane.b32.xlu2 %v1990_v29, %s7203_s26  ;;  %2010 = vrot.lane.b32.xlu1 %v1989_v26, %s7203_s26  ;;  %v1994_v26 = vmul.f32 %v1986_v52, %v7517_v51  ;;  %12900 = vst [vmem:[#allocation125_spill] sm:$0xff] %v8190_v24 }
 0x9d9   : > { %2008 = vrot.lane.b32.xlu0 %v1988_v11, %s7203_s26  ;;  %v1997_v11 = vmul.f32 %v1986_v52, %v7597_v33 }
 0x9e0   : > { %2018 = vrot.lane.b32.xlu2 %v1993_v14, %s7203_s26  ;;  %2016 = vrot.lane.b32.xlu1 %v1992_v47, %s7203_s26 }
 0x9e1   : > { %2014 = vrot.lane.b32.xlu0 %v1991_v35, %s7203_s26 }
 0x9e8   : > { %2024 = vrot.lane.b32.xlu2 %v1996_v7, %s7203_s26  ;;  %2022 = vrot.lane.b32.xlu1 %v1995_v58, %s7203_s26  ;;  %v7204_v7 = vmov 23  }
 0x9e9   : > { %2020 = vrot.lane.b32.xlu0 %v1994_v26, %s7203_s26  ;;  %v8204_v26 = vpop.permute.xlu0 %1150 }
 0x9ea   : > { %12907 = vst [vmem:[#allocation132_spill] sm:$0xff] %v8204_v26 }
 0x9f0   : > { %2058 = vperm.xlu2 %6951, %v7937_v4   ;;  %2054 = vperm.xlu1 %6950, %v7943_v1  }
 0x9f1   : > { %2026 = vrot.lane.b32.xlu0 %v1997_v11, %s7203_s26  ;;  %s7211_s26 = smov 103  }
 0x9f8   : > { %6953 = vset.pattern.permute.xlu2 %v7204_v7  ;;  %6952 = vset.pattern.permute.xlu1 %v7204_v7 }
 0xa32   : > { %v8192_v47 = vpop.permute.xlu2 %2012 }
 0xa33   : > { %12901 = vst [vmem:[#allocation126_spill] sm:$0xff] %v8192_v47 }
 0xa3a   : > { %v8198_v14 = vpop.permute.xlu2 %2018 }
 0xa3b   : > { %12904 = vst [vmem:[#allocation129_spill] sm:$0xff] %v8198_v14 }
 0xa42   : > { %v8202_v52 = vpop.permute.xlu2 %2024 }
 0xa43   : > { %12906 = vst [vmem:[#allocation131_spill] sm:$0xff] %v8202_v52 }
 0xa4a   : > { %v8194_v35 = vpop.permute.xlu1 %2010  ;;  %v2059_v14 = vpop.permute.xlu2 %2058 }
 0xa4b   : > { %12902 = vst [vmem:[#allocation127_spill] sm:$0xff] %v8194_v35  ;;  %v2066_v7 = vmul.f32 %v2059_v14, %v7526_v55  ;;  %v2069_v26 = vmul.f32 %v2059_v14, %v7539_v59  ;;  %v2068_v24 = vmul.f32 %v2059_v14, %v7550_v5 }
 0xa52   : > { %v8196_v29 = vpop.permute.xlu1 %2016 }
 0xa53   : > { %12903 = vst [vmem:[#allocation128_spill] sm:$0xff] %v8196_v29  ;;  %v8209_v29 = vpop.permute.xlu0 %1205 }
 0xa54   : > { %12908 = vst [vmem:[#allocation133_spill] sm:$0xff] %v8209_v29 }
 0xa5a   : > { %v8200_v58 = vpop.permute.xlu1 %2022 }
 0xa5b   : > { %12905 = vst [vmem:[#allocation130_spill] sm:$0xff] %v8200_v58  ;;  %v8216_v48 = vpop.permute.xlu0 %1211 }
 0xa5c   : > { %12909 = vst [vmem:[#allocation134_spill] sm:$0xff] %v8216_v48 }
 0xa62   : > { %v2055_v2 = vpop.permute.xlu1 %2054 }
 0xa63   : > { %v2063_v11 = vmul.f32 %v2055_v2, %v7484_v40  ;;  %v2062_v47 = vmul.f32 %v2055_v2, %v7464_v32  ;;  %v2061_v35 = vmul.f32 %v2055_v2, %v7452_v27  ;;  %v2065_v58 = vmul.f32 %v2055_v2, %v7575_v28 }
 0xa64   : > { %v2064_v52 = vmul.f32 %v2055_v2, %v7497_v44  ;;  %v8222_v2 = vpop.permute.xlu0 %1217 }
 0xa65   : > { %2085 = vrot.lane.b32.xlu2 %v2063_v11, %s7205_s28  ;;  %2083 = vrot.lane.b32.xlu1 %v2062_v47, %s7205_s28  ;;  %v2067_v47 = vmul.f32 %v2059_v14, %v7517_v51  ;;  %12910 = vst [vmem:[#allocation135_spill] sm:$0xff] %v8222_v2 }
 0xa66   : > { %2081 = vrot.lane.b32.xlu0 %v2061_v35, %s7205_s28  ;;  %v2070_v35 = vmul.f32 %v2059_v14, %v7597_v33 }
 0xa6d   : > { %2091 = vrot.lane.b32.xlu2 %v2066_v7, %s7205_s28  ;;  %2089 = vrot.lane.b32.xlu1 %v2065_v58, %s7205_s28 }
 0xa6e   : > { %2087 = vrot.lane.b32.xlu0 %v2064_v52, %s7205_s28 }
 0xa75   : > { %2097 = vrot.lane.b32.xlu2 %v2069_v26, %s7205_s28  ;;  %2095 = vrot.lane.b32.xlu1 %v2068_v24, %s7205_s28  ;;  %v7206_v26 = vmov 24  }
 0xa76   : > { %2093 = vrot.lane.b32.xlu0 %v2067_v47, %s7205_s28  ;;  %v8236_v47 = vpop.permute.xlu0 %1223 }
 0xa77   : > { %12917 = vst [vmem:[#allocation142_spill] sm:$0xff] %v8236_v47 }
 0xa7d   : > { %2131 = vperm.xlu2 %6953, %v7937_v4   ;;  %2127 = vperm.xlu1 %6952, %v7943_v1  }
 0xa7e   : > { %2099 = vrot.lane.b32.xlu0 %v2070_v35, %s7205_s28  ;;  %s7213_s28 = smov 102  }
 0xa85   : > { %6955 = vset.pattern.permute.xlu2 %v7206_v26  ;;  %6954 = vset.pattern.permute.xlu1 %v7206_v26 }
 0xabf   : > { %v8224_v58 = vpop.permute.xlu2 %2085 }
 0xac0   : > { %12911 = vst [vmem:[#allocation136_spill] sm:$0xff] %v8224_v58 }
 0xac7   : > { %v8230_v7 = vpop.permute.xlu2 %2091 }
 0xac8   : > { %12914 = vst [vmem:[#allocation139_spill] sm:$0xff] %v8230_v7 }
 0xacf   : > { %v8234_v14 = vpop.permute.xlu2 %2097 }
 0xad0   : > { %12916 = vst [vmem:[#allocation141_spill] sm:$0xff] %v8234_v14 }
 0xad7   : > { %v8226_v52 = vpop.permute.xlu1 %2083  ;;  %v2132_v7 = vpop.permute.xlu2 %2131 }
 0xad8   : > { %12912 = vst [vmem:[#allocation137_spill] sm:$0xff] %v8226_v52  ;;  %v2139_v26 = vmul.f32 %v2132_v7, %v7526_v55  ;;  %v2142_v47 = vmul.f32 %v2132_v7, %v7539_v59  ;;  %v2141_v2 = vmul.f32 %v2132_v7, %v7550_v5 }
 0xadf   : > { %v8228_v11 = vpop.permute.xlu1 %2089 }
 0xae0   : > { %12913 = vst [vmem:[#allocation138_spill] sm:$0xff] %v8228_v11  ;;  %v8241_v11 = vpop.permute.xlu0 %1278 }
 0xae1   : > { %12918 = vst [vmem:[#allocation143_spill] sm:$0xff] %v8241_v11 }
 0xae7   : > { %v8232_v24 = vpop.permute.xlu1 %2095 }
 0xae8   : > { %12915 = vst [vmem:[#allocation140_spill] sm:$0xff] %v8232_v24  ;;  %v8248_v29 = vpop.permute.xlu0 %1284 }
 0xae9   : > { %12919 = vst [vmem:[#allocation144_spill] sm:$0xff] %v8248_v29 }
 0xaef   : > { %v2128_v48 = vpop.permute.xlu1 %2127 }
 0xaf0   : > { %v2136_v35 = vmul.f32 %v2128_v48, %v7484_v40  ;;  %v2135_v58 = vmul.f32 %v2128_v48, %v7464_v32  ;;  %v2134_v52 = vmul.f32 %v2128_v48, %v7452_v27  ;;  %v2138_v24 = vmul.f32 %v2128_v48, %v7575_v28 }
 0xaf1   : > { %v2137_v14 = vmul.f32 %v2128_v48, %v7497_v44  ;;  %v8254_v48 = vpop.permute.xlu0 %1290 }
 0xaf2   : > { %2158 = vrot.lane.b32.xlu2 %v2136_v35, %s7207_s14  ;;  %2156 = vrot.lane.b32.xlu1 %v2135_v58, %s7207_s14  ;;  %v2140_v58 = vmul.f32 %v2132_v7, %v7517_v51  ;;  %12920 = vst [vmem:[#allocation145_spill] sm:$0xff] %v8254_v48 }
 0xaf3   : > { %2154 = vrot.lane.b32.xlu0 %v2134_v52, %s7207_s14  ;;  %v2143_v52 = vmul.f32 %v2132_v7, %v7597_v33 }
 0xafa   : > { %2164 = vrot.lane.b32.xlu2 %v2139_v26, %s7207_s14  ;;  %2162 = vrot.lane.b32.xlu1 %v2138_v24, %s7207_s14 }
 0xafb   : > { %2160 = vrot.lane.b32.xlu0 %v2137_v14, %s7207_s14 }
 0xb02   : > { %2170 = vrot.lane.b32.xlu2 %v2142_v47, %s7207_s14  ;;  %2168 = vrot.lane.b32.xlu1 %v2141_v2, %s7207_s14  ;;  %v7208_v47 = vmov 25  }
 0xb03   : > { %2166 = vrot.lane.b32.xlu0 %v2140_v58, %s7207_s14  ;;  %v8268_v58 = vpop.permute.xlu0 %1296 }
 0xb04   : > { %12927 = vst [vmem:[#allocation152_spill] sm:$0xff] %v8268_v58 }
 0xb0a   : > { %2204 = vperm.xlu2 %6955, %v7937_v4   ;;  %2200 = vperm.xlu1 %6954, %v7943_v1  }
 0xb0b   : > { %2172 = vrot.lane.b32.xlu0 %v2143_v52, %s7207_s14  ;;  %s7215_s14 = smov 101  }
 0xb12   : > { %6957 = vset.pattern.permute.xlu2 %v7208_v47  ;;  %6956 = vset.pattern.permute.xlu1 %v7208_v47 }
 0xb4c   : > { %v8256_v24 = vpop.permute.xlu2 %2158 }
 0xb4d   : > { %12921 = vst [vmem:[#allocation146_spill] sm:$0xff] %v8256_v24 }
 0xb54   : > { %v8262_v26 = vpop.permute.xlu2 %2164 }
 0xb55   : > { %12924 = vst [vmem:[#allocation149_spill] sm:$0xff] %v8262_v26  ;;  %v8276_v26 = vpop.permute.xlu0 %1351 }
 0xb56   : > { %12928 = vst [vmem:[#allocation153_spill] sm:$0xff] %v8276_v26 }
 0xb5c   : > { %v8266_v7 = vpop.permute.xlu2 %2170 }
 0xb5d   : > { %12926 = vst [vmem:[#allocation151_spill] sm:$0xff] %v8266_v7 }
 0xb64   : > { %v8258_v14 = vpop.permute.xlu1 %2156  ;;  %v2205_v47 = vpop.permute.xlu2 %2204 }
 0xb65   : > { %12922 = vst [vmem:[#allocation147_spill] sm:$0xff] %v8258_v14  ;;  %v2213_v26 = vmul.f32 %v2205_v47, %v7517_v51 }
 0xb6c   : > { %v8260_v35 = vpop.permute.xlu1 %2162 }
 0xb6d   : > { %12923 = vst [vmem:[#allocation148_spill] sm:$0xff] %v8260_v35 }
 0xb74   : > { %v8264_v2 = vpop.permute.xlu1 %2168 }
 0xb75   : > { %12925 = vst [vmem:[#allocation150_spill] sm:$0xff] %v8264_v2  ;;  %v2212_v2 = vmul.f32 %v2205_v47, %v7526_v55 }
 0xb7c   : > { %v2201_v29 = vpop.permute.xlu1 %2200 }
 0xb7d   : > { %v2209_v52 = vmul.f32 %v2201_v29, %v7484_v40  ;;  %v2208_v24 = vmul.f32 %v2201_v29, %v7464_v32  ;;  %v2207_v14 = vmul.f32 %v2201_v29, %v7452_v27  ;;  %v2211_v7 = vmul.f32 %v2201_v29, %v7575_v28 }
 0xb7e   : > { %v2210_v35 = vmul.f32 %v2201_v29, %v7497_v44  ;;  %v2216_v29 = vmul.f32 %v2205_v47, %v7597_v33 }
 0xb7f   : > { %2231 = vrot.lane.b32.xlu2 %v2209_v52, %s12528_s16  ;;  %2229 = vrot.lane.b32.xlu1 %v2208_v24, %s12528_s16  ;;  %v2215_v52 = vmul.f32 %v2205_v47, %v7539_v59  ;;  %v2214_v24 = vmul.f32 %v2205_v47, %v7550_v5 }
 0xb80   : > { %2227 = vrot.lane.b32.xlu0 %v2207_v14, %s12528_s16  ;;  %v8286_v14 = vpop.permute.xlu0 %1357 }
 0xb81   : > { %12929 = vst [vmem:[#allocation154_spill] sm:$0xff] %v8286_v14 }
 0xb87   : > { %2237 = vrot.lane.b32.xlu2 %v2212_v2, %s12528_s16  ;;  %2235 = vrot.lane.b32.xlu1 %v2211_v7, %s12528_s16 }
 0xb88   : > { %2233 = vrot.lane.b32.xlu0 %v2210_v35, %s12528_s16  ;;  %v8295_v35 = vpop.permute.xlu0 %1363 }
 0xb89   : > { %12930 = vst [vmem:[#allocation155_spill] sm:$0xff] %v8295_v35 }
 0xb8f   : > { %2243 = vrot.lane.b32.xlu2 %v2215_v52, %s12528_s16  ;;  %2241 = vrot.lane.b32.xlu1 %v2214_v24, %s12528_s16  ;;  %v7210_v24 = vmov 26  }
 0xb90   : > { %2239 = vrot.lane.b32.xlu0 %v2213_v26, %s12528_s16  ;;  %v8310_v58 = vpop.permute.xlu0 %1369 }
 0xb91   : > { %12937 = vst [vmem:[#allocation162_spill] sm:$0xff] %v8310_v58 }
 0xb97   : > { %2277 = vperm.xlu2 %6957, %v7937_v4   ;;  %2273 = vperm.xlu1 %6956, %v7943_v1  }
 0xb98   : > { %2245 = vrot.lane.b32.xlu0 %v2216_v29, %s12528_s16  ;;  %s7221_s16 = smov 98  }
 0xb9f   : > { %6959 = vset.pattern.permute.xlu2 %v7210_v24  ;;  %6958 = vset.pattern.permute.xlu1 %v7210_v24 }
 0xbd9   : > { %v8298_v2 = vpop.permute.xlu2 %2231 }
 0xbda   : > { %12931 = vst [vmem:[#allocation156_spill] sm:$0xff] %v8298_v2 }
 0xbe1   : > { %v8304_v52 = vpop.permute.xlu2 %2237 }
 0xbe2   : > { %12934 = vst [vmem:[#allocation159_spill] sm:$0xff] %v8304_v52 }
 0xbe9   : > { %v8308_v47 = vpop.permute.xlu2 %2243 }
 0xbea   : > { %12936 = vst [vmem:[#allocation161_spill] sm:$0xff] %v8308_v47 }
 0xbf1   : > { %v8300_v7 = vpop.permute.xlu1 %2229  ;;  %v2278_v52 = vpop.permute.xlu2 %2277 }
 0xbf2   : > { %12932 = vst [vmem:[#allocation157_spill] sm:$0xff] %v8300_v7  ;;  %v2285_v24 = vmul.f32 %v2278_v52, %v7526_v55  ;;  %v2288_v58 = vmul.f32 %v2278_v52, %v7539_v59  ;;  %v2287_v48 = vmul.f32 %v2278_v52, %v7550_v5 }
 0xbf9   : > { %v8302_v14 = vpop.permute.xlu1 %2235 }
 0xbfa   : > { %12933 = vst [vmem:[#allocation158_spill] sm:$0xff] %v8302_v14  ;;  %v8315_v14 = vpop.permute.xlu0 %1424 }
 0xbfb   : > { %12938 = vst [vmem:[#allocation163_spill] sm:$0xff] %v8315_v14 }
 0xc01   : > { %v8306_v26 = vpop.permute.xlu1 %2241 }
 0xc02   : > { %12935 = vst [vmem:[#allocation160_spill] sm:$0xff] %v8306_v26  ;;  %v8322_v11 = vpop.permute.xlu0 %1430 }
 0xc03   : > { %12939 = vst [vmem:[#allocation164_spill] sm:$0xff] %v8322_v11 }
 0xc09   : > { %v2274_v35 = vpop.permute.xlu1 %2273 }
 0xc0a   : > { %v2282_v29 = vmul.f32 %v2274_v35, %v7484_v40  ;;  %v2281_v2 = vmul.f32 %v2274_v35, %v7464_v32  ;;  %v2280_v7 = vmul.f32 %v2274_v35, %v7452_v27  ;;  %v2284_v26 = vmul.f32 %v2274_v35, %v7575_v28 }
 0xc0b   : > { %v2283_v47 = vmul.f32 %v2274_v35, %v7497_v44  ;;  %v8328_v35 = vpop.permute.xlu0 %1436 }
 0xc0c   : > { %2304 = vrot.lane.b32.xlu2 %v2282_v29, %s7211_s26  ;;  %2302 = vrot.lane.b32.xlu1 %v2281_v2, %s7211_s26  ;;  %v2286_v2 = vmul.f32 %v2278_v52, %v7517_v51  ;;  %12940 = vst [vmem:[#allocation165_spill] sm:$0xff] %v8328_v35 }
 0xc0d   : > { %2300 = vrot.lane.b32.xlu0 %v2280_v7, %s7211_s26  ;;  %v2289_v7 = vmul.f32 %v2278_v52, %v7597_v33 }
 0xc14   : > { %2310 = vrot.lane.b32.xlu2 %v2285_v24, %s7211_s26  ;;  %2308 = vrot.lane.b32.xlu1 %v2284_v26, %s7211_s26 }
 0xc15   : > { %2306 = vrot.lane.b32.xlu0 %v2283_v47, %s7211_s26 }
 0xc1c   : > { %2316 = vrot.lane.b32.xlu2 %v2288_v58, %s7211_s26  ;;  %2314 = vrot.lane.b32.xlu1 %v2287_v48, %s7211_s26  ;;  %v7212_v58 = vmov 27  }
 0xc1d   : > { %2312 = vrot.lane.b32.xlu0 %v2286_v2, %s7211_s26  ;;  %v8342_v2 = vpop.permute.xlu0 %1442 }
 0xc1e   : > { %12947 = vst [vmem:[#allocation172_spill] sm:$0xff] %v8342_v2 }
 0xc24   : > { %2350 = vperm.xlu2 %6959, %v7937_v4   ;;  %2346 = vperm.xlu1 %6958, %v7943_v1  }
 0xc25   : > { %2318 = vrot.lane.b32.xlu0 %v2289_v7, %s7211_s26  ;;  %s12623_s26 = smov 100  }
 0xc2c   : > { %6961 = vset.pattern.permute.xlu2 %v7212_v58  ;;  %6960 = vset.pattern.permute.xlu1 %v7212_v58 }
 0xc66   : > { %v8330_v26 = vpop.permute.xlu2 %2304 }
 0xc67   : > { %12941 = vst [vmem:[#allocation166_spill] sm:$0xff] %v8330_v26 }
 0xc6e   : > { %v8336_v24 = vpop.permute.xlu2 %2310 }
 0xc6f   : > { %12944 = vst [vmem:[#allocation169_spill] sm:$0xff] %v8336_v24 }
 0xc76   : > { %v8340_v52 = vpop.permute.xlu2 %2316 }
 0xc77   : > { %12946 = vst [vmem:[#allocation171_spill] sm:$0xff] %v8340_v52 }
 0xc7e   : > { %v8332_v47 = vpop.permute.xlu1 %2302  ;;  %v2351_v24 = vpop.permute.xlu2 %2350 }
 0xc7f   : > { %12942 = vst [vmem:[#allocation167_spill] sm:$0xff] %v8332_v47  ;;  %v2358_v58 = vmul.f32 %v2351_v24, %v7526_v55  ;;  %v2361_v2 = vmul.f32 %v2351_v24, %v7539_v59  ;;  %v2360_v35 = vmul.f32 %v2351_v24, %v7550_v5 }
 0xc86   : > { %v8334_v29 = vpop.permute.xlu1 %2308 }
 0xc87   : > { %12943 = vst [vmem:[#allocation168_spill] sm:$0xff] %v8334_v29  ;;  %v8347_v29 = vpop.permute.xlu0 %1497 }
 0xc88   : > { %12948 = vst [vmem:[#allocation173_spill] sm:$0xff] %v8347_v29 }
 0xc8e   : > { %v8338_v48 = vpop.permute.xlu1 %2314 }
 0xc8f   : > { %12945 = vst [vmem:[#allocation170_spill] sm:$0xff] %v8338_v48  ;;  %v8354_v14 = vpop.permute.xlu0 %1503 }
 0xc90   : > { %12949 = vst [vmem:[#allocation174_spill] sm:$0xff] %v8354_v14 }
 0xc96   : > { %v2347_v11 = vpop.permute.xlu1 %2346 }
 0xc97   : > { %v2355_v7 = vmul.f32 %v2347_v11, %v7484_v40  ;;  %v2354_v26 = vmul.f32 %v2347_v11, %v7464_v32  ;;  %v2353_v47 = vmul.f32 %v2347_v11, %v7452_v27  ;;  %v2357_v48 = vmul.f32 %v2347_v11, %v7575_v28 }
 0xc98   : > { %v2356_v52 = vmul.f32 %v2347_v11, %v7497_v44  ;;  %v8360_v11 = vpop.permute.xlu0 %1509 }
 0xc99   : > { %2377 = vrot.lane.b32.xlu2 %v2355_v7, %s7213_s28  ;;  %2375 = vrot.lane.b32.xlu1 %v2354_v26, %s7213_s28  ;;  %v2359_v26 = vmul.f32 %v2351_v24, %v7517_v51  ;;  %12950 = vst [vmem:[#allocation175_spill] sm:$0xff] %v8360_v11 }
 0xc9a   : > { %2373 = vrot.lane.b32.xlu0 %v2353_v47, %s7213_s28  ;;  %v2362_v47 = vmul.f32 %v2351_v24, %v7597_v33 }
 0xca1   : > { %2383 = vrot.lane.b32.xlu2 %v2358_v58, %s7213_s28  ;;  %2381 = vrot.lane.b32.xlu1 %v2357_v48, %s7213_s28 }
 0xca2   : > { %2379 = vrot.lane.b32.xlu0 %v2356_v52, %s7213_s28 }
 0xca9   : > { %2389 = vrot.lane.b32.xlu2 %v2361_v2, %s7213_s28  ;;  %2387 = vrot.lane.b32.xlu1 %v2360_v35, %s7213_s28  ;;  %v7214_v2 = vmov 28  }
 0xcaa   : > { %2385 = vrot.lane.b32.xlu0 %v2359_v26, %s7213_s28  ;;  %v8374_v26 = vpop.permute.xlu0 %1515 }
 0xcab   : > { %12957 = vst [vmem:[#allocation182_spill] sm:$0xff] %v8374_v26 }
 0xcb1   : > { %2423 = vperm.xlu2 %6961, %v7937_v4   ;;  %2419 = vperm.xlu1 %6960, %v7943_v1  }
 0xcb2   : > { %2391 = vrot.lane.b32.xlu0 %v2362_v47, %s7213_s28  ;;  %s7223_s28 = smov 97  }
 0xcb9   : > { %6963 = vset.pattern.permute.xlu2 %v7214_v2  ;;  %6962 = vset.pattern.permute.xlu1 %v7214_v2 }
 0xcf3   : > { %v8362_v48 = vpop.permute.xlu2 %2377 }
 0xcf4   : > { %12951 = vst [vmem:[#allocation176_spill] sm:$0xff] %v8362_v48 }
 0xcfb   : > { %v8368_v58 = vpop.permute.xlu2 %2383 }
 0xcfc   : > { %12954 = vst [vmem:[#allocation179_spill] sm:$0xff] %v8368_v58 }
 0xd03   : > { %v8372_v24 = vpop.permute.xlu2 %2389 }
 0xd04   : > { %12956 = vst [vmem:[#allocation181_spill] sm:$0xff] %v8372_v24 }
 0xd0b   : > { %v8364_v52 = vpop.permute.xlu1 %2375  ;;  %v2424_v58 = vpop.permute.xlu2 %2423 }
 0xd0c   : > { %12952 = vst [vmem:[#allocation177_spill] sm:$0xff] %v8364_v52  ;;  %v2431_v2 = vmul.f32 %v2424_v58, %v7526_v55  ;;  %v2434_v26 = vmul.f32 %v2424_v58, %v7539_v59  ;;  %v2433_v11 = vmul.f32 %v2424_v58, %v7550_v5 }
 0xd13   : > { %v8366_v7 = vpop.permute.xlu1 %2381 }
 0xd14   : > { %12953 = vst [vmem:[#allocation178_spill] sm:$0xff] %v8366_v7  ;;  %v8379_v7 = vpop.permute.xlu0 %1570 }
 0xd15   : > { %12958 = vst [vmem:[#allocation183_spill] sm:$0xff] %v8379_v7 }
 0xd1b   : > { %v8370_v35 = vpop.permute.xlu1 %2387 }
 0xd1c   : > { %12955 = vst [vmem:[#allocation180_spill] sm:$0xff] %v8370_v35  ;;  %v8386_v29 = vpop.permute.xlu0 %1576 }
 0xd1d   : > { %12959 = vst [vmem:[#allocation184_spill] sm:$0xff] %v8386_v29 }
 0xd23   : > { %v2420_v14 = vpop.permute.xlu1 %2419 }
 0xd24   : > { %v2428_v47 = vmul.f32 %v2420_v14, %v7484_v40  ;;  %v2427_v48 = vmul.f32 %v2420_v14, %v7464_v32  ;;  %v2426_v52 = vmul.f32 %v2420_v14, %v7452_v27  ;;  %v2430_v35 = vmul.f32 %v2420_v14, %v7575_v28 }
 0xd25   : > { %v2429_v24 = vmul.f32 %v2420_v14, %v7497_v44  ;;  %v8392_v14 = vpop.permute.xlu0 %1582 }
 0xd26   : > { %2450 = vrot.lane.b32.xlu2 %v2428_v47, %s7215_s14  ;;  %2448 = vrot.lane.b32.xlu1 %v2427_v48, %s7215_s14  ;;  %v2432_v48 = vmul.f32 %v2424_v58, %v7517_v51  ;;  %12960 = vst [vmem:[#allocation185_spill] sm:$0xff] %v8392_v14 }
 0xd27   : > { %2446 = vrot.lane.b32.xlu0 %v2426_v52, %s7215_s14  ;;  %v2435_v52 = vmul.f32 %v2424_v58, %v7597_v33 }
 0xd2e   : > { %2456 = vrot.lane.b32.xlu2 %v2431_v2, %s7215_s14  ;;  %2454 = vrot.lane.b32.xlu1 %v2430_v35, %s7215_s14 }
 0xd2f   : > { %2452 = vrot.lane.b32.xlu0 %v2429_v24, %s7215_s14 }
 0xd36   : > { %2462 = vrot.lane.b32.xlu2 %v2434_v26, %s7215_s14  ;;  %2460 = vrot.lane.b32.xlu1 %v2433_v11, %s7215_s14  ;;  %v7216_v26 = vmov 29  }
 0xd37   : > { %2458 = vrot.lane.b32.xlu0 %v2432_v48, %s7215_s14 }
 0xd3e   : > { %2496 = vperm.xlu2 %6963, %v7937_v4   ;;  %2492 = vperm.xlu1 %6962, %v7943_v1   ;;  %v8406_v4 = vpop.permute.xlu0 %1588 }
 0xd3f   : > { %2464 = vrot.lane.b32.xlu0 %v2435_v52, %s7215_s14  ;;  %12967 = vst [vmem:[#allocation192_spill] sm:$0xff] %v8406_v4  ;;  %s12621_s14 = smov 96  }
 0xd46   : > { %6965 = vset.pattern.permute.xlu2 %v7216_v26  ;;  %6964 = vset.pattern.permute.xlu1 %v7216_v26 }
 0xd80   : > { %v8394_v35 = vpop.permute.xlu2 %2450 }
 0xd81   : > { %12961 = vst [vmem:[#allocation186_spill] sm:$0xff] %v8394_v35 }
 0xd88   : > { %v8400_v2 = vpop.permute.xlu2 %2456 }
 0xd89   : > { %12964 = vst [vmem:[#allocation189_spill] sm:$0xff] %v8400_v2  ;;  %v8414_v2 = vpop.permute.xlu0 %1643 }
 0xd8a   : > { %12968 = vst [vmem:[#allocation193_spill] sm:$0xff] %v8414_v2 }
 0xd90   : > { %v8404_v58 = vpop.permute.xlu2 %2462 }
 0xd91   : > { %12966 = vst [vmem:[#allocation191_spill] sm:$0xff] %v8404_v58 }
 0xd98   : > { %v8396_v24 = vpop.permute.xlu1 %2448  ;;  %v2497_v26 = vpop.permute.xlu2 %2496 }
 0xd99   : > { %12962 = vst [vmem:[#allocation187_spill] sm:$0xff] %v8396_v24  ;;  %v2505_v35 = vmul.f32 %v2497_v26, %v7517_v51 }
 0xda0   : > { %v8398_v47 = vpop.permute.xlu1 %2454 }
 0xda1   : > { %12963 = vst [vmem:[#allocation188_spill] sm:$0xff] %v8398_v47 }
 0xda8   : > { %v8402_v11 = vpop.permute.xlu1 %2460 }
 0xda9   : > { %12965 = vst [vmem:[#allocation190_spill] sm:$0xff] %v8402_v11  ;;  %v2504_v11 = vmul.f32 %v2497_v26, %v7526_v55 }
 0xdb0   : > { %v2493_v1 = vpop.permute.xlu1 %2492 }
 0xdb1   : > { %v2501_v48 = vmul.f32 %v2493_v1, %v7484_v40  ;;  %v2500_v52 = vmul.f32 %v2493_v1, %v7464_v32  ;;  %v2499_v24 = vmul.f32 %v2493_v1, %v7452_v27  ;;  %v2503_v58 = vmul.f32 %v2493_v1, %v7575_v28 }
 0xdb2   : > { %v2502_v47 = vmul.f32 %v2493_v1, %v7497_v44 }
 0xdb3   : > { %2523 = vrot.lane.b32.xlu2 %v2501_v48, %s12623_s26  ;;  %2521 = vrot.lane.b32.xlu1 %v2500_v52, %s12623_s26  ;;  %v2507_v48 = vmul.f32 %v2497_v26, %v7539_v59  ;;  %v2506_v52 = vmul.f32 %v2497_v26, %v7550_v5 }
 0xdb4   : > { %2519 = vrot.lane.b32.xlu0 %v2499_v24, %s12623_s26  ;;  %v8424_v24 = vpop.permute.xlu0 %1649 }
 0xdb5   : > { %12969 = vst [vmem:[#allocation194_spill] sm:$0xff] %v8424_v24  ;;  %v7218_v24 = vmov 30  }
 0xdbb   : > { %2529 = vrot.lane.b32.xlu2 %v2504_v11, %s12623_s26  ;;  %2527 = vrot.lane.b32.xlu1 %v2503_v58, %s12623_s26  ;;  %v2508_v11 = vmul.f32 %v2497_v26, %v7597_v33  ;;  %v8440_v58 = vld [vmem:[%s12376_s2] sm:$0xff] }
 0xdbc   : > { %2525 = vrot.lane.b32.xlu0 %v2502_v47, %s12623_s26  ;;  %v8434_v47 = vld [vmem:[%s12376_s2 + $0x8] sm:$0xff]  ;;  %v8443_v1 = vpop.permute.xlu0 %1655 }
 0xdbd   : > { %12970 = vst [vmem:[#allocation195_spill] sm:$0xff] %v8443_v1 }
 0xdc3   : > { %2535 = vrot.lane.b32.xlu2 %v2507_v48, %s12623_s26  ;;  %2533 = vrot.lane.b32.xlu1 %v2506_v52, %s12623_s26 }
 0xdc4   : > { %2531 = vrot.lane.b32.xlu0 %v2505_v35, %s12623_s26  ;;  %v8458_v14 = vpop.permute.xlu0 %1661 }
 0xdc5   : > { %12977 = vst [vmem:[#allocation202_spill] sm:$0xff] %v8458_v14 }
 0xdcb   : > { %2569 = vperm.xlu2 %6965, %v8434_v47   ;;  %2565 = vperm.xlu1 %6964, %v8440_v58  }
 0xdcc   : > { %2537 = vrot.lane.b32.xlu0 %v2508_v11, %s12623_s26  ;;  %s7247_s26 = smov 85  }
 0xdd3   : > { %6967 = vset.pattern.permute.xlu2 %v7218_v24  ;;  %6966 = vset.pattern.permute.xlu1 %v7218_v24 }
 0xe0d   : > { %v8446_v35 = vpop.permute.xlu2 %2523 }
 0xe0e   : > { %12971 = vst [vmem:[#allocation196_spill] sm:$0xff] %v8446_v35 }
 0xe15   : > { %v8452_v52 = vpop.permute.xlu2 %2529 }
 0xe16   : > { %12974 = vst [vmem:[#allocation199_spill] sm:$0xff] %v8452_v52 }
 0xe1d   : > { %v8456_v4 = vpop.permute.xlu2 %2535 }
 0xe1e   : > { %12976 = vst [vmem:[#allocation201_spill] sm:$0xff] %v8456_v4 }
 0xe25   : > { %v8448_v26 = vpop.permute.xlu1 %2521  ;;  %v2570_v52 = vpop.permute.xlu2 %2569 }
 0xe26   : > { %12972 = vst [vmem:[#allocation197_spill] sm:$0xff] %v8448_v26  ;;  %v2577_v24 = vmul.f32 %v2570_v52, %v7526_v55  ;;  %v2580_v14 = vmul.f32 %v2570_v52, %v7539_v59  ;;  %v2579_v29 = vmul.f32 %v2570_v52, %v7550_v5 }
 0xe2d   : > { %v8450_v48 = vpop.permute.xlu1 %2527 }
 0xe2e   : > { %12973 = vst [vmem:[#allocation198_spill] sm:$0xff] %v8450_v48  ;;  %v8463_v48 = vpop.permute.xlu0 %1716 }
 0xe2f   : > { %12978 = vst [vmem:[#allocation203_spill] sm:$0xff] %v8463_v48 }
 0xe35   : > { %v8454_v2 = vpop.permute.xlu1 %2533 }
 0xe36   : > { %12975 = vst [vmem:[#allocation200_spill] sm:$0xff] %v8454_v2  ;;  %v8470_v7 = vpop.permute.xlu0 %1722 }
 0xe37   : > { %12979 = vst [vmem:[#allocation204_spill] sm:$0xff] %v8470_v7 }
 0xe3d   : > { %v2566_v1 = vpop.permute.xlu1 %2565 }
 0xe3e   : > { %v2574_v11 = vmul.f32 %v2566_v1, %v7484_v40  ;;  %v2573_v35 = vmul.f32 %v2566_v1, %v7464_v32  ;;  %v2572_v26 = vmul.f32 %v2566_v1, %v7452_v27  ;;  %v2576_v2 = vmul.f32 %v2566_v1, %v7575_v28 }
 0xe3f   : > { %v2575_v4 = vmul.f32 %v2566_v1, %v7497_v44  ;;  %v8476_v1 = vpop.permute.xlu0 %1728 }
 0xe40   : > { %2596 = vrot.lane.b32.xlu2 %v2574_v11, %s7219_s17  ;;  %2594 = vrot.lane.b32.xlu1 %v2573_v35, %s7219_s17  ;;  %v2578_v35 = vmul.f32 %v2570_v52, %v7517_v51  ;;  %12980 = vst [vmem:[#allocation205_spill] sm:$0xff] %v8476_v1 }
 0xe41   : > { %2592 = vrot.lane.b32.xlu0 %v2572_v26, %s7219_s17  ;;  %v2581_v26 = vmul.f32 %v2570_v52, %v7597_v33 }
 0xe48   : > { %2602 = vrot.lane.b32.xlu2 %v2577_v24, %s7219_s17  ;;  %2600 = vrot.lane.b32.xlu1 %v2576_v2, %s7219_s17 }
 0xe49   : > { %2598 = vrot.lane.b32.xlu0 %v2575_v4, %s7219_s17 }
 0xe50   : > { %2608 = vrot.lane.b32.xlu2 %v2580_v14, %s7219_s17  ;;  %2606 = vrot.lane.b32.xlu1 %v2579_v29, %s7219_s17  ;;  %v7220_v14 = vmov 31  }
 0xe51   : > { %2604 = vrot.lane.b32.xlu0 %v2578_v35, %s7219_s17  ;;  %v8490_v35 = vpop.permute.xlu0 %1734 }
 0xe52   : > { %12987 = vst [vmem:[#allocation212_spill] sm:$0xff] %v8490_v35 }
 0xe58   : > { %2642 = vperm.xlu2 %6967, %v8434_v47   ;;  %2638 = vperm.xlu1 %6966, %v8440_v58  }
 0xe59   : > { %2610 = vrot.lane.b32.xlu0 %v2581_v26, %s7219_s17  ;;  %s7227_s17 = smov 95  }
 0xe60   : > { %6969 = vset.pattern.permute.xlu2 %v7220_v14  ;;  %6968 = vset.pattern.permute.xlu1 %v7220_v14 }
 0xe9a   : > { %v8478_v2 = vpop.permute.xlu2 %2596 }
 0xe9b   : > { %12981 = vst [vmem:[#allocation206_spill] sm:$0xff] %v8478_v2 }
 0xea2   : > { %v8484_v24 = vpop.permute.xlu2 %2602 }
 0xea3   : > { %12984 = vst [vmem:[#allocation209_spill] sm:$0xff] %v8484_v24 }
 0xeaa   : > { %v8488_v52 = vpop.permute.xlu2 %2608 }
 0xeab   : > { %12986 = vst [vmem:[#allocation211_spill] sm:$0xff] %v8488_v52 }
 0xeb2   : > { %v8480_v4 = vpop.permute.xlu1 %2594  ;;  %v2643_v24 = vpop.permute.xlu2 %2642 }
 0xeb3   : > { %12982 = vst [vmem:[#allocation207_spill] sm:$0xff] %v8480_v4  ;;  %v2650_v14 = vmul.f32 %v2643_v24, %v7526_v55  ;;  %v2653_v35 = vmul.f32 %v2643_v24, %v7539_v59  ;;  %v2652_v1 = vmul.f32 %v2643_v24, %v7550_v5 }
 0xeba   : > { %v8482_v11 = vpop.permute.xlu1 %2600 }
 0xebb   : > { %12983 = vst [vmem:[#allocation208_spill] sm:$0xff] %v8482_v11  ;;  %v8495_v11 = vpop.permute.xlu0 %1789 }
 0xebc   : > { %12988 = vst [vmem:[#allocation213_spill] sm:$0xff] %v8495_v11 }
 0xec2   : > { %v8486_v29 = vpop.permute.xlu1 %2606 }
 0xec3   : > { %12985 = vst [vmem:[#allocation210_spill] sm:$0xff] %v8486_v29  ;;  %v8502_v48 = vpop.permute.xlu0 %1795 }
 0xec4   : > { %12989 = vst [vmem:[#allocation214_spill] sm:$0xff] %v8502_v48 }
 0xeca   : > { %v2639_v7 = vpop.permute.xlu1 %2638 }
 0xecb   : > { %v2647_v26 = vmul.f32 %v2639_v7, %v7484_v40  ;;  %v2646_v2 = vmul.f32 %v2639_v7, %v7464_v32  ;;  %v2645_v4 = vmul.f32 %v2639_v7, %v7452_v27  ;;  %v2649_v29 = vmul.f32 %v2639_v7, %v7575_v28 }
 0xecc   : > { %v2648_v52 = vmul.f32 %v2639_v7, %v7497_v44  ;;  %v8508_v7 = vpop.permute.xlu0 %1801 }
 0xecd   : > { %2669 = vrot.lane.b32.xlu2 %v2647_v26, %s7221_s16  ;;  %2667 = vrot.lane.b32.xlu1 %v2646_v2, %s7221_s16  ;;  %v2651_v2 = vmul.f32 %v2643_v24, %v7517_v51  ;;  %12990 = vst [vmem:[#allocation215_spill] sm:$0xff] %v8508_v7 }
 0xece   : > { %2665 = vrot.lane.b32.xlu0 %v2645_v4, %s7221_s16  ;;  %v2654_v4 = vmul.f32 %v2643_v24, %v7597_v33 }
 0xed5   : > { %2675 = vrot.lane.b32.xlu2 %v2650_v14, %s7221_s16  ;;  %2673 = vrot.lane.b32.xlu1 %v2649_v29, %s7221_s16 }
 0xed6   : > { %2671 = vrot.lane.b32.xlu0 %v2648_v52, %s7221_s16 }
 0xedd   : > { %2681 = vrot.lane.b32.xlu2 %v2653_v35, %s7221_s16  ;;  %2679 = vrot.lane.b32.xlu1 %v2652_v1, %s7221_s16  ;;  %v7222_v35 = vmov 32  }
 0xede   : > { %2677 = vrot.lane.b32.xlu0 %v2651_v2, %s7221_s16  ;;  %v8522_v2 = vpop.permute.xlu0 %1807 }
 0xedf   : > { %12997 = vst [vmem:[#allocation222_spill] sm:$0xff] %v8522_v2 }
 0xee5   : > { %2715 = vperm.xlu2 %6969, %v8434_v47   ;;  %2711 = vperm.xlu1 %6968, %v8440_v58  }
 0xee6   : > { %2683 = vrot.lane.b32.xlu0 %v2654_v4, %s7221_s16  ;;  %s7229_s16 = smov 94  }
 0xeed   : > { %6971 = vset.pattern.permute.xlu2 %v7222_v35  ;;  %6970 = vset.pattern.permute.xlu1 %v7222_v35 }
 0xf27   : > { %v8510_v29 = vpop.permute.xlu2 %2669 }
 0xf28   : > { %12991 = vst [vmem:[#allocation216_spill] sm:$0xff] %v8510_v29 }
 0xf2f   : > { %v8516_v14 = vpop.permute.xlu2 %2675 }
 0xf30   : > { %12994 = vst [vmem:[#allocation219_spill] sm:$0xff] %v8516_v14 }
 0xf37   : > { %v8520_v24 = vpop.permute.xlu2 %2681 }
 0xf38   : > { %12996 = vst [vmem:[#allocation221_spill] sm:$0xff] %v8520_v24 }
 0xf3f   : > { %v8512_v52 = vpop.permute.xlu1 %2667  ;;  %v2716_v14 = vpop.permute.xlu2 %2715 }
 0xf40   : > { %12992 = vst [vmem:[#allocation217_spill] sm:$0xff] %v8512_v52  ;;  %v2723_v35 = vmul.f32 %v2716_v14, %v7526_v55  ;;  %v2726_v2 = vmul.f32 %v2716_v14, %v7539_v59  ;;  %v2725_v7 = vmul.f32 %v2716_v14, %v7550_v5 }
 0xf47   : > { %v8514_v26 = vpop.permute.xlu1 %2673 }
 0xf48   : > { %12993 = vst [vmem:[#allocation218_spill] sm:$0xff] %v8514_v26  ;;  %v8527_v26 = vpop.permute.xlu0 %1862 }
 0xf49   : > { %12998 = vst [vmem:[#allocation223_spill] sm:$0xff] %v8527_v26 }
 0xf4f   : > { %v8518_v1 = vpop.permute.xlu1 %2679 }
 0xf50   : > { %12995 = vst [vmem:[#allocation220_spill] sm:$0xff] %v8518_v1  ;;  %v8534_v11 = vpop.permute.xlu0 %1868 }
 0xf51   : > { %12999 = vst [vmem:[#allocation224_spill] sm:$0xff] %v8534_v11 }
 0xf57   : > { %v2712_v48 = vpop.permute.xlu1 %2711 }
 0xf58   : > { %v2720_v4 = vmul.f32 %v2712_v48, %v7484_v40  ;;  %v2719_v29 = vmul.f32 %v2712_v48, %v7464_v32  ;;  %v2718_v52 = vmul.f32 %v2712_v48, %v7452_v27  ;;  %v2722_v1 = vmul.f32 %v2712_v48, %v7575_v28 }
 0xf59   : > { %v2721_v24 = vmul.f32 %v2712_v48, %v7497_v44  ;;  %v8540_v48 = vpop.permute.xlu0 %1874 }
 0xf5a   : > { %2742 = vrot.lane.b32.xlu2 %v2720_v4, %s7223_s28  ;;  %2740 = vrot.lane.b32.xlu1 %v2719_v29, %s7223_s28  ;;  %v2724_v29 = vmul.f32 %v2716_v14, %v7517_v51  ;;  %13000 = vst [vmem:[#allocation225_spill] sm:$0xff] %v8540_v48 }
 0xf5b   : > { %2738 = vrot.lane.b32.xlu0 %v2718_v52, %s7223_s28  ;;  %v2727_v52 = vmul.f32 %v2716_v14, %v7597_v33 }
 0xf62   : > { %2748 = vrot.lane.b32.xlu2 %v2723_v35, %s7223_s28  ;;  %2746 = vrot.lane.b32.xlu1 %v2722_v1, %s7223_s28 }
 0xf63   : > { %2744 = vrot.lane.b32.xlu0 %v2721_v24, %s7223_s28 }
 0xf6a   : > { %2754 = vrot.lane.b32.xlu2 %v2726_v2, %s7223_s28  ;;  %2752 = vrot.lane.b32.xlu1 %v2725_v7, %s7223_s28  ;;  %v7224_v2 = vmov 33  }
 0xf6b   : > { %2750 = vrot.lane.b32.xlu0 %v2724_v29, %s7223_s28  ;;  %v8554_v29 = vpop.permute.xlu0 %1880 }
 0xf6c   : > { %13007 = vst [vmem:[#allocation232_spill] sm:$0xff] %v8554_v29 }
 0xf72   : > { %2788 = vperm.xlu2 %6971, %v8434_v47   ;;  %2784 = vperm.xlu1 %6970, %v8440_v58  }
 0xf73   : > { %2756 = vrot.lane.b32.xlu0 %v2727_v52, %s7223_s28  ;;  %s7231_s28 = smov 93  }
 0xf7a   : > { %6973 = vset.pattern.permute.xlu2 %v7224_v2  ;;  %6972 = vset.pattern.permute.xlu1 %v7224_v2 }
 0xfb4   : > { %v8542_v1 = vpop.permute.xlu2 %2742 }
 0xfb5   : > { %13001 = vst [vmem:[#allocation226_spill] sm:$0xff] %v8542_v1 }
 0xfbc   : > { %v8548_v35 = vpop.permute.xlu2 %2748 }
 0xfbd   : > { %13004 = vst [vmem:[#allocation229_spill] sm:$0xff] %v8548_v35  ;;  %v8562_v35 = vpop.permute.xlu0 %1935 }
 0xfbe   : > { %13008 = vst [vmem:[#allocation233_spill] sm:$0xff] %v8562_v35 }
 0xfc4   : > { %v8552_v14 = vpop.permute.xlu2 %2754 }
 0xfc5   : > { %13006 = vst [vmem:[#allocation231_spill] sm:$0xff] %v8552_v14 }
 0xfcc   : > { %v8544_v24 = vpop.permute.xlu1 %2740  ;;  %v2789_v2 = vpop.permute.xlu2 %2788 }
 0xfcd   : > { %13002 = vst [vmem:[#allocation227_spill] sm:$0xff] %v8544_v24  ;;  %v2797_v35 = vmul.f32 %v2789_v2, %v7517_v51 }
 0xfd4   : > { %v8546_v4 = vpop.permute.xlu1 %2746 }
 0xfd5   : > { %13003 = vst [vmem:[#allocation228_spill] sm:$0xff] %v8546_v4 }
 0xfdc   : > { %v8550_v7 = vpop.permute.xlu1 %2752 }
 0xfdd   : > { %13005 = vst [vmem:[#allocation230_spill] sm:$0xff] %v8550_v7  ;;  %v2796_v7 = vmul.f32 %v2789_v2, %v7526_v55 }
 0xfe4   : > { %v2785_v11 = vpop.permute.xlu1 %2784 }
 0xfe5   : > { %v2793_v52 = vmul.f32 %v2785_v11, %v7484_v40  ;;  %v2792_v1 = vmul.f32 %v2785_v11, %v7464_v32  ;;  %v2791_v24 = vmul.f32 %v2785_v11, %v7452_v27  ;;  %v2795_v14 = vmul.f32 %v2785_v11, %v7575_v28 }
 0xfe6   : > { %v2794_v4 = vmul.f32 %v2785_v11, %v7497_v44  ;;  %v2800_v11 = vmul.f32 %v2789_v2, %v7597_v33 }
 0xfe7   : > { %2815 = vrot.lane.b32.xlu2 %v2793_v52, %s12621_s14  ;;  %2813 = vrot.lane.b32.xlu1 %v2792_v1, %s12621_s14  ;;  %v2799_v52 = vmul.f32 %v2789_v2, %v7539_v59  ;;  %v2798_v1 = vmul.f32 %v2789_v2, %v7550_v5 }
 0xfe8   : > { %2811 = vrot.lane.b32.xlu0 %v2791_v24, %s12621_s14  ;;  %v8572_v24 = vpop.permute.xlu0 %1941 }
 0xfe9   : > { %13009 = vst [vmem:[#allocation234_spill] sm:$0xff] %v8572_v24 }
 0xfef   : > { %2821 = vrot.lane.b32.xlu2 %v2796_v7, %s12621_s14  ;;  %2819 = vrot.lane.b32.xlu1 %v2795_v14, %s12621_s14 }
 0xff0   : > { %2817 = vrot.lane.b32.xlu0 %v2794_v4, %s12621_s14  ;;  %v8581_v4 = vpop.permute.xlu0 %1947 }
 0xff1   : > { %13010 = vst [vmem:[#allocation235_spill] sm:$0xff] %v8581_v4 }
 0xff7   : > { %2827 = vrot.lane.b32.xlu2 %v2799_v52, %s12621_s14  ;;  %2825 = vrot.lane.b32.xlu1 %v2798_v1, %s12621_s14  ;;  %v7226_v1 = vmov 34  }
 0xff8   : > { %2823 = vrot.lane.b32.xlu0 %v2797_v35, %s12621_s14  ;;  %v8596_v29 = vpop.permute.xlu0 %1953 }
 0xff9   : > { %13017 = vst [vmem:[#allocation242_spill] sm:$0xff] %v8596_v29 }
 0xfff   : > { %2861 = vperm.xlu2 %6973, %v8434_v47   ;;  %2857 = vperm.xlu1 %6972, %v8440_v58  }
0x1000   : > { %2829 = vrot.lane.b32.xlu0 %v2800_v11, %s12621_s14  ;;  %s12712_s14 = smov 84  }
0x1007   : > { %6975 = vset.pattern.permute.xlu2 %v7226_v1  ;;  %6974 = vset.pattern.permute.xlu1 %v7226_v1 }
0x1041   : > { %v8584_v7 = vpop.permute.xlu2 %2815 }
0x1042   : > { %13011 = vst [vmem:[#allocation236_spill] sm:$0xff] %v8584_v7 }
0x1049   : > { %v8590_v52 = vpop.permute.xlu2 %2821 }
0x104a   : > { %13014 = vst [vmem:[#allocation239_spill] sm:$0xff] %v8590_v52 }
0x1051   : > { %v8594_v2 = vpop.permute.xlu2 %2827 }
0x1052   : > { %13016 = vst [vmem:[#allocation241_spill] sm:$0xff] %v8594_v2 }
0x1059   : > { %v8586_v14 = vpop.permute.xlu1 %2813  ;;  %v2862_v52 = vpop.permute.xlu2 %2861 }
0x105a   : > { %13012 = vst [vmem:[#allocation237_spill] sm:$0xff] %v8586_v14  ;;  %v2869_v1 = vmul.f32 %v2862_v52, %v7526_v55  ;;  %v2872_v29 = vmul.f32 %v2862_v52, %v7539_v59  ;;  %v2871_v48 = vmul.f32 %v2862_v52, %v7550_v5 }
0x1061   : > { %v8588_v24 = vpop.permute.xlu1 %2819 }
0x1062   : > { %13013 = vst [vmem:[#allocation238_spill] sm:$0xff] %v8588_v24  ;;  %v8601_v24 = vpop.permute.xlu0 %2008 }
0x1063   : > { %13018 = vst [vmem:[#allocation243_spill] sm:$0xff] %v8601_v24 }
0x1069   : > { %v8592_v35 = vpop.permute.xlu1 %2825 }
0x106a   : > { %13015 = vst [vmem:[#allocation240_spill] sm:$0xff] %v8592_v35  ;;  %v8608_v26 = vpop.permute.xlu0 %2014 }
0x106b   : > { %13019 = vst [vmem:[#allocation244_spill] sm:$0xff] %v8608_v26 }
0x1071   : > { %v2858_v4 = vpop.permute.xlu1 %2857 }
0x1072   : > { %v2866_v11 = vmul.f32 %v2858_v4, %v7484_v40  ;;  %v2865_v7 = vmul.f32 %v2858_v4, %v7464_v32  ;;  %v2864_v14 = vmul.f32 %v2858_v4, %v7452_v27  ;;  %v2868_v35 = vmul.f32 %v2858_v4, %v7575_v28 }
0x1073   : > { %v2867_v2 = vmul.f32 %v2858_v4, %v7497_v44  ;;  %v8614_v4 = vpop.permute.xlu0 %2020 }
0x1074   : > { %2888 = vrot.lane.b32.xlu2 %v2866_v11, %s7227_s17  ;;  %2886 = vrot.lane.b32.xlu1 %v2865_v7, %s7227_s17  ;;  %v2870_v7 = vmul.f32 %v2862_v52, %v7517_v51  ;;  %13020 = vst [vmem:[#allocation245_spill] sm:$0xff] %v8614_v4 }
0x1075   : > { %2884 = vrot.lane.b32.xlu0 %v2864_v14, %s7227_s17  ;;  %v2873_v14 = vmul.f32 %v2862_v52, %v7597_v33 }
0x107c   : > { %2894 = vrot.lane.b32.xlu2 %v2869_v1, %s7227_s17  ;;  %2892 = vrot.lane.b32.xlu1 %v2868_v35, %s7227_s17 }
0x107d   : > { %2890 = vrot.lane.b32.xlu0 %v2867_v2, %s7227_s17 }
0x1084   : > { %2900 = vrot.lane.b32.xlu2 %v2872_v29, %s7227_s17  ;;  %2898 = vrot.lane.b32.xlu1 %v2871_v48, %s7227_s17  ;;  %v7228_v29 = vmov 35  }
0x1085   : > { %2896 = vrot.lane.b32.xlu0 %v2870_v7, %s7227_s17  ;;  %v8628_v7 = vpop.permute.xlu0 %2026 }
0x1086   : > { %13027 = vst [vmem:[#allocation252_spill] sm:$0xff] %v8628_v7 }
0x108c   : > { %2934 = vperm.xlu2 %6975, %v8434_v47   ;;  %2930 = vperm.xlu1 %6974, %v8440_v58  }
0x108d   : > { %2902 = vrot.lane.b32.xlu0 %v2873_v14, %s7227_s17  ;;  %s12619_s17 = smov 92  }
0x1094   : > { %6977 = vset.pattern.permute.xlu2 %v7228_v29  ;;  %6976 = vset.pattern.permute.xlu1 %v7228_v29 }
0x10ce   : > { %v8616_v35 = vpop.permute.xlu2 %2888 }
0x10cf   : > { %13021 = vst [vmem:[#allocation246_spill] sm:$0xff] %v8616_v35 }
0x10d6   : > { %v8622_v1 = vpop.permute.xlu2 %2894 }
0x10d7   : > { %13024 = vst [vmem:[#allocation249_spill] sm:$0xff] %v8622_v1 }
0x10de   : > { %v8626_v52 = vpop.permute.xlu2 %2900 }
0x10df   : > { %13026 = vst [vmem:[#allocation251_spill] sm:$0xff] %v8626_v52 }
0x10e6   : > { %v8618_v2 = vpop.permute.xlu1 %2886  ;;  %v2935_v1 = vpop.permute.xlu2 %2934 }
0x10e7   : > { %13022 = vst [vmem:[#allocation247_spill] sm:$0xff] %v8618_v2  ;;  %v2942_v29 = vmul.f32 %v2935_v1, %v7526_v55  ;;  %v2945_v7 = vmul.f32 %v2935_v1, %v7539_v59  ;;  %v2944_v4 = vmul.f32 %v2935_v1, %v7550_v5 }
0x10ee   : > { %v8620_v11 = vpop.permute.xlu1 %2892 }
0x10ef   : > { %13023 = vst [vmem:[#allocation248_spill] sm:$0xff] %v8620_v11  ;;  %v8633_v11 = vpop.permute.xlu0 %2081 }
0x10f0   : > { %13028 = vst [vmem:[#allocation253_spill] sm:$0xff] %v8633_v11 }
0x10f6   : > { %v8624_v48 = vpop.permute.xlu1 %2898 }
0x10f7   : > { %13025 = vst [vmem:[#allocation250_spill] sm:$0xff] %v8624_v48  ;;  %v8640_v24 = vpop.permute.xlu0 %2087 }
0x10f8   : > { %13029 = vst [vmem:[#allocation254_spill] sm:$0xff] %v8640_v24 }
0x10fe   : > { %v2931_v26 = vpop.permute.xlu1 %2930 }
0x10ff   : > { %v2939_v14 = vmul.f32 %v2931_v26, %v7484_v40  ;;  %v2938_v35 = vmul.f32 %v2931_v26, %v7464_v32  ;;  %v2937_v2 = vmul.f32 %v2931_v26, %v7452_v27  ;;  %v2941_v48 = vmul.f32 %v2931_v26, %v7575_v28 }
0x1100   : > { %v2940_v52 = vmul.f32 %v2931_v26, %v7497_v44  ;;  %v8646_v26 = vpop.permute.xlu0 %2093 }
0x1101   : > { %2961 = vrot.lane.b32.xlu2 %v2939_v14, %s7229_s16  ;;  %2959 = vrot.lane.b32.xlu1 %v2938_v35, %s7229_s16  ;;  %v2943_v35 = vmul.f32 %v2935_v1, %v7517_v51  ;;  %13030 = vst [vmem:[#allocation255_spill] sm:$0xff] %v8646_v26 }
0x1102   : > { %2957 = vrot.lane.b32.xlu0 %v2937_v2, %s7229_s16  ;;  %v2946_v2 = vmul.f32 %v2935_v1, %v7597_v33 }
0x1109   : > { %2967 = vrot.lane.b32.xlu2 %v2942_v29, %s7229_s16  ;;  %2965 = vrot.lane.b32.xlu1 %v2941_v48, %s7229_s16 }
0x110a   : > { %2963 = vrot.lane.b32.xlu0 %v2940_v52, %s7229_s16 }
0x1111   : > { %2973 = vrot.lane.b32.xlu2 %v2945_v7, %s7229_s16  ;;  %2971 = vrot.lane.b32.xlu1 %v2944_v4, %s7229_s16  ;;  %v7230_v7 = vmov 36  }
0x1112   : > { %2969 = vrot.lane.b32.xlu0 %v2943_v35, %s7229_s16  ;;  %v8660_v35 = vpop.permute.xlu0 %2099 }
0x1113   : > { %13037 = vst [vmem:[#allocation262_spill] sm:$0xff] %v8660_v35 }
0x1119   : > { %3007 = vperm.xlu2 %6977, %v8434_v47   ;;  %3003 = vperm.xlu1 %6976, %v8440_v58  }
0x111a   : > { %2975 = vrot.lane.b32.xlu0 %v2946_v2, %s7229_s16  ;;  %s7235_s16 = smov 91  }
0x1121   : > { %6979 = vset.pattern.permute.xlu2 %v7230_v7  ;;  %6978 = vset.pattern.permute.xlu1 %v7230_v7 }
0x115b   : > { %v8648_v48 = vpop.permute.xlu2 %2961 }
0x115c   : > { %13031 = vst [vmem:[#allocation256_spill] sm:$0xff] %v8648_v48 }
0x1163   : > { %v8654_v29 = vpop.permute.xlu2 %2967 }
0x1164   : > { %13034 = vst [vmem:[#allocation259_spill] sm:$0xff] %v8654_v29 }
0x116b   : > { %v8658_v1 = vpop.permute.xlu2 %2973 }
0x116c   : > { %13036 = vst [vmem:[#allocation261_spill] sm:$0xff] %v8658_v1 }
0x1173   : > { %v8650_v52 = vpop.permute.xlu1 %2959  ;;  %v3008_v29 = vpop.permute.xlu2 %3007 }
0x1174   : > { %13032 = vst [vmem:[#allocation257_spill] sm:$0xff] %v8650_v52  ;;  %v3015_v7 = vmul.f32 %v3008_v29, %v7526_v55  ;;  %v3018_v35 = vmul.f32 %v3008_v29, %v7539_v59  ;;  %v3017_v26 = vmul.f32 %v3008_v29, %v7550_v5 }
0x117b   : > { %v8652_v14 = vpop.permute.xlu1 %2965 }
0x117c   : > { %13033 = vst [vmem:[#allocation258_spill] sm:$0xff] %v8652_v14  ;;  %v8665_v14 = vpop.permute.xlu0 %2154 }
0x117d   : > { %13038 = vst [vmem:[#allocation263_spill] sm:$0xff] %v8665_v14 }
0x1183   : > { %v8656_v4 = vpop.permute.xlu1 %2971 }
0x1184   : > { %13035 = vst [vmem:[#allocation260_spill] sm:$0xff] %v8656_v4  ;;  %v8672_v11 = vpop.permute.xlu0 %2160 }
0x1185   : > { %13039 = vst [vmem:[#allocation264_spill] sm:$0xff] %v8672_v11 }
0x118b   : > { %v3004_v24 = vpop.permute.xlu1 %3003 }
0x118c   : > { %v3012_v2 = vmul.f32 %v3004_v24, %v7484_v40  ;;  %v3011_v48 = vmul.f32 %v3004_v24, %v7464_v32  ;;  %v3010_v52 = vmul.f32 %v3004_v24, %v7452_v27  ;;  %v3014_v4 = vmul.f32 %v3004_v24, %v7575_v28 }
0x118d   : > { %v3013_v1 = vmul.f32 %v3004_v24, %v7497_v44  ;;  %v8678_v24 = vpop.permute.xlu0 %2166 }
0x118e   : > { %3034 = vrot.lane.b32.xlu2 %v3012_v2, %s7231_s28  ;;  %3032 = vrot.lane.b32.xlu1 %v3011_v48, %s7231_s28  ;;  %v3016_v48 = vmul.f32 %v3008_v29, %v7517_v51  ;;  %13040 = vst [vmem:[#allocation265_spill] sm:$0xff] %v8678_v24 }
0x118f   : > { %3030 = vrot.lane.b32.xlu0 %v3010_v52, %s7231_s28  ;;  %v3019_v52 = vmul.f32 %v3008_v29, %v7597_v33 }
0x1196   : > { %3040 = vrot.lane.b32.xlu2 %v3015_v7, %s7231_s28  ;;  %3038 = vrot.lane.b32.xlu1 %v3014_v4, %s7231_s28 }
0x1197   : > { %3036 = vrot.lane.b32.xlu0 %v3013_v1, %s7231_s28 }
0x119e   : > { %3046 = vrot.lane.b32.xlu2 %v3018_v35, %s7231_s28  ;;  %3044 = vrot.lane.b32.xlu1 %v3017_v26, %s7231_s28  ;;  %v7232_v35 = vmov 37  }
0x119f   : > { %3042 = vrot.lane.b32.xlu0 %v3016_v48, %s7231_s28  ;;  %v8692_v48 = vpop.permute.xlu0 %2172 }
0x11a0   : > { %13047 = vst [vmem:[#allocation272_spill] sm:$0xff] %v8692_v48 }
0x11a6   : > { %3080 = vperm.xlu2 %6979, %v8434_v47   ;;  %3076 = vperm.xlu1 %6978, %v8440_v58  }
0x11a7   : > { %3048 = vrot.lane.b32.xlu0 %v3019_v52, %s7231_s28  ;;  %s7237_s28 = smov 90  }
0x11ae   : > { %6981 = vset.pattern.permute.xlu2 %v7232_v35  ;;  %6980 = vset.pattern.permute.xlu1 %v7232_v35 }
0x11e8   : > { %v8680_v4 = vpop.permute.xlu2 %3034 }
0x11e9   : > { %13041 = vst [vmem:[#allocation266_spill] sm:$0xff] %v8680_v4 }
0x11f0   : > { %v8686_v7 = vpop.permute.xlu2 %3040 }
0x11f1   : > { %13044 = vst [vmem:[#allocation269_spill] sm:$0xff] %v8686_v7  ;;  %v8700_v7 = vpop.permute.xlu0 %2227 }
0x11f2   : > { %13048 = vst [vmem:[#allocation273_spill] sm:$0xff] %v8700_v7 }
0x11f8   : > { %v8690_v29 = vpop.permute.xlu2 %3046 }
0x11f9   : > { %13046 = vst [vmem:[#allocation271_spill] sm:$0xff] %v8690_v29 }
0x1200   : > { %v8682_v1 = vpop.permute.xlu1 %3032  ;;  %v3081_v35 = vpop.permute.xlu2 %3080 }
0x1201   : > { %13042 = vst [vmem:[#allocation267_spill] sm:$0xff] %v8682_v1  ;;  %v3089_v7 = vmul.f32 %v3081_v35, %v7517_v51 }
0x1208   : > { %v8684_v2 = vpop.permute.xlu1 %3038 }
0x1209   : > { %13043 = vst [vmem:[#allocation268_spill] sm:$0xff] %v8684_v2 }
0x1210   : > { %v8688_v26 = vpop.permute.xlu1 %3044 }
0x1211   : > { %13045 = vst [vmem:[#allocation270_spill] sm:$0xff] %v8688_v26  ;;  %v3088_v26 = vmul.f32 %v3081_v35, %v7526_v55 }
0x1218   : > { %v3077_v11 = vpop.permute.xlu1 %3076 }
0x1219   : > { %v3085_v52 = vmul.f32 %v3077_v11, %v7484_v40  ;;  %v3084_v4 = vmul.f32 %v3077_v11, %v7464_v32  ;;  %v3083_v1 = vmul.f32 %v3077_v11, %v7452_v27  ;;  %v3087_v29 = vmul.f32 %v3077_v11, %v7575_v28 }
0x121a   : > { %v3086_v2 = vmul.f32 %v3077_v11, %v7497_v44  ;;  %v3092_v11 = vmul.f32 %v3081_v35, %v7597_v33 }
0x121b   : > { %3107 = vrot.lane.b32.xlu2 %v3085_v52, %s12619_s17  ;;  %3105 = vrot.lane.b32.xlu1 %v3084_v4, %s12619_s17  ;;  %v3091_v52 = vmul.f32 %v3081_v35, %v7539_v59  ;;  %v3090_v4 = vmul.f32 %v3081_v35, %v7550_v5 }
0x121c   : > { %3103 = vrot.lane.b32.xlu0 %v3083_v1, %s12619_s17  ;;  %v8710_v1 = vpop.permute.xlu0 %2233 }
0x121d   : > { %13049 = vst [vmem:[#allocation274_spill] sm:$0xff] %v8710_v1 }
0x1223   : > { %3113 = vrot.lane.b32.xlu2 %v3088_v26, %s12619_s17  ;;  %3111 = vrot.lane.b32.xlu1 %v3087_v29, %s12619_s17 }
0x1224   : > { %3109 = vrot.lane.b32.xlu0 %v3086_v2, %s12619_s17  ;;  %v8719_v2 = vpop.permute.xlu0 %2239 }
0x1225   : > { %13050 = vst [vmem:[#allocation275_spill] sm:$0xff] %v8719_v2 }
0x122b   : > { %3119 = vrot.lane.b32.xlu2 %v3091_v52, %s12619_s17  ;;  %3117 = vrot.lane.b32.xlu1 %v3090_v4, %s12619_s17  ;;  %v7234_v4 = vmov 38  }
0x122c   : > { %3115 = vrot.lane.b32.xlu0 %v3089_v7, %s12619_s17  ;;  %v8734_v48 = vpop.permute.xlu0 %2245 }
0x122d   : > { %13057 = vst [vmem:[#allocation282_spill] sm:$0xff] %v8734_v48 }
0x1233   : > { %3153 = vperm.xlu2 %6981, %v8434_v47   ;;  %3149 = vperm.xlu1 %6980, %v8440_v58  }
0x1234   : > { %3121 = vrot.lane.b32.xlu0 %v3092_v11, %s12619_s17  ;;  %s7251_s17 = smov 83  }
0x123b   : > { %6983 = vset.pattern.permute.xlu2 %v7234_v4  ;;  %6982 = vset.pattern.permute.xlu1 %v7234_v4 }
0x1275   : > { %v8722_v26 = vpop.permute.xlu2 %3107 }
0x1276   : > { %13051 = vst [vmem:[#allocation276_spill] sm:$0xff] %v8722_v26 }
0x127d   : > { %v8728_v52 = vpop.permute.xlu2 %3113 }
0x127e   : > { %13054 = vst [vmem:[#allocation279_spill] sm:$0xff] %v8728_v52 }
0x1285   : > { %v8732_v35 = vpop.permute.xlu2 %3119 }
0x1286   : > { %13056 = vst [vmem:[#allocation281_spill] sm:$0xff] %v8732_v35 }
0x128d   : > { %v8724_v29 = vpop.permute.xlu1 %3105  ;;  %v3154_v52 = vpop.permute.xlu2 %3153 }
0x128e   : > { %13052 = vst [vmem:[#allocation277_spill] sm:$0xff] %v8724_v29  ;;  %v3161_v4 = vmul.f32 %v3154_v52, %v7526_v55  ;;  %v3164_v48 = vmul.f32 %v3154_v52, %v7539_v59  ;;  %v3163_v24 = vmul.f32 %v3154_v52, %v7550_v5 }
0x1295   : > { %v8726_v1 = vpop.permute.xlu1 %3111 }
0x1296   : > { %13053 = vst [vmem:[#allocation278_spill] sm:$0xff] %v8726_v1  ;;  %v8739_v1 = vpop.permute.xlu0 %2300 }
0x1297   : > { %13058 = vst [vmem:[#allocation283_spill] sm:$0xff] %v8739_v1 }
0x129d   : > { %v8730_v7 = vpop.permute.xlu1 %3117 }
0x129e   : > { %13055 = vst [vmem:[#allocation280_spill] sm:$0xff] %v8730_v7  ;;  %v8746_v14 = vpop.permute.xlu0 %2306 }
0x129f   : > { %13059 = vst [vmem:[#allocation284_spill] sm:$0xff] %v8746_v14 }
0x12a5   : > { %v3150_v2 = vpop.permute.xlu1 %3149 }
0x12a6   : > { %v3158_v11 = vmul.f32 %v3150_v2, %v7484_v40  ;;  %v3157_v26 = vmul.f32 %v3150_v2, %v7464_v32  ;;  %v3156_v29 = vmul.f32 %v3150_v2, %v7452_v27  ;;  %v3160_v7 = vmul.f32 %v3150_v2, %v7575_v28 }
0x12a7   : > { %v3159_v35 = vmul.f32 %v3150_v2, %v7497_v44  ;;  %v8752_v2 = vpop.permute.xlu0 %2312 }
0x12a8   : > { %3180 = vrot.lane.b32.xlu2 %v3158_v11, %s7235_s16  ;;  %3178 = vrot.lane.b32.xlu1 %v3157_v26, %s7235_s16  ;;  %v3162_v26 = vmul.f32 %v3154_v52, %v7517_v51  ;;  %13060 = vst [vmem:[#allocation285_spill] sm:$0xff] %v8752_v2 }
0x12a9   : > { %3176 = vrot.lane.b32.xlu0 %v3156_v29, %s7235_s16  ;;  %v3165_v29 = vmul.f32 %v3154_v52, %v7597_v33 }
0x12b0   : > { %3186 = vrot.lane.b32.xlu2 %v3161_v4, %s7235_s16  ;;  %3184 = vrot.lane.b32.xlu1 %v3160_v7, %s7235_s16 }
0x12b1   : > { %3182 = vrot.lane.b32.xlu0 %v3159_v35, %s7235_s16 }
0x12b8   : > { %3192 = vrot.lane.b32.xlu2 %v3164_v48, %s7235_s16  ;;  %3190 = vrot.lane.b32.xlu1 %v3163_v24, %s7235_s16  ;;  %v7236_v48 = vmov 39  }
0x12b9   : > { %3188 = vrot.lane.b32.xlu0 %v3162_v26, %s7235_s16  ;;  %v8766_v26 = vpop.permute.xlu0 %2318 }
0x12ba   : > { %13067 = vst [vmem:[#allocation292_spill] sm:$0xff] %v8766_v26 }
0x12c0   : > { %3226 = vperm.xlu2 %6983, %v8434_v47   ;;  %3222 = vperm.xlu1 %6982, %v8440_v58  }
0x12c1   : > { %3194 = vrot.lane.b32.xlu0 %v3165_v29, %s7235_s16  ;;  %s7239_s16 = smov 89  }
0x12c8   : > { %6985 = vset.pattern.permute.xlu2 %v7236_v48  ;;  %6984 = vset.pattern.permute.xlu1 %v7236_v48 }
0x1302   : > { %v8754_v7 = vpop.permute.xlu2 %3180 }
0x1303   : > { %13061 = vst [vmem:[#allocation286_spill] sm:$0xff] %v8754_v7 }
0x130a   : > { %v8760_v4 = vpop.permute.xlu2 %3186 }
0x130b   : > { %13064 = vst [vmem:[#allocation289_spill] sm:$0xff] %v8760_v4 }
0x1312   : > { %v8764_v52 = vpop.permute.xlu2 %3192 }
0x1313   : > { %13066 = vst [vmem:[#allocation291_spill] sm:$0xff] %v8764_v52 }
0x131a   : > { %v8756_v35 = vpop.permute.xlu1 %3178  ;;  %v3227_v4 = vpop.permute.xlu2 %3226 }
0x131b   : > { %13062 = vst [vmem:[#allocation287_spill] sm:$0xff] %v8756_v35  ;;  %v3234_v48 = vmul.f32 %v3227_v4, %v7526_v55  ;;  %v3237_v26 = vmul.f32 %v3227_v4, %v7539_v59  ;;  %v3236_v2 = vmul.f32 %v3227_v4, %v7550_v5 }
0x1322   : > { %v8758_v11 = vpop.permute.xlu1 %3184 }
0x1323   : > { %13063 = vst [vmem:[#allocation288_spill] sm:$0xff] %v8758_v11  ;;  %v8771_v11 = vpop.permute.xlu0 %2373 }
0x1324   : > { %13068 = vst [vmem:[#allocation293_spill] sm:$0xff] %v8771_v11 }
0x132a   : > { %v8762_v24 = vpop.permute.xlu1 %3190 }
0x132b   : > { %13065 = vst [vmem:[#allocation290_spill] sm:$0xff] %v8762_v24  ;;  %v8778_v1 = vpop.permute.xlu0 %2379 }
0x132c   : > { %13069 = vst [vmem:[#allocation294_spill] sm:$0xff] %v8778_v1 }
0x1332   : > { %v3223_v14 = vpop.permute.xlu1 %3222 }
0x1333   : > { %v3231_v29 = vmul.f32 %v3223_v14, %v7484_v40  ;;  %v3230_v7 = vmul.f32 %v3223_v14, %v7464_v32  ;;  %v3229_v35 = vmul.f32 %v3223_v14, %v7452_v27  ;;  %v3233_v24 = vmul.f32 %v3223_v14, %v7575_v28 }
0x1334   : > { %v3232_v52 = vmul.f32 %v3223_v14, %v7497_v44  ;;  %v8784_v14 = vpop.permute.xlu0 %2385 }
0x1335   : > { %3253 = vrot.lane.b32.xlu2 %v3231_v29, %s7237_s28  ;;  %3251 = vrot.lane.b32.xlu1 %v3230_v7, %s7237_s28  ;;  %v3235_v7 = vmul.f32 %v3227_v4, %v7517_v51  ;;  %13070 = vst [vmem:[#allocation295_spill] sm:$0xff] %v8784_v14 }
0x1336   : > { %3249 = vrot.lane.b32.xlu0 %v3229_v35, %s7237_s28  ;;  %v3238_v35 = vmul.f32 %v3227_v4, %v7597_v33 }
0x133d   : > { %3259 = vrot.lane.b32.xlu2 %v3234_v48, %s7237_s28  ;;  %3257 = vrot.lane.b32.xlu1 %v3233_v24, %s7237_s28 }
0x133e   : > { %3255 = vrot.lane.b32.xlu0 %v3232_v52, %s7237_s28 }
0x1345   : > { %3265 = vrot.lane.b32.xlu2 %v3237_v26, %s7237_s28  ;;  %3263 = vrot.lane.b32.xlu1 %v3236_v2, %s7237_s28  ;;  %v7238_v26 = vmov 40  }
0x1346   : > { %3261 = vrot.lane.b32.xlu0 %v3235_v7, %s7237_s28  ;;  %v8798_v7 = vpop.permute.xlu0 %2391 }
0x1347   : > { %13077 = vst [vmem:[#allocation302_spill] sm:$0xff] %v8798_v7 }
0x134d   : > { %3299 = vperm.xlu2 %6985, %v8434_v47   ;;  %3295 = vperm.xlu1 %6984, %v8440_v58  }
0x134e   : > { %3267 = vrot.lane.b32.xlu0 %v3238_v35, %s7237_s28  ;;  %s12617_s28 = smov 88  }
0x1355   : > { %6987 = vset.pattern.permute.xlu2 %v7238_v26  ;;  %6986 = vset.pattern.permute.xlu1 %v7238_v26 }
0x138f   : > { %v8786_v24 = vpop.permute.xlu2 %3253 }
0x1390   : > { %13071 = vst [vmem:[#allocation296_spill] sm:$0xff] %v8786_v24 }
0x1397   : > { %v8792_v48 = vpop.permute.xlu2 %3259 }
0x1398   : > { %13074 = vst [vmem:[#allocation299_spill] sm:$0xff] %v8792_v48 }
0x139f   : > { %v8796_v4 = vpop.permute.xlu2 %3265 }
0x13a0   : > { %13076 = vst [vmem:[#allocation301_spill] sm:$0xff] %v8796_v4 }
0x13a7   : > { %v8788_v52 = vpop.permute.xlu1 %3251  ;;  %v3300_v48 = vpop.permute.xlu2 %3299 }
0x13a8   : > { %13072 = vst [vmem:[#allocation297_spill] sm:$0xff] %v8788_v52  ;;  %v3307_v26 = vmul.f32 %v3300_v48, %v7526_v55  ;;  %v3310_v7 = vmul.f32 %v3300_v48, %v7539_v59  ;;  %v3309_v14 = vmul.f32 %v3300_v48, %v7550_v5 }
0x13af   : > { %v8790_v29 = vpop.permute.xlu1 %3257 }
0x13b0   : > { %13073 = vst [vmem:[#allocation298_spill] sm:$0xff] %v8790_v29  ;;  %v8803_v29 = vpop.permute.xlu0 %2446 }
0x13b1   : > { %13078 = vst [vmem:[#allocation303_spill] sm:$0xff] %v8803_v29 }
0x13b7   : > { %v8794_v2 = vpop.permute.xlu1 %3263 }
0x13b8   : > { %13075 = vst [vmem:[#allocation300_spill] sm:$0xff] %v8794_v2  ;;  %v8810_v11 = vpop.permute.xlu0 %2452 }
0x13b9   : > { %13079 = vst [vmem:[#allocation304_spill] sm:$0xff] %v8810_v11 }
0x13bf   : > { %v3296_v1 = vpop.permute.xlu1 %3295 }
0x13c0   : > { %v3304_v35 = vmul.f32 %v3296_v1, %v7484_v40  ;;  %v3303_v24 = vmul.f32 %v3296_v1, %v7464_v32  ;;  %v3302_v52 = vmul.f32 %v3296_v1, %v7452_v27  ;;  %v3306_v2 = vmul.f32 %v3296_v1, %v7575_v28 }
0x13c1   : > { %v3305_v4 = vmul.f32 %v3296_v1, %v7497_v44  ;;  %v8816_v1 = vpop.permute.xlu0 %2458 }
0x13c2   : > { %3326 = vrot.lane.b32.xlu2 %v3304_v35, %s7239_s16  ;;  %3324 = vrot.lane.b32.xlu1 %v3303_v24, %s7239_s16  ;;  %v3308_v24 = vmul.f32 %v3300_v48, %v7517_v51  ;;  %13080 = vst [vmem:[#allocation305_spill] sm:$0xff] %v8816_v1 }
0x13c3   : > { %3322 = vrot.lane.b32.xlu0 %v3302_v52, %s7239_s16  ;;  %v3311_v52 = vmul.f32 %v3300_v48, %v7597_v33 }
0x13ca   : > { %3332 = vrot.lane.b32.xlu2 %v3307_v26, %s7239_s16  ;;  %3330 = vrot.lane.b32.xlu1 %v3306_v2, %s7239_s16 }
0x13cb   : > { %3328 = vrot.lane.b32.xlu0 %v3305_v4, %s7239_s16 }
0x13d2   : > { %3338 = vrot.lane.b32.xlu2 %v3310_v7, %s7239_s16  ;;  %3336 = vrot.lane.b32.xlu1 %v3309_v14, %s7239_s16  ;;  %v7240_v7 = vmov 41  }
0x13d3   : > { %3334 = vrot.lane.b32.xlu0 %v3308_v24, %s7239_s16  ;;  %v8830_v24 = vpop.permute.xlu0 %2464 }
0x13d4   : > { %13087 = vst [vmem:[#allocation312_spill] sm:$0xff] %v8830_v24 }
0x13da   : > { %3372 = vperm.xlu2 %6987, %v8434_v47   ;;  %3368 = vperm.xlu1 %6986, %v8440_v58  }
0x13db   : > { %3340 = vrot.lane.b32.xlu0 %v3311_v52, %s7239_s16  ;;  %s7243_s16 = smov 87  }
0x13e2   : > { %6989 = vset.pattern.permute.xlu2 %v7240_v7  ;;  %6988 = vset.pattern.permute.xlu1 %v7240_v7 }
0x141c   : > { %v8818_v2 = vpop.permute.xlu2 %3326 }
0x141d   : > { %13081 = vst [vmem:[#allocation306_spill] sm:$0xff] %v8818_v2 }
0x1424   : > { %v8824_v26 = vpop.permute.xlu2 %3332 }
0x1425   : > { %13084 = vst [vmem:[#allocation309_spill] sm:$0xff] %v8824_v26  ;;  %v8838_v26 = vpop.permute.xlu0 %2519 }
0x1426   : > { %13088 = vst [vmem:[#allocation313_spill] sm:$0xff] %v8838_v26 }
0x142c   : > { %v8828_v48 = vpop.permute.xlu2 %3338 }
0x142d   : > { %13086 = vst [vmem:[#allocation311_spill] sm:$0xff] %v8828_v48 }
0x1434   : > { %v8820_v4 = vpop.permute.xlu1 %3324  ;;  %v3373_v7 = vpop.permute.xlu2 %3372 }
0x1435   : > { %13082 = vst [vmem:[#allocation307_spill] sm:$0xff] %v8820_v4  ;;  %v3381_v26 = vmul.f32 %v3373_v7, %v7517_v51 }
0x143c   : > { %v8822_v35 = vpop.permute.xlu1 %3330 }
0x143d   : > { %13083 = vst [vmem:[#allocation308_spill] sm:$0xff] %v8822_v35 }
0x1444   : > { %v8826_v14 = vpop.permute.xlu1 %3336 }
0x1445   : > { %13085 = vst [vmem:[#allocation310_spill] sm:$0xff] %v8826_v14  ;;  %v3380_v14 = vmul.f32 %v3373_v7, %v7526_v55 }
0x144c   : > { %v3369_v11 = vpop.permute.xlu1 %3368 }
0x144d   : > { %v3377_v52 = vmul.f32 %v3369_v11, %v7484_v40  ;;  %v3376_v2 = vmul.f32 %v3369_v11, %v7464_v32  ;;  %v3375_v4 = vmul.f32 %v3369_v11, %v7452_v27  ;;  %v3379_v48 = vmul.f32 %v3369_v11, %v7575_v28 }
0x144e   : > { %v3378_v35 = vmul.f32 %v3369_v11, %v7497_v44  ;;  %v3384_v11 = vmul.f32 %v3373_v7, %v7597_v33 }
0x144f   : > { %3399 = vrot.lane.b32.xlu2 %v3377_v52, %s12617_s28  ;;  %3397 = vrot.lane.b32.xlu1 %v3376_v2, %s12617_s28  ;;  %v3383_v52 = vmul.f32 %v3373_v7, %v7539_v59  ;;  %v3382_v2 = vmul.f32 %v3373_v7, %v7550_v5 }
0x1450   : > { %3395 = vrot.lane.b32.xlu0 %v3375_v4, %s12617_s28  ;;  %v8848_v4 = vpop.permute.xlu0 %2525 }
0x1451   : > { %13089 = vst [vmem:[#allocation314_spill] sm:$0xff] %v8848_v4 }
0x1457   : > { %3405 = vrot.lane.b32.xlu2 %v3380_v14, %s12617_s28  ;;  %3403 = vrot.lane.b32.xlu1 %v3379_v48, %s12617_s28 }
0x1458   : > { %3401 = vrot.lane.b32.xlu0 %v3378_v35, %s12617_s28  ;;  %v8857_v35 = vpop.permute.xlu0 %2531 }
0x1459   : > { %13090 = vst [vmem:[#allocation315_spill] sm:$0xff] %v8857_v35 }
0x145f   : > { %3411 = vrot.lane.b32.xlu2 %v3383_v52, %s12617_s28  ;;  %3409 = vrot.lane.b32.xlu1 %v3382_v2, %s12617_s28  ;;  %v7242_v2 = vmov 42  }
0x1460   : > { %3407 = vrot.lane.b32.xlu0 %v3381_v26, %s12617_s28  ;;  %v8872_v24 = vpop.permute.xlu0 %2537 }
0x1461   : > { %13097 = vst [vmem:[#allocation322_spill] sm:$0xff] %v8872_v24 }
0x1467   : > { %3445 = vperm.xlu2 %6989, %v8434_v47   ;;  %3441 = vperm.xlu1 %6988, %v8440_v58  }
0x1468   : > { %3413 = vrot.lane.b32.xlu0 %v3384_v11, %s12617_s28  ;;  %s7253_s28 = smov 82  }
0x146f   : > { %6991 = vset.pattern.permute.xlu2 %v7242_v2  ;;  %6990 = vset.pattern.permute.xlu1 %v7242_v2 }
0x14a9   : > { %v8860_v14 = vpop.permute.xlu2 %3399 }
0x14aa   : > { %13091 = vst [vmem:[#allocation316_spill] sm:$0xff] %v8860_v14 }
0x14b1   : > { %v8866_v52 = vpop.permute.xlu2 %3405 }
0x14b2   : > { %13094 = vst [vmem:[#allocation319_spill] sm:$0xff] %v8866_v52 }
0x14b9   : > { %v8870_v7 = vpop.permute.xlu2 %3411 }
0x14ba   : > { %13096 = vst [vmem:[#allocation321_spill] sm:$0xff] %v8870_v7 }
0x14c1   : > { %v8862_v48 = vpop.permute.xlu1 %3397  ;;  %v3446_v52 = vpop.permute.xlu2 %3445 }
0x14c2   : > { %13092 = vst [vmem:[#allocation317_spill] sm:$0xff] %v8862_v48  ;;  %v3453_v2 = vmul.f32 %v3446_v52, %v7526_v55  ;;  %v3456_v24 = vmul.f32 %v3446_v52, %v7539_v59  ;;  %v3455_v1 = vmul.f32 %v3446_v52, %v7550_v5 }
0x14c9   : > { %v8864_v4 = vpop.permute.xlu1 %3403 }
0x14ca   : > { %13093 = vst [vmem:[#allocation318_spill] sm:$0xff] %v8864_v4  ;;  %v8877_v4 = vpop.permute.xlu0 %2592 }
0x14cb   : > { %13098 = vst [vmem:[#allocation323_spill] sm:$0xff] %v8877_v4 }
0x14d1   : > { %v8868_v26 = vpop.permute.xlu1 %3409 }
0x14d2   : > { %13095 = vst [vmem:[#allocation320_spill] sm:$0xff] %v8868_v26  ;;  %v8884_v29 = vpop.permute.xlu0 %2598 }
0x14d3   : > { %13099 = vst [vmem:[#allocation324_spill] sm:$0xff] %v8884_v29 }
0x14d9   : > { %v3442_v35 = vpop.permute.xlu1 %3441 }
0x14da   : > { %v3450_v11 = vmul.f32 %v3442_v35, %v7484_v40  ;;  %v3449_v14 = vmul.f32 %v3442_v35, %v7464_v32  ;;  %v3448_v48 = vmul.f32 %v3442_v35, %v7452_v27  ;;  %v3452_v26 = vmul.f32 %v3442_v35, %v7575_v28 }
0x14db   : > { %v3451_v7 = vmul.f32 %v3442_v35, %v7497_v44  ;;  %v8890_v35 = vpop.permute.xlu0 %2604 }
0x14dc   : > { %3472 = vrot.lane.b32.xlu2 %v3450_v11, %s7243_s16  ;;  %3470 = vrot.lane.b32.xlu1 %v3449_v14, %s7243_s16  ;;  %v3454_v14 = vmul.f32 %v3446_v52, %v7517_v51  ;;  %13100 = vst [vmem:[#allocation325_spill] sm:$0xff] %v8890_v35 }
0x14dd   : > { %3468 = vrot.lane.b32.xlu0 %v3448_v48, %s7243_s16  ;;  %v3457_v48 = vmul.f32 %v3446_v52, %v7597_v33 }
0x14e4   : > { %3478 = vrot.lane.b32.xlu2 %v3453_v2, %s7243_s16  ;;  %3476 = vrot.lane.b32.xlu1 %v3452_v26, %s7243_s16 }
0x14e5   : > { %3474 = vrot.lane.b32.xlu0 %v3451_v7, %s7243_s16 }
0x14ec   : > { %3484 = vrot.lane.b32.xlu2 %v3456_v24, %s7243_s16  ;;  %3482 = vrot.lane.b32.xlu1 %v3455_v1, %s7243_s16  ;;  %v7244_v24 = vmov 43  }
0x14ed   : > { %3480 = vrot.lane.b32.xlu0 %v3454_v14, %s7243_s16 }
0x14f4   : > { %3518 = vperm.xlu2 %6991, %v8434_v47   ;;  %3514 = vperm.xlu1 %6990, %v8440_v58   ;;  %v8904_v47 = vpop.permute.xlu0 %2610 }
0x14f5   : > { %3486 = vrot.lane.b32.xlu0 %v3457_v48, %s7243_s16  ;;  %13107 = vst [vmem:[#allocation332_spill] sm:$0xff] %v8904_v47  ;;  %s7245_s16 = smov 86  }
0x14fc   : > { %6993 = vset.pattern.permute.xlu2 %v7244_v24  ;;  %6992 = vset.pattern.permute.xlu1 %v7244_v24 }
0x1536   : > { %v8892_v26 = vpop.permute.xlu2 %3472 }
0x1537   : > { %13101 = vst [vmem:[#allocation326_spill] sm:$0xff] %v8892_v26 }
0x153e   : > { %v8898_v2 = vpop.permute.xlu2 %3478 }
0x153f   : > { %13104 = vst [vmem:[#allocation329_spill] sm:$0xff] %v8898_v2 }
0x1546   : > { %v8902_v52 = vpop.permute.xlu2 %3484 }
0x1547   : > { %13106 = vst [vmem:[#allocation331_spill] sm:$0xff] %v8902_v52 }
0x154e   : > { %v8894_v7 = vpop.permute.xlu1 %3470  ;;  %v3519_v2 = vpop.permute.xlu2 %3518 }
0x154f   : > { %13102 = vst [vmem:[#allocation327_spill] sm:$0xff] %v8894_v7  ;;  %v3526_v24 = vmul.f32 %v3519_v2, %v7526_v55  ;;  %v3529_v26 = vmul.f32 %v3519_v2, %v7539_v59  ;;  %v3528_v47 = vmul.f32 %v3519_v2, %v7550_v5 }
0x1556   : > { %v8896_v11 = vpop.permute.xlu1 %3476 }
0x1557   : > { %13103 = vst [vmem:[#allocation328_spill] sm:$0xff] %v8896_v11  ;;  %v8909_v11 = vpop.permute.xlu0 %2665 }
0x1558   : > { %13108 = vst [vmem:[#allocation333_spill] sm:$0xff] %v8909_v11 }
0x155e   : > { %v8900_v1 = vpop.permute.xlu1 %3482 }
0x155f   : > { %13105 = vst [vmem:[#allocation330_spill] sm:$0xff] %v8900_v1  ;;  %v8916_v35 = vpop.permute.xlu0 %2671 }
0x1560   : > { %13109 = vst [vmem:[#allocation334_spill] sm:$0xff] %v8916_v35 }
0x1566   : > { %v3515_v58 = vpop.permute.xlu1 %3514 }
0x1567   : > { %v3523_v14 = vmul.f32 %v3515_v58, %v7484_v40  ;;  %v3522_v48 = vmul.f32 %v3515_v58, %v7464_v32  ;;  %v3521_v7 = vmul.f32 %v3515_v58, %v7452_v27  ;;  %v3525_v1 = vmul.f32 %v3515_v58, %v7575_v28 }
0x1568   : > { %v3524_v52 = vmul.f32 %v3515_v58, %v7497_v44  ;;  %v8923_v58 = vld [vmem:[%s12376_s2 + $0x8] sm:$0xff] }
0x1569   : > { %3545 = vrot.lane.b32.xlu2 %v3523_v14, %s7245_s16  ;;  %3543 = vrot.lane.b32.xlu1 %v3522_v48, %s7245_s16  ;;  %v3530_v14 = vmul.f32 %v3519_v2, %v7597_v33 }
0x156a   : > { %3541 = vrot.lane.b32.xlu0 %v3521_v7, %s7245_s16  ;;  %v3527_v7 = vmul.f32 %v3519_v2, %v7517_v51 }
0x1571   : > { %3551 = vrot.lane.b32.xlu2 %v3526_v24, %s7245_s16  ;;  %3549 = vrot.lane.b32.xlu1 %v3525_v1, %s7245_s16  ;;  %v8929_v1 = vld [vmem:[%s12376_s2] sm:$0xff]  ;;  %v7246_v24 = vmov 44  }
0x1572   : > { %3547 = vrot.lane.b32.xlu0 %v3524_v52, %s7245_s16  ;;  %v8932_v52 = vpop.permute.xlu0 %2677 }
0x1573   : > { %13110 = vst [vmem:[#allocation335_spill] sm:$0xff] %v8932_v52 }
0x1579   : > { %3557 = vrot.lane.b32.xlu2 %v3529_v26, %s7245_s16  ;;  %3555 = vrot.lane.b32.xlu1 %v3528_v47, %s7245_s16 }
0x157a   : > { %3553 = vrot.lane.b32.xlu0 %v3527_v7, %s7245_s16  ;;  %v8946_v11 = vpop.permute.xlu0 %2683 }
0x157b   : > { %13117 = vst [vmem:[#allocation342_spill] sm:$0xff] %v8946_v11 }
0x1581   : > { %3591 = vperm.xlu2 %6993, %v8923_v58   ;;  %3587 = vperm.xlu1 %6992, %v8929_v1  }
0x1582   : > { %3559 = vrot.lane.b32.xlu0 %v3530_v14, %s7245_s16  ;;  %s7255_s16 = smov 81  }
0x1589   : > { %6995 = vset.pattern.permute.xlu2 %v7246_v24  ;;  %6994 = vset.pattern.permute.xlu1 %v7246_v24 }
0x15c3   : > { %v8934_v26 = vpop.permute.xlu2 %3545 }
0x15c4   : > { %13111 = vst [vmem:[#allocation336_spill] sm:$0xff] %v8934_v26 }
0x15cb   : > { %v8940_v48 = vpop.permute.xlu2 %3551 }
0x15cc   : > { %13114 = vst [vmem:[#allocation339_spill] sm:$0xff] %v8940_v48 }
0x15d3   : > { %v8944_v35 = vpop.permute.xlu2 %3557 }
0x15d4   : > { %13116 = vst [vmem:[#allocation341_spill] sm:$0xff] %v8944_v35 }
0x15db   : > { %v8936_v2 = vpop.permute.xlu1 %3543  ;;  %v3592_v48 = vpop.permute.xlu2 %3591 }
0x15dc   : > { %13112 = vst [vmem:[#allocation337_spill] sm:$0xff] %v8936_v2  ;;  %v3599_v24 = vmul.f32 %v3592_v48, %v7526_v55  ;;  %v3602_v11 = vmul.f32 %v3592_v48, %v7539_v59  ;;  %v3601_v52 = vmul.f32 %v3592_v48, %v7550_v5 }
0x15e3   : > { %v8938_v47 = vpop.permute.xlu1 %3549 }
0x15e4   : > { %13113 = vst [vmem:[#allocation338_spill] sm:$0xff] %v8938_v47  ;;  %v8951_v47 = vpop.permute.xlu0 %2738 }
0x15e5   : > { %13118 = vst [vmem:[#allocation343_spill] sm:$0xff] %v8951_v47 }
0x15eb   : > { %v8942_v7 = vpop.permute.xlu1 %3555 }
0x15ec   : > { %13115 = vst [vmem:[#allocation340_spill] sm:$0xff] %v8942_v7  ;;  %v8958_v4 = vpop.permute.xlu0 %2744 }
0x15ed   : > { %13119 = vst [vmem:[#allocation344_spill] sm:$0xff] %v8958_v4 }
0x15f3   : > { %v3588_v29 = vpop.permute.xlu1 %3587 }
0x15f4   : > { %v3596_v14 = vmul.f32 %v3588_v29, %v7484_v40  ;;  %v3595_v26 = vmul.f32 %v3588_v29, %v7464_v32  ;;  %v3594_v2 = vmul.f32 %v3588_v29, %v7452_v27  ;;  %v3598_v7 = vmul.f32 %v3588_v29, %v7575_v28 }
0x15f5   : > { %v3597_v35 = vmul.f32 %v3588_v29, %v7497_v44  ;;  %v8964_v29 = vpop.permute.xlu0 %2750 }
0x15f6   : > { %3618 = vrot.lane.b32.xlu2 %v3596_v14, %s7247_s26  ;;  %3616 = vrot.lane.b32.xlu1 %v3595_v26, %s7247_s26  ;;  %v3600_v26 = vmul.f32 %v3592_v48, %v7517_v51  ;;  %13120 = vst [vmem:[#allocation345_spill] sm:$0xff] %v8964_v29 }
0x15f7   : > { %3614 = vrot.lane.b32.xlu0 %v3594_v2, %s7247_s26  ;;  %v3603_v2 = vmul.f32 %v3592_v48, %v7597_v33 }
0x15fe   : > { %3624 = vrot.lane.b32.xlu2 %v3599_v24, %s7247_s26  ;;  %3622 = vrot.lane.b32.xlu1 %v3598_v7, %s7247_s26 }
0x15ff   : > { %3620 = vrot.lane.b32.xlu0 %v3597_v35, %s7247_s26 }
0x1606   : > { %3630 = vrot.lane.b32.xlu2 %v3602_v11, %s7247_s26  ;;  %3628 = vrot.lane.b32.xlu1 %v3601_v52, %s7247_s26  ;;  %v7248_v11 = vmov 45  }
0x1607   : > { %3626 = vrot.lane.b32.xlu0 %v3600_v26, %s7247_s26  ;;  %v8978_v26 = vpop.permute.xlu0 %2756 }
0x1608   : > { %13127 = vst [vmem:[#allocation352_spill] sm:$0xff] %v8978_v26 }
0x160e   : > { %3664 = vperm.xlu2 %6995, %v8923_v58   ;;  %3660 = vperm.xlu1 %6994, %v8929_v1  }
0x160f   : > { %3632 = vrot.lane.b32.xlu0 %v3603_v2, %s7247_s26  ;;  %s12710_s26 = smov 80  }
0x1616   : > { %6997 = vset.pattern.permute.xlu2 %v7248_v11  ;;  %6996 = vset.pattern.permute.xlu1 %v7248_v11 }
0x1650   : > { %v8966_v35 = vpop.permute.xlu2 %3618 }
0x1651   : > { %13121 = vst [vmem:[#allocation346_spill] sm:$0xff] %v8966_v35 }
0x1658   : > { %v8972_v24 = vpop.permute.xlu2 %3624 }
0x1659   : > { %13124 = vst [vmem:[#allocation349_spill] sm:$0xff] %v8972_v24  ;;  %v8986_v24 = vpop.permute.xlu0 %2811 }
0x165a   : > { %13128 = vst [vmem:[#allocation353_spill] sm:$0xff] %v8986_v24 }
0x1660   : > { %v8976_v48 = vpop.permute.xlu2 %3630 }
0x1661   : > { %13126 = vst [vmem:[#allocation351_spill] sm:$0xff] %v8976_v48 }
0x1668   : > { %v8968_v7 = vpop.permute.xlu1 %3616  ;;  %v3665_v11 = vpop.permute.xlu2 %3664 }
0x1669   : > { %13122 = vst [vmem:[#allocation347_spill] sm:$0xff] %v8968_v7  ;;  %v3673_v24 = vmul.f32 %v3665_v11, %v7517_v51 }
0x1670   : > { %v8970_v14 = vpop.permute.xlu1 %3622 }
0x1671   : > { %13123 = vst [vmem:[#allocation348_spill] sm:$0xff] %v8970_v14 }
0x1678   : > { %v8974_v52 = vpop.permute.xlu1 %3628 }
0x1679   : > { %13125 = vst [vmem:[#allocation350_spill] sm:$0xff] %v8974_v52  ;;  %v3672_v52 = vmul.f32 %v3665_v11, %v7526_v55 }
0x1680   : > { %v3661_v4 = vpop.permute.xlu1 %3660 }
0x1681   : > { %v3669_v2 = vmul.f32 %v3661_v4, %v7484_v40  ;;  %v3668_v35 = vmul.f32 %v3661_v4, %v7464_v32  ;;  %v3667_v7 = vmul.f32 %v3661_v4, %v7452_v27  ;;  %v3671_v48 = vmul.f32 %v3661_v4, %v7575_v28 }
0x1682   : > { %v3670_v14 = vmul.f32 %v3661_v4, %v7497_v44  ;;  %v3676_v4 = vmul.f32 %v3665_v11, %v7597_v33 }
0x1683   : > { %3691 = vrot.lane.b32.xlu2 %v3669_v2, %s12712_s14  ;;  %3689 = vrot.lane.b32.xlu1 %v3668_v35, %s12712_s14  ;;  %v3675_v2 = vmul.f32 %v3665_v11, %v7539_v59  ;;  %v3674_v35 = vmul.f32 %v3665_v11, %v7550_v5 }
0x1684   : > { %3687 = vrot.lane.b32.xlu0 %v3667_v7, %s12712_s14  ;;  %v8996_v7 = vpop.permute.xlu0 %2817 }
0x1685   : > { %13129 = vst [vmem:[#allocation354_spill] sm:$0xff] %v8996_v7 }
0x168b   : > { %3697 = vrot.lane.b32.xlu2 %v3672_v52, %s12712_s14  ;;  %3695 = vrot.lane.b32.xlu1 %v3671_v48, %s12712_s14 }
0x168c   : > { %3693 = vrot.lane.b32.xlu0 %v3670_v14, %s12712_s14  ;;  %v9005_v14 = vpop.permute.xlu0 %2823 }
0x168d   : > { %13130 = vst [vmem:[#allocation355_spill] sm:$0xff] %v9005_v14 }
0x1693   : > { %3703 = vrot.lane.b32.xlu2 %v3675_v2, %s12712_s14  ;;  %3701 = vrot.lane.b32.xlu1 %v3674_v35, %s12712_s14  ;;  %v7250_v35 = vmov 46  }
0x1694   : > { %3699 = vrot.lane.b32.xlu0 %v3673_v24, %s12712_s14  ;;  %v9020_v26 = vpop.permute.xlu0 %2829 }
0x1695   : > { %13137 = vst [vmem:[#allocation362_spill] sm:$0xff] %v9020_v26 }
0x169b   : > { %3737 = vperm.xlu2 %6997, %v8923_v58   ;;  %3733 = vperm.xlu1 %6996, %v8929_v1  }
0x169c   : > { %3705 = vrot.lane.b32.xlu0 %v3676_v4, %s12712_s14  ;;  %s7275_s14 = smov 71  }
0x16a3   : > { %6999 = vset.pattern.permute.xlu2 %v7250_v35  ;;  %6998 = vset.pattern.permute.xlu1 %v7250_v35 }
0x16dd   : > { %v9008_v52 = vpop.permute.xlu2 %3691 }
0x16de   : > { %13131 = vst [vmem:[#allocation356_spill] sm:$0xff] %v9008_v52 }
0x16e5   : > { %v9014_v2 = vpop.permute.xlu2 %3697 }
0x16e6   : > { %13134 = vst [vmem:[#allocation359_spill] sm:$0xff] %v9014_v2 }
0x16ed   : > { %v9018_v11 = vpop.permute.xlu2 %3703 }
0x16ee   : > { %13136 = vst [vmem:[#allocation361_spill] sm:$0xff] %v9018_v11 }
0x16f5   : > { %v9010_v48 = vpop.permute.xlu1 %3689  ;;  %v3738_v2 = vpop.permute.xlu2 %3737 }
0x16f6   : > { %13132 = vst [vmem:[#allocation357_spill] sm:$0xff] %v9010_v48  ;;  %v3745_v35 = vmul.f32 %v3738_v2, %v7526_v55  ;;  %v3748_v26 = vmul.f32 %v3738_v2, %v7539_v59  ;;  %v3747_v29 = vmul.f32 %v3738_v2, %v7550_v5 }
0x16fd   : > { %v9012_v7 = vpop.permute.xlu1 %3695 }
0x16fe   : > { %13133 = vst [vmem:[#allocation358_spill] sm:$0xff] %v9012_v7  ;;  %v9025_v7 = vpop.permute.xlu0 %2884 }
0x16ff   : > { %13138 = vst [vmem:[#allocation363_spill] sm:$0xff] %v9025_v7 }
0x1705   : > { %v9016_v24 = vpop.permute.xlu1 %3701 }
0x1706   : > { %13135 = vst [vmem:[#allocation360_spill] sm:$0xff] %v9016_v24  ;;  %v9032_v47 = vpop.permute.xlu0 %2890 }
0x1707   : > { %13139 = vst [vmem:[#allocation364_spill] sm:$0xff] %v9032_v47 }
0x170d   : > { %v3734_v14 = vpop.permute.xlu1 %3733 }
0x170e   : > { %v3742_v4 = vmul.f32 %v3734_v14, %v7484_v40  ;;  %v3741_v52 = vmul.f32 %v3734_v14, %v7464_v32  ;;  %v3740_v48 = vmul.f32 %v3734_v14, %v7452_v27  ;;  %v3744_v24 = vmul.f32 %v3734_v14, %v7575_v28 }
0x170f   : > { %v3743_v11 = vmul.f32 %v3734_v14, %v7497_v44  ;;  %v9038_v14 = vpop.permute.xlu0 %2896 }
0x1710   : > { %3764 = vrot.lane.b32.xlu2 %v3742_v4, %s7251_s17  ;;  %3762 = vrot.lane.b32.xlu1 %v3741_v52, %s7251_s17  ;;  %v3746_v52 = vmul.f32 %v3738_v2, %v7517_v51  ;;  %13140 = vst [vmem:[#allocation365_spill] sm:$0xff] %v9038_v14 }
0x1711   : > { %3760 = vrot.lane.b32.xlu0 %v3740_v48, %s7251_s17  ;;  %v3749_v48 = vmul.f32 %v3738_v2, %v7597_v33 }
0x1718   : > { %3770 = vrot.lane.b32.xlu2 %v3745_v35, %s7251_s17  ;;  %3768 = vrot.lane.b32.xlu1 %v3744_v24, %s7251_s17 }
0x1719   : > { %3766 = vrot.lane.b32.xlu0 %v3743_v11, %s7251_s17 }
0x1720   : > { %3776 = vrot.lane.b32.xlu2 %v3748_v26, %s7251_s17  ;;  %3774 = vrot.lane.b32.xlu1 %v3747_v29, %s7251_s17  ;;  %v7252_v26 = vmov 47  }
0x1721   : > { %3772 = vrot.lane.b32.xlu0 %v3746_v52, %s7251_s17  ;;  %v9052_v52 = vpop.permute.xlu0 %2902 }
0x1722   : > { %13147 = vst [vmem:[#allocation372_spill] sm:$0xff] %v9052_v52 }
0x1728   : > { %3810 = vperm.xlu2 %6999, %v8923_v58   ;;  %3806 = vperm.xlu1 %6998, %v8929_v1  }
0x1729   : > { %3778 = vrot.lane.b32.xlu0 %v3749_v48, %s7251_s17  ;;  %s7259_s17 = smov 79  }
0x1730   : > { %7001 = vset.pattern.permute.xlu2 %v7252_v26  ;;  %7000 = vset.pattern.permute.xlu1 %v7252_v26 }
0x176a   : > { %v9040_v24 = vpop.permute.xlu2 %3764 }
0x176b   : > { %13141 = vst [vmem:[#allocation366_spill] sm:$0xff] %v9040_v24 }
0x1772   : > { %v9046_v35 = vpop.permute.xlu2 %3770 }
0x1773   : > { %13144 = vst [vmem:[#allocation369_spill] sm:$0xff] %v9046_v35 }
0x177a   : > { %v9050_v2 = vpop.permute.xlu2 %3776 }
0x177b   : > { %13146 = vst [vmem:[#allocation371_spill] sm:$0xff] %v9050_v2 }
0x1782   : > { %v9042_v11 = vpop.permute.xlu1 %3762  ;;  %v3811_v35 = vpop.permute.xlu2 %3810 }
0x1783   : > { %13142 = vst [vmem:[#allocation367_spill] sm:$0xff] %v9042_v11  ;;  %v3818_v26 = vmul.f32 %v3811_v35, %v7526_v55  ;;  %v3821_v52 = vmul.f32 %v3811_v35, %v7539_v59  ;;  %v3820_v14 = vmul.f32 %v3811_v35, %v7550_v5 }
0x178a   : > { %v9044_v4 = vpop.permute.xlu1 %3768 }
0x178b   : > { %13143 = vst [vmem:[#allocation368_spill] sm:$0xff] %v9044_v4  ;;  %v9057_v4 = vpop.permute.xlu0 %2957 }
0x178c   : > { %13148 = vst [vmem:[#allocation373_spill] sm:$0xff] %v9057_v4 }
0x1792   : > { %v9048_v29 = vpop.permute.xlu1 %3774 }
0x1793   : > { %13145 = vst [vmem:[#allocation370_spill] sm:$0xff] %v9048_v29  ;;  %v9064_v7 = vpop.permute.xlu0 %2963 }
0x1794   : > { %13149 = vst [vmem:[#allocation374_spill] sm:$0xff] %v9064_v7 }
0x179a   : > { %v3807_v47 = vpop.permute.xlu1 %3806 }
0x179b   : > { %v3815_v48 = vmul.f32 %v3807_v47, %v7484_v40  ;;  %v3814_v24 = vmul.f32 %v3807_v47, %v7464_v32  ;;  %v3813_v11 = vmul.f32 %v3807_v47, %v7452_v27  ;;  %v3817_v29 = vmul.f32 %v3807_v47, %v7575_v28 }
0x179c   : > { %v3816_v2 = vmul.f32 %v3807_v47, %v7497_v44  ;;  %v9070_v47 = vpop.permute.xlu0 %2969 }
0x179d   : > { %3837 = vrot.lane.b32.xlu2 %v3815_v48, %s7253_s28  ;;  %3835 = vrot.lane.b32.xlu1 %v3814_v24, %s7253_s28  ;;  %v3819_v24 = vmul.f32 %v3811_v35, %v7517_v51  ;;  %13150 = vst [vmem:[#allocation375_spill] sm:$0xff] %v9070_v47 }
0x179e   : > { %3833 = vrot.lane.b32.xlu0 %v3813_v11, %s7253_s28  ;;  %v3822_v11 = vmul.f32 %v3811_v35, %v7597_v33 }
0x17a5   : > { %3843 = vrot.lane.b32.xlu2 %v3818_v26, %s7253_s28  ;;  %3841 = vrot.lane.b32.xlu1 %v3817_v29, %s7253_s28 }
0x17a6   : > { %3839 = vrot.lane.b32.xlu0 %v3816_v2, %s7253_s28 }
0x17ad   : > { %3849 = vrot.lane.b32.xlu2 %v3821_v52, %s7253_s28  ;;  %3847 = vrot.lane.b32.xlu1 %v3820_v14, %s7253_s28  ;;  %v7254_v52 = vmov 48  }
0x17ae   : > { %3845 = vrot.lane.b32.xlu0 %v3819_v24, %s7253_s28  ;;  %v9084_v24 = vpop.permute.xlu0 %2975 }
0x17af   : > { %13157 = vst [vmem:[#allocation382_spill] sm:$0xff] %v9084_v24 }
0x17b5   : > { %3883 = vperm.xlu2 %7001, %v8923_v58   ;;  %3879 = vperm.xlu1 %7000, %v8929_v1  }
0x17b6   : > { %3851 = vrot.lane.b32.xlu0 %v3822_v11, %s7253_s28  ;;  %s7261_s28 = smov 78  }
0x17bd   : > { %7003 = vset.pattern.permute.xlu2 %v7254_v52  ;;  %7002 = vset.pattern.permute.xlu1 %v7254_v52 }
0x17f7   : > { %v9072_v29 = vpop.permute.xlu2 %3837 }
0x17f8   : > { %13151 = vst [vmem:[#allocation376_spill] sm:$0xff] %v9072_v29 }
0x17ff   : > { %v9078_v26 = vpop.permute.xlu2 %3843 }
0x1800   : > { %13154 = vst [vmem:[#allocation379_spill] sm:$0xff] %v9078_v26 }
0x1807   : > { %v9082_v35 = vpop.permute.xlu2 %3849 }
0x1808   : > { %13156 = vst [vmem:[#allocation381_spill] sm:$0xff] %v9082_v35 }
0x180f   : > { %v9074_v2 = vpop.permute.xlu1 %3835  ;;  %v3884_v26 = vpop.permute.xlu2 %3883 }
0x1810   : > { %13152 = vst [vmem:[#allocation377_spill] sm:$0xff] %v9074_v2  ;;  %v3891_v52 = vmul.f32 %v3884_v26, %v7526_v55  ;;  %v3894_v24 = vmul.f32 %v3884_v26, %v7539_v59  ;;  %v3893_v47 = vmul.f32 %v3884_v26, %v7550_v5 }
0x1817   : > { %v9076_v48 = vpop.permute.xlu1 %3841 }
0x1818   : > { %13153 = vst [vmem:[#allocation378_spill] sm:$0xff] %v9076_v48  ;;  %v9089_v48 = vpop.permute.xlu0 %3030 }
0x1819   : > { %13158 = vst [vmem:[#allocation383_spill] sm:$0xff] %v9089_v48 }
0x181f   : > { %v9080_v14 = vpop.permute.xlu1 %3847 }
0x1820   : > { %13155 = vst [vmem:[#allocation380_spill] sm:$0xff] %v9080_v14  ;;  %v9096_v4 = vpop.permute.xlu0 %3036 }
0x1821   : > { %13159 = vst [vmem:[#allocation384_spill] sm:$0xff] %v9096_v4 }
0x1827   : > { %v3880_v7 = vpop.permute.xlu1 %3879 }
0x1828   : > { %v3888_v11 = vmul.f32 %v3880_v7, %v7484_v40  ;;  %v3887_v29 = vmul.f32 %v3880_v7, %v7464_v32  ;;  %v3886_v2 = vmul.f32 %v3880_v7, %v7452_v27  ;;  %v3890_v14 = vmul.f32 %v3880_v7, %v7575_v28 }
0x1829   : > { %v3889_v35 = vmul.f32 %v3880_v7, %v7497_v44  ;;  %v9102_v7 = vpop.permute.xlu0 %3042 }
0x182a   : > { %3910 = vrot.lane.b32.xlu2 %v3888_v11, %s7255_s16  ;;  %3908 = vrot.lane.b32.xlu1 %v3887_v29, %s7255_s16  ;;  %v3892_v29 = vmul.f32 %v3884_v26, %v7517_v51  ;;  %13160 = vst [vmem:[#allocation385_spill] sm:$0xff] %v9102_v7 }
0x182b   : > { %3906 = vrot.lane.b32.xlu0 %v3886_v2, %s7255_s16  ;;  %v3895_v2 = vmul.f32 %v3884_v26, %v7597_v33 }
0x1832   : > { %3916 = vrot.lane.b32.xlu2 %v3891_v52, %s7255_s16  ;;  %3914 = vrot.lane.b32.xlu1 %v3890_v14, %s7255_s16 }
0x1833   : > { %3912 = vrot.lane.b32.xlu0 %v3889_v35, %s7255_s16 }
0x183a   : > { %3922 = vrot.lane.b32.xlu2 %v3894_v24, %s7255_s16  ;;  %3920 = vrot.lane.b32.xlu1 %v3893_v47, %s7255_s16  ;;  %v7256_v24 = vmov 49  }
0x183b   : > { %3918 = vrot.lane.b32.xlu0 %v3892_v29, %s7255_s16  ;;  %v9116_v29 = vpop.permute.xlu0 %3048 }
0x183c   : > { %13167 = vst [vmem:[#allocation392_spill] sm:$0xff] %v9116_v29 }
0x1842   : > { %3956 = vperm.xlu2 %7003, %v8923_v58   ;;  %3952 = vperm.xlu1 %7002, %v8929_v1  }
0x1843   : > { %3924 = vrot.lane.b32.xlu0 %v3895_v2, %s7255_s16  ;;  %s7263_s16 = smov 77  }
0x184a   : > { %7005 = vset.pattern.permute.xlu2 %v7256_v24  ;;  %7004 = vset.pattern.permute.xlu1 %v7256_v24 }
0x1884   : > { %v9104_v14 = vpop.permute.xlu2 %3910 }
0x1885   : > { %13161 = vst [vmem:[#allocation386_spill] sm:$0xff] %v9104_v14 }
0x188c   : > { %v9110_v52 = vpop.permute.xlu2 %3916 }
0x188d   : > { %13164 = vst [vmem:[#allocation389_spill] sm:$0xff] %v9110_v52  ;;  %v9124_v52 = vpop.permute.xlu0 %3103 }
0x188e   : > { %13168 = vst [vmem:[#allocation393_spill] sm:$0xff] %v9124_v52 }
0x1894   : > { %v9114_v26 = vpop.permute.xlu2 %3922 }
0x1895   : > { %13166 = vst [vmem:[#allocation391_spill] sm:$0xff] %v9114_v26 }
0x189c   : > { %v9106_v35 = vpop.permute.xlu1 %3908  ;;  %v3957_v24 = vpop.permute.xlu2 %3956 }
0x189d   : > { %13162 = vst [vmem:[#allocation387_spill] sm:$0xff] %v9106_v35  ;;  %v3965_v52 = vmul.f32 %v3957_v24, %v7517_v51 }
0x18a4   : > { %v9108_v11 = vpop.permute.xlu1 %3914 }
0x18a5   : > { %13163 = vst [vmem:[#allocation388_spill] sm:$0xff] %v9108_v11 }
0x18ac   : > { %v9112_v47 = vpop.permute.xlu1 %3920 }
0x18ad   : > { %13165 = vst [vmem:[#allocation390_spill] sm:$0xff] %v9112_v47  ;;  %v3964_v47 = vmul.f32 %v3957_v24, %v7526_v55 }
0x18b4   : > { %v3953_v4 = vpop.permute.xlu1 %3952 }
0x18b5   : > { %v3961_v2 = vmul.f32 %v3953_v4, %v7484_v40  ;;  %v3960_v14 = vmul.f32 %v3953_v4, %v7464_v32  ;;  %v3959_v35 = vmul.f32 %v3953_v4, %v7452_v27  ;;  %v3963_v26 = vmul.f32 %v3953_v4, %v7575_v28 }
0x18b6   : > { %v3962_v11 = vmul.f32 %v3953_v4, %v7497_v44  ;;  %v3968_v4 = vmul.f32 %v3957_v24, %v7597_v33 }
0x18b7   : > { %3983 = vrot.lane.b32.xlu2 %v3961_v2, %s12710_s26  ;;  %3981 = vrot.lane.b32.xlu1 %v3960_v14, %s12710_s26  ;;  %v3967_v2 = vmul.f32 %v3957_v24, %v7539_v59  ;;  %v3966_v14 = vmul.f32 %v3957_v24, %v7550_v5 }
0x18b8   : > { %3979 = vrot.lane.b32.xlu0 %v3959_v35, %s12710_s26  ;;  %v9134_v35 = vpop.permute.xlu0 %3109 }
0x18b9   : > { %13169 = vst [vmem:[#allocation394_spill] sm:$0xff] %v9134_v35 }
0x18bf   : > { %3989 = vrot.lane.b32.xlu2 %v3964_v47, %s12710_s26  ;;  %3987 = vrot.lane.b32.xlu1 %v3963_v26, %s12710_s26 }
0x18c0   : > { %3985 = vrot.lane.b32.xlu0 %v3962_v11, %s12710_s26  ;;  %v9143_v11 = vpop.permute.xlu0 %3115 }
0x18c1   : > { %13170 = vst [vmem:[#allocation395_spill] sm:$0xff] %v9143_v11 }
0x18c7   : > { %3995 = vrot.lane.b32.xlu2 %v3967_v2, %s12710_s26  ;;  %3993 = vrot.lane.b32.xlu1 %v3966_v14, %s12710_s26  ;;  %v7258_v14 = vmov 50  }
0x18c8   : > { %3991 = vrot.lane.b32.xlu0 %v3965_v52, %s12710_s26  ;;  %v9158_v29 = vpop.permute.xlu0 %3121 }
0x18c9   : > { %13177 = vst [vmem:[#allocation402_spill] sm:$0xff] %v9158_v29 }
0x18cf   : > { %4029 = vperm.xlu2 %7005, %v8923_v58   ;;  %4025 = vperm.xlu1 %7004, %v8929_v1  }
0x18d0   : > { %3997 = vrot.lane.b32.xlu0 %v3968_v4, %s12710_s26  ;;  %s7277_s26 = smov 70  }
0x18d7   : > { %7007 = vset.pattern.permute.xlu2 %v7258_v14  ;;  %7006 = vset.pattern.permute.xlu1 %v7258_v14 }
0x1911   : > { %v9146_v47 = vpop.permute.xlu2 %3983 }
0x1912   : > { %13171 = vst [vmem:[#allocation396_spill] sm:$0xff] %v9146_v47 }
0x1919   : > { %v9152_v2 = vpop.permute.xlu2 %3989 }
0x191a   : > { %13174 = vst [vmem:[#allocation399_spill] sm:$0xff] %v9152_v2 }
0x1921   : > { %v9156_v24 = vpop.permute.xlu2 %3995 }
0x1922   : > { %13176 = vst [vmem:[#allocation401_spill] sm:$0xff] %v9156_v24 }
0x1929   : > { %v9148_v26 = vpop.permute.xlu1 %3981  ;;  %v4030_v2 = vpop.permute.xlu2 %4029 }
0x192a   : > { %13172 = vst [vmem:[#allocation397_spill] sm:$0xff] %v9148_v26  ;;  %v4037_v14 = vmul.f32 %v4030_v2, %v7526_v55  ;;  %v4040_v29 = vmul.f32 %v4030_v2, %v7539_v59  ;;  %v4039_v7 = vmul.f32 %v4030_v2, %v7550_v5 }
0x1931   : > { %v9150_v35 = vpop.permute.xlu1 %3987 }
0x1932   : > { %13173 = vst [vmem:[#allocation398_spill] sm:$0xff] %v9150_v35  ;;  %v9163_v35 = vpop.permute.xlu0 %3176 }
0x1933   : > { %13178 = vst [vmem:[#allocation403_spill] sm:$0xff] %v9163_v35 }
0x1939   : > { %v9154_v52 = vpop.permute.xlu1 %3993 }
0x193a   : > { %13175 = vst [vmem:[#allocation400_spill] sm:$0xff] %v9154_v52  ;;  %v9170_v48 = vpop.permute.xlu0 %3182 }
0x193b   : > { %13179 = vst [vmem:[#allocation404_spill] sm:$0xff] %v9170_v48 }
0x1941   : > { %v4026_v11 = vpop.permute.xlu1 %4025 }
0x1942   : > { %v4034_v4 = vmul.f32 %v4026_v11, %v7484_v40  ;;  %v4033_v47 = vmul.f32 %v4026_v11, %v7464_v32  ;;  %v4032_v26 = vmul.f32 %v4026_v11, %v7452_v27  ;;  %v4036_v52 = vmul.f32 %v4026_v11, %v7575_v28 }
0x1943   : > { %v4035_v24 = vmul.f32 %v4026_v11, %v7497_v44  ;;  %v9176_v11 = vpop.permute.xlu0 %3188 }
0x1944   : > { %4056 = vrot.lane.b32.xlu2 %v4034_v4, %s7259_s17  ;;  %4054 = vrot.lane.b32.xlu1 %v4033_v47, %s7259_s17  ;;  %v4038_v47 = vmul.f32 %v4030_v2, %v7517_v51  ;;  %13180 = vst [vmem:[#allocation405_spill] sm:$0xff] %v9176_v11 }
0x1945   : > { %4052 = vrot.lane.b32.xlu0 %v4032_v26, %s7259_s17  ;;  %v4041_v26 = vmul.f32 %v4030_v2, %v7597_v33 }
0x194c   : > { %4062 = vrot.lane.b32.xlu2 %v4037_v14, %s7259_s17  ;;  %4060 = vrot.lane.b32.xlu1 %v4036_v52, %s7259_s17 }
0x194d   : > { %4058 = vrot.lane.b32.xlu0 %v4035_v24, %s7259_s17 }
0x1954   : > { %4068 = vrot.lane.b32.xlu2 %v4040_v29, %s7259_s17  ;;  %4066 = vrot.lane.b32.xlu1 %v4039_v7, %s7259_s17  ;;  %v7260_v29 = vmov 51  }
0x1955   : > { %4064 = vrot.lane.b32.xlu0 %v4038_v47, %s7259_s17  ;;  %v9190_v47 = vpop.permute.xlu0 %3194 }
0x1956   : > { %13187 = vst [vmem:[#allocation412_spill] sm:$0xff] %v9190_v47 }
0x195c   : > { %4102 = vperm.xlu2 %7007, %v8923_v58   ;;  %4098 = vperm.xlu1 %7006, %v8929_v1  }
0x195d   : > { %4070 = vrot.lane.b32.xlu0 %v4041_v26, %s7259_s17  ;;  %s12708_s17 = smov 76  }
0x1964   : > { %7009 = vset.pattern.permute.xlu2 %v7260_v29  ;;  %7008 = vset.pattern.permute.xlu1 %v7260_v29 }
0x199e   : > { %v9178_v52 = vpop.permute.xlu2 %4056 }
0x199f   : > { %13181 = vst [vmem:[#allocation406_spill] sm:$0xff] %v9178_v52 }
0x19a6   : > { %v9184_v14 = vpop.permute.xlu2 %4062 }
0x19a7   : > { %13184 = vst [vmem:[#allocation409_spill] sm:$0xff] %v9184_v14 }
0x19ae   : > { %v9188_v2 = vpop.permute.xlu2 %4068 }
0x19af   : > { %13186 = vst [vmem:[#allocation411_spill] sm:$0xff] %v9188_v2 }
0x19b6   : > { %v9180_v24 = vpop.permute.xlu1 %4054  ;;  %v4103_v14 = vpop.permute.xlu2 %4102 }
0x19b7   : > { %13182 = vst [vmem:[#allocation407_spill] sm:$0xff] %v9180_v24  ;;  %v4110_v29 = vmul.f32 %v4103_v14, %v7526_v55  ;;  %v4113_v47 = vmul.f32 %v4103_v14, %v7539_v59  ;;  %v4112_v11 = vmul.f32 %v4103_v14, %v7550_v5 }
0x19be   : > { %v9182_v4 = vpop.permute.xlu1 %4060 }
0x19bf   : > { %13183 = vst [vmem:[#allocation408_spill] sm:$0xff] %v9182_v4  ;;  %v9195_v4 = vpop.permute.xlu0 %3249 }
0x19c0   : > { %13188 = vst [vmem:[#allocation413_spill] sm:$0xff] %v9195_v4 }
0x19c6   : > { %v9186_v7 = vpop.permute.xlu1 %4066 }
0x19c7   : > { %13185 = vst [vmem:[#allocation410_spill] sm:$0xff] %v9186_v7  ;;  %v9202_v35 = vpop.permute.xlu0 %3255 }
0x19c8   : > { %13189 = vst [vmem:[#allocation414_spill] sm:$0xff] %v9202_v35 }
0x19ce   : > { %v4099_v48 = vpop.permute.xlu1 %4098 }
0x19cf   : > { %v4107_v26 = vmul.f32 %v4099_v48, %v7484_v40  ;;  %v4106_v52 = vmul.f32 %v4099_v48, %v7464_v32  ;;  %v4105_v24 = vmul.f32 %v4099_v48, %v7452_v27  ;;  %v4109_v7 = vmul.f32 %v4099_v48, %v7575_v28 }
0x19d0   : > { %v4108_v2 = vmul.f32 %v4099_v48, %v7497_v44  ;;  %v9208_v48 = vpop.permute.xlu0 %3261 }
0x19d1   : > { %4129 = vrot.lane.b32.xlu2 %v4107_v26, %s7261_s28  ;;  %4127 = vrot.lane.b32.xlu1 %v4106_v52, %s7261_s28  ;;  %v4111_v52 = vmul.f32 %v4103_v14, %v7517_v51  ;;  %13190 = vst [vmem:[#allocation415_spill] sm:$0xff] %v9208_v48 }
0x19d2   : > { %4125 = vrot.lane.b32.xlu0 %v4105_v24, %s7261_s28  ;;  %v4114_v24 = vmul.f32 %v4103_v14, %v7597_v33 }
0x19d9   : > { %4135 = vrot.lane.b32.xlu2 %v4110_v29, %s7261_s28  ;;  %4133 = vrot.lane.b32.xlu1 %v4109_v7, %s7261_s28 }
0x19da   : > { %4131 = vrot.lane.b32.xlu0 %v4108_v2, %s7261_s28 }
0x19e1   : > { %4141 = vrot.lane.b32.xlu2 %v4113_v47, %s7261_s28  ;;  %4139 = vrot.lane.b32.xlu1 %v4112_v11, %s7261_s28  ;;  %v7262_v47 = vmov 52  }
0x19e2   : > { %4137 = vrot.lane.b32.xlu0 %v4111_v52, %s7261_s28  ;;  %v9222_v52 = vpop.permute.xlu0 %3267 }
0x19e3   : > { %13197 = vst [vmem:[#allocation422_spill] sm:$0xff] %v9222_v52 }
0x19e9   : > { %4175 = vperm.xlu2 %7009, %v8923_v58   ;;  %4171 = vperm.xlu1 %7008, %v8929_v1  }
0x19ea   : > { %4143 = vrot.lane.b32.xlu0 %v4114_v24, %s7261_s28  ;;  %s7267_s28 = smov 75  }
0x19f1   : > { %7011 = vset.pattern.permute.xlu2 %v7262_v47  ;;  %7010 = vset.pattern.permute.xlu1 %v7262_v47 }
0x1a2b   : > { %v9210_v7 = vpop.permute.xlu2 %4129 }
0x1a2c   : > { %13191 = vst [vmem:[#allocation416_spill] sm:$0xff] %v9210_v7 }
0x1a33   : > { %v9216_v29 = vpop.permute.xlu2 %4135 }
0x1a34   : > { %13194 = vst [vmem:[#allocation419_spill] sm:$0xff] %v9216_v29 }
0x1a3b   : > { %v9220_v14 = vpop.permute.xlu2 %4141 }
0x1a3c   : > { %13196 = vst [vmem:[#allocation421_spill] sm:$0xff] %v9220_v14 }
0x1a43   : > { %v9212_v2 = vpop.permute.xlu1 %4127  ;;  %v4176_v29 = vpop.permute.xlu2 %4175 }
0x1a44   : > { %13192 = vst [vmem:[#allocation417_spill] sm:$0xff] %v9212_v2  ;;  %v4183_v47 = vmul.f32 %v4176_v29, %v7526_v55  ;;  %v4186_v52 = vmul.f32 %v4176_v29, %v7539_v59  ;;  %v4185_v48 = vmul.f32 %v4176_v29, %v7550_v5 }
0x1a4b   : > { %v9214_v26 = vpop.permute.xlu1 %4133 }
0x1a4c   : > { %13193 = vst [vmem:[#allocation418_spill] sm:$0xff] %v9214_v26  ;;  %v9227_v26 = vpop.permute.xlu0 %3322 }
0x1a4d   : > { %13198 = vst [vmem:[#allocation423_spill] sm:$0xff] %v9227_v26 }
0x1a53   : > { %v9218_v11 = vpop.permute.xlu1 %4139 }
0x1a54   : > { %13195 = vst [vmem:[#allocation420_spill] sm:$0xff] %v9218_v11  ;;  %v9234_v4 = vpop.permute.xlu0 %3328 }
0x1a55   : > { %13199 = vst [vmem:[#allocation424_spill] sm:$0xff] %v9234_v4 }
0x1a5b   : > { %v4172_v35 = vpop.permute.xlu1 %4171 }
0x1a5c   : > { %v4180_v24 = vmul.f32 %v4172_v35, %v7484_v40  ;;  %v4179_v7 = vmul.f32 %v4172_v35, %v7464_v32  ;;  %v4178_v2 = vmul.f32 %v4172_v35, %v7452_v27  ;;  %v4182_v11 = vmul.f32 %v4172_v35, %v7575_v28 }
0x1a5d   : > { %v4181_v14 = vmul.f32 %v4172_v35, %v7497_v44  ;;  %v9240_v35 = vpop.permute.xlu0 %3334 }
0x1a5e   : > { %4202 = vrot.lane.b32.xlu2 %v4180_v24, %s7263_s16  ;;  %4200 = vrot.lane.b32.xlu1 %v4179_v7, %s7263_s16  ;;  %v4184_v7 = vmul.f32 %v4176_v29, %v7517_v51  ;;  %13200 = vst [vmem:[#allocation425_spill] sm:$0xff] %v9240_v35 }
0x1a5f   : > { %4198 = vrot.lane.b32.xlu0 %v4178_v2, %s7263_s16  ;;  %v4187_v2 = vmul.f32 %v4176_v29, %v7597_v33 }
0x1a66   : > { %4208 = vrot.lane.b32.xlu2 %v4183_v47, %s7263_s16  ;;  %4206 = vrot.lane.b32.xlu1 %v4182_v11, %s7263_s16 }
0x1a67   : > { %4204 = vrot.lane.b32.xlu0 %v4181_v14, %s7263_s16 }
0x1a6e   : > { %4214 = vrot.lane.b32.xlu2 %v4186_v52, %s7263_s16  ;;  %4212 = vrot.lane.b32.xlu1 %v4185_v48, %s7263_s16  ;;  %v7264_v52 = vmov 53  }
0x1a6f   : > { %4210 = vrot.lane.b32.xlu0 %v4184_v7, %s7263_s16  ;;  %v9254_v7 = vpop.permute.xlu0 %3340 }
0x1a70   : > { %13207 = vst [vmem:[#allocation432_spill] sm:$0xff] %v9254_v7 }
0x1a76   : > { %4248 = vperm.xlu2 %7011, %v8923_v58   ;;  %4244 = vperm.xlu1 %7010, %v8929_v1  }
0x1a77   : > { %4216 = vrot.lane.b32.xlu0 %v4187_v2, %s7263_s16  ;;  %s7269_s16 = smov 74  }
0x1a7e   : > { %7013 = vset.pattern.permute.xlu2 %v7264_v52  ;;  %7012 = vset.pattern.permute.xlu1 %v7264_v52 }
0x1ab8   : > { %v9242_v11 = vpop.permute.xlu2 %4202 }
0x1ab9   : > { %13201 = vst [vmem:[#allocation426_spill] sm:$0xff] %v9242_v11 }
0x1ac0   : > { %v9248_v47 = vpop.permute.xlu2 %4208 }
0x1ac1   : > { %13204 = vst [vmem:[#allocation429_spill] sm:$0xff] %v9248_v47  ;;  %v9262_v47 = vpop.permute.xlu0 %3395 }
0x1ac2   : > { %13208 = vst [vmem:[#allocation433_spill] sm:$0xff] %v9262_v47 }
0x1ac8   : > { %v9252_v29 = vpop.permute.xlu2 %4214 }
0x1ac9   : > { %13206 = vst [vmem:[#allocation431_spill] sm:$0xff] %v9252_v29 }
0x1ad0   : > { %v9244_v14 = vpop.permute.xlu1 %4200  ;;  %v4249_v52 = vpop.permute.xlu2 %4248 }
0x1ad1   : > { %13202 = vst [vmem:[#allocation427_spill] sm:$0xff] %v9244_v14  ;;  %v4257_v47 = vmul.f32 %v4249_v52, %v7517_v51 }
0x1ad8   : > { %v9246_v24 = vpop.permute.xlu1 %4206 }
0x1ad9   : > { %13203 = vst [vmem:[#allocation428_spill] sm:$0xff] %v9246_v24 }
0x1ae0   : > { %v9250_v48 = vpop.permute.xlu1 %4212 }
0x1ae1   : > { %13205 = vst [vmem:[#allocation430_spill] sm:$0xff] %v9250_v48  ;;  %v4256_v48 = vmul.f32 %v4249_v52, %v7526_v55 }
0x1ae8   : > { %v4245_v4 = vpop.permute.xlu1 %4244 }
0x1ae9   : > { %v4253_v2 = vmul.f32 %v4245_v4, %v7484_v40  ;;  %v4252_v11 = vmul.f32 %v4245_v4, %v7464_v32  ;;  %v4251_v14 = vmul.f32 %v4245_v4, %v7452_v27  ;;  %v4255_v29 = vmul.f32 %v4245_v4, %v7575_v28 }
0x1aea   : > { %v4254_v24 = vmul.f32 %v4245_v4, %v7497_v44  ;;  %v4260_v4 = vmul.f32 %v4249_v52, %v7597_v33 }
0x1aeb   : > { %4275 = vrot.lane.b32.xlu2 %v4253_v2, %s12708_s17  ;;  %4273 = vrot.lane.b32.xlu1 %v4252_v11, %s12708_s17  ;;  %v4259_v2 = vmul.f32 %v4249_v52, %v7539_v59  ;;  %v4258_v11 = vmul.f32 %v4249_v52, %v7550_v5 }
0x1aec   : > { %4271 = vrot.lane.b32.xlu0 %v4251_v14, %s12708_s17  ;;  %v9272_v14 = vpop.permute.xlu0 %3401 }
0x1aed   : > { %13209 = vst [vmem:[#allocation434_spill] sm:$0xff] %v9272_v14 }
0x1af3   : > { %4281 = vrot.lane.b32.xlu2 %v4256_v48, %s12708_s17  ;;  %4279 = vrot.lane.b32.xlu1 %v4255_v29, %s12708_s17 }
0x1af4   : > { %4277 = vrot.lane.b32.xlu0 %v4254_v24, %s12708_s17  ;;  %v9281_v24 = vpop.permute.xlu0 %3407 }
0x1af5   : > { %13210 = vst [vmem:[#allocation435_spill] sm:$0xff] %v9281_v24 }
0x1afb   : > { %4287 = vrot.lane.b32.xlu2 %v4259_v2, %s12708_s17  ;;  %4285 = vrot.lane.b32.xlu1 %v4258_v11, %s12708_s17  ;;  %v7266_v11 = vmov 54  }
0x1afc   : > { %4283 = vrot.lane.b32.xlu0 %v4257_v47, %s12708_s17  ;;  %v9296_v7 = vpop.permute.xlu0 %3413 }
0x1afd   : > { %13217 = vst [vmem:[#allocation442_spill] sm:$0xff] %v9296_v7 }
0x1b03   : > { %4321 = vperm.xlu2 %7013, %v8923_v58   ;;  %4317 = vperm.xlu1 %7012, %v8929_v1  }
0x1b04   : > { %4289 = vrot.lane.b32.xlu0 %v4260_v4, %s12708_s17  ;;  %s7279_s17 = smov 69  }
0x1b0b   : > { %7015 = vset.pattern.permute.xlu2 %v7266_v11  ;;  %7014 = vset.pattern.permute.xlu1 %v7266_v11 }
0x1b45   : > { %v9284_v48 = vpop.permute.xlu2 %4275 }
0x1b46   : > { %13211 = vst [vmem:[#allocation436_spill] sm:$0xff] %v9284_v48 }
0x1b4d   : > { %v9290_v2 = vpop.permute.xlu2 %4281 }
0x1b4e   : > { %13214 = vst [vmem:[#allocation439_spill] sm:$0xff] %v9290_v2 }
0x1b55   : > { %v9294_v52 = vpop.permute.xlu2 %4287 }
0x1b56   : > { %13216 = vst [vmem:[#allocation441_spill] sm:$0xff] %v9294_v52 }
0x1b5d   : > { %v9286_v29 = vpop.permute.xlu1 %4273  ;;  %v4322_v2 = vpop.permute.xlu2 %4321 }
0x1b5e   : > { %13212 = vst [vmem:[#allocation437_spill] sm:$0xff] %v9286_v29  ;;  %v4329_v11 = vmul.f32 %v4322_v2, %v7526_v55  ;;  %v4332_v7 = vmul.f32 %v4322_v2, %v7539_v59  ;;  %v4331_v35 = vmul.f32 %v4322_v2, %v7550_v5 }
0x1b65   : > { %v9288_v14 = vpop.permute.xlu1 %4279 }
0x1b66   : > { %13213 = vst [vmem:[#allocation438_spill] sm:$0xff] %v9288_v14  ;;  %v9301_v14 = vpop.permute.xlu0 %3468 }
0x1b67   : > { %13218 = vst [vmem:[#allocation443_spill] sm:$0xff] %v9301_v14 }
0x1b6d   : > { %v9292_v47 = vpop.permute.xlu1 %4285 }
0x1b6e   : > { %13215 = vst [vmem:[#allocation440_spill] sm:$0xff] %v9292_v47  ;;  %v9308_v26 = vpop.permute.xlu0 %3474 }
0x1b6f   : > { %13219 = vst [vmem:[#allocation444_spill] sm:$0xff] %v9308_v26 }
0x1b75   : > { %v4318_v24 = vpop.permute.xlu1 %4317 }
0x1b76   : > { %v4326_v4 = vmul.f32 %v4318_v24, %v7484_v40  ;;  %v4325_v48 = vmul.f32 %v4318_v24, %v7464_v32  ;;  %v4324_v29 = vmul.f32 %v4318_v24, %v7452_v27  ;;  %v4328_v47 = vmul.f32 %v4318_v24, %v7575_v28 }
0x1b77   : > { %v4327_v52 = vmul.f32 %v4318_v24, %v7497_v44  ;;  %v9314_v24 = vpop.permute.xlu0 %3480 }
0x1b78   : > { %4348 = vrot.lane.b32.xlu2 %v4326_v4, %s7267_s28  ;;  %4346 = vrot.lane.b32.xlu1 %v4325_v48, %s7267_s28  ;;  %v4330_v48 = vmul.f32 %v4322_v2, %v7517_v51  ;;  %13220 = vst [vmem:[#allocation445_spill] sm:$0xff] %v9314_v24 }
0x1b79   : > { %4344 = vrot.lane.b32.xlu0 %v4324_v29, %s7267_s28  ;;  %v4333_v29 = vmul.f32 %v4322_v2, %v7597_v33 }
0x1b80   : > { %4354 = vrot.lane.b32.xlu2 %v4329_v11, %s7267_s28  ;;  %4352 = vrot.lane.b32.xlu1 %v4328_v47, %s7267_s28 }
0x1b81   : > { %4350 = vrot.lane.b32.xlu0 %v4327_v52, %s7267_s28 }
0x1b88   : > { %4360 = vrot.lane.b32.xlu2 %v4332_v7, %s7267_s28  ;;  %4358 = vrot.lane.b32.xlu1 %v4331_v35, %s7267_s28  ;;  %v7268_v7 = vmov 55  }
0x1b89   : > { %4356 = vrot.lane.b32.xlu0 %v4330_v48, %s7267_s28  ;;  %v9328_v48 = vpop.permute.xlu0 %3486 }
0x1b8a   : > { %13227 = vst [vmem:[#allocation452_spill] sm:$0xff] %v9328_v48 }
0x1b90   : > { %4394 = vperm.xlu2 %7015, %v8923_v58   ;;  %4390 = vperm.xlu1 %7014, %v8929_v1  }
0x1b91   : > { %4362 = vrot.lane.b32.xlu0 %v4333_v29, %s7267_s28  ;;  %s7271_s28 = smov 73  }
0x1b98   : > { %7017 = vset.pattern.permute.xlu2 %v7268_v7  ;;  %7016 = vset.pattern.permute.xlu1 %v7268_v7 }
0x1bd2   : > { %v9316_v47 = vpop.permute.xlu2 %4348 }
0x1bd3   : > { %13221 = vst [vmem:[#allocation446_spill] sm:$0xff] %v9316_v47 }
0x1bda   : > { %v9322_v11 = vpop.permute.xlu2 %4354 }
0x1bdb   : > { %13224 = vst [vmem:[#allocation449_spill] sm:$0xff] %v9322_v11 }
0x1be2   : > { %v9326_v2 = vpop.permute.xlu2 %4360 }
0x1be3   : > { %13226 = vst [vmem:[#allocation451_spill] sm:$0xff] %v9326_v2 }
0x1bea   : > { %v9318_v52 = vpop.permute.xlu1 %4346  ;;  %v4395_v11 = vpop.permute.xlu2 %4394 }
0x1beb   : > { %13222 = vst [vmem:[#allocation447_spill] sm:$0xff] %v9318_v52  ;;  %v4402_v7 = vmul.f32 %v4395_v11, %v7526_v55  ;;  %v4405_v48 = vmul.f32 %v4395_v11, %v7539_v59  ;;  %v4404_v24 = vmul.f32 %v4395_v11, %v7550_v5 }
0x1bf2   : > { %v9320_v4 = vpop.permute.xlu1 %4352 }
0x1bf3   : > { %13223 = vst [vmem:[#allocation448_spill] sm:$0xff] %v9320_v4  ;;  %v9333_v4 = vpop.permute.xlu0 %3541 }
0x1bf4   : > { %13228 = vst [vmem:[#allocation453_spill] sm:$0xff] %v9333_v4 }
0x1bfa   : > { %v9324_v35 = vpop.permute.xlu1 %4358 }
0x1bfb   : > { %13225 = vst [vmem:[#allocation450_spill] sm:$0xff] %v9324_v35  ;;  %v9340_v14 = vpop.permute.xlu0 %3547 }
0x1bfc   : > { %13229 = vst [vmem:[#allocation454_spill] sm:$0xff] %v9340_v14 }
0x1c02   : > { %v4391_v26 = vpop.permute.xlu1 %4390 }
0x1c03   : > { %v4399_v29 = vmul.f32 %v4391_v26, %v7484_v40  ;;  %v4398_v47 = vmul.f32 %v4391_v26, %v7464_v32  ;;  %v4397_v52 = vmul.f32 %v4391_v26, %v7452_v27  ;;  %v4401_v35 = vmul.f32 %v4391_v26, %v7575_v28 }
0x1c04   : > { %v4400_v2 = vmul.f32 %v4391_v26, %v7497_v44  ;;  %v9346_v26 = vpop.permute.xlu0 %3553 }
0x1c05   : > { %4421 = vrot.lane.b32.xlu2 %v4399_v29, %s7269_s16  ;;  %4419 = vrot.lane.b32.xlu1 %v4398_v47, %s7269_s16  ;;  %v4403_v47 = vmul.f32 %v4395_v11, %v7517_v51  ;;  %13230 = vst [vmem:[#allocation455_spill] sm:$0xff] %v9346_v26 }
0x1c06   : > { %4417 = vrot.lane.b32.xlu0 %v4397_v52, %s7269_s16  ;;  %v4406_v52 = vmul.f32 %v4395_v11, %v7597_v33 }
0x1c0d   : > { %4427 = vrot.lane.b32.xlu2 %v4402_v7, %s7269_s16  ;;  %4425 = vrot.lane.b32.xlu1 %v4401_v35, %s7269_s16 }
0x1c0e   : > { %4423 = vrot.lane.b32.xlu0 %v4400_v2, %s7269_s16 }
0x1c15   : > { %4433 = vrot.lane.b32.xlu2 %v4405_v48, %s7269_s16  ;;  %4431 = vrot.lane.b32.xlu1 %v4404_v24, %s7269_s16  ;;  %v7270_v48 = vmov 56  }
0x1c16   : > { %4429 = vrot.lane.b32.xlu0 %v4403_v47, %s7269_s16  ;;  %v9360_v47 = vpop.permute.xlu0 %3559 }
0x1c17   : > { %13237 = vst [vmem:[#allocation462_spill] sm:$0xff] %v9360_v47 }
0x1c1d   : > { %4467 = vperm.xlu2 %7017, %v8923_v58   ;;  %4463 = vperm.xlu1 %7016, %v8929_v1  }
0x1c1e   : > { %4435 = vrot.lane.b32.xlu0 %v4406_v52, %s7269_s16  ;;  %s12768_s16 = smov 72  }
0x1c25   : > { %7019 = vset.pattern.permute.xlu2 %v7270_v48  ;;  %7018 = vset.pattern.permute.xlu1 %v7270_v48 }
0x1c5f   : > { %v9348_v35 = vpop.permute.xlu2 %4421 }
0x1c60   : > { %13231 = vst [vmem:[#allocation456_spill] sm:$0xff] %v9348_v35 }
0x1c67   : > { %v9354_v7 = vpop.permute.xlu2 %4427 }
0x1c68   : > { %13234 = vst [vmem:[#allocation459_spill] sm:$0xff] %v9354_v7 }
0x1c6f   : > { %v9358_v11 = vpop.permute.xlu2 %4433 }
0x1c70   : > { %13236 = vst [vmem:[#allocation461_spill] sm:$0xff] %v9358_v11 }
0x1c77   : > { %v9350_v2 = vpop.permute.xlu1 %4419  ;;  %v4468_v7 = vpop.permute.xlu2 %4467 }
0x1c78   : > { %13232 = vst [vmem:[#allocation457_spill] sm:$0xff] %v9350_v2  ;;  %v4475_v48 = vmul.f32 %v4468_v7, %v7526_v55  ;;  %v4478_v47 = vmul.f32 %v4468_v7, %v7539_v59  ;;  %v4477_v26 = vmul.f32 %v4468_v7, %v7550_v5 }
0x1c7f   : > { %v9352_v29 = vpop.permute.xlu1 %4425 }
0x1c80   : > { %13233 = vst [vmem:[#allocation458_spill] sm:$0xff] %v9352_v29  ;;  %v9365_v29 = vpop.permute.xlu0 %3614 }
0x1c81   : > { %13238 = vst [vmem:[#allocation463_spill] sm:$0xff] %v9365_v29 }
0x1c87   : > { %v9356_v24 = vpop.permute.xlu1 %4431 }
0x1c88   : > { %13235 = vst [vmem:[#allocation460_spill] sm:$0xff] %v9356_v24  ;;  %v9372_v4 = vpop.permute.xlu0 %3620 }
0x1c89   : > { %13239 = vst [vmem:[#allocation464_spill] sm:$0xff] %v9372_v4 }
0x1c8f   : > { %v4464_v14 = vpop.permute.xlu1 %4463 }
0x1c90   : > { %v4472_v52 = vmul.f32 %v4464_v14, %v7484_v40  ;;  %v4471_v35 = vmul.f32 %v4464_v14, %v7464_v32  ;;  %v4470_v2 = vmul.f32 %v4464_v14, %v7452_v27  ;;  %v4474_v24 = vmul.f32 %v4464_v14, %v7575_v28 }
0x1c91   : > { %v4473_v11 = vmul.f32 %v4464_v14, %v7497_v44  ;;  %v9378_v14 = vpop.permute.xlu0 %3626 }
0x1c92   : > { %4494 = vrot.lane.b32.xlu2 %v4472_v52, %s7271_s28  ;;  %4492 = vrot.lane.b32.xlu1 %v4471_v35, %s7271_s28  ;;  %v4476_v35 = vmul.f32 %v4468_v7, %v7517_v51  ;;  %13240 = vst [vmem:[#allocation465_spill] sm:$0xff] %v9378_v14 }
0x1c93   : > { %4490 = vrot.lane.b32.xlu0 %v4470_v2, %s7271_s28  ;;  %v4479_v2 = vmul.f32 %v4468_v7, %v7597_v33 }
0x1c9a   : > { %4500 = vrot.lane.b32.xlu2 %v4475_v48, %s7271_s28  ;;  %4498 = vrot.lane.b32.xlu1 %v4474_v24, %s7271_s28 }
0x1c9b   : > { %4496 = vrot.lane.b32.xlu0 %v4473_v11, %s7271_s28 }
0x1ca2   : > { %4506 = vrot.lane.b32.xlu2 %v4478_v47, %s7271_s28  ;;  %4504 = vrot.lane.b32.xlu1 %v4477_v26, %s7271_s28  ;;  %v7272_v47 = vmov 57  }
0x1ca3   : > { %4502 = vrot.lane.b32.xlu0 %v4476_v35, %s7271_s28 }
0x1caa   : > { %4540 = vperm.xlu2 %7019, %v8923_v58   ;;  %4536 = vperm.xlu1 %7018, %v8929_v1   ;;  %v9392_v58 = vpop.permute.xlu0 %3632 }
0x1cab   : > { %4508 = vrot.lane.b32.xlu0 %v4479_v2, %s7271_s28  ;;  %13247 = vst [vmem:[#allocation472_spill] sm:$0xff] %v9392_v58  ;;  %s12766_s28 = smov 68  }
0x1cb2   : > { %7021 = vset.pattern.permute.xlu2 %v7272_v47  ;;  %7020 = vset.pattern.permute.xlu1 %v7272_v47 }
0x1cec   : > { %v9380_v24 = vpop.permute.xlu2 %4494 }
0x1ced   : > { %13241 = vst [vmem:[#allocation466_spill] sm:$0xff] %v9380_v24 }
0x1cf4   : > { %v9386_v48 = vpop.permute.xlu2 %4500 }
0x1cf5   : > { %13244 = vst [vmem:[#allocation469_spill] sm:$0xff] %v9386_v48  ;;  %v9400_v48 = vpop.permute.xlu0 %3687 }
0x1cf6   : > { %13248 = vst [vmem:[#allocation473_spill] sm:$0xff] %v9400_v48 }
0x1cfc   : > { %v9390_v7 = vpop.permute.xlu2 %4506 }
0x1cfd   : > { %13246 = vst [vmem:[#allocation471_spill] sm:$0xff] %v9390_v7 }
0x1d04   : > { %v9382_v11 = vpop.permute.xlu1 %4492  ;;  %v4541_v47 = vpop.permute.xlu2 %4540 }
0x1d05   : > { %13242 = vst [vmem:[#allocation467_spill] sm:$0xff] %v9382_v11  ;;  %v4549_v24 = vmul.f32 %v4541_v47, %v7517_v51 }
0x1d0c   : > { %v9384_v52 = vpop.permute.xlu1 %4498 }
0x1d0d   : > { %13243 = vst [vmem:[#allocation468_spill] sm:$0xff] %v9384_v52 }
0x1d14   : > { %v9388_v26 = vpop.permute.xlu1 %4504 }
0x1d15   : > { %13245 = vst [vmem:[#allocation470_spill] sm:$0xff] %v9388_v26  ;;  %v4548_v26 = vmul.f32 %v4541_v47, %v7526_v55 }
0x1d1c   : > { %v4537_v1 = vpop.permute.xlu1 %4536 }
0x1d1d   : > { %v4545_v35 = vmul.f32 %v4537_v1, %v7484_v40  ;;  %v4544_v2 = vmul.f32 %v4537_v1, %v7464_v32  ;;  %v4543_v11 = vmul.f32 %v4537_v1, %v7452_v27  ;;  %v4547_v7 = vmul.f32 %v4537_v1, %v7575_v28 }
0x1d1e   : > { %v4546_v52 = vmul.f32 %v4537_v1, %v7497_v44 }
0x1d1f   : > { %4567 = vrot.lane.b32.xlu2 %v4545_v35, %s12768_s16  ;;  %4565 = vrot.lane.b32.xlu1 %v4544_v2, %s12768_s16  ;;  %v4551_v35 = vmul.f32 %v4541_v47, %v7539_v59  ;;  %v4550_v2 = vmul.f32 %v4541_v47, %v7550_v5 }
0x1d20   : > { %4563 = vrot.lane.b32.xlu0 %v4543_v11, %s12768_s16  ;;  %v9410_v11 = vpop.permute.xlu0 %3693 }
0x1d21   : > { %13249 = vst [vmem:[#allocation474_spill] sm:$0xff] %v9410_v11  ;;  %v7274_v11 = vmov 58  }
0x1d27   : > { %4573 = vrot.lane.b32.xlu2 %v4548_v26, %s12768_s16  ;;  %4571 = vrot.lane.b32.xlu1 %v4547_v7, %s12768_s16  ;;  %v4552_v26 = vmul.f32 %v4541_v47, %v7597_v33  ;;  %v9426_v7 = vld [vmem:[%s12376_s2] sm:$0xff] }
0x1d28   : > { %4569 = vrot.lane.b32.xlu0 %v4546_v52, %s12768_s16  ;;  %v9420_v52 = vld [vmem:[%s12376_s2 + $0x8] sm:$0xff]  ;;  %v9429_v1 = vpop.permute.xlu0 %3699 }
0x1d29   : > { %13250 = vst [vmem:[#allocation475_spill] sm:$0xff] %v9429_v1 }
0x1d2f   : > { %4579 = vrot.lane.b32.xlu2 %v4551_v35, %s12768_s16  ;;  %4577 = vrot.lane.b32.xlu1 %v4550_v2, %s12768_s16 }
0x1d30   : > { %4575 = vrot.lane.b32.xlu0 %v4549_v24, %s12768_s16  ;;  %v9444_v14 = vpop.permute.xlu0 %3705 }
0x1d31   : > { %13257 = vst [vmem:[#allocation482_spill] sm:$0xff] %v9444_v14 }
0x1d37   : > { %4613 = vperm.xlu2 %7021, %v9420_v52   ;;  %4609 = vperm.xlu1 %7020, %v9426_v7  }
0x1d38   : > { %4581 = vrot.lane.b32.xlu0 %v4552_v26, %s12768_s16  ;;  %s13916_s16 = smov 84  }
0x1d3f   : > { %7023 = vset.pattern.permute.xlu2 %v7274_v11  ;;  %7022 = vset.pattern.permute.xlu1 %v7274_v11 }
0x1d79   : > { %v9432_v24 = vpop.permute.xlu2 %4567 }
0x1d7a   : > { %13251 = vst [vmem:[#allocation476_spill] sm:$0xff] %v9432_v24 }
0x1d81   : > { %v9438_v2 = vpop.permute.xlu2 %4573 }
0x1d82   : > { %13254 = vst [vmem:[#allocation479_spill] sm:$0xff] %v9438_v2 }
0x1d89   : > { %v9442_v58 = vpop.permute.xlu2 %4579 }
0x1d8a   : > { %13256 = vst [vmem:[#allocation481_spill] sm:$0xff] %v9442_v58 }
0x1d91   : > { %v9434_v47 = vpop.permute.xlu1 %4565  ;;  %v4614_v2 = vpop.permute.xlu2 %4613 }
0x1d92   : > { %13252 = vst [vmem:[#allocation477_spill] sm:$0xff] %v9434_v47  ;;  %v4621_v11 = vmul.f32 %v4614_v2, %v7526_v55  ;;  %v4624_v14 = vmul.f32 %v4614_v2, %v7539_v59  ;;  %v4623_v4 = vmul.f32 %v4614_v2, %v7550_v5 }
0x1d99   : > { %v9436_v35 = vpop.permute.xlu1 %4571 }
0x1d9a   : > { %13253 = vst [vmem:[#allocation478_spill] sm:$0xff] %v9436_v35  ;;  %v9449_v35 = vpop.permute.xlu0 %3760 }
0x1d9b   : > { %13258 = vst [vmem:[#allocation483_spill] sm:$0xff] %v9449_v35 }
0x1da1   : > { %v9440_v48 = vpop.permute.xlu1 %4577 }
0x1da2   : > { %13255 = vst [vmem:[#allocation480_spill] sm:$0xff] %v9440_v48  ;;  %v9456_v29 = vpop.permute.xlu0 %3766 }
0x1da3   : > { %13259 = vst [vmem:[#allocation484_spill] sm:$0xff] %v9456_v29 }
0x1da9   : > { %v4610_v1 = vpop.permute.xlu1 %4609 }
0x1daa   : > { %v4618_v26 = vmul.f32 %v4610_v1, %v7484_v40  ;;  %v4617_v24 = vmul.f32 %v4610_v1, %v7464_v32  ;;  %v4616_v47 = vmul.f32 %v4610_v1, %v7452_v27  ;;  %v4620_v48 = vmul.f32 %v4610_v1, %v7575_v28 }
0x1dab   : > { %v4619_v58 = vmul.f32 %v4610_v1, %v7497_v44  ;;  %v9462_v1 = vpop.permute.xlu0 %3772 }
0x1dac   : > { %4640 = vrot.lane.b32.xlu2 %v4618_v26, %s7275_s14  ;;  %4638 = vrot.lane.b32.xlu1 %v4617_v24, %s7275_s14  ;;  %v4622_v24 = vmul.f32 %v4614_v2, %v7517_v51  ;;  %13260 = vst [vmem:[#allocation485_spill] sm:$0xff] %v9462_v1 }
0x1dad   : > { %4636 = vrot.lane.b32.xlu0 %v4616_v47, %s7275_s14  ;;  %v4625_v47 = vmul.f32 %v4614_v2, %v7597_v33 }
0x1db4   : > { %4646 = vrot.lane.b32.xlu2 %v4621_v11, %s7275_s14  ;;  %4644 = vrot.lane.b32.xlu1 %v4620_v48, %s7275_s14 }
0x1db5   : > { %4642 = vrot.lane.b32.xlu0 %v4619_v58, %s7275_s14 }
0x1dbc   : > { %4652 = vrot.lane.b32.xlu2 %v4624_v14, %s7275_s14  ;;  %4650 = vrot.lane.b32.xlu1 %v4623_v4, %s7275_s14  ;;  %v7276_v14 = vmov 59  }
0x1dbd   : > { %4648 = vrot.lane.b32.xlu0 %v4622_v24, %s7275_s14  ;;  %v9476_v24 = vpop.permute.xlu0 %3778 }
0x1dbe   : > { %13267 = vst [vmem:[#allocation492_spill] sm:$0xff] %v9476_v24 }
0x1dc4   : > { %4686 = vperm.xlu2 %7023, %v9420_v52   ;;  %4682 = vperm.xlu1 %7022, %v9426_v7  }
0x1dc5   : > { %4654 = vrot.lane.b32.xlu0 %v4625_v47, %s7275_s14  ;;  %s7283_s14 = smov 67  }
0x1dcc   : > { %7025 = vset.pattern.permute.xlu2 %v7276_v14  ;;  %7024 = vset.pattern.permute.xlu1 %v7276_v14 }
0x1e06   : > { %v9464_v48 = vpop.permute.xlu2 %4640 }
0x1e07   : > { %13261 = vst [vmem:[#allocation486_spill] sm:$0xff] %v9464_v48 }
0x1e0e   : > { %v9470_v11 = vpop.permute.xlu2 %4646 }
0x1e0f   : > { %13264 = vst [vmem:[#allocation489_spill] sm:$0xff] %v9470_v11 }
0x1e16   : > { %v9474_v2 = vpop.permute.xlu2 %4652 }
0x1e17   : > { %13266 = vst [vmem:[#allocation491_spill] sm:$0xff] %v9474_v2 }
0x1e1e   : > { %v9466_v58 = vpop.permute.xlu1 %4638  ;;  %v4687_v11 = vpop.permute.xlu2 %4686 }
0x1e1f   : > { %13262 = vst [vmem:[#allocation487_spill] sm:$0xff] %v9466_v58  ;;  %v4694_v14 = vmul.f32 %v4687_v11, %v7526_v55  ;;  %v4697_v24 = vmul.f32 %v4687_v11, %v7539_v59  ;;  %v4696_v1 = vmul.f32 %v4687_v11, %v7550_v5 }
0x1e26   : > { %v9468_v26 = vpop.permute.xlu1 %4644 }
0x1e27   : > { %13263 = vst [vmem:[#allocation488_spill] sm:$0xff] %v9468_v26  ;;  %v9481_v26 = vpop.permute.xlu0 %3833 }
0x1e28   : > { %13268 = vst [vmem:[#allocation493_spill] sm:$0xff] %v9481_v26 }
0x1e2e   : > { %v9472_v4 = vpop.permute.xlu1 %4650 }
0x1e2f   : > { %13265 = vst [vmem:[#allocation490_spill] sm:$0xff] %v9472_v4  ;;  %v9488_v35 = vpop.permute.xlu0 %3839 }
0x1e30   : > { %13269 = vst [vmem:[#allocation494_spill] sm:$0xff] %v9488_v35 }
0x1e36   : > { %v4683_v29 = vpop.permute.xlu1 %4682 }
0x1e37   : > { %v4691_v47 = vmul.f32 %v4683_v29, %v7484_v40  ;;  %v4690_v48 = vmul.f32 %v4683_v29, %v7464_v32  ;;  %v4689_v58 = vmul.f32 %v4683_v29, %v7452_v27  ;;  %v4693_v4 = vmul.f32 %v4683_v29, %v7575_v28 }
0x1e38   : > { %v4692_v2 = vmul.f32 %v4683_v29, %v7497_v44  ;;  %v9494_v29 = vpop.permute.xlu0 %3845 }
0x1e39   : > { %4713 = vrot.lane.b32.xlu2 %v4691_v47, %s7277_s26  ;;  %4711 = vrot.lane.b32.xlu1 %v4690_v48, %s7277_s26  ;;  %v4695_v48 = vmul.f32 %v4687_v11, %v7517_v51  ;;  %13270 = vst [vmem:[#allocation495_spill] sm:$0xff] %v9494_v29 }
0x1e3a   : > { %4709 = vrot.lane.b32.xlu0 %v4689_v58, %s7277_s26  ;;  %v4698_v58 = vmul.f32 %v4687_v11, %v7597_v33 }
0x1e41   : > { %4719 = vrot.lane.b32.xlu2 %v4694_v14, %s7277_s26  ;;  %4717 = vrot.lane.b32.xlu1 %v4693_v4, %s7277_s26 }
0x1e42   : > { %4715 = vrot.lane.b32.xlu0 %v4692_v2, %s7277_s26 }
0x1e49   : > { %4725 = vrot.lane.b32.xlu2 %v4697_v24, %s7277_s26  ;;  %4723 = vrot.lane.b32.xlu1 %v4696_v1, %s7277_s26  ;;  %v7278_v24 = vmov 60  }
0x1e4a   : > { %4721 = vrot.lane.b32.xlu0 %v4695_v48, %s7277_s26  ;;  %v9508_v48 = vpop.permute.xlu0 %3851 }
0x1e4b   : > { %13277 = vst [vmem:[#allocation502_spill] sm:$0xff] %v9508_v48 }
0x1e51   : > { %4759 = vperm.xlu2 %7025, %v9420_v52   ;;  %4755 = vperm.xlu1 %7024, %v9426_v7  }
0x1e52   : > { %4727 = vrot.lane.b32.xlu0 %v4698_v58, %s7277_s26  ;;  %s7285_s26 = smov 66  }
0x1e59   : > { %7027 = vset.pattern.permute.xlu2 %v7278_v24  ;;  %7026 = vset.pattern.permute.xlu1 %v7278_v24 }
0x1e93   : > { %v9496_v4 = vpop.permute.xlu2 %4713 }
0x1e94   : > { %13271 = vst [vmem:[#allocation496_spill] sm:$0xff] %v9496_v4 }
0x1e9b   : > { %v9502_v14 = vpop.permute.xlu2 %4719 }
0x1e9c   : > { %13274 = vst [vmem:[#allocation499_spill] sm:$0xff] %v9502_v14 }
0x1ea3   : > { %v9506_v11 = vpop.permute.xlu2 %4725 }
0x1ea4   : > { %13276 = vst [vmem:[#allocation501_spill] sm:$0xff] %v9506_v11 }
0x1eab   : > { %v9498_v2 = vpop.permute.xlu1 %4711  ;;  %v4760_v14 = vpop.permute.xlu2 %4759 }
0x1eac   : > { %13272 = vst [vmem:[#allocation497_spill] sm:$0xff] %v9498_v2  ;;  %v4767_v24 = vmul.f32 %v4760_v14, %v7526_v55  ;;  %v4770_v48 = vmul.f32 %v4760_v14, %v7539_v59  ;;  %v4769_v29 = vmul.f32 %v4760_v14, %v7550_v5 }
0x1eb3   : > { %v9500_v47 = vpop.permute.xlu1 %4717 }
0x1eb4   : > { %13273 = vst [vmem:[#allocation498_spill] sm:$0xff] %v9500_v47  ;;  %v9513_v47 = vpop.permute.xlu0 %3906 }
0x1eb5   : > { %13278 = vst [vmem:[#allocation503_spill] sm:$0xff] %v9513_v47  ;;  %v500_v47 = vmul.f32 %v7444_v23, %v7550_v5 }
0x1ebb   : > { %v9504_v1 = vpop.permute.xlu1 %4723 }
0x1ebc   : > { %13275 = vst [vmem:[#allocation500_spill] sm:$0xff] %v9504_v1  ;;  %v9520_v26 = vpop.permute.xlu0 %3912 }
0x1ebd   : > { %13279 = vst [vmem:[#allocation504_spill] sm:$0xff] %v9520_v26 }
0x1ec3   : > { %v4756_v35 = vpop.permute.xlu1 %4755 }
0x1ec4   : > { %v4764_v58 = vmul.f32 %v4756_v35, %v7484_v40  ;;  %v4763_v4 = vmul.f32 %v4756_v35, %v7464_v32  ;;  %v4762_v2 = vmul.f32 %v4756_v35, %v7452_v27  ;;  %v4766_v1 = vmul.f32 %v4756_v35, %v7575_v28 }
0x1ec5   : > { %v4765_v11 = vmul.f32 %v4756_v35, %v7497_v44  ;;  %v9526_v35 = vpop.permute.xlu0 %3918 }
0x1ec6   : > { %4786 = vrot.lane.b32.xlu2 %v4764_v58, %s7279_s17  ;;  %4784 = vrot.lane.b32.xlu1 %v4763_v4, %s7279_s17  ;;  %v4768_v4 = vmul.f32 %v4760_v14, %v7517_v51  ;;  %13280 = vst [vmem:[#allocation505_spill] sm:$0xff] %v9526_v35 }
0x1ec7   : > { %4782 = vrot.lane.b32.xlu0 %v4762_v2, %s7279_s17  ;;  %v4771_v2 = vmul.f32 %v4760_v14, %v7597_v33 }
0x1ece   : > { %4792 = vrot.lane.b32.xlu2 %v4767_v24, %s7279_s17  ;;  %4790 = vrot.lane.b32.xlu1 %v4766_v1, %s7279_s17  ;;  %v9528_v1 = vpop.permute.xlu0 %3924 }
0x1ecf   : > { %4788 = vrot.lane.b32.xlu0 %v4765_v11, %s7279_s17  ;;  %13281 = vst [vmem:[#allocation506_spill] sm:$0xff] %v9528_v1 }
0x1ed6   : > { %4798 = vrot.lane.b32.xlu2 %v4770_v48, %s7279_s17  ;;  %4796 = vrot.lane.b32.xlu1 %v4769_v29, %s7279_s17  ;;  %v9530_v11 = vpop.permute.xlu0 %3979 }
0x1ed7   : > { %4794 = vrot.lane.b32.xlu0 %v4768_v4, %s7279_s17  ;;  %13282 = vst [vmem:[#allocation507_spill] sm:$0xff] %v9530_v11  ;;  %v7280_v4 = vmov 61  }
0x1ede   : > { %4832 = vperm.xlu2 %7027, %v9420_v52   ;;  %4828 = vperm.xlu1 %7026, %v9426_v7   ;;  %v9536_v48 = vpop.permute.xlu0 %3985 }
0x1edf   : > { %4800 = vrot.lane.b32.xlu0 %v4771_v2, %s7279_s17  ;;  %13285 = vst [vmem:[#allocation510_spill] sm:$0xff] %v9536_v48  ;;  %s7286_s17 = smov 65  }
0x1ee6   : > { %7029 = vset.pattern.permute.xlu2 %v7280_v4  ;;  %7028 = vset.pattern.permute.xlu1 %v7280_v4  ;;  %v9542_v26 = vpop.permute.xlu0 %3991 }
0x1ee7   : > { %13288 = vst [vmem:[#allocation513_spill] sm:$0xff] %v9542_v26 }
0x1eee   : > { %v9548_v11 = vpop.permute.xlu0 %3997 }
0x1eef   : > { %13291 = vst [vmem:[#allocation516_spill] sm:$0xff] %v9548_v11 }
0x1f20   : > { %v9532_v58 = vpop.permute.xlu2 %4786 }
0x1f21   : > { %13283 = vst [vmem:[#allocation508_spill] sm:$0xff] %v9532_v58 }
0x1f28   : > { %v9540_v14 = vpop.permute.xlu2 %4792 }
0x1f29   : > { %13287 = vst [vmem:[#allocation512_spill] sm:$0xff] %v9540_v14  ;;  %v9556_v14 = vpop.permute.xlu0 %4052 }
0x1f2a   : > { %13292 = vst [vmem:[#allocation517_spill] sm:$0xff] %v9556_v14 }
0x1f30   : > { %v9546_v1 = vpop.permute.xlu2 %4798 }
0x1f31   : > { %13290 = vst [vmem:[#allocation515_spill] sm:$0xff] %v9546_v1 }
0x1f38   : > { %v9534_v24 = vpop.permute.xlu1 %4784  ;;  %v4833_v4 = vpop.permute.xlu2 %4832 }
0x1f39   : > { %13284 = vst [vmem:[#allocation509_spill] sm:$0xff] %v9534_v24  ;;  %v4841_v14 = vmul.f32 %v4833_v4, %v7517_v51 }
0x1f40   : > { %v9538_v29 = vpop.permute.xlu1 %4790 }
0x1f41   : > { %13286 = vst [vmem:[#allocation511_spill] sm:$0xff] %v9538_v29 }
0x1f48   : > { %v9544_v2 = vpop.permute.xlu1 %4796 }
0x1f49   : > { %13289 = vst [vmem:[#allocation514_spill] sm:$0xff] %v9544_v2  ;;  %v4840_v2 = vmul.f32 %v4833_v4, %v7526_v55 }
0x1f50   : > { %v4829_v58 = vpop.permute.xlu1 %4828 }
0x1f51   : > { %v4837_v24 = vmul.f32 %v4829_v58, %v7484_v40  ;;  %v4836_v48 = vmul.f32 %v4829_v58, %v7464_v32  ;;  %v4835_v29 = vmul.f32 %v4829_v58, %v7452_v27  ;;  %v4839_v1 = vmul.f32 %v4829_v58, %v7575_v28 }
0x1f52   : > { %v4838_v11 = vmul.f32 %v4829_v58, %v7497_v44  ;;  %v4844_v58 = vmul.f32 %v4833_v4, %v7597_v33 }
0x1f53   : > { %4859 = vrot.lane.b32.xlu2 %v4837_v24, %s12766_s28  ;;  %4857 = vrot.lane.b32.xlu1 %v4836_v48, %s12766_s28  ;;  %v4843_v24 = vmul.f32 %v4833_v4, %v7539_v59  ;;  %v4842_v48 = vmul.f32 %v4833_v4, %v7550_v5 }
0x1f54   : > { %4855 = vrot.lane.b32.xlu0 %v4835_v29, %s12766_s28  ;;  %v9566_v29 = vpop.permute.xlu0 %4058 }
0x1f55   : > { %13293 = vst [vmem:[#allocation518_spill] sm:$0xff] %v9566_v29 }
0x1f5b   : > { %4865 = vrot.lane.b32.xlu2 %v4840_v2, %s12766_s28  ;;  %4863 = vrot.lane.b32.xlu1 %v4839_v1, %s12766_s28 }
0x1f5c   : > { %4861 = vrot.lane.b32.xlu0 %v4838_v11, %s12766_s28  ;;  %v9575_v1 = vpop.permute.xlu0 %4064 }
0x1f5d   : > { %13294 = vst [vmem:[#allocation519_spill] sm:$0xff] %v9575_v1 }
0x1f63   : > { %4871 = vrot.lane.b32.xlu2 %v4843_v24, %s12766_s28  ;;  %4869 = vrot.lane.b32.xlu1 %v4842_v48, %s12766_s28 }
0x1f64   : > { %4867 = vrot.lane.b32.xlu0 %v4841_v14, %s12766_s28  ;;  %v9578_v11 = vpop.permute.xlu0 %4070 }
0x1f65   : > { %13295 = vst [vmem:[#allocation520_spill] sm:$0xff] %v9578_v11 }
0x1f6b   : > { %4905 = vperm.xlu2 %7029, %v9420_v52   ;;  %4901 = vperm.xlu1 %7028, %v9426_v7  }
0x1f6c   : > { %4873 = vrot.lane.b32.xlu0 %v4844_v58, %s12766_s28  ;;  %v9580_v2 = vpop.permute.xlu0 %4125  ;;  %s13917_s28 = smov 80  }
0x1f6d   : > { %13296 = vst [vmem:[#allocation521_spill] sm:$0xff] %v9580_v2 }
0x1f74   : > { %v9582_v29 = vpop.permute.xlu0 %4131 }
0x1f75   : > { %13297 = vst [vmem:[#allocation522_spill] sm:$0xff] %v9582_v29 }
0x1f7c   : > { %v9584_v24 = vpop.permute.xlu0 %4137 }
0x1f7d   : > { %13298 = vst [vmem:[#allocation523_spill] sm:$0xff] %v9584_v24  ;;  %v7282_v24 = vmov 62  }
0x1f7e   : > { %7031 = vset.pattern.permute.xlu2 %v7282_v24  ;;  %7030 = vset.pattern.permute.xlu1 %v7282_v24 }
0x1f84   : > { %v9586_v48 = vpop.permute.xlu0 %4143 }
0x1f85   : > { %13299 = vst [vmem:[#allocation524_spill] sm:$0xff] %v9586_v48 }
0x1f8c   : > { %v9588_v14 = vpop.permute.xlu0 %4198 }
0x1f8d   : > { %13300 = vst [vmem:[#allocation525_spill] sm:$0xff] %v9588_v14 }
0x1f94   : > { %v9590_v4 = vpop.permute.xlu0 %4204 }
0x1f95   : > { %13301 = vst [vmem:[#allocation526_spill] sm:$0xff] %v9590_v4 }
0x1f9c   : > { %v9592_v26 = vpop.permute.xlu0 %4210 }
0x1f9d   : > { %13302 = vst [vmem:[#allocation527_spill] sm:$0xff] %v9592_v26 }
0x1fa4   : > { %v9594_v35 = vpop.permute.xlu0 %4216 }
0x1fa5   : > { %13303 = vst [vmem:[#allocation528_spill] sm:$0xff] %v9594_v35 }
0x1fac   : > { %v9600_v11 = vpop.permute.xlu0 %4271 }
0x1fad   : > { %v9596_v1 = vpop.permute.xlu2 %4859  ;;  %13306 = vst [vmem:[#allocation531_spill] sm:$0xff] %v9600_v11 }
0x1fae   : > { %13304 = vst [vmem:[#allocation529_spill] sm:$0xff] %v9596_v1 }
0x1fb4   : > { %v9606_v14 = vpop.permute.xlu0 %4277 }
0x1fb5   : > { %v9604_v29 = vpop.permute.xlu2 %4865  ;;  %13309 = vst [vmem:[#allocation534_spill] sm:$0xff] %v9606_v14 }
0x1fb6   : > { %13308 = vst [vmem:[#allocation533_spill] sm:$0xff] %v9604_v29 }
0x1fbc   : > { %v9612_v48 = vpop.permute.xlu0 %4283 }
0x1fbd   : > { %v9610_v26 = vpop.permute.xlu2 %4871  ;;  %13312 = vst [vmem:[#allocation537_spill] sm:$0xff] %v9612_v48 }
0x1fbe   : > { %13311 = vst [vmem:[#allocation536_spill] sm:$0xff] %v9610_v26 }
0x1fc4   : > { %v9620_v14 = vpop.permute.xlu0 %4289 }
0x1fc5   : > { %v9598_v58 = vpop.permute.xlu1 %4857  ;;  %v4906_v24 = vpop.permute.xlu2 %4905  ;;  %13313 = vst [vmem:[#allocation538_spill] sm:$0xff] %v9620_v14 }
0x1fc6   : > { %13305 = vst [vmem:[#allocation530_spill] sm:$0xff] %v9598_v58  ;;  %v4913_v29 = vmul.f32 %v4906_v24, %v7526_v55  ;;  %v4916_v48 = vmul.f32 %v4906_v24, %v7539_v59  ;;  %v4915_v11 = vmul.f32 %v4906_v24, %v7550_v5 }
0x1fcd   : > { %v9602_v2 = vpop.permute.xlu1 %4863 }
0x1fce   : > { %13307 = vst [vmem:[#allocation532_spill] sm:$0xff] %v9602_v2 }
0x1fd5   : > { %v9608_v4 = vpop.permute.xlu1 %4869 }
0x1fd6   : > { %13310 = vst [vmem:[#allocation535_spill] sm:$0xff] %v9608_v4 }
0x1fdd   : > { %v4902_v35 = vpop.permute.xlu1 %4901 }
0x1fde   : > { %v4910_v58 = vmul.f32 %v4902_v35, %v7484_v40  ;;  %v4909_v1 = vmul.f32 %v4902_v35, %v7464_v32  ;;  %v4908_v2 = vmul.f32 %v4902_v35, %v7452_v27  ;;  %v4912_v4 = vmul.f32 %v4902_v35, %v7575_v28 }
0x1fdf   : > { %v4911_v26 = vmul.f32 %v4902_v35, %v7497_v44 }
0x1fe0   : > { %4932 = vrot.lane.b32.xlu2 %v4910_v58, %s7283_s14  ;;  %4930 = vrot.lane.b32.xlu1 %v4909_v1, %s7283_s14  ;;  %v4914_v58 = vmul.f32 %v4906_v24, %v7517_v51  ;;  %v9625_v1 = vpop.permute.xlu0 %4344 }
0x1fe1   : > { %4928 = vrot.lane.b32.xlu0 %v4908_v2, %s7283_s14  ;;  %13314 = vst [vmem:[#allocation539_spill] sm:$0xff] %v9625_v1  ;;  %v4917_v2 = vmul.f32 %v4906_v24, %v7597_v33 }
0x1fe8   : > { %4938 = vrot.lane.b32.xlu2 %v4913_v29, %s7283_s14  ;;  %4936 = vrot.lane.b32.xlu1 %v4912_v4, %s7283_s14  ;;  %v9630_v35 = vpop.permute.xlu0 %4350 }
0x1fe9   : > { %4934 = vrot.lane.b32.xlu0 %v4911_v26, %s7283_s14  ;;  %13315 = vst [vmem:[#allocation540_spill] sm:$0xff] %v9630_v35 }
0x1ff0   : > { %4944 = vrot.lane.b32.xlu2 %v4916_v48, %s7283_s14  ;;  %4942 = vrot.lane.b32.xlu1 %v4915_v11, %s7283_s14  ;;  %v9632_v26 = vpop.permute.xlu0 %4356 }
0x1ff1   : > { %4940 = vrot.lane.b32.xlu0 %v4914_v58, %s7283_s14  ;;  %13316 = vst [vmem:[#allocation541_spill] sm:$0xff] %v9632_v26 }
0x1ff8   : > { %4978 = vperm.xlu2 %7031, %v9420_v52   ;;  %4974 = vperm.xlu1 %7030, %v9426_v7   ;;  %v9634_v29 = vpop.permute.xlu0 %4362 }
0x1ff9   : > { %4946 = vrot.lane.b32.xlu0 %v4917_v2, %s7283_s14  ;;  %13317 = vst [vmem:[#allocation542_spill] sm:$0xff] %v9634_v29  ;;  %s13902_s14 = smov 100  }
0x2000   : > { %v9636_v4 = vpop.permute.xlu0 %4417 }
0x2001   : > { %13318 = vst [vmem:[#allocation543_spill] sm:$0xff] %v9636_v4 }
0x2008   : > { %v9638_v14 = vpop.permute.xlu0 %4423 }
0x2009   : > { %13319 = vst [vmem:[#allocation544_spill] sm:$0xff] %v9638_v14  ;;  %v7284_v14 = vmov 63  }
0x200a   : > { %7033 = vset.pattern.permute.xlu2 %v7284_v14  ;;  %7032 = vset.pattern.permute.xlu1 %v7284_v14 }
0x2010   : > { %v9640_v48 = vpop.permute.xlu0 %4429 }
0x2011   : > { %13320 = vst [vmem:[#allocation545_spill] sm:$0xff] %v9640_v48 }
0x2018   : > { %v9642_v11 = vpop.permute.xlu0 %4435 }
0x2019   : > { %13321 = vst [vmem:[#allocation546_spill] sm:$0xff] %v9642_v11 }
0x2020   : > { %v9644_v24 = vpop.permute.xlu0 %4490 }
0x2021   : > { %13322 = vst [vmem:[#allocation547_spill] sm:$0xff] %v9644_v24 }
0x2028   : > { %v9646_v58 = vpop.permute.xlu0 %4496 }
0x2029   : > { %13323 = vst [vmem:[#allocation548_spill] sm:$0xff] %v9646_v58 }
0x2030   : > { %v9648_v1 = vpop.permute.xlu0 %4502 }
0x2031   : > { %13324 = vst [vmem:[#allocation549_spill] sm:$0xff] %v9648_v1 }
0x2038   : > { %v9654_v26 = vpop.permute.xlu0 %4508 }
0x2039   : > { %13327 = vst [vmem:[#allocation552_spill] sm:$0xff] %v9654_v26 }
0x203a   : > { %v9650_v2 = vpop.permute.xlu2 %4932 }
0x203b   : > { %13325 = vst [vmem:[#allocation550_spill] sm:$0xff] %v9650_v2 }
0x2040   : > { %v9660_v11 = vpop.permute.xlu0 %4563 }
0x2041   : > { %13330 = vst [vmem:[#allocation555_spill] sm:$0xff] %v9660_v11  ;;  %v715_v11 = vsel %vm714_vm3, %v7613_v46, %v7622_v36  ;;  %v643_v46 = vsel %vm641_vm2, %v7601_v42, %v7648_v60 }
0x2042   : > { %v9658_v4 = vpop.permute.xlu2 %4938 }
0x2043   : > { %13329 = vst [vmem:[#allocation554_spill] sm:$0xff] %v9658_v4 }
0x2048   : > { %v9669_v48 = vpop.permute.xlu0 %4569 }
0x2049   : > { %13333 = vst [vmem:[#allocation558_spill] sm:$0xff] %v9669_v48  ;;  %v495_v48 = vmul.f32 %v7438_v20, %v7464_v32 }
0x204a   : > { %v9664_v58 = vpop.permute.xlu2 %4944 }
0x204b   : > { %13332 = vst [vmem:[#allocation557_spill] sm:$0xff] %v9664_v58  ;;  %v569_v58 = vsel %vm568_vm1, %v7573_v18, %v7588_v37  ;;  %v570_v18 = vsel %vm568_vm1, %v7588_v37, %v7946_v50 }
0x2052   : > { %v9652_v35 = vpop.permute.xlu1 %4930  ;;  %v9674_v14 = vpop.permute.xlu2 %4978 }
0x2053   : > { %13326 = vst [vmem:[#allocation551_spill] sm:$0xff] %v9652_v35  ;;  %v4986_v4 = vmul.f32 %v9674_v14, %v7526_v55 }
0x205a   : > { %v9656_v29 = vpop.permute.xlu1 %4936 }
0x205b   : > { %13328 = vst [vmem:[#allocation553_spill] sm:$0xff] %v9656_v29 }
0x2062   : > { %v9662_v24 = vpop.permute.xlu1 %4942 }
0x2063   : > { %13331 = vst [vmem:[#allocation556_spill] sm:$0xff] %v9662_v24  ;;  %v494_v24 = vmul.f32 %v7438_v20, %v7452_v27 }
0x2065   : > { %v585_v29 = vadd.f32 %v569_v58, %v494_v24  ;;  %v9702_v24 = vpop.permute.xlu0 %4575  ;;  %v499_v58 = vmul.f32 %v7444_v23, %v7517_v51 }
0x2066   : > { %13334 = vst [vmem:[#allocation559_spill] sm:$0xff] %v9702_v24  ;;  %v497_v24 = vmul.f32 %v7438_v20, %v7497_v44 }
0x206a   : > { %v4975_v1 = vpop.permute.xlu1 %4974 }
0x206b   : > { %v4983_v2 = vmul.f32 %v4975_v1, %v7484_v40  ;;  %v4982_v35 = vmul.f32 %v4975_v1, %v7464_v32  ;;  %v4981_v26 = vmul.f32 %v4975_v1, %v7452_v27 }
0x206d   : > { %5005 = vrot.lane.b32.xlu2 %v4983_v2, %s7285_s26  ;;  %5003 = vrot.lane.b32.xlu1 %v4982_v35, %s7285_s26  ;;  %v4985_v2 = vmul.f32 %v4975_v1, %v7575_v28  ;;  %v642_v35 = vsel %vm641_vm2, %v7611_v30, %v7601_v42  ;;  %v496_v30 = vmul.f32 %v7438_v20, %v7484_v40 }
0x206e   : > { %5001 = vrot.lane.b32.xlu0 %v4981_v26, %s7285_s26  ;;  %v4984_v26 = vmul.f32 %v4975_v1, %v7497_v44  ;;  %v498_v1 = vmul.f32 %v7444_v23, %v7526_v55  ;;  %v658_v37 = vadd.f32 %v642_v35, %v585_v29  ;;  %v501_v29 = vmul.f32 %v7444_v23, %v7539_v59 }
0x206f   : > { %v716_v42 = vsel %vm714_vm3, %v7622_v36, %v7634_v53  ;;  %v574_v20 = vsel %vm568_vm1, %v7652_v62, %v7666_v10  ;;  %v572_v23 = vsel %vm568_vm1, %v7644_v21, %v7684_v38  ;;  %v4989_v36 = vmul.f32 %v9674_v14, %v7539_v59 }
0x2070   : > { %v731_v35 = vadd.f32 %v715_v11, %v658_v37  ;;  %v4988_v11 = vmul.f32 %v9674_v14, %v7550_v5  ;;  %v575_v37 = vsel %vm568_vm1, %v7666_v10, %v8019_v17  ;;  %v861_v38 = vsel %vm860_vm5, %v7930_v3, %v7639_v56 }
0x2071   : > { %v648_v10 = vsel %vm641_vm2, %v8034_v34, %v7662_v8 }
0x2075   : > { %5011 = vrot.lane.b32.xlu2 %v4986_v4, %s7285_s26  ;;  %5009 = vrot.lane.b32.xlu1 %v4985_v2, %s7285_s26  ;;  %v571_v4 = vsel %vm568_vm1, %v7946_v50, %v7644_v21  ;;  %v586_v2 = vadd.f32 %v570_v18, %v495_v48  ;;  %v788_v50 = vsel %vm787_vm4, %v7923_v54, %v7632_v22 }
0x2076   : > { %5007 = vrot.lane.b32.xlu0 %v4984_v26, %s7285_s26  ;;  %v587_v48 = vadd.f32 %v571_v4, %v496_v30  ;;  %v644_v26 = vsel %vm641_vm2, %v7648_v60, %v7624_v49  ;;  %v576_v54 = vsel %vm568_vm1, %v8019_v17, %v7688_v41  ;;  %v804_v60 = vadd.f32 %v788_v50, %v731_v35 }
0x2077   : > { %v659_v18 = vadd.f32 %v643_v46, %v586_v2  ;;  %v573_v30 = vsel %vm568_vm1, %v7978_v31, %v7652_v62  ;;  %v4987_v21 = vmul.f32 %v9674_v14, %v7517_v51  ;;  %v647_v4 = vsel %vm641_vm2, %v7650_v61, %v8034_v34 }
0x2078   : > { %v660_v41 = vadd.f32 %v644_v26, %v587_v48  ;;  %v590_v62 = vadd.f32 %v574_v20, %v499_v58  ;;  %v588_v31 = vadd.f32 %v572_v23, %v497_v24  ;;  %v592_v17 = vadd.f32 %v576_v54, %v501_v29  ;;  %v9769_v26 = vpop.permute.xlu0 %4581 }
0x2079   : > { %v732_v46 = vadd.f32 %v716_v42, %v659_v18  ;;  %v589_v3 = vadd.f32 %v573_v30, %v498_v1  ;;  %v591_v2 = vadd.f32 %v575_v37, %v500_v47  ;;  %v9761_v35 = vadd.f32 %v861_v38, %v804_v60  ;;  %v13340_v30 = vld [vmem:[#allocation13_spill] sm:$0xff] }
0x207a   : > { %v789_v50 = vsel %vm787_vm4, %v7632_v22, %v7641_v57  ;;  %v646_v58 = vsel %vm641_vm2, %v7658_v6, %v7650_v61  ;;  %v663_v48 = vadd.f32 %v647_v4, %v590_v62  ;;  %v717_v34 = vsel %vm714_vm3, %v7634_v53, %v7960_v19  ;;  %v13341_v4 = vld [vmem:[#allocation15_spill] sm:$0xff] }
0x207b   : > { %v664_v24 = vadd.f32 %v648_v10, %v591_v2  ;;  %v645_v47 = vsel %vm641_vm2, %v7624_v49, %v8039_v13  ;;  %v649_v22 = vsel %vm641_vm2, %v7662_v8, %v7690_v43  ;;  %v790_v61 = vsel %vm787_vm4, %v7641_v57, %v7965_v45  ;;  %v13342_v10 = vld [vmem:[#allocation85_spill] sm:$0xff]  ;;  %v13343_v2 = vld [vmem:[#allocation12_spill] sm:$0xff] }
0x207c   : > { %v733_v6 = vadd.f32 %v717_v34, %v660_v41  ;;  %v661_v1 = vadd.f32 %v645_v47, %v588_v31  ;;  %v665_v29 = vadd.f32 %v649_v22, %v592_v17  ;;  %v805_v42 = vadd.f32 %v789_v50, %v732_v46  ;;  %v13345_v34 = vld [vmem:[#allocation92_spill] sm:$0xff]  ;;  %v13347_v47 = vld [vmem:[#allocation17_spill] sm:$0xff]  ;;  %v13348_v22 = vld [vmem:[#allocation18_spill] sm:$0xff] }
0x207d   : > { %5017 = vrot.lane.b32.xlu2 %v4989_v36, %s7285_s26  ;;  %5015 = vrot.lane.b32.xlu1 %v4988_v11, %s7285_s26  ;;  %v662_v18 = vadd.f32 %v646_v58, %v589_v3  ;;  %v719_v53 = vsel %vm714_vm3, %v7654_v63, %v7992_v16  ;;  %v720_v49 = vsel %vm714_vm3, %v7992_v16, %v7664_v9  ;;  %v13336_v11 = vld [vmem:[#allocation71_spill] sm:$0xff]  ;;  %v13344_v58 = vld [vmem:[#allocation16_spill] sm:$0xff] }
0x207e   : > { %5013 = vrot.lane.b32.xlu0 %v4987_v21, %s7285_s26  ;;  %v792_v8 = vsel %vm787_vm4, %v7656_v25, %v8000_v39  ;;  %v721_v57 = vsel %vm714_vm3, %v7664_v9, %v7670_v12  ;;  %v736_v13 = vadd.f32 %v720_v49, %v663_v48  ;;  %v4990_v43 = vmul.f32 %v9674_v14, %v7597_v33  ;;  %v13335_v14 = vld [vmem:[#allocation9_spill] sm:$0xff] }
0x207f   : > { %v737_v20 = vadd.f32 %v721_v57, %v664_v24  ;;  %v718_v63 = vsel %vm714_vm3, %v7960_v19, %v7676_v15  ;;  %v722_v16 = vsel %vm714_vm3, %v7670_v12, %v8046_v0  ;;  %v806_v25 = vadd.f32 %v790_v61, %v733_v6  ;;  %v13337_v19 = vld [vmem:[#allocation78_spill] sm:$0xff] }
0x2080   : > { %v735_v23 = vadd.f32 %v719_v53, %v662_v18  ;;  %v734_v9 = vadd.f32 %v718_v63, %v661_v1  ;;  %v738_v54 = vadd.f32 %v722_v16, %v665_v29  ;;  %v862_v36 = vsel %vm860_vm5, %v7639_v56, %v13335_v14  ;;  %v13338_v12 = vld [vmem:[#allocation10_spill] sm:$0xff]  ;;  %v9821_v56 = vpop.permute.xlu0 %4636  ;;  %v13349_v29 = vld [vmem:[#allocation93_spill] sm:$0xff] }
0x2081   : > { %v863_v15 = vsel %vm860_vm5, %v13335_v14, %v13336_v11  ;;  %v865_v0 = vsel %vm860_vm5, %v13338_v12, %v13337_v19  ;;  %v878_v38 = vadd.f32 %v862_v36, %v805_v42  ;;  %v791_v62 = vsel %vm787_vm4, %v7965_v45, %v13341_v4  ;;  %v13346_v24 = vld [vmem:[#allocation14_spill] sm:$0xff]  ;;  %v13362_v4 = vld [vmem:[#allocation25_spill] sm:$0xff] }
0x2082   : > { %v808_v60 = vadd.f32 %v792_v8, %v735_v23  ;;  %v795_v31 = vsel %vm787_vm4, %v13340_v30, %v13342_v10  ;;  %v807_v46 = vadd.f32 %v791_v62, %v734_v9  ;;  %v866_v50 = vsel %vm860_vm5, %v13337_v19, %v13343_v2  ;;  %v13350_v18 = vld [vmem:[#allocation94_spill] sm:$0xff]  ;;  %v13351_v8 = vld [vmem:[#allocation19_spill] sm:$0xff] }
0x2083   : > { %v811_v3 = vadd.f32 %v795_v31, %v738_v54  ;;  %v864_v48 = vsel %vm860_vm5, %v13336_v11, %v13344_v58  ;;  %v868_v45 = vsel %vm860_vm5, %v13346_v24, %v13345_v34  ;;  %v935_v61 = vsel %vm933_vm6, %v13348_v22, %v13347_v47  ;;  %v13355_v9 = vld [vmem:[#allocation95_spill] sm:$0xff]  ;;  %v13356_v54 = vld [vmem:[#allocation20_spill] sm:$0xff]  ;;  %v13357_v19 = vld [vmem:[#allocation102_spill] sm:$0xff] }
0x2084   : > { %v881_v17 = vadd.f32 %v865_v0, %v808_v60  ;;  %v867_v1 = vsel %vm860_vm5, %v13343_v2, %v13346_v24  ;;  %v934_v42 = vsel %vm933_vm6, %v13349_v29, %v13348_v22  ;;  %v936_v53 = vsel %vm933_vm6, %v13347_v47, %v13350_v18  ;;  %v13359_v60 = vld [vmem:[#allocation24_spill] sm:$0xff]  ;;  %v13365_v2 = vld [vmem:[#allocation105_spill] sm:$0xff] }
0x2085   : > { %5051 = vperm.xlu2 %7033, %v9420_v52   ;;  %5047 = vperm.xlu1 %7032, %v9426_v7   ;;  %v13339_v52 = vld [vmem:[#allocation11_spill] sm:$0xff]  ;;  %v937_v57 = vsel %vm933_vm6, %v13350_v18, %v13351_v8  ;;  %v13354_v63 = vmov 0   ;;  %v880_v16 = vadd.f32 %v864_v48, %v807_v46  ;;  %v951_v23 = vadd.f32 %v935_v61, %v878_v38  ;;  %v13361_v38 = vld [vmem:[#allocation104_spill] sm:$0xff]  ;;  %v13371_v8 = vld [vmem:[#allocation114_spill] sm:$0xff] }
0x2086   : > { %5019 = vrot.lane.b32.xlu0 %v4990_v43, %s7285_s26  ;;  %v793_v7 = vsel %vm787_vm4, %v8000_v39, %v13339_v52  ;;  %v794_v37 = vsel %vm787_vm4, %v13339_v52, %v13340_v30  ;;  %v879_v39 = vadd.f32 %v863_v15, %v806_v25  ;;  %v13353_v43 = vld [vmem:[#allocation21_spill] sm:$0xff]  ;;  %v884_v25 = vadd.f32 %v868_v45, %v811_v3  ;;  %v13364_v46 = vld [vmem:[#allocation27_spill] sm:$0xff]  ;;  %v13367_v45 = vld [vmem:[#allocation112_spill] sm:$0xff]  ;;  %s13906_s26 = smov 96  }
0x2087   : > { %v809_v21 = vadd.f32 %v793_v7, %v736_v13  ;;  %v810_v41 = vadd.f32 %v794_v37, %v737_v20  ;;  %v13352_v13 = vld [vmem:[#allocation22_spill] sm:$0xff]  ;;  %v938_v14 = vsel %vm933_vm6, %v13356_v54, %v13355_v9  ;;  %v950_v36 = vadd.f32 %v934_v42, %v9761_v35  ;;  %v13358_v7 = vld [vmem:[#allocation23_spill] sm:$0xff]  ;;  %v13370_v42 = vld [vmem:[#allocation113_spill] sm:$0xff] }
0x2088   : > { %v940_v20 = vsel %vm933_vm6, %v13353_v43, %v13352_v13  ;;  %v952_v11 = vadd.f32 %v936_v53, %v879_v39  ;;  %v939_v15 = vsel %vm933_vm6, %v13355_v9, %v13353_v43  ;;  %v941_v12 = vsel %vm933_vm6, %v13352_v13, %v13357_v19  ;;  %v13360_v37 = vld [vmem:[#allocation103_spill] sm:$0xff]  ;;  %v13363_v39 = vld [vmem:[#allocation28_spill] sm:$0xff] }
0x2089   : > { %v882_v6 = vadd.f32 %v866_v50, %v809_v21  ;;  %v883_v49 = vadd.f32 %v867_v1, %v810_v41  ;;  %v953_v0 = vadd.f32 %v937_v57, %v880_v16  ;;  %v1008_v30 = vsel %vm1006_vm7, %v13359_v60, %v13358_v7  ;;  %v13366_v50 = vld [vmem:[#allocation26_spill] sm:$0xff] }
0x208a   : > { %v1007_v21 = vsel %vm1006_vm7, %v13360_v37, %v13359_v60  ;;  %v954_v35 = vadd.f32 %v938_v14, %v881_v17  ;;  %v1009_v41 = vsel %vm1006_vm7, %v13358_v7, %v13361_v38  ;;  %v1010_v62 = vsel %vm1006_vm7, %v13361_v38, %v13362_v4  ;;  %v9886_v17 = vpop.permute.xlu0 %4642  ;;  %v13369_v1 = vld [vmem:[#allocation30_spill] sm:$0xff]  ;;  %v13378_v7 = vld [vmem:[#allocation35_spill] sm:$0xff]  ;;  %v13379_v60 = vld [vmem:[#allocation36_spill] sm:$0xff] }
0x208b   : > { %v956_v52 = vadd.f32 %v940_v20, %v883_v49  ;;  %v955_v10 = vadd.f32 %v939_v15, %v882_v6  ;;  %v957_v31 = vadd.f32 %v941_v12, %v884_v25  ;;  %v1013_v3 = vsel %vm1006_vm7, %v13364_v46, %v13363_v39  ;;  %v13368_v6 = vld [vmem:[#allocation29_spill] sm:$0xff]  ;;  %v13372_v20 = vld [vmem:[#allocation31_spill] sm:$0xff]  ;;  %v13373_v25 = vld [vmem:[#allocation34_spill] sm:$0xff] }
0x208c   : > { %v1011_v58 = vsel %vm1006_vm7, %v13366_v50, %v13365_v2  ;;  %v1024_v48 = vadd.f32 %v1008_v30, %v951_v23  ;;  %v1023_v34 = vadd.f32 %v1007_v21, %v950_v36  ;;  %v1012_v24 = vsel %vm1006_vm7, %v13365_v2, %v13364_v46  ;;  %v13374_v23 = vld [vmem:[#allocation33_spill] sm:$0xff]  ;;  %v13375_v36 = vld [vmem:[#allocation115_spill] sm:$0xff]  ;;  %v13383_v46 = vld [vmem:[#allocation40_spill] sm:$0xff] }
0x208d   : > { %7034 = vset.pattern.permute.xlu1 %v13354_v63  ;;  %7035 = vset.pattern.permute.xlu2 %v13354_v63  ;;  %v1014_v47 = vsel %vm1006_vm7, %v13363_v39, %v13367_v45  ;;  %v1025_v22 = vadd.f32 %v1009_v41, %v952_v11  ;;  %v1026_v61 = vadd.f32 %v1010_v62, %v953_v0  ;;  %v13376_v11 = vld [vmem:[#allocation32_spill] sm:$0xff]  ;;  %v13377_v0 = vld [vmem:[#allocation122_spill] sm:$0xff]  ;;  %v13380_v37 = vld [vmem:[#allocation123_spill] sm:$0xff]  ;;  %vm1663_vm5 = vcmask 916480  }
0x208e   : > { %v1081_v29 = vsel %vm1079_vm8, %v13369_v1, %v13368_v6  ;;  %v1080_v18 = vsel %vm1079_vm8, %v13370_v42, %v13369_v1  ;;  %v1029_v53 = vadd.f32 %v1013_v3, %v956_v52  ;;  %v1027_v49 = vadd.f32 %v1011_v58, %v954_v35  ;;  %v13381_v41 = vld [vmem:[#allocation124_spill] sm:$0xff]  ;;  %v13384_v3 = vld [vmem:[#allocation39_spill] sm:$0xff]  ;;  %v13388_v1 = vld [vmem:[#allocation41_spill] sm:$0xff] }
0x208f   : > { %v1082_v57 = vsel %vm1079_vm8, %v13368_v6, %v13371_v8  ;;  %v1028_v13 = vadd.f32 %v1012_v24, %v955_v10  ;;  %v1030_v43 = vadd.f32 %v1014_v47, %v957_v31  ;;  %v1083_v16 = vsel %vm1079_vm8, %v13371_v8, %v13372_v20  ;;  %v13382_v31 = vld [vmem:[#allocation37_spill] sm:$0xff]  ;;  %v13386_v24 = vld [vmem:[#allocation38_spill] sm:$0xff] }
0x2090   : > { %v1086_v9 = vsel %vm1079_vm8, %v13374_v23, %v13373_v25  ;;  %v1097_v54 = vadd.f32 %v1081_v29, %v1024_v48  ;;  %v1096_v14 = vadd.f32 %v1080_v18, %v1023_v34  ;;  %v1084_v15 = vsel %vm1079_vm8, %v13376_v11, %v13375_v36  ;;  %v13385_v34 = vld [vmem:[#allocation125_spill] sm:$0xff]  ;;  %v13389_v29 = vld [vmem:[#allocation42_spill] sm:$0xff] }
0x2091   : > { %v1085_v19 = vsel %vm1079_vm8, %v13375_v36, %v13374_v23  ;;  %v1098_v12 = vadd.f32 %v1082_v57, %v1025_v22  ;;  %v1087_v52 = vsel %vm1079_vm8, %v13373_v25, %v13377_v0  ;;  %v1154_v30 = vsel %vm1152_vm9, %v13379_v60, %v13378_v7  ;;  %v13390_v8 = vld [vmem:[#allocation133_spill] sm:$0xff]  ;;  %v13393_v23 = vld [vmem:[#allocation46_spill] sm:$0xff] }
0x2092   : > { %v1153_v21 = vsel %vm1152_vm9, %v13380_v37, %v13379_v60  ;;  %v1099_v35 = vadd.f32 %v1083_v16, %v1026_v61  ;;  %v1102_v38 = vadd.f32 %v1086_v9, %v1029_v53  ;;  %v1155_v4 = vsel %vm1152_vm9, %v13378_v7, %v13381_v41  ;;  %v13387_v61 = vld [vmem:[#allocation132_spill] sm:$0xff]  ;;  %v9945_v18 = vpop.permute.xlu0 %4648  ;;  %v13392_v16 = vld [vmem:[#allocation43_spill] sm:$0xff]  ;;  %v13394_v9 = vld [vmem:[#allocation45_spill] sm:$0xff] }
0x2093   : > { %v1100_v62 = vadd.f32 %v1084_v15, %v1027_v49  ;;  %v1101_v10 = vadd.f32 %v1085_v19, %v1028_v13  ;;  %v1156_v39 = vsel %vm1152_vm9, %v13381_v41, %v13382_v31  ;;  %v1159_v2 = vsel %vm1152_vm9, %v13384_v3, %v13383_v46  ;;  %v13391_v13 = vld [vmem:[#allocation134_spill] sm:$0xff]  ;;  %v13395_v15 = vld [vmem:[#allocation135_spill] sm:$0xff]  ;;  %v13396_v19 = vld [vmem:[#allocation44_spill] sm:$0xff] }
0x2094   : > { %v1103_v50 = vadd.f32 %v1087_v52, %v1030_v43  ;;  %v1170_v58 = vadd.f32 %v1154_v30, %v1097_v54  ;;  %v1169_v48 = vadd.f32 %v1153_v21, %v1096_v14  ;;  %v1157_v45 = vsel %vm1152_vm9, %v13386_v24, %v13385_v34  ;;  %v13397_v60 = vld [vmem:[#allocation142_spill] sm:$0xff]  ;;  %v13401_v31 = vld [vmem:[#allocation144_spill] sm:$0xff]  ;;  %v13405_v24 = vld [vmem:[#allocation145_spill] sm:$0xff] }
0x2095   : > { %v1171_v47 = vadd.f32 %v1155_v4, %v1098_v12  ;;  %v1158_v22 = vsel %vm1152_vm9, %v13385_v34, %v13384_v3  ;;  %v1160_v6 = vsel %vm1152_vm9, %v13383_v46, %v13387_v61  ;;  %v1227_v42 = vsel %vm1225_vm10, %v13389_v29, %v13388_v1  ;;  %v13400_v4 = vld [vmem:[#allocation143_spill] sm:$0xff]  ;;  %v13402_v46 = vld [vmem:[#allocation49_spill] sm:$0xff] }
0x2096   : > { %v1172_v53 = vadd.f32 %v1156_v39, %v1099_v35  ;;  %v1175_v49 = vadd.f32 %v1159_v2, %v1102_v38  ;;  %v1226_v57 = vsel %vm1225_vm10, %v13390_v8, %v13389_v29  ;;  %v1228_v43 = vsel %vm1225_vm10, %v13388_v1, %v13391_v13  ;;  %v13398_v35 = vld [vmem:[#allocation47_spill] sm:$0xff]  ;;  %v13399_v38 = vld [vmem:[#allocation48_spill] sm:$0xff]  ;;  %v13409_v8 = vld [vmem:[#allocation54_spill] sm:$0xff] }
0x2097   : > { %v1173_v20 = vadd.f32 %v1157_v45, %v1100_v62  ;;  %v1229_v25 = vsel %vm1225_vm10, %v13391_v13, %v13392_v16  ;;  %v1232_v54 = vsel %vm1225_vm10, %v13394_v9, %v13393_v23  ;;  %v1174_v14 = vadd.f32 %v1158_v22, %v1101_v10  ;;  %v13406_v45 = vld [vmem:[#allocation50_spill] sm:$0xff]  ;;  %v13407_v1 = vld [vmem:[#allocation152_spill] sm:$0xff]  ;;  %v13410_v13 = vld [vmem:[#allocation153_spill] sm:$0xff] }
0x2098   : > { %v1176_v36 = vadd.f32 %v1160_v6, %v1103_v50  ;;  %v1243_v11 = vadd.f32 %v1227_v42, %v1170_v58  ;;  %v1230_v12 = vsel %vm1225_vm10, %v13396_v19, %v13395_v15  ;;  %v1242_v0 = vadd.f32 %v1226_v57, %v1169_v48  ;;  %v13403_v58 = vld [vmem:[#allocation52_spill] sm:$0xff]  ;;  %v13404_v48 = vld [vmem:[#allocation51_spill] sm:$0xff]  ;;  %v13414_v19 = vld [vmem:[#allocation57_spill] sm:$0xff] }
0x2099   : > { %v1244_v52 = vadd.f32 %v1228_v43, %v1171_v47  ;;  %v1231_v7 = vsel %vm1225_vm10, %v13395_v15, %v13394_v9  ;;  %v1233_v30 = vsel %vm1225_vm10, %v13393_v23, %v13397_v60  ;;  %v1245_v37 = vadd.f32 %v1229_v25, %v1172_v53  ;;  %v13411_v25 = vld [vmem:[#allocation154_spill] sm:$0xff]  ;;  %v13416_v60 = vld [vmem:[#allocation56_spill] sm:$0xff] }
0x209a   : > { %v1248_v21 = vadd.f32 %v1232_v54, %v1175_v49  ;;  %v1300_v41 = vsel %vm1298_vm11, %v13399_v38, %v13398_v35  ;;  %v1299_v62 = vsel %vm1298_vm11, %v13400_v4, %v13399_v38  ;;  %v1246_v10 = vadd.f32 %v1230_v12, %v1173_v20  ;;  %v13408_v49 = vld [vmem:[#allocation53_spill] sm:$0xff]  ;;  %v10001_v9 = vpop.permute.xlu0 %4654  ;;  %v13413_v15 = vld [vmem:[#allocation58_spill] sm:$0xff]  ;;  %v13419_v4 = vld [vmem:[#allocation60_spill] sm:$0xff] }
0x209b   : > { %v1301_v39 = vsel %vm1298_vm11, %v13398_v35, %v13401_v31  ;;  %v1302_v3 = vsel %vm1298_vm11, %v13401_v31, %v13402_v46  ;;  %v1247_v2 = vadd.f32 %v1231_v7, %v1174_v14  ;;  %v1249_v50 = vadd.f32 %v1233_v30, %v1176_v36  ;;  %v13412_v36 = vld [vmem:[#allocation55_spill] sm:$0xff]  ;;  %v13417_v35 = vld [vmem:[#allocation162_spill] sm:$0xff] }
0x209c   : > { %v1305_v34 = vsel %vm1298_vm11, %v13404_v48, %v13403_v58  ;;  %v1303_v47 = vsel %vm1298_vm11, %v13406_v45, %v13405_v24  ;;  %v1316_v22 = vadd.f32 %v1300_v41, %v1243_v11  ;;  %v1315_v61 = vadd.f32 %v1299_v62, %v1242_v0  ;;  %v13415_v7 = vld [vmem:[#allocation155_spill] sm:$0xff] }
0x209d   : > { %v1304_v6 = vsel %vm1298_vm11, %v13405_v24, %v13404_v48  ;;  %v1306_v29 = vsel %vm1298_vm11, %v13403_v58, %v13407_v1  ;;  %v1317_v42 = vadd.f32 %v1301_v39, %v1244_v52  ;;  %v1318_v53 = vadd.f32 %v1302_v3, %v1245_v37  ;;  %v13418_v41 = vld [vmem:[#allocation59_spill] sm:$0xff]  ;;  %v13421_v3 = vld [vmem:[#allocation164_spill] sm:$0xff]  ;;  %v13422_v48 = vld [vmem:[#allocation61_spill] sm:$0xff] }
0x209e   : > { %v1373_v57 = vsel %vm1371_vm12, %v13409_v8, %v13408_v49  ;;  %v1372_v43 = vsel %vm1371_vm12, %v13410_v13, %v13409_v8  ;;  %v1321_v20 = vadd.f32 %v1305_v34, %v1248_v21  ;;  %v1319_v16 = vadd.f32 %v1303_v47, %v1246_v10  ;;  %v13420_v10 = vld [vmem:[#allocation163_spill] sm:$0xff]  ;;  %v13423_v24 = vld [vmem:[#allocation64_spill] sm:$0xff]  ;;  %v13425_v1 = vld [vmem:[#allocation165_spill] sm:$0xff] }
0x209f   : > { %v1374_v23 = vsel %vm1371_vm12, %v13408_v49, %v13411_v25  ;;  %v1320_v54 = vadd.f32 %v1304_v6, %v1247_v2  ;;  %v1322_v14 = vadd.f32 %v1306_v29, %v1249_v50  ;;  %v1375_v11 = vsel %vm1371_vm12, %v13411_v25, %v13412_v36  ;;  %v13424_v45 = vld [vmem:[#allocation63_spill] sm:$0xff]  ;;  %v13426_v29 = vld [vmem:[#allocation62_spill] sm:$0xff]  ;;  %v13427_v8 = vld [vmem:[#allocation172_spill] sm:$0xff] }
0x20a0   : > { %v1378_v12 = vsel %vm1371_vm12, %v13414_v19, %v13413_v15  ;;  %v1389_v0 = vadd.f32 %v1373_v57, %v1316_v22  ;;  %v1388_v52 = vadd.f32 %v1372_v43, %v1315_v61  ;;  %v1376_v30 = vsel %vm1371_vm12, %v13416_v60, %v13415_v7  ;;  %v13428_v13 = vld [vmem:[#allocation65_spill] sm:$0xff]  ;;  %v13429_v43 = vld [vmem:[#allocation66_spill] sm:$0xff] }
0x20a1   : > { %v1377_v37 = vsel %vm1371_vm12, %v13415_v7, %v13414_v19  ;;  %v1390_v21 = vadd.f32 %v1374_v23, %v1317_v42  ;;  %v1379_v38 = vsel %vm1371_vm12, %v13413_v15, %v13417_v35  ;;  %v1446_v62 = vsel %vm1444_vm13, %v13419_v4, %v13418_v41  ;;  %v13430_v23 = vld [vmem:[#allocation173_spill] sm:$0xff]  ;;  %v13432_v19 = vld [vmem:[#allocation67_spill] sm:$0xff]  ;;  %v13436_v35 = vld [vmem:[#allocation68_spill] sm:$0xff] }
0x20a2   : > { %v1445_v31 = vsel %vm1444_vm13, %v13420_v10, %v13419_v4  ;;  %v1391_v39 = vadd.f32 %v1375_v11, %v1318_v53  ;;  %v1394_v46 = vadd.f32 %v1378_v12, %v1321_v20  ;;  %v1447_v2 = vsel %vm1444_vm13, %v13418_v41, %v13421_v3  ;;  %v10051_v11 = vpop.permute.xlu0 %4709  ;;  %v13437_v10 = vld [vmem:[#allocation182_spill] sm:$0xff] }
0x20a3   : > { %v1392_v50 = vadd.f32 %v1376_v30, %v1319_v16  ;;  %v1393_v58 = vadd.f32 %v1377_v37, %v1320_v54  ;;  %v1448_v34 = vsel %vm1444_vm13, %v13421_v3, %v13422_v48  ;;  %v1451_v47 = vsel %vm1444_vm13, %v13424_v45, %v13423_v24  ;;  %v13438_v3 = vld [vmem:[#allocation72_spill] sm:$0xff] }
0x20a4   : > { %v1395_v22 = vadd.f32 %v1379_v38, %v1322_v14  ;;  %v1462_v61 = vadd.f32 %v1446_v62, %v1389_v0  ;;  %v1461_v6 = vadd.f32 %v1445_v31, %v1388_v52  ;;  %v1449_v42 = vsel %vm1444_vm13, %v13426_v29, %v13425_v1  ;;  %v13431_v14 = vld [vmem:[#allocation174_spill] sm:$0xff]  ;;  %v13434_v52 = vld [vmem:[#allocation69_spill] sm:$0xff]  ;;  %v13444_v29 = vld [vmem:[#allocation76_spill] sm:$0xff] }
0x20a5   : > { %v1463_v53 = vadd.f32 %v1447_v2, %v1390_v21  ;;  %v1450_v49 = vsel %vm1444_vm13, %v13425_v1, %v13424_v45  ;;  %v1452_v57 = vsel %vm1444_vm13, %v13423_v24, %v13427_v8  ;;  %v1519_v20 = vsel %vm1517_vm14, %v13429_v43, %v13428_v13  ;;  %v13433_v0 = vld [vmem:[#allocation70_spill] sm:$0xff]  ;;  %v13435_v21 = vld [vmem:[#allocation175_spill] sm:$0xff]  ;;  %v13439_v2 = vld [vmem:[#allocation73_spill] sm:$0xff] }
0x20a6   : > { %v1464_v16 = vadd.f32 %v1448_v34, %v1391_v39  ;;  %v1467_v25 = vadd.f32 %v1451_v47, %v1394_v46  ;;  %v1518_v54 = vsel %vm1517_vm14, %v13430_v23, %v13429_v43  ;;  %v1520_v36 = vsel %vm1517_vm14, %v13428_v13, %v13431_v14  ;;  %v13441_v24 = vld [vmem:[#allocation184_spill] sm:$0xff]  ;;  %v13442_v47 = vld [vmem:[#allocation74_spill] sm:$0xff]  ;;  %v13443_v1 = vld [vmem:[#allocation77_spill] sm:$0xff] }
0x20a7   : > { %v1465_v15 = vadd.f32 %v1449_v42, %v1392_v50  ;;  %v1521_v12 = vsel %vm1517_vm14, %v13431_v14, %v13432_v19  ;;  %v1524_v7 = vsel %vm1517_vm14, %v13434_v52, %v13433_v0  ;;  %v1466_v60 = vadd.f32 %v1450_v49, %v1393_v58  ;;  %v13440_v58 = vld [vmem:[#allocation183_spill] sm:$0xff]  ;;  %v13449_v14 = vld [vmem:[#allocation80_spill] sm:$0xff] }
0x20a8   : > { %v1468_v30 = vadd.f32 %v1452_v57, %v1395_v22  ;;  %v1535_v37 = vadd.f32 %v1519_v20, %v1462_v61  ;;  %v1522_v38 = vsel %vm1517_vm14, %v13436_v35, %v13435_v21  ;;  %v1534_v41 = vadd.f32 %v1518_v54, %v1461_v6  ;;  %v13446_v49 = vld [vmem:[#allocation75_spill] sm:$0xff]  ;;  %v13447_v20 = vld [vmem:[#allocation192_spill] sm:$0xff] }
0x20a9   : > { %v1536_v4 = vadd.f32 %v1520_v36, %v1463_v53  ;;  %v1523_v62 = vsel %vm1517_vm14, %v13435_v21, %v13434_v52  ;;  %v1525_v31 = vsel %vm1517_vm14, %v13433_v0, %v13437_v10  ;;  %v1537_v39 = vadd.f32 %v1521_v12, %v1464_v16  ;;  %v13445_v53 = vld [vmem:[#allocation185_spill] sm:$0xff]  ;;  %v13448_v54 = vld [vmem:[#allocation79_spill] sm:$0xff]  ;;  %v13451_v52 = vld [vmem:[#allocation194_spill] sm:$0xff] }
0x20aa   : > { %v1540_v46 = vadd.f32 %v1524_v7, %v1467_v25  ;;  %v1592_v50 = vsel %vm1590_vm15, %v13439_v2, %v13438_v3  ;;  %v1591_v48 = vsel %vm1590_vm15, %v13440_v58, %v13439_v2  ;;  %v1538_v34 = vadd.f32 %v1522_v38, %v1465_v15  ;;  %v13450_v15 = vld [vmem:[#allocation193_spill] sm:$0xff]  ;;  %v13453_v35 = vld [vmem:[#allocation84_spill] sm:$0xff]  ;;  %v13454_v38 = vld [vmem:[#allocation83_spill] sm:$0xff] }
0x20ab   : > { %v1593_v45 = vsel %vm1590_vm15, %v13438_v3, %v13441_v24  ;;  %v1594_v22 = vsel %vm1590_vm15, %v13441_v24, %v13442_v47  ;;  %v1539_v61 = vadd.f32 %v1523_v62, %v1466_v60  ;;  %v1541_v6 = vadd.f32 %v1525_v31, %v1468_v30  ;;  %v13455_v31 = vld [vmem:[#allocation195_spill] sm:$0xff] }
0x20ac   : > { %v1597_v42 = vsel %vm1590_vm15, %v13444_v29, %v13443_v1  ;;  %v1595_v8 = vsel %vm1590_vm15, %v13446_v49, %v13445_v53  ;;  %v1608_v57 = vadd.f32 %v1592_v50, %v1535_v37  ;;  %v1607_v13 = vadd.f32 %v1591_v48, %v1534_v41  ;;  %v13452_v37 = vld [vmem:[#allocation81_spill] sm:$0xff]  ;;  %v13457_v50 = vld [vmem:[#allocation202_spill] sm:$0xff] }
0x20ad   : > { %v1596_v43 = vsel %vm1590_vm15, %v13445_v53, %v13444_v29  ;;  %v1598_v16 = vsel %vm1590_vm15, %v13443_v1, %v13447_v20  ;;  %v1609_v25 = vadd.f32 %v1593_v45, %v1536_v4  ;;  %v1610_v23 = vadd.f32 %v1594_v22, %v1537_v39  ;;  %v10107_v4 = vpop.permute.xlu0 %4715  ;;  %v13456_v39 = vld [vmem:[#allocation82_spill] sm:$0xff]  ;;  %v13460_v45 = vld [vmem:[#allocation203_spill] sm:$0xff]  ;;  %v13462_v53 = vld [vmem:[#allocation88_spill] sm:$0xff] }
0x20ae   : > { %v1665_v36 = vsel %vm1663_vm5, %v13449_v14, %v13448_v54  ;;  %v1664_v19 = vsel %vm1663_vm5, %v13450_v15, %v13449_v14  ;;  %v1613_v12 = vadd.f32 %v1597_v42, %v1540_v46  ;;  %v1611_v0 = vadd.f32 %v1595_v8, %v1538_v34  ;;  %v13458_v48 = vld [vmem:[#allocation86_spill] sm:$0xff]  ;;  %v13459_v34 = vld [vmem:[#allocation87_spill] sm:$0xff]  ;;  %v13467_v15 = vld [vmem:[#allocation212_spill] sm:$0xff] }
0x20af   : > { %v1666_v7 = vsel %vm1663_vm5, %v13448_v54, %v13451_v52  ;;  %vm1736_vm6 = vcmask 908288   ;;  %v1612_v60 = vadd.f32 %v1596_v43, %v1539_v61  ;;  %v1614_v30 = vadd.f32 %v1598_v16, %v1541_v6  ;;  %v13461_v6 = vld [vmem:[#allocation204_spill] sm:$0xff]  ;;  %v13463_v8 = vld [vmem:[#allocation91_spill] sm:$0xff] }
0x20b0   : > { %v1667_v21 = vsel %vm1663_vm5, %v13451_v52, %v13452_v37  ;;  %v1670_v41 = vsel %vm1663_vm5, %v13454_v38, %v13453_v35  ;;  %v1681_v62 = vadd.f32 %v1665_v36, %v1608_v57  ;;  %v1680_v10 = vadd.f32 %v1664_v19, %v1607_v13  ;;  %v13464_v57 = vld [vmem:[#allocation90_spill] sm:$0xff] }
0x20b1   : > { %v1668_v46 = vsel %vm1663_vm5, %v13456_v39, %v13455_v31  ;;  %v1669_v3 = vsel %vm1663_vm5, %v13455_v31, %v13454_v38  ;;  %v1682_v2 = vadd.f32 %v1666_v7, %v1609_v25  ;;  %v1671_v58 = vsel %vm1663_vm5, %v13453_v35, %v13457_v50  ;;  %v13465_v25 = vld [vmem:[#allocation205_spill] sm:$0xff]  ;;  %v13471_v35 = vld [vmem:[#allocation214_spill] sm:$0xff]  ;;  %v13474_v31 = vld [vmem:[#allocation100_spill] sm:$0xff] }
0x20b2   : > { %v1738_v24 = vsel %vm1736_vm6, %v13459_v34, %v13458_v48  ;;  %v1737_v47 = vsel %vm1736_vm6, %v13460_v45, %v13459_v34  ;;  %v1683_v22 = vadd.f32 %v1667_v21, %v1610_v23  ;;  %v1686_v61 = vadd.f32 %v1670_v41, %v1613_v12  ;;  %v13466_v23 = vld [vmem:[#allocation89_spill] sm:$0xff]  ;;  %v13468_v12 = vld [vmem:[#allocation96_spill] sm:$0xff]  ;;  %v13472_v41 = vld [vmem:[#allocation98_spill] sm:$0xff] }
0x20b3   : > { %v1739_v1 = vsel %vm1736_vm6, %v13458_v48, %v13461_v6  ;;  %vm1809_vm7 = vcmask 900096   ;;  %v1684_v29 = vadd.f32 %v1668_v46, %v1611_v0  ;;  %v1685_v42 = vadd.f32 %v1669_v3, %v1612_v60  ;;  %v13469_v0 = vld [vmem:[#allocation97_spill] sm:$0xff]  ;;  %v13475_v50 = vld [vmem:[#allocation215_spill] sm:$0xff]  ;;  %v13477_v45 = vld [vmem:[#allocation222_spill] sm:$0xff] }
0x20b4   : > { %v1740_v49 = vsel %vm1736_vm6, %v13461_v6, %v13462_v53  ;;  %v1743_v13 = vsel %vm1736_vm6, %v13464_v57, %v13463_v8  ;;  %v1687_v43 = vadd.f32 %v1671_v58, %v1614_v30  ;;  %v1754_v20 = vadd.f32 %v1738_v24, %v1681_v62  ;;  %v13470_v30 = vld [vmem:[#allocation213_spill] sm:$0xff]  ;;  %v13476_v58 = vld [vmem:[#allocation99_spill] sm:$0xff] }
0x20b5   : > { %v1753_v16 = vadd.f32 %v1737_v47, %v1680_v10  ;;  %v1741_v54 = vsel %vm1736_vm6, %v13466_v23, %v13465_v25  ;;  %v1755_v14 = vadd.f32 %v1739_v1, %v1682_v2  ;;  %v1742_v36 = vsel %vm1736_vm6, %v13465_v25, %v13464_v57  ;;  %v13473_v10 = vld [vmem:[#allocation101_spill] sm:$0xff]  ;;  %v10169_v1 = vpop.permute.xlu0 %4721 }
0x20b6   : > { %v1744_v19 = vsel %vm1736_vm6, %v13463_v8, %v13467_v15  ;;  %v1811_v52 = vsel %vm1809_vm7, %v13469_v0, %v13468_v12  ;;  %v1756_v7 = vadd.f32 %v1740_v49, %v1683_v22  ;;  %v1759_v60 = vadd.f32 %v1743_v13, %v1686_v61  ;;  %v13478_v22 = vld [vmem:[#allocation106_spill] sm:$0xff]  ;;  %v13479_v61 = vld [vmem:[#allocation107_spill] sm:$0xff]  ;;  %v13481_v13 = vld [vmem:[#allocation224_spill] sm:$0xff] }
0x20b7   : > { %v1810_v37 = vsel %vm1809_vm7, %v13470_v30, %v13469_v0  ;;  %vm1882_vm9 = vcmask 891904   ;;  %v1757_v21 = vadd.f32 %v1741_v54, %v1684_v29  ;;  %v1812_v38 = vsel %vm1809_vm7, %v13468_v12, %v13471_v35  ;;  %v13480_v49 = vld [vmem:[#allocation223_spill] sm:$0xff]  ;;  %v13485_v12 = vld [vmem:[#allocation225_spill] sm:$0xff] }
0x20b8   : > { %v1813_v62 = vsel %vm1809_vm7, %v13471_v35, %v13472_v41  ;;  %v1816_v39 = vsel %vm1809_vm7, %v13474_v31, %v13473_v10  ;;  %v1758_v46 = vadd.f32 %v1742_v36, %v1685_v42  ;;  %v1760_v3 = vadd.f32 %v1744_v19, %v1687_v43  ;;  %v13484_v36 = vld [vmem:[#allocation110_spill] sm:$0xff]  ;;  %v13486_v0 = vld [vmem:[#allocation109_spill] sm:$0xff]  ;;  %v13488_v35 = vld [vmem:[#allocation116_spill] sm:$0xff] }
0x20b9   : > { %v1827_v2 = vadd.f32 %v1811_v52, %v1754_v20  ;;  %v1814_v48 = vsel %vm1809_vm7, %v13476_v58, %v13475_v50  ;;  %v1826_v34 = vadd.f32 %v1810_v37, %v1753_v16  ;;  %v1815_v24 = vsel %vm1809_vm7, %v13475_v50, %v13474_v31  ;;  %v13482_v20 = vld [vmem:[#allocation108_spill] sm:$0xff] }
0x20ba   : > { %v1817_v47 = vsel %vm1809_vm7, %v13473_v10, %v13477_v45  ;;  %v1884_v6 = vsel %vm1882_vm9, %v13479_v61, %v13478_v22  ;;  %v1828_v29 = vadd.f32 %v1812_v38, %v1755_v14  ;;  %v1829_v42 = vadd.f32 %v1813_v62, %v1756_v7  ;;  %v13483_v14 = vld [vmem:[#allocation111_spill] sm:$0xff]  ;;  %v13489_v38 = vld [vmem:[#allocation117_spill] sm:$0xff] }
0x20bb   : > { %v1832_v53 = vadd.f32 %v1816_v39, %v1759_v60  ;;  %v1883_v8 = vsel %vm1882_vm9, %v13480_v49, %v13479_v61  ;;  %v1830_v57 = vadd.f32 %v1814_v48, %v1757_v21  ;;  %v1885_v43 = vsel %vm1882_vm9, %v13478_v22, %v13481_v13  ;;  %v13487_v60 = vld [vmem:[#allocation232_spill] sm:$0xff]  ;;  %v13490_v62 = vld [vmem:[#allocation233_spill] sm:$0xff]  ;;  %v13491_v39 = vld [vmem:[#allocation234_spill] sm:$0xff] }
0x20bc   : > { %v1886_v16 = vsel %vm1882_vm9, %v13481_v13, %v13482_v20  ;;  %vm1955_vm10 = vcmask 883712   ;;  %v1831_v25 = vadd.f32 %v1815_v24, %v1758_v46  ;;  %v1833_v23 = vadd.f32 %v1817_v47, %v1760_v3  ;;  %v13492_v3 = vld [vmem:[#allocation118_spill] sm:$0xff]  ;;  %v13494_v24 = vld [vmem:[#allocation120_spill] sm:$0xff]  ;;  %v13495_v61 = vld [vmem:[#allocation235_spill] sm:$0xff] }
0x20bd   : > { %v1900_v54 = vadd.f32 %v1884_v6, %v1827_v2  ;;  %v1889_v15 = vsel %vm1882_vm9, %v13484_v36, %v13483_v14  ;;  %v1899_v19 = vadd.f32 %v1883_v8, %v1826_v34  ;;  %v1887_v52 = vsel %vm1882_vm9, %v13486_v0, %v13485_v12  ;;  %v13493_v34 = vld [vmem:[#allocation121_spill] sm:$0xff]  ;;  %v13496_v6 = vld [vmem:[#allocation119_spill] sm:$0xff]  ;;  %v13497_v8 = vld [vmem:[#allocation242_spill] sm:$0xff] }
0x20be   : > { %v1888_v7 = vsel %vm1882_vm9, %v13485_v12, %v13484_v36  ;;  %v1890_v30 = vsel %vm1882_vm9, %v13483_v14, %v13487_v60  ;;  %v1901_v37 = vadd.f32 %v1885_v43, %v1828_v29  ;;  %v1902_v21 = vadd.f32 %v1886_v16, %v1829_v42  ;;  %v13498_v13 = vld [vmem:[#allocation126_spill] sm:$0xff]  ;;  %v13499_v43 = vld [vmem:[#allocation127_spill] sm:$0xff]  ;;  %v10225_v36 = vpop.permute.xlu0 %4727  ;;  %v13502_v12 = vld [vmem:[#allocation128_spill] sm:$0xff] }
0x20bf   : > { %v1957_v41 = vsel %vm1955_vm10, %v13489_v38, %v13488_v35  ;;  %v1956_v10 = vsel %vm1955_vm10, %v13490_v62, %v13489_v38  ;;  %v1905_v31 = vadd.f32 %v1889_v15, %v1832_v53  ;;  %v1958_v46 = vsel %vm1955_vm10, %v13488_v35, %v13491_v39  ;;  %v13506_v35 = vld [vmem:[#allocation129_spill] sm:$0xff] }
0x20c0   : > { %v1959_v2 = vsel %vm1955_vm10, %v13491_v39, %v13492_v3  ;;  %vm2028_vm11 = vcmask 875520   ;;  %v1903_v50 = vadd.f32 %v1887_v52, %v1830_v57  ;;  %v1904_v58 = vadd.f32 %v1888_v7, %v1831_v25  ;;  %v13500_v25 = vld [vmem:[#allocation243_spill] sm:$0xff]  ;;  %v13504_v7 = vld [vmem:[#allocation130_spill] sm:$0xff]  ;;  %v13509_v3 = vld [vmem:[#allocation137_spill] sm:$0xff] }
0x20c1   : > { %v1906_v48 = vadd.f32 %v1890_v30, %v1833_v23  ;;  %v1962_v45 = vsel %vm1955_vm10, %v13494_v24, %v13493_v34  ;;  %v1973_v47 = vadd.f32 %v1957_v41, %v1900_v54  ;;  %v1972_v22 = vadd.f32 %v1956_v10, %v1899_v19  ;;  %v13501_v54 = vld [vmem:[#allocation244_spill] sm:$0xff]  ;;  %v13503_v52 = vld [vmem:[#allocation131_spill] sm:$0xff] }
0x20c2   : > { %v1960_v29 = vsel %vm1955_vm10, %v13496_v6, %v13495_v61  ;;  %v1961_v42 = vsel %vm1955_vm10, %v13495_v61, %v13494_v24  ;;  %v1974_v53 = vadd.f32 %v1958_v46, %v1901_v37  ;;  %v1975_v49 = vadd.f32 %v1959_v2, %v1902_v21  ;;  %v13505_v21 = vld [vmem:[#allocation245_spill] sm:$0xff]  ;;  %v13508_v46 = vld [vmem:[#allocation136_spill] sm:$0xff]  ;;  %v13511_v24 = vld [vmem:[#allocation254_spill] sm:$0xff] }
0x20c3   : > { %v1963_v57 = vsel %vm1955_vm10, %v13493_v34, %v13497_v8  ;;  %v2030_v20 = vsel %vm2028_vm11, %v13499_v43, %v13498_v13  ;;  %v1978_v16 = vadd.f32 %v1962_v45, %v1905_v31  ;;  %v2029_v23 = vsel %vm2028_vm11, %v13500_v25, %v13499_v43  ;;  %v13507_v31 = vld [vmem:[#allocation252_spill] sm:$0xff]  ;;  %v13512_v61 = vld [vmem:[#allocation138_spill] sm:$0xff] }
0x20c4   : > { %v2031_v14 = vsel %vm2028_vm11, %v13498_v13, %v13501_v54  ;;  %vm2101_vm13 = vcmask 867328   ;;  %v1976_v15 = vadd.f32 %v1960_v29, %v1903_v50  ;;  %v1977_v19 = vadd.f32 %v1961_v42, %v1904_v58  ;;  %v13516_v13 = vld [vmem:[#allocation139_spill] sm:$0xff] }
0x20c5   : > { %v2032_v0 = vsel %vm2028_vm11, %v13501_v54, %v13502_v12  ;;  %v2035_v60 = vsel %vm2028_vm11, %v13504_v7, %v13503_v52  ;;  %v1979_v30 = vadd.f32 %v1963_v57, %v1906_v48  ;;  %v2046_v37 = vadd.f32 %v2030_v20, %v1973_v47  ;;  %v13510_v48 = vld [vmem:[#allocation253_spill] sm:$0xff]  ;;  %v13515_v57 = vld [vmem:[#allocation255_spill] sm:$0xff] }
0x20c6   : > { %v2033_v38 = vsel %vm2028_vm11, %v13506_v35, %v13505_v21  ;;  %v2034_v41 = vsel %vm2028_vm11, %v13505_v21, %v13504_v7  ;;  %v2045_v62 = vadd.f32 %v2029_v23, %v1972_v22  ;;  %v2047_v10 = vadd.f32 %v2031_v14, %v1974_v53  ;;  %v13513_v53 = vld [vmem:[#allocation141_spill] sm:$0xff]  ;;  %v13517_v23 = vld [vmem:[#allocation262_spill] sm:$0xff]  ;;  %v13521_v7 = vld [vmem:[#allocation264_spill] sm:$0xff] }
0x20c7   : > { %v2036_v39 = vsel %vm2028_vm11, %v13503_v52, %v13507_v31  ;;  %v2103_v2 = vsel %vm2101_vm13, %v13509_v3, %v13508_v46  ;;  %v2048_v50 = vadd.f32 %v2032_v0, %v1975_v49  ;;  %v2051_v58 = vadd.f32 %v2035_v60, %v1978_v16  ;;  %v13514_v49 = vld [vmem:[#allocation140_spill] sm:$0xff]  ;;  %v13520_v0 = vld [vmem:[#allocation263_spill] sm:$0xff]  ;;  %v13524_v31 = vld [vmem:[#allocation150_spill] sm:$0xff] }
0x20c8   : > { %v2102_v34 = vsel %vm2101_vm13, %v13510_v48, %v13509_v3  ;;  %v2104_v45 = vsel %vm2101_vm13, %v13508_v46, %v13511_v24  ;;  %v2049_v47 = vadd.f32 %v2033_v38, %v1976_v15  ;;  %v2050_v22 = vadd.f32 %v2034_v41, %v1977_v19  ;;  %v13518_v15 = vld [vmem:[#allocation146_spill] sm:$0xff]  ;;  %v13519_v19 = vld [vmem:[#allocation147_spill] sm:$0xff]  ;;  %v13522_v35 = vld [vmem:[#allocation148_spill] sm:$0xff] }
0x20c9   : > { %v2105_v6 = vsel %vm2101_vm13, %v13511_v24, %v13512_v61  ;;  %vm2174_vm14 = vcmask 859136   ;;  %v2052_v29 = vadd.f32 %v2036_v39, %v1979_v30  ;;  %v2119_v42 = vadd.f32 %v2103_v2, %v2046_v37  ;;  %v10275_v30 = vpop.permute.xlu0 %4782  ;;  %v13525_v46 = vld [vmem:[#allocation265_spill] sm:$0xff] }
0x20ca   : > { %v2108_v8 = vsel %vm2101_vm13, %v13514_v49, %v13513_v53  ;;  %v2106_v43 = vsel %vm2101_vm13, %v13516_v13, %v13515_v57  ;;  %v2118_v20 = vadd.f32 %v2102_v34, %v2045_v62  ;;  %v2120_v16 = vadd.f32 %v2104_v45, %v2047_v10  ;;  %v13523_v10 = vld [vmem:[#allocation151_spill] sm:$0xff]  ;;  %v13526_v3 = vld [vmem:[#allocation149_spill] sm:$0xff]  ;;  %v13527_v45 = vld [vmem:[#allocation272_spill] sm:$0xff] }
0x20cb   : > { %v2107_v25 = vsel %vm2101_vm13, %v13515_v57, %v13514_v49  ;;  %v2109_v54 = vsel %vm2101_vm13, %v13513_v53, %v13517_v23  ;;  %v2121_v14 = vadd.f32 %v2105_v6, %v2048_v50  ;;  %v2176_v12 = vsel %vm2174_vm14, %v13519_v19, %v13518_v15  ;;  %v13529_v61 = vld [vmem:[#allocation157_spill] sm:$0xff] }
0x20cc   : > { %v2175_v52 = vsel %vm2174_vm14, %v13520_v0, %v13519_v19  ;;  %v2177_v60 = vsel %vm2174_vm14, %v13518_v15, %v13521_v7  ;;  %v2124_v37 = vadd.f32 %v2108_v8, %v2051_v58  ;;  %v2122_v21 = vadd.f32 %v2106_v43, %v2049_v47  ;;  %v13531_v8 = vld [vmem:[#allocation274_spill] sm:$0xff] }
0x20cd   : > { %v2178_v38 = vsel %vm2174_vm14, %v13521_v7, %v13522_v35  ;;  %vm2247_vm15 = vcmask 850944   ;;  %v2123_v41 = vadd.f32 %v2107_v25, %v2050_v22  ;;  %v2125_v62 = vadd.f32 %v2109_v54, %v2052_v29  ;;  %v13528_v22 = vld [vmem:[#allocation156_spill] sm:$0xff]  ;;  %v13530_v29 = vld [vmem:[#allocation273_spill] sm:$0xff]  ;;  %v13532_v43 = vld [vmem:[#allocation158_spill] sm:$0xff] }
0x20ce   : > { %v2181_v39 = vsel %vm2174_vm14, %v13524_v31, %v13523_v10  ;;  %v2179_v2 = vsel %vm2174_vm14, %v13526_v3, %v13525_v46  ;;  %v2192_v50 = vadd.f32 %v2176_v12, %v2119_v42  ;;  %v2191_v48 = vadd.f32 %v2175_v52, %v2118_v20  ;;  %v13534_v25 = vld [vmem:[#allocation160_spill] sm:$0xff]  ;;  %v13535_v54 = vld [vmem:[#allocation275_spill] sm:$0xff] }
0x20cf   : > { %v2193_v34 = vadd.f32 %v2177_v60, %v2120_v16  ;;  %v2180_v58 = vsel %vm2174_vm14, %v13525_v46, %v13524_v31  ;;  %v2194_v24 = vadd.f32 %v2178_v38, %v2121_v14  ;;  %v2182_v47 = vsel %vm2174_vm14, %v13523_v10, %v13527_v45  ;;  %v13533_v16 = vld [vmem:[#allocation161_spill] sm:$0xff]  ;;  %v13536_v14 = vld [vmem:[#allocation159_spill] sm:$0xff]  ;;  %v13537_v60 = vld [vmem:[#allocation282_spill] sm:$0xff] }
0x20d0   : > { %v2249_v6 = vsel %vm2247_vm15, %v13529_v61, %v13528_v22  ;;  %v2248_v53 = vsel %vm2247_vm15, %v13530_v29, %v13529_v61  ;;  %v2197_v42 = vadd.f32 %v2181_v39, %v2124_v37  ;;  %v2195_v49 = vadd.f32 %v2179_v2, %v2122_v21  ;;  %v13538_v21 = vld [vmem:[#allocation166_spill] sm:$0xff]  ;;  %v13539_v35 = vld [vmem:[#allocation167_spill] sm:$0xff]  ;;  %v13541_v3 = vld [vmem:[#allocation284_spill] sm:$0xff] }
0x20d1   : > { %v2250_v57 = vsel %vm2247_vm15, %v13528_v22, %v13531_v8  ;;  %vm2320_vm6 = vcmask 842752   ;;  %v2196_v13 = vadd.f32 %v2180_v58, %v2123_v41  ;;  %v2251_v20 = vsel %vm2247_vm15, %v13531_v8, %v13532_v43  ;;  %v13540_v41 = vld [vmem:[#allocation283_spill] sm:$0xff]  ;;  %v13544_v58 = vld [vmem:[#allocation170_spill] sm:$0xff]  ;;  %v13546_v29 = vld [vmem:[#allocation169_spill] sm:$0xff] }
0x20d2   : > { %v2254_v23 = vsel %vm2247_vm15, %v13534_v25, %v13533_v16  ;;  %v2252_v15 = vsel %vm2247_vm15, %v13536_v14, %v13535_v54  ;;  %v2198_v19 = vadd.f32 %v2182_v47, %v2125_v62  ;;  %v2265_v12 = vadd.f32 %v2249_v6, %v2192_v50  ;;  %v13542_v50 = vld [vmem:[#allocation168_spill] sm:$0xff]  ;;  %v10331_v47 = vpop.permute.xlu0 %4788  ;;  %v13545_v6 = vld [vmem:[#allocation285_spill] sm:$0xff] }
0x20d3   : > { %v2264_v0 = vadd.f32 %v2248_v53, %v2191_v48  ;;  %v2253_v52 = vsel %vm2247_vm15, %v13535_v54, %v13534_v25  ;;  %v2266_v7 = vadd.f32 %v2250_v57, %v2193_v34  ;;  %v2255_v37 = vsel %vm2247_vm15, %v13533_v16, %v13537_v60  ;;  %v13543_v34 = vld [vmem:[#allocation171_spill] sm:$0xff]  ;;  %v13547_v57 = vld [vmem:[#allocation292_spill] sm:$0xff]  ;;  %v13550_v25 = vld [vmem:[#allocation293_spill] sm:$0xff] }
0x20d4   : > { %v2322_v38 = vsel %vm2320_vm6, %v13539_v35, %v13538_v21  ;;  %v2321_v10 = vsel %vm2320_vm6, %v13540_v41, %v13539_v35  ;;  %v2267_v62 = vadd.f32 %v2251_v20, %v2194_v24  ;;  %v2270_v31 = vadd.f32 %v2254_v23, %v2197_v42  ;;  %v10336_v42 = vpop.permute.xlu2 %5005  ;;  %v13548_v43 = vld [vmem:[#allocation176_spill] sm:$0xff]  ;;  %v13549_v20 = vld [vmem:[#allocation177_spill] sm:$0xff] }
0x20d5   : > { %v2268_v39 = vadd.f32 %v2252_v15, %v2195_v49  ;;  %vm2393_vm7 = vcmask 834560   ;;  %v2269_v46 = vadd.f32 %v2253_v52, %v2196_v13  ;;  %v2323_v2 = vsel %vm2320_vm6, %v13538_v21, %v13541_v3  ;;  %v13552_v52 = vld [vmem:[#allocation178_spill] sm:$0xff]  ;;  %v13554_v21 = vld [vmem:[#allocation180_spill] sm:$0xff] }
0x20d6   : > { %v2324_v48 = vsel %vm2320_vm6, %v13541_v3, %v13542_v50  ;;  %v2327_v45 = vsel %vm2320_vm6, %v13544_v58, %v13543_v34  ;;  %v2271_v22 = vadd.f32 %v2255_v37, %v2198_v19  ;;  %v2338_v24 = vadd.f32 %v2322_v38, %v2265_v12  ;;  %v13551_v12 = vld [vmem:[#allocation294_spill] sm:$0xff]  ;;  %v13553_v37 = vld [vmem:[#allocation181_spill] sm:$0xff] }
0x20d7   : > { %v2337_v61 = vadd.f32 %v2321_v10, %v2264_v0  ;;  %v2325_v53 = vsel %vm2320_vm6, %v13546_v29, %v13545_v6  ;;  %v2326_v8 = vsel %vm2320_vm6, %v13545_v6, %v13544_v58  ;;  %v2328_v13 = vsel %vm2320_vm6, %v13543_v34, %v13547_v57  ;;  %v13559_v34 = vld [vmem:[#allocation187_spill] sm:$0xff]  ;;  %v13561_v6 = vld [vmem:[#allocation304_spill] sm:$0xff] }
0x20d8   : > { %v2395_v16 = vsel %vm2393_vm7, %v13549_v20, %v13548_v43  ;;  %v2394_v23 = vsel %vm2393_vm7, %v13550_v25, %v13549_v20  ;;  %v2339_v54 = vadd.f32 %v2323_v2, %v2266_v7  ;;  %v2340_v14 = vadd.f32 %v2324_v48, %v2267_v62  ;;  %v13555_v62 = vld [vmem:[#allocation295_spill] sm:$0xff]  ;;  %v13557_v2 = vld [vmem:[#allocation302_spill] sm:$0xff] }
0x20d9   : > { %v2343_v15 = vadd.f32 %v2327_v45, %v2270_v31  ;;  %vm2466_vm9 = vcmask 826368   ;;  %v2341_v19 = vadd.f32 %v2325_v53, %v2268_v39  ;;  %v2396_v0 = vsel %vm2393_vm7, %v13548_v43, %v13551_v12  ;;  %v13556_v31 = vld [vmem:[#allocation179_spill] sm:$0xff]  ;;  %v13558_v48 = vld [vmem:[#allocation186_spill] sm:$0xff]  ;;  %v13562_v53 = vld [vmem:[#allocation188_spill] sm:$0xff] }
0x20da   : > { %v2397_v60 = vsel %vm2393_vm7, %v13551_v12, %v13552_v52  ;;  %v2400_v35 = vsel %vm2393_vm7, %v13554_v21, %v13553_v37  ;;  %v2342_v38 = vadd.f32 %v2326_v8, %v2269_v46  ;;  %v2344_v41 = vadd.f32 %v2328_v13, %v2271_v22  ;;  %v13563_v57 = vld [vmem:[#allocation191_spill] sm:$0xff]  ;;  %v13564_v13 = vld [vmem:[#allocation190_spill] sm:$0xff]  ;;  %v13566_v12 = vld [vmem:[#allocation189_spill] sm:$0xff] }
0x20db   : > { %v2411_v10 = vadd.f32 %v2395_v16, %v2338_v24  ;;  %v2410_v7 = vadd.f32 %v2394_v23, %v2337_v61  ;;  %v2398_v39 = vsel %vm2393_vm7, %v13556_v31, %v13555_v62  ;;  %v2399_v3 = vsel %vm2393_vm7, %v13555_v62, %v13554_v21  ;;  %v13560_v24 = vld [vmem:[#allocation303_spill] sm:$0xff]  ;;  %v13570_v31 = vld [vmem:[#allocation313_spill] sm:$0xff] }
0x20dc   : > { %v2401_v50 = vsel %vm2393_vm7, %v13553_v37, %v13557_v2  ;;  %v2468_v58 = vsel %vm2466_vm9, %v13559_v34, %v13558_v48  ;;  %v2412_v46 = vadd.f32 %v2396_v0, %v2339_v54  ;;  %v2413_v45 = vadd.f32 %v2397_v60, %v2340_v14  ;;  %v13567_v60 = vld [vmem:[#allocation312_spill] sm:$0xff]  ;;  %v10401_v62 = vpop.permute.xlu2 %5011 }
0x20dd   : > { %v2416_v22 = vadd.f32 %v2400_v35, %v2343_v15  ;;  %v2467_v61 = vsel %vm2466_vm9, %v13560_v24, %v13559_v34  ;;  %v2469_v29 = vsel %vm2466_vm9, %v13558_v48, %v13561_v6  ;;  %v2470_v8 = vsel %vm2466_vm9, %v13561_v6, %v13562_v53  ;;  %v13565_v15 = vld [vmem:[#allocation305_spill] sm:$0xff]  ;;  %v13575_v6 = vld [vmem:[#allocation315_spill] sm:$0xff] }
0x20de   : > { %v2473_v43 = vsel %vm2466_vm9, %v13564_v13, %v13563_v57  ;;  %vm2539_vm11 = vcmask 818176   ;;  %v2414_v20 = vadd.f32 %v2398_v39, %v2341_v19  ;;  %v2415_v16 = vadd.f32 %v2399_v3, %v2342_v38  ;;  %v13568_v38 = vld [vmem:[#allocation196_spill] sm:$0xff]  ;;  %v13571_v3 = vld [vmem:[#allocation314_spill] sm:$0xff] }
0x20df   : > { %v10338_v49 = vpop.permute.xlu1 %5003  ;;  %v2417_v25 = vadd.f32 %v2401_v50, %v2344_v41  ;;  %v2484_v23 = vadd.f32 %v2468_v58, %v2411_v10  ;;  %v2483_v14 = vadd.f32 %v2467_v61, %v2410_v7  ;;  %v2471_v0 = vsel %vm2466_vm9, %v13566_v12, %v13565_v15  ;;  %v13569_v41 = vld [vmem:[#allocation197_spill] sm:$0xff]  ;;  %v10399_v7 = vpop.permute.xlu0 %4794  ;;  %v13572_v50 = vld [vmem:[#allocation198_spill] sm:$0xff] }
0x20e0   : > { %v2472_v52 = vsel %vm2466_vm9, %v13565_v15, %v13564_v13  ;;  %v2474_v37 = vsel %vm2466_vm9, %v13563_v57, %v13567_v60  ;;  %v2485_v21 = vadd.f32 %v2469_v29, %v2412_v46  ;;  %v2486_v19 = vadd.f32 %v2470_v8, %v2413_v45  ;;  %v13573_v45 = vld [vmem:[#allocation201_spill] sm:$0xff]  ;;  %v13576_v29 = vld [vmem:[#allocation199_spill] sm:$0xff]  ;;  %v13577_v57 = vld [vmem:[#allocation322_spill] sm:$0xff] }
0x20e1   : > { %v2489_v35 = vadd.f32 %v2473_v43, %v2416_v22  ;;  %v2541_v10 = vsel %vm2539_vm11, %v13569_v41, %v13568_v38  ;;  %v2540_v39 = vsel %vm2539_vm11, %v13570_v31, %v13569_v41  ;;  %v2542_v2 = vsel %vm2539_vm11, %v13568_v38, %v13571_v3  ;;  %v13574_v22 = vld [vmem:[#allocation200_spill] sm:$0xff]  ;;  %v13579_v15 = vld [vmem:[#allocation207_spill] sm:$0xff] }
0x20e2   : > { %v2543_v48 = vsel %vm2539_vm11, %v13571_v3, %v13572_v50  ;;  %vm2612_vm13 = vcmask 809984   ;;  %v2487_v34 = vadd.f32 %v2471_v0, %v2414_v20  ;;  %v2488_v58 = vadd.f32 %v2472_v52, %v2415_v16  ;;  %v13580_v0 = vld [vmem:[#allocation323_spill] sm:$0xff]  ;;  %v13581_v60 = vld [vmem:[#allocation324_spill] sm:$0xff]  ;;  %v13586_v50 = vld [vmem:[#allocation209_spill] sm:$0xff] }
0x20e3   : > { %v2490_v46 = vadd.f32 %v2474_v37, %v2417_v25  ;;  %v2546_v24 = vsel %vm2539_vm11, %v13574_v22, %v13573_v45  ;;  %v2557_v61 = vadd.f32 %v2541_v10, %v2484_v23  ;;  %v2544_v53 = vsel %vm2539_vm11, %v13576_v29, %v13575_v6  ;;  %v13578_v25 = vld [vmem:[#allocation206_spill] sm:$0xff]  ;;  %v13582_v38 = vld [vmem:[#allocation208_spill] sm:$0xff] }
0x20e4   : > { %v2545_v8 = vsel %vm2539_vm11, %v13575_v6, %v13574_v22  ;;  %v2547_v13 = vsel %vm2539_vm11, %v13573_v45, %v13577_v57  ;;  %v2556_v43 = vadd.f32 %v2540_v39, %v2483_v14  ;;  %v2558_v20 = vadd.f32 %v2542_v2, %v2485_v21  ;;  %v13584_v39 = vld [vmem:[#allocation210_spill] sm:$0xff]  ;;  %v13585_v2 = vld [vmem:[#allocation325_spill] sm:$0xff] }
0x20e5   : > { %v2559_v16 = vadd.f32 %v2543_v48, %v2486_v19  ;;  %v2614_v12 = vsel %vm2612_vm13, %v13579_v15, %v13578_v25  ;;  %v2562_v23 = vadd.f32 %v2546_v24, %v2489_v35  ;;  %v2613_v52 = vsel %vm2612_vm13, %v13580_v0, %v13579_v15  ;;  %v13583_v35 = vld [vmem:[#allocation211_spill] sm:$0xff]  ;;  %v13589_v6 = vld [vmem:[#allocation217_spill] sm:$0xff]  ;;  %v13591_v57 = vld [vmem:[#allocation334_spill] sm:$0xff]  ;;  %v10464_v0 = vpop.permute.xlu2 %5017 }
0x20e6   : > { %v2615_v37 = vsel %vm2612_vm13, %v13578_v25, %v13581_v60  ;;  %v2616_v41 = vsel %vm2612_vm13, %v13581_v60, %v13582_v38  ;;  %v2560_v14 = vadd.f32 %v2544_v53, %v2487_v34  ;;  %v2561_v21 = vadd.f32 %v2545_v8, %v2488_v58  ;;  %v13590_v53 = vld [vmem:[#allocation333_spill] sm:$0xff]  ;;  %v13592_v25 = vld [vmem:[#allocation218_spill] sm:$0xff] }
0x20e7   : > { %v10385_v54 = vpop.permute.xlu1 %5009  ;;  %v2563_v19 = vadd.f32 %v2547_v13, %v2490_v46  ;;  %vm2685_vm14 = vcmask 801792   ;;  %v2630_v31 = vadd.f32 %v2614_v12, %v2557_v61  ;;  %v2619_v3 = vsel %vm2612_vm13, %v13584_v39, %v13583_v35  ;;  %v13587_v46 = vld [vmem:[#allocation332_spill] sm:$0xff]  ;;  %v10462_v12 = vpop.permute.xlu0 %4800  ;;  %v13593_v60 = vld [vmem:[#allocation221_spill] sm:$0xff] }
0x20e8   : > { %v2617_v48 = vsel %vm2612_vm13, %v13586_v50, %v13585_v2  ;;  %v2618_v45 = vsel %vm2612_vm13, %v13585_v2, %v13584_v39  ;;  %v2629_v22 = vadd.f32 %v2613_v52, %v2556_v43  ;;  %v2631_v34 = vadd.f32 %v2615_v37, %v2558_v20  ;;  %v13588_v61 = vld [vmem:[#allocation216_spill] sm:$0xff]  ;;  %v13597_v50 = vld [vmem:[#allocation342_spill] sm:$0xff] }
0x20e9   : > { %v2632_v58 = vadd.f32 %v2616_v41, %v2559_v16  ;;  %v2620_v24 = vsel %vm2612_vm13, %v13583_v35, %v13587_v46  ;;  %v2687_v29 = vsel %vm2685_vm14, %v13589_v6, %v13588_v61  ;;  %v2686_v8 = vsel %vm2685_vm14, %v13590_v53, %v13589_v6  ;;  %v13594_v37 = vld [vmem:[#allocation220_spill] sm:$0xff]  ;;  %v13595_v41 = vld [vmem:[#allocation335_spill] sm:$0xff] }
0x20ea   : > { %v2688_v13 = vsel %vm2685_vm14, %v13588_v61, %v13591_v57  ;;  %v2689_v43 = vsel %vm2685_vm14, %v13591_v57, %v13592_v25  ;;  %v2635_v20 = vadd.f32 %v2619_v3, %v2562_v23  ;;  %v2633_v16 = vadd.f32 %v2617_v48, %v2560_v14  ;;  %v13596_v35 = vld [vmem:[#allocation219_spill] sm:$0xff]  ;;  %v13598_v48 = vld [vmem:[#allocation226_spill] sm:$0xff]  ;;  %v13601_v6 = vld [vmem:[#allocation344_spill] sm:$0xff] }
0x20eb   : > { %v2634_v15 = vadd.f32 %v2618_v45, %v2561_v21  ;;  %vm2758_vm6 = vcmask 793600   ;;  %v2636_v52 = vadd.f32 %v2620_v24, %v2563_v19  ;;  %v2692_v38 = vsel %vm2685_vm14, %v13594_v37, %v13593_v60  ;;  %v13599_v45 = vld [vmem:[#allocation227_spill] sm:$0xff] }
0x20ec   : > { %v2690_v39 = vsel %vm2685_vm14, %v13596_v35, %v13595_v41  ;;  %v2691_v23 = vsel %vm2685_vm14, %v13595_v41, %v13594_v37  ;;  %v2703_v14 = vadd.f32 %v2687_v29, %v2630_v31  ;;  %v2702_v21 = vadd.f32 %v2686_v8, %v2629_v22  ;;  %v13600_v24 = vld [vmem:[#allocation343_spill] sm:$0xff] }
0x20ed   : > { %v2704_v3 = vadd.f32 %v2688_v13, %v2631_v34  ;;  %v2705_v2 = vadd.f32 %v2689_v43, %v2632_v58  ;;  %v2693_v19 = vsel %vm2685_vm14, %v13593_v60, %v13597_v50  ;;  %v2760_v46 = vsel %vm2758_vm6, %v13599_v45, %v13598_v48  ;;  %v13602_v58 = vld [vmem:[#allocation228_spill] sm:$0xff]  ;;  %v13603_v35 = vld [vmem:[#allocation231_spill] sm:$0xff] }
0x20ee   : > { %v2759_v61 = vsel %vm2758_vm6, %v13600_v24, %v13599_v45  ;;  %v2761_v53 = vsel %vm2758_vm6, %v13598_v48, %v13601_v6  ;;  %v2708_v31 = vadd.f32 %v2692_v38, %v2635_v20  ;;  %v2706_v22 = vadd.f32 %v2690_v39, %v2633_v16  ;;  %v13604_v20 = vld [vmem:[#allocation230_spill] sm:$0xff]  ;;  %v13606_v38 = vld [vmem:[#allocation229_spill] sm:$0xff] }
0x20ef   : > { %v10436_v10 = vpop.permute.xlu1 %5015  ;;  %v2707_v34 = vadd.f32 %v2691_v23, %v2634_v15  ;;  %v2762_v29 = vsel %vm2758_vm6, %v13601_v6, %v13602_v58  ;;  %vm2831_vm7 = vcmask 785408   ;;  %v2709_v43 = vadd.f32 %v2693_v19, %v2636_v52  ;;  %v13605_v15 = vld [vmem:[#allocation345_spill] sm:$0xff]  ;;  %v13608_v23 = vld [vmem:[#allocation236_spill] sm:$0xff]  ;;  %v10513_v19 = vpop.permute.xlu0 %4855  ;;  %v13611_v48 = vld [vmem:[#allocation354_spill] sm:$0xff] }
0x20f0   : > { %v2776_v60 = vadd.f32 %v2760_v46, %v2703_v14  ;;  %v2775_v37 = vadd.f32 %v2759_v61, %v2702_v21  ;;  %v2777_v41 = vadd.f32 %v2761_v53, %v2704_v3  ;;  %v2765_v16 = vsel %vm2758_vm6, %v13604_v20, %v13603_v35  ;;  %v13609_v14 = vld [vmem:[#allocation237_spill] sm:$0xff]  ;;  %v13612_v45 = vld [vmem:[#allocation238_spill] sm:$0xff]  ;;  %v13614_v61 = vld [vmem:[#allocation240_spill] sm:$0xff] }
0x20f1   : > { %v2763_v39 = vsel %vm2758_vm6, %v13606_v38, %v13605_v15  ;;  %v2833_v21 = vsel %vm2831_vm7, %v13609_v14, %v13608_v23  ;;  %v13610_v3 = vld [vmem:[#allocation353_spill] sm:$0xff]  ;;  %v2835_v46 = vsel %vm2831_vm7, %v13611_v48, %v13612_v45  ;;  %v13615_v53 = vld [vmem:[#allocation355_spill] sm:$0xff]  ;;  %vm2904_vm9 = vcmask 777216   ;;  %v13617_v45 = vld [vmem:[#allocation362_spill] sm:$0xff] }
0x20f2   : > { %v2832_v50 = vsel %vm2831_vm7, %v13610_v3, %v13609_v14  ;;  %v13613_v24 = vld [vmem:[#allocation241_spill] sm:$0xff]  ;;  %v13616_v58 = vld [vmem:[#allocation239_spill] sm:$0xff]  ;;  %vm2977_vm13 = vcmask 769024   ;;  %vm3050_vm14 = vcmask 760832  }
0x20f3   : > { %v2838_v6 = vsel %vm2831_vm7, %v13614_v61, %v13613_v24  ;;  %v2848_v38 = vadd.f32 %v2832_v50, %v2775_v37 }
0x20f7   : > { %v5048_v8 = vpop.permute.xlu1 %5047 }
0x20f8   : > { %v5056_v57 = vmul.f32 %v5048_v8, %v7484_v40  ;;  %v5055_v13 = vmul.f32 %v5048_v8, %v7464_v32  ;;  %v5054_v25 = vmul.f32 %v5048_v8, %v7452_v27  ;;  %v2764_v40 = vsel %vm2758_vm6, %v13605_v15, %v13604_v20  ;;  %v13607_v32 = vld [vmem:[#allocation352_spill] sm:$0xff] }
0x20f9   : > { %v2778_v27 = vadd.f32 %v2762_v29, %v2705_v2  ;;  %v2766_v52 = vsel %vm2758_vm6, %v13603_v35, %v13607_v32  ;;  %v2834_v2 = vsel %vm2831_vm7, %v13608_v23, %v13611_v48  ;;  %v2836_v29 = vsel %vm2831_vm7, %v13616_v58, %v13615_v53  ;;  %v13627_v58 = vld [vmem:[#allocation372_spill] sm:$0xff] }
0x20fa   : > { %5078 = vrot.lane.b32.xlu2 %v5056_v57, %s7286_s17  ;;  %5076 = vrot.lane.b32.xlu1 %v5055_v13, %s7286_s17  ;;  %v2781_v57 = vadd.f32 %v2765_v16, %v2708_v31  ;;  %v2779_v13 = vadd.f32 %v2763_v39, %v2706_v22  ;;  %v2780_v35 = vadd.f32 %v2764_v40, %v2707_v34  ;;  %v13618_v22 = vld [vmem:[#allocation246_spill] sm:$0xff]  ;;  %v13619_v34 = vld [vmem:[#allocation247_spill] sm:$0xff]  ;;  %vm3123_vm6 = vcmask 752640  }
0x20fb   : > { %5074 = vrot.lane.b32.xlu0 %v5054_v25, %s7286_s17  ;;  %v10528_v25 = vpop.permute.xlu2 %5051  ;;  %v2782_v20 = vadd.f32 %v2766_v52, %v2709_v43  ;;  %v2849_v15 = vadd.f32 %v2833_v21, %v2776_v60  ;;  %v2837_v32 = vsel %vm2831_vm7, %v13615_v53, %v13614_v61  ;;  %v2850_v23 = vadd.f32 %v2834_v2, %v2777_v41  ;;  %v13620_v39 = vld [vmem:[#allocation363_spill] sm:$0xff]  ;;  %v13622_v21 = vld [vmem:[#allocation248_spill] sm:$0xff]  ;;  %v13625_v61 = vld [vmem:[#allocation365_spill] sm:$0xff] }
0x20fc   : > { %v2851_v14 = vadd.f32 %v2835_v46, %v2778_v27  ;;  %v2854_v3 = vadd.f32 %v2838_v6, %v2781_v57  ;;  %v2852_v48 = vadd.f32 %v2836_v29, %v2779_v13  ;;  %v2839_v31 = vsel %vm2831_vm7, %v13613_v24, %v13617_v45  ;;  %v13621_v27 = vld [vmem:[#allocation364_spill] sm:$0xff]  ;;  %v13623_v2 = vld [vmem:[#allocation251_spill] sm:$0xff]  ;;  %v13629_v13 = vld [vmem:[#allocation257_spill] sm:$0xff] }
0x20fd   : > { %v2906_v16 = vsel %vm2904_vm9, %v13619_v34, %v13618_v22  ;;  %v5059_v43 = vmul.f32 %v10528_v25, %v7526_v55  ;;  %v5058_v60 = vmul.f32 %v5048_v8, %v7575_v28  ;;  %v2853_v37 = vadd.f32 %v2837_v32, %v2780_v35  ;;  %v13624_v55 = vld [vmem:[#allocation250_spill] sm:$0xff]  ;;  %v13628_v57 = vld [vmem:[#allocation256_spill] sm:$0xff] }
0x20fe   : > { %v2905_v41 = vsel %vm2904_vm9, %v13620_v39, %v13619_v34  ;;  %v5057_v40 = vmul.f32 %v5048_v8, %v7497_v44  ;;  %v2907_v52 = vsel %vm2904_vm9, %v13618_v22, %v13621_v27  ;;  %v2908_v50 = vsel %vm2904_vm9, %v13621_v27, %v13622_v21  ;;  %v13626_v44 = vld [vmem:[#allocation249_spill] sm:$0xff]  ;;  %v13631_v22 = vld [vmem:[#allocation374_spill] sm:$0xff] }
0x20ff   : > { %v2911_v28 = vsel %vm2904_vm9, %v13624_v55, %v13623_v2  ;;  %v2855_v46 = vadd.f32 %v2839_v31, %v2782_v20  ;;  %v2922_v24 = vadd.f32 %v2906_v16, %v2849_v15  ;;  %v2909_v8 = vsel %vm2904_vm9, %v13626_v44, %v13625_v61  ;;  %v13630_v20 = vld [vmem:[#allocation373_spill] sm:$0xff] }
0x2100   : > { %v2910_v6 = vsel %vm2904_vm9, %v13625_v61, %v13624_v55  ;;  %v2921_v53 = vadd.f32 %v2905_v41, %v2848_v38  ;;  %v2912_v29 = vsel %vm2904_vm9, %v13623_v2, %v13627_v58  ;;  %v2979_v35 = vsel %vm2977_vm13, %v13629_v13, %v13628_v57  ;;  %v10576_v38 = vpop.permute.xlu0 %4861  ;;  %v13633_v41 = vld [vmem:[#allocation261_spill] sm:$0xff]  ;;  %v13637_v61 = vld [vmem:[#allocation382_spill] sm:$0xff] }
0x2101   : > { %v2978_v15 = vsel %vm2977_vm13, %v13630_v20, %v13629_v13  ;;  %v2923_v32 = vadd.f32 %v2907_v52, %v2850_v23  ;;  %v2924_v45 = vadd.f32 %v2908_v50, %v2851_v14  ;;  %v2927_v31 = vadd.f32 %v2911_v28, %v2854_v3  ;;  %v13635_v52 = vld [vmem:[#allocation375_spill] sm:$0xff] }
0x2102   : > { %5084 = vrot.lane.b32.xlu2 %v5059_v43, %s7286_s17  ;;  %5082 = vrot.lane.b32.xlu1 %v5058_v60, %s7286_s17  ;;  %v2980_v34 = vsel %vm2977_vm13, %v13628_v57, %v13631_v22  ;;  %v2925_v16 = vadd.f32 %v2909_v8, %v2852_v48  ;;  %v2926_v43 = vadd.f32 %v2910_v6, %v2853_v37  ;;  %v13632_v60 = vld [vmem:[#allocation258_spill] sm:$0xff]  ;;  %v13636_v50 = vld [vmem:[#allocation259_spill] sm:$0xff]  ;;  %v13642_v57 = vld [vmem:[#allocation268_spill] sm:$0xff]  ;;  %vm3196_vm9 = vcmask 744448  }
0x2103   : > { %5080 = vrot.lane.b32.xlu0 %v5057_v40, %s7286_s17  ;;  %v2981_v39 = vsel %vm2977_vm13, %v13631_v22, %v13632_v60  ;;  %v13634_v40 = vld [vmem:[#allocation260_spill] sm:$0xff]  ;;  %v2928_v21 = vadd.f32 %v2912_v29, %v2855_v46  ;;  %v2995_v23 = vadd.f32 %v2979_v35, %v2922_v24  ;;  %v2994_v14 = vadd.f32 %v2978_v15, %v2921_v53  ;;  %v13638_v8 = vld [vmem:[#allocation266_spill] sm:$0xff]  ;;  %v13639_v6 = vld [vmem:[#allocation267_spill] sm:$0xff] }
0x2104   : > { %v2984_v27 = vsel %vm2977_vm13, %v13634_v40, %v13633_v41  ;;  %v2996_v3 = vadd.f32 %v2980_v34, %v2923_v32  ;;  %v2982_v2 = vsel %vm2977_vm13, %v13636_v50, %v13635_v52  ;;  %v5062_v48 = vmul.f32 %v10528_v25, %v7539_v59  ;;  %v13640_v53 = vld [vmem:[#allocation383_spill] sm:$0xff]  ;;  %v13641_v29 = vld [vmem:[#allocation384_spill] sm:$0xff]  ;;  %v13644_v15 = vld [vmem:[#allocation270_spill] sm:$0xff] }
0x2105   : > { %v5061_v37 = vmul.f32 %v10528_v25, %v7550_v5  ;;  %v2997_v55 = vadd.f32 %v2981_v39, %v2924_v45  ;;  %v3000_v28 = vadd.f32 %v2984_v27, %v2927_v31  ;;  %v2983_v46 = vsel %vm2977_vm13, %v13635_v52, %v13634_v40  ;;  %v13643_v20 = vld [vmem:[#allocation271_spill] sm:$0xff]  ;;  %v13645_v45 = vld [vmem:[#allocation385_spill] sm:$0xff]  ;;  %v13648_v52 = vld [vmem:[#allocation276_spill] sm:$0xff] }
0x2106   : > { %v5060_v24 = vmul.f32 %v10528_v25, %v7517_v51  ;;  %v2985_v44 = vsel %vm2977_vm13, %v13633_v41, %v13637_v61  ;;  %v3052_v59 = vsel %vm3050_vm14, %v13639_v6, %v13638_v8  ;;  %v3051_v5 = vsel %vm3050_vm14, %v13640_v53, %v13639_v6  ;;  %v13646_v31 = vld [vmem:[#allocation269_spill] sm:$0xff]  ;;  %v13647_v41 = vld [vmem:[#allocation392_spill] sm:$0xff] }
0x2107   : > { %v2998_v58 = vadd.f32 %v2982_v2, %v2925_v16  ;;  %v3053_v51 = vsel %vm3050_vm14, %v13638_v8, %v13641_v29  ;;  %v3054_v13 = vsel %vm3050_vm14, %v13641_v29, %v13642_v57  ;;  %v2999_v35 = vadd.f32 %v2983_v46, %v2926_v43  ;;  %v13649_v50 = vld [vmem:[#allocation277_spill] sm:$0xff]  ;;  %v13652_v8 = vld [vmem:[#allocation278_spill] sm:$0xff]  ;;  %v13655_v29 = vld [vmem:[#allocation395_spill] sm:$0xff] }
0x2108   : > { %v3057_v32 = vsel %vm3050_vm14, %v13644_v15, %v13643_v20  ;;  %v3055_v22 = vsel %vm3050_vm14, %v13646_v31, %v13645_v45  ;;  %v3056_v34 = vsel %vm3050_vm14, %v13645_v45, %v13644_v15  ;;  %v3001_v16 = vadd.f32 %v2985_v44, %v2928_v21  ;;  %v13651_v21 = vld [vmem:[#allocation394_spill] sm:$0xff]  ;;  %v13653_v6 = vld [vmem:[#allocation281_spill] sm:$0xff] }
0x2109   : > { %v3068_v60 = vadd.f32 %v3052_v59, %v2995_v23  ;;  %v3067_v39 = vadd.f32 %v3051_v5, %v2994_v14  ;;  %v3058_v40 = vsel %vm3050_vm14, %v13643_v20, %v13647_v41  ;;  %v3069_v43 = vadd.f32 %v3053_v51, %v2996_v3  ;;  %v10635_v14 = vpop.permute.xlu0 %4867  ;;  %v5119_v3 = vld [vmem:[%s12377_s3] sm:$0xff]  ;;  %v13656_v51 = vld [vmem:[#allocation279_spill] sm:$0xff]  ;;  %v13657_v15 = vld [vmem:[#allocation402_spill] sm:$0xff] }
0x210a   : > { %5090 = vrot.lane.b32.xlu2 %v5062_v48, %s7286_s17  ;;  %5088 = vrot.lane.b32.xlu1 %v5061_v37, %s7286_s17  ;;  %v3070_v27 = vadd.f32 %v3054_v13, %v2997_v55  ;;  %v3125_v2 = vsel %vm3123_vm6, %v13649_v50, %v13648_v52  ;;  %v13650_v48 = vld [vmem:[#allocation393_spill] sm:$0xff]  ;;  %v3073_v46 = vadd.f32 %v3057_v32, %v3000_v28  ;;  %v13654_v59 = vld [vmem:[#allocation280_spill] sm:$0xff]  ;;  %vm3269_vm13 = vcmask 736256  }
0x210b   : > { %5086 = vrot.lane.b32.xlu0 %v5060_v24, %s7286_s17  ;;  %v3124_v37 = vsel %vm3123_vm6, %v13650_v48, %v13649_v50  ;;  %v3071_v24 = vadd.f32 %v3055_v22, %v2998_v58  ;;  %v3072_v61 = vadd.f32 %v3056_v34, %v2999_v35  ;;  %v3126_v23 = vsel %vm3123_vm6, %v13648_v52, %v13651_v21  ;;  %v5120_v55 = vld [vmem:[%s12377_s3 + $0x8] sm:$0xff]  ;;  %v13659_v34 = vld [vmem:[#allocation287_spill] sm:$0xff] }
0x210c   : > { %v3074_v44 = vadd.f32 %v3058_v40, %v3001_v16  ;;  %v3127_v28 = vsel %vm3123_vm6, %v13651_v21, %v13652_v8  ;;  %v3130_v53 = vsel %vm3123_vm6, %v13654_v59, %v13653_v6  ;;  %v3141_v5 = vadd.f32 %v3125_v2, %v3068_v60  ;;  %v13658_v22 = vld [vmem:[#allocation286_spill] sm:$0xff]  ;;  %v13660_v60 = vld [vmem:[#allocation403_spill] sm:$0xff]  ;;  %v13662_v40 = vld [vmem:[#allocation288_spill] sm:$0xff] }
0x210d   : > { %v3140_v58 = vadd.f32 %v3124_v37, %v3067_v39  ;;  %v3128_v57 = vsel %vm3123_vm6, %v13656_v51, %v13655_v29  ;;  %v5063_v13 = vmul.f32 %v10528_v25, %v7597_v33  ;;  %v3142_v35 = vadd.f32 %v3126_v23, %v3069_v43  ;;  %v13661_v39 = vld [vmem:[#allocation404_spill] sm:$0xff]  ;;  %v13663_v50 = vld [vmem:[#allocation291_spill] sm:$0xff]  ;;  %v13664_v2 = vld [vmem:[#allocation290_spill] sm:$0xff] }
0x210e   : > { %v3129_v20 = vsel %vm3123_vm6, %v13655_v29, %v13654_v59  ;;  %v3131_v32 = vsel %vm3123_vm6, %v13653_v6, %v13657_v15  ;;  %v3143_v45 = vadd.f32 %v3127_v28, %v3070_v27  ;;  %v3146_v31 = vadd.f32 %v3130_v53, %v3073_v46  ;;  %v13665_v37 = vld [vmem:[#allocation405_spill] sm:$0xff]  ;;  %v13668_v28 = vld [vmem:[#allocation296_spill] sm:$0xff]  ;;  %v13671_v51 = vld [vmem:[#allocation414_spill] sm:$0xff] }
0x210f   : > { %v3198_v16 = vsel %vm3196_vm9, %v13659_v34, %v13658_v22  ;;  %v3197_v33 = vsel %vm3196_vm9, %v13660_v60, %v13659_v34  ;;  %v3144_v25 = vadd.f32 %v3128_v57, %v3071_v24  ;;  %v3199_v41 = vsel %vm3196_vm9, %v13658_v22, %v13661_v39  ;;  %v13666_v46 = vld [vmem:[#allocation289_spill] sm:$0xff]  ;;  %v13672_v15 = vld [vmem:[#allocation298_spill] sm:$0xff]  ;;  %v13675_v60 = vld [vmem:[#allocation415_spill] sm:$0xff] }
0x2110   : > { %v3200_v43 = vsel %vm3196_vm9, %v13661_v39, %v13662_v40  ;;  %v3145_v27 = vadd.f32 %v3129_v20, %v3072_v61  ;;  %v3147_v52 = vadd.f32 %v3131_v32, %v3074_v44  ;;  %v3203_v48 = vsel %vm3196_vm9, %v13664_v2, %v13663_v50  ;;  %v13669_v6 = vld [vmem:[#allocation297_spill] sm:$0xff] }
0x2111   : > { %v3201_v21 = vsel %vm3196_vm9, %v13666_v46, %v13665_v37  ;;  %v3214_v24 = vadd.f32 %v3198_v16, %v3141_v5  ;;  %v3213_v23 = vadd.f32 %v3197_v33, %v3140_v58  ;;  %v3215_v61 = vadd.f32 %v3199_v41, %v3142_v35  ;;  %v13670_v53 = vld [vmem:[#allocation413_spill] sm:$0xff]  ;;  %v10700_v34 = vpop.permute.xlu0 %4873  ;;  %v13676_v33 = vld [vmem:[#allocation299_spill] sm:$0xff] }
0x2112   : > { %5123 = vperm.xlu1 %7034, %v5119_v3   ;;  %5128 = vperm.xlu2 %7035, %v5120_v55   ;;  %v3202_v3 = vsel %vm3196_vm9, %v13665_v37, %v13664_v2  ;;  %v13667_v55 = vld [vmem:[#allocation412_spill] sm:$0xff]  ;;  %v3216_v44 = vadd.f32 %v3200_v43, %v3143_v45  ;;  %v3271_v59 = vsel %vm3269_vm13, %v13669_v6, %v13668_v28  ;;  %vm3342_vm14 = vcmask 728064   ;;  %v13673_v32 = vld [vmem:[#allocation301_spill] sm:$0xff]  ;;  %v13678_v43 = vld [vmem:[#allocation422_spill] sm:$0xff] }
0x2113   : > { %5092 = vrot.lane.b32.xlu0 %v5063_v13, %s7286_s17  ;;  %v3204_v8 = vsel %vm3196_vm9, %v13663_v50, %v13667_v55  ;;  %v3270_v29 = vsel %vm3269_vm13, %v13670_v53, %v13669_v6  ;;  %v3219_v5 = vadd.f32 %v3203_v48, %v3146_v31  ;;  %v3217_v58 = vadd.f32 %v3201_v21, %v3144_v25  ;;  %v13674_v45 = vld [vmem:[#allocation300_spill] sm:$0xff]  ;;  %v13680_v50 = vld [vmem:[#allocation307_spill] sm:$0xff]  ;;  %v13685_v6 = vld [vmem:[#allocation310_spill] sm:$0xff]  ;;  %s13899_s17 = smov 104  }
0x2114   : > { %v3272_v57 = vsel %vm3269_vm13, %v13668_v28, %v13671_v51  ;;  %v3218_v13 = vadd.f32 %v3202_v3, %v3145_v27  ;;  %v3220_v20 = vadd.f32 %v3204_v8, %v3147_v52  ;;  %v3273_v35 = vsel %vm3269_vm13, %v13671_v51, %v13672_v15  ;;  %v13679_v52 = vld [vmem:[#allocation306_spill] sm:$0xff]  ;;  %v13681_v48 = vld [vmem:[#allocation423_spill] sm:$0xff]  ;;  %v13683_v8 = vld [vmem:[#allocation308_spill] sm:$0xff] }
0x2115   : > { %v3276_v22 = vsel %vm3269_vm13, %v13674_v45, %v13673_v32  ;;  %v3287_v16 = vadd.f32 %v3271_v59, %v3214_v24  ;;  %v3286_v31 = vadd.f32 %v3270_v29, %v3213_v23  ;;  %v3274_v25 = vsel %vm3269_vm13, %v13676_v33, %v13675_v60  ;;  %v13682_v24 = vld [vmem:[#allocation424_spill] sm:$0xff]  ;;  %v13684_v28 = vld [vmem:[#allocation311_spill] sm:$0xff]  ;;  %v13692_v33 = vld [vmem:[#allocation434_spill] sm:$0xff] }
0x2116   : > { %v3275_v39 = vsel %vm3269_vm13, %v13675_v60, %v13674_v45  ;;  %v13677_v41 = vmov 1   ;;  %v3288_v40 = vadd.f32 %v3272_v57, %v3215_v61  ;;  %v3277_v27 = vsel %vm3269_vm13, %v13673_v32, %v13678_v43  ;;  %v13689_v32 = vld [vmem:[#allocation316_spill] sm:$0xff]  ;;  %v13690_v45 = vld [vmem:[#allocation317_spill] sm:$0xff] }
0x2117   : > { %v3344_v2 = vsel %vm3342_vm14, %v13680_v50, %v13679_v52  ;;  %v3343_v37 = vsel %vm3342_vm14, %v13681_v48, %v13680_v50  ;;  %v3289_v46 = vadd.f32 %v3273_v35, %v3216_v44  ;;  %v3292_v21 = vadd.f32 %v3276_v22, %v3219_v5  ;;  %v13686_v44 = vld [vmem:[#allocation425_spill] sm:$0xff] }
0x2118   : > { %v3345_v23 = vsel %vm3342_vm14, %v13679_v52, %v13682_v24  ;;  %vm12776_vm9 = vcmask 719872   ;;  %v3290_v3 = vadd.f32 %v3274_v25, %v3217_v58  ;;  %v3291_v55 = vadd.f32 %v3275_v39, %v3218_v13  ;;  %v13687_v5 = vld [vmem:[#allocation309_spill] sm:$0xff]  ;;  %v13688_v13 = vld [vmem:[#allocation432_spill] sm:$0xff] }
0x2119   : > { %v3346_v61 = vsel %vm3342_vm14, %v13682_v24, %v13683_v8  ;;  %v3349_v59 = vsel %vm3342_vm14, %v13685_v6, %v13684_v28  ;;  %v3293_v53 = vadd.f32 %v3277_v27, %v3220_v20  ;;  %v3360_v29 = vadd.f32 %v3344_v2, %v3287_v16  ;;  %v13694_v27 = vld [vmem:[#allocation321_spill] sm:$0xff]  ;;  %v13695_v52 = vld [vmem:[#allocation320_spill] sm:$0xff]  ;;  %v10751_v2 = vpop.permute.xlu0 %4928  ;;  %v13697_v24 = vld [vmem:[#allocation319_spill] sm:$0xff] }
0x211a   : > { %7036 = vset.pattern.permute.xlu2 %v13677_v41  ;;  %v3359_v51 = vadd.f32 %v3343_v37, %v3286_v31  ;;  %v3347_v57 = vsel %vm3342_vm14, %v13687_v5, %v13686_v44  ;;  %v3361_v15 = vadd.f32 %v3345_v23, %v3288_v40  ;;  %v3348_v58 = vsel %vm3342_vm14, %v13686_v44, %v13685_v6  ;;  %v13691_v31 = vld [vmem:[#allocation433_spill] sm:$0xff]  ;;  %v13693_v40 = vld [vmem:[#allocation318_spill] sm:$0xff] }
0x211b   : > { %v3350_v35 = vsel %vm3342_vm14, %v13684_v28, %v13688_v13  ;;  %v3417_v22 = vsel %vm12776_vm9, %v13690_v45, %v13689_v32  ;;  %v3362_v20 = vadd.f32 %v3346_v61, %v3289_v46  ;;  %v3365_v16 = vadd.f32 %v3349_v59, %v3292_v21  ;;  %v13696_v21 = vld [vmem:[#allocation435_spill] sm:$0xff]  ;;  %v13698_v28 = vld [vmem:[#allocation442_spill] sm:$0xff]  ;;  %v13703_v13 = vld [vmem:[#allocation328_spill] sm:$0xff] }
0x211c   : > { %v3416_v60 = vsel %vm12776_vm9, %v13691_v31, %v13690_v45  ;;  %v3418_v25 = vsel %vm12776_vm9, %v13689_v32, %v13692_v33  ;;  %v3363_v39 = vadd.f32 %v3347_v57, %v3290_v3  ;;  %v3419_v43 = vsel %vm12776_vm9, %v13692_v33, %v13693_v40  ;;  %v13699_v5 = vld [vmem:[#allocation326_spill] sm:$0xff]  ;;  %v13706_v31 = vld [vmem:[#allocation445_spill] sm:$0xff] }
0x211d   : > { %v3422_v50 = vsel %vm12776_vm9, %v13695_v52, %v13694_v27  ;;  %vm3488_vm13 = vcmask 711680   ;;  %v3364_v48 = vadd.f32 %v3348_v58, %v3291_v55  ;;  %v3366_v37 = vadd.f32 %v3350_v35, %v3293_v53  ;;  %v13700_v55 = vld [vmem:[#allocation327_spill] sm:$0xff] }
0x211e   : > { %v3433_v46 = vadd.f32 %v3417_v22, %v3360_v29  ;;  %v3420_v23 = vsel %vm12776_vm9, %v13697_v24, %v13696_v21  ;;  %v3432_v8 = vadd.f32 %v3416_v60, %v3359_v51  ;;  %v3434_v3 = vadd.f32 %v3418_v25, %v3361_v15  ;;  %v13701_v29 = vld [vmem:[#allocation443_spill] sm:$0xff]  ;;  %v13702_v15 = vld [vmem:[#allocation444_spill] sm:$0xff]  ;;  %v13707_v60 = vld [vmem:[#allocation329_spill] sm:$0xff] }
0x211f   : > { %v3421_v61 = vsel %vm12776_vm9, %v13696_v21, %v13695_v52  ;;  %v3423_v6 = vsel %vm12776_vm9, %v13694_v27, %v13698_v28  ;;  %v3435_v59 = vadd.f32 %v3419_v43, %v3362_v20  ;;  %v3438_v44 = vadd.f32 %v3422_v50, %v3365_v16  ;;  %v13704_v22 = vld [vmem:[#allocation331_spill] sm:$0xff]  ;;  %v13705_v20 = vld [vmem:[#allocation330_spill] sm:$0xff]  ;;  %v13708_v43 = vld [vmem:[#allocation452_spill] sm:$0xff] }
0x2120   : > { %v3490_v53 = vsel %vm3488_vm13, %v13700_v55, %v13699_v5  ;;  %v3489_v57 = vsel %vm3488_vm13, %v13701_v29, %v13700_v55  ;;  %v3436_v51 = vadd.f32 %v3420_v23, %v3363_v39  ;;  %v3491_v58 = vsel %vm3488_vm13, %v13699_v5, %v13702_v15  ;;  %v13711_v24 = vld [vmem:[#allocation453_spill] sm:$0xff]  ;;  %v13713_v55 = vld [vmem:[#allocation338_spill] sm:$0xff] }
0x2121   : > { %v3492_v35 = vsel %vm3488_vm13, %v13702_v15, %v13703_v13  ;;  %vm3561_vm14 = vcmask 703488   ;;  %v3437_v32 = vadd.f32 %v3421_v61, %v3364_v48  ;;  %v3439_v45 = vadd.f32 %v3423_v6, %v3366_v37  ;;  %v13709_v48 = vld [vmem:[#allocation336_spill] sm:$0xff]  ;;  %v13710_v37 = vld [vmem:[#allocation337_spill] sm:$0xff]  ;;  %v13712_v61 = vld [vmem:[#allocation454_spill] sm:$0xff] }
0x2122   : > { %v3495_v16 = vsel %vm3488_vm13, %v13705_v20, %v13704_v22  ;;  %v3493_v33 = vsel %vm3488_vm13, %v13707_v60, %v13706_v31  ;;  %v3506_v25 = vadd.f32 %v3490_v53, %v3433_v46  ;;  %v3505_v39 = vadd.f32 %v3489_v57, %v3432_v8  ;;  %v13715_v53 = vld [vmem:[#allocation340_spill] sm:$0xff]  ;;  %v13721_v60 = vld [vmem:[#allocation463_spill] sm:$0xff] }
0x2123   : > { %v3494_v40 = vsel %vm3488_vm13, %v13706_v31, %v13705_v20  ;;  %v3496_v27 = vsel %vm3488_vm13, %v13704_v22, %v13708_v43  ;;  %v3507_v52 = vadd.f32 %v3491_v58, %v3434_v3  ;;  %v3508_v50 = vadd.f32 %v3492_v35, %v3435_v59  ;;  %v13714_v59 = vld [vmem:[#allocation341_spill] sm:$0xff]  ;;  %v13716_v58 = vld [vmem:[#allocation455_spill] sm:$0xff]  ;;  %v10807_v35 = vpop.permute.xlu0 %4934  ;;  %v13719_v20 = vld [vmem:[#allocation346_spill] sm:$0xff] }
0x2124   : > { %v3563_v21 = vsel %vm3561_vm14, %v13710_v37, %v13709_v48  ;;  %v3562_v23 = vsel %vm3561_vm14, %v13711_v24, %v13710_v37  ;;  %v3511_v46 = vadd.f32 %v3495_v16, %v3438_v44  ;;  %v3509_v8 = vadd.f32 %v3493_v33, %v3436_v51  ;;  %v13717_v44 = vld [vmem:[#allocation339_spill] sm:$0xff]  ;;  %v13725_v24 = vld [vmem:[#allocation350_spill] sm:$0xff] }
0x2125   : > { %v3564_v28 = vsel %vm3561_vm14, %v13709_v48, %v13712_v61  ;;  %v3510_v6 = vadd.f32 %v3494_v40, %v3437_v32  ;;  %v3512_v5 = vadd.f32 %v3496_v27, %v3439_v45  ;;  %v3565_v3 = vsel %vm3561_vm14, %v13712_v61, %v13713_v55  ;;  %v13718_v45 = vld [vmem:[#allocation462_spill] sm:$0xff]  ;;  %v13720_v16 = vld [vmem:[#allocation347_spill] sm:$0xff]  ;;  %v13722_v40 = vld [vmem:[#allocation464_spill] sm:$0xff] }
0x2126   : > { %v3568_v29 = vsel %vm3561_vm14, %v13715_v53, %v13714_v59  ;;  %v3579_v57 = vadd.f32 %v3563_v21, %v3506_v25  ;;  %v3578_v15 = vadd.f32 %v3562_v23, %v3505_v39  ;;  %v3566_v51 = vsel %vm3561_vm14, %v13717_v44, %v13716_v58  ;;  %v13723_v48 = vld [vmem:[#allocation348_spill] sm:$0xff]  ;;  %v13724_v21 = vld [vmem:[#allocation351_spill] sm:$0xff] }
0x2127   : > { %v3567_v13 = vsel %vm3561_vm14, %v13716_v58, %v13715_v53  ;;  %v3580_v32 = vadd.f32 %v3564_v28, %v3507_v52  ;;  %v3569_v22 = vsel %vm3561_vm14, %v13714_v59, %v13718_v45  ;;  %v3636_v31 = vsel %vm3634_vm0, %v13720_v16, %v13719_v20  ;;  %v13730_v58 = vld [vmem:[#allocation357_spill] sm:$0xff] }
0x2128   : > { %v3635_v33 = vsel %vm3634_vm0, %v13721_v60, %v13720_v16  ;;  %v3581_v25 = vadd.f32 %v3565_v3, %v3508_v50  ;;  %v3584_v39 = vadd.f32 %v3568_v29, %v3511_v46  ;;  %v3637_v43 = vsel %vm3634_vm0, %v13719_v20, %v13722_v40  ;;  %v13726_v50 = vld [vmem:[#allocation465_spill] sm:$0xff]  ;;  %v13729_v29 = vld [vmem:[#allocation356_spill] sm:$0xff] }
0x2129   : > { %vm12771_vm13 = vcmask 687104   ;;  %v3582_v27 = vadd.f32 %v3566_v51, %v3509_v8  ;;  %v3583_v52 = vadd.f32 %v3567_v13, %v3510_v6  ;;  %v3638_v37 = vsel %vm3634_vm0, %v13722_v40, %v13723_v48  ;;  %v13727_v46 = vld [vmem:[#allocation349_spill] sm:$0xff]  ;;  %v13728_v6 = vld [vmem:[#allocation472_spill] sm:$0xff]  ;;  %v13732_v13 = vld [vmem:[#allocation474_spill] sm:$0xff] }
0x212a   : > { %v3641_v23 = vsel %vm3634_vm0, %v13725_v24, %v13724_v21  ;;  %v3585_v61 = vadd.f32 %v3569_v22, %v3512_v5  ;;  %v3652_v28 = vadd.f32 %v3636_v31, %v3579_v57  ;;  %v3651_v55 = vadd.f32 %v3635_v33, %v3578_v15  ;;  %v13731_v15 = vld [vmem:[#allocation473_spill] sm:$0xff]  ;;  %v13733_v22 = vld [vmem:[#allocation358_spill] sm:$0xff]  ;;  %v13735_v31 = vld [vmem:[#allocation360_spill] sm:$0xff] }
0x212b   : > { %v3639_v3 = vsel %vm3634_vm0, %v13727_v46, %v13726_v50  ;;  %v3653_v59 = vadd.f32 %v3637_v43, %v3580_v32  ;;  %v3640_v8 = vsel %vm3634_vm0, %v13726_v50, %v13725_v24  ;;  %v3642_v53 = vsel %vm3634_vm0, %v13724_v21, %v13728_v6  ;;  %v13734_v16 = vld [vmem:[#allocation361_spill] sm:$0xff]  ;;  %v13736_v40 = vld [vmem:[#allocation475_spill] sm:$0xff]  ;;  %v13738_v24 = vld [vmem:[#allocation482_spill] sm:$0xff] }
0x212c   : > { %v3709_v44 = vsel %vm12771_vm13, %v13730_v58, %v13729_v29  ;;  %v3654_v5 = vadd.f32 %v3638_v37, %v3581_v25  ;;  %v3657_v57 = vadd.f32 %v3641_v23, %v3584_v39  ;;  %v3708_v51 = vsel %vm12771_vm13, %v13731_v15, %v13730_v58  ;;  %v13737_v43 = vld [vmem:[#allocation359_spill] sm:$0xff]  ;;  %v13742_v6 = vld [vmem:[#allocation484_spill] sm:$0xff]  ;;  %v13745_v15 = vld [vmem:[#allocation370_spill] sm:$0xff] }
0x212d   : > { %v3710_v32 = vsel %vm12771_vm13, %v13729_v29, %v13732_v13  ;;  %v3655_v45 = vadd.f32 %v3639_v3, %v3582_v27  ;;  %v3711_v20 = vsel %vm12771_vm13, %v13732_v13, %v13733_v22  ;;  %v3714_v60 = vsel %vm12771_vm13, %v13735_v31, %v13734_v16  ;;  %v13739_v3 = vld [vmem:[#allocation366_spill] sm:$0xff]  ;;  %v13743_v29 = vld [vmem:[#allocation368_spill] sm:$0xff]  ;;  %v13746_v13 = vld [vmem:[#allocation485_spill] sm:$0xff] }
0x212e   : > { %vm3780_vm0 = vcmask 678912   ;;  %v3656_v33 = vadd.f32 %v3640_v8, %v3583_v52  ;;  %v3658_v25 = vadd.f32 %v3642_v53, %v3585_v61  ;;  %v3725_v39 = vadd.f32 %v3709_v44, %v3652_v28  ;;  %v13740_v52 = vld [vmem:[#allocation367_spill] sm:$0xff] }
0x212f   : > { %v3712_v48 = vsel %vm12771_vm13, %v13737_v43, %v13736_v40  ;;  %v3724_v37 = vadd.f32 %v3708_v51, %v3651_v55  ;;  %v3726_v21 = vadd.f32 %v3710_v32, %v3653_v59  ;;  %v3713_v27 = vsel %vm12771_vm13, %v13736_v40, %v13735_v31  ;;  %v13741_v28 = vld [vmem:[#allocation483_spill] sm:$0xff]  ;;  %v10866_v55 = vpop.permute.xlu0 %4940  ;;  %v13747_v32 = vld [vmem:[#allocation369_spill] sm:$0xff]  ;;  %v13748_v31 = vld [vmem:[#allocation492_spill] sm:$0xff] }
0x2130   : > { %v3715_v23 = vsel %vm12771_vm13, %v13734_v16, %v13738_v24  ;;  %v3727_v50 = vadd.f32 %v3711_v20, %v3654_v5  ;;  %v3730_v46 = vadd.f32 %v3714_v60, %v3657_v57  ;;  %v3782_v61 = vsel %vm3780_vm0, %v13740_v52, %v13739_v3  ;;  %v13744_v57 = vld [vmem:[#allocation371_spill] sm:$0xff]  ;;  %v13749_v40 = vld [vmem:[#allocation376_spill] sm:$0xff]  ;;  %v13750_v43 = vld [vmem:[#allocation377_spill] sm:$0xff] }
0x2131   : > { %v3781_v8 = vsel %vm3780_vm0, %v13741_v28, %v13740_v52  ;;  %v3728_v59 = vadd.f32 %v3712_v48, %v3655_v45  ;;  %v3783_v53 = vsel %vm3780_vm0, %v13739_v3, %v13742_v6  ;;  %v3784_v58 = vsel %vm3780_vm0, %v13742_v6, %v13743_v29  ;;  %v13753_v28 = vld [vmem:[#allocation378_spill] sm:$0xff] }
0x2132   : > { %vm3853_vm14 = vcmask 670720   ;;  %v3729_v44 = vadd.f32 %v3713_v27, %v3656_v33  ;;  %v3731_v5 = vadd.f32 %v3715_v23, %v3658_v25  ;;  %v3787_v51 = vsel %vm3780_vm0, %v13745_v15, %v13744_v57  ;;  %v13751_v27 = vld [vmem:[#allocation493_spill] sm:$0xff]  ;;  %v13752_v23 = vld [vmem:[#allocation494_spill] sm:$0xff] }
0x2133   : > { %v3785_v22 = vsel %vm3780_vm0, %v13747_v32, %v13746_v13  ;;  %v3798_v45 = vadd.f32 %v3782_v61, %v3725_v39  ;;  %v3797_v20 = vadd.f32 %v3781_v8, %v3724_v37  ;;  %v3786_v16 = vsel %vm3780_vm0, %v13746_v13, %v13745_v15  ;;  %v13755_v8 = vld [vmem:[#allocation380_spill] sm:$0xff]  ;;  %v13760_v13 = vld [vmem:[#allocation387_spill] sm:$0xff] }
0x2134   : > { %v3788_v60 = vsel %vm3780_vm0, %v13744_v57, %v13748_v31  ;;  %v3799_v33 = vadd.f32 %v3783_v53, %v3726_v21  ;;  %v3800_v25 = vadd.f32 %v3784_v58, %v3727_v50  ;;  %v3855_v48 = vsel %vm3853_vm14, %v13750_v43, %v13749_v40  ;;  %v13754_v50 = vld [vmem:[#allocation381_spill] sm:$0xff]  ;;  %v13756_v58 = vld [vmem:[#allocation495_spill] sm:$0xff]  ;;  %v13762_v31 = vld [vmem:[#allocation504_spill] sm:$0xff] }
0x2135   : > { %v3854_v24 = vsel %vm3853_vm14, %v13751_v27, %v13750_v43  ;;  %v3803_v39 = vadd.f32 %v3787_v51, %v3730_v46  ;;  %v3801_v37 = vadd.f32 %v3785_v22, %v3728_v59  ;;  %v3856_v3 = vsel %vm3853_vm14, %v13749_v40, %v13752_v23  ;;  %v13757_v46 = vld [vmem:[#allocation379_spill] sm:$0xff]  ;;  %v13759_v51 = vld [vmem:[#allocation386_spill] sm:$0xff]  ;;  %v13763_v43 = vld [vmem:[#allocation388_spill] sm:$0xff] }
0x2136   : > { %vm3926_vm13 = vcmask 662528   ;;  %v3802_v52 = vadd.f32 %v3786_v16, %v3729_v44  ;;  %v3804_v61 = vadd.f32 %v3788_v60, %v3731_v5  ;;  %v3857_v21 = vsel %vm3853_vm14, %v13752_v23, %v13753_v28  ;;  %v13758_v5 = vld [vmem:[#allocation502_spill] sm:$0xff]  ;;  %v13761_v22 = vld [vmem:[#allocation503_spill] sm:$0xff] }
0x2137   : > { %v3860_v6 = vsel %vm3853_vm14, %v13755_v8, %v13754_v50  ;;  %v3871_v53 = vadd.f32 %v3855_v48, %v3798_v45  ;;  %v3870_v29 = vadd.f32 %v3854_v24, %v3797_v20  ;;  %v3858_v59 = vsel %vm3853_vm14, %v13757_v46, %v13756_v58  ;;  %v13764_v27 = vld [vmem:[#allocation391_spill] sm:$0xff]  ;;  %v13765_v24 = vld [vmem:[#allocation390_spill] sm:$0xff]  ;;  %v13769_v46 = vld [vmem:[#allocation396_spill] sm:$0xff] }
0x2138   : > { %v3859_v57 = vsel %vm3853_vm14, %v13756_v58, %v13755_v8  ;;  %v3872_v44 = vadd.f32 %v3856_v3, %v3799_v33  ;;  %v3861_v15 = vsel %vm3853_vm14, %v13754_v50, %v13758_v5  ;;  %v3928_v32 = vsel %vm3926_vm13, %v13760_v13, %v13759_v51  ;;  %v10925_v3 = vpop.permute.xlu0 %4946  ;;  %v13767_v50 = vld [vmem:[#allocation389_spill] sm:$0xff] }
0x2139   : > { %v3927_v45 = vsel %vm3926_vm13, %v13761_v22, %v13760_v13  ;;  %v3873_v20 = vadd.f32 %v3857_v21, %v3800_v25  ;;  %v3876_v16 = vadd.f32 %v3860_v6, %v3803_v39  ;;  %v3929_v60 = vsel %vm3926_vm13, %v13759_v51, %v13762_v31  ;;  %v13766_v21 = vld [vmem:[#allocation505_spill] sm:$0xff]  ;;  %v13773_v13 = vld [vmem:[#allocation398_spill] sm:$0xff] }
0x213a   : > { %vm12772_vm0 = vcmask 654336   ;;  %v3874_v33 = vadd.f32 %v3858_v59, %v3801_v37  ;;  %v3875_v40 = vadd.f32 %v3859_v57, %v3802_v52  ;;  %v3930_v48 = vsel %vm3926_vm13, %v13762_v31, %v13763_v43  ;;  %v13768_v52 = vld [vmem:[#allocation506_spill] sm:$0xff]  ;;  %v13770_v59 = vld [vmem:[#allocation397_spill] sm:$0xff] }
0x213b   : > { %v3933_v23 = vsel %vm3926_vm13, %v13765_v24, %v13764_v27  ;;  %v3877_v28 = vadd.f32 %v3861_v15, %v3804_v61  ;;  %v3944_v25 = vadd.f32 %v3928_v32, %v3871_v53  ;;  %v3943_v39 = vadd.f32 %v3927_v45, %v3870_v29  ;;  %v13771_v29 = vld [vmem:[#allocation507_spill] sm:$0xff]  ;;  %v13772_v15 = vld [vmem:[#allocation510_spill] sm:$0xff]  ;;  %v13774_v22 = vld [vmem:[#allocation401_spill] sm:$0xff] }
0x213c   : > { %v3931_v8 = vsel %vm3926_vm13, %v13767_v50, %v13766_v21  ;;  %v3945_v6 = vadd.f32 %v3929_v60, %v3872_v44  ;;  %v3932_v37 = vsel %vm3926_vm13, %v13766_v21, %v13765_v24  ;;  %v3934_v58 = vsel %vm3926_vm13, %v13764_v27, %v13768_v52  ;;  %v13775_v45 = vld [vmem:[#allocation400_spill] sm:$0xff]  ;;  %v13776_v43 = vld [vmem:[#allocation513_spill] sm:$0xff]  ;;  %v13779_v50 = vld [vmem:[#allocation406_spill] sm:$0xff] }
0x213d   : > { %v4001_v57 = vsel %vm12772_vm0, %v13770_v59, %v13769_v46  ;;  %v3946_v61 = vadd.f32 %v3930_v48, %v3873_v20  ;;  %v3949_v53 = vadd.f32 %v3933_v23, %v3876_v16  ;;  %v4000_v5 = vsel %vm12772_vm0, %v13771_v29, %v13770_v59  ;;  %v13777_v48 = vld [vmem:[#allocation399_spill] sm:$0xff]  ;;  %v13778_v23 = vld [vmem:[#allocation516_spill] sm:$0xff] }
0x213e   : > { %vm4072_vm14 = vcmask 646144   ;;  %v3947_v44 = vadd.f32 %v3931_v8, %v3874_v33  ;;  %v4002_v51 = vsel %vm12772_vm0, %v13769_v46, %v13772_v15  ;;  %v4003_v32 = vsel %vm12772_vm0, %v13772_v15, %v13773_v13  ;;  %v13780_v8 = vld [vmem:[#allocation407_spill] sm:$0xff]  ;;  %v13782_v46 = vld [vmem:[#allocation518_spill] sm:$0xff] }
0x213f   : > { %v4006_v31 = vsel %vm12772_vm0, %v13775_v45, %v13774_v22  ;;  %v3948_v20 = vadd.f32 %v3932_v37, %v3875_v40  ;;  %v3950_v16 = vadd.f32 %v3934_v58, %v3877_v28  ;;  %v4017_v60 = vadd.f32 %v4001_v57, %v3944_v25  ;;  %v13781_v37 = vld [vmem:[#allocation517_spill] sm:$0xff]  ;;  %v13783_v57 = vld [vmem:[#allocation408_spill] sm:$0xff] }
0x2140   : > { %v4004_v27 = vsel %vm12772_vm0, %v13777_v48, %v13776_v43  ;;  %v4016_v33 = vadd.f32 %v4000_v5, %v3943_v39  ;;  %v4005_v24 = vsel %vm12772_vm0, %v13776_v43, %v13775_v45  ;;  %v4007_v21 = vsel %vm12772_vm0, %v13774_v22, %v13778_v23  ;;  %v10972_v5 = vpop.permute.xlu0 %5001  ;;  %v13787_v22 = vld [vmem:[#allocation409_spill] sm:$0xff]  ;;  %v13788_v43 = vld [vmem:[#allocation520_spill] sm:$0xff] }
0x2141   : > { %v4074_v52 = vsel %vm4072_vm14, %v13780_v8, %v13779_v50  ;;  %v4018_v40 = vadd.f32 %v4002_v51, %v3945_v6  ;;  %v4019_v28 = vadd.f32 %v4003_v32, %v3946_v61  ;;  %v4022_v25 = vadd.f32 %v4006_v31, %v3949_v53  ;;  %v13784_v53 = vld [vmem:[#allocation411_spill] sm:$0xff]  ;;  %v13785_v51 = vld [vmem:[#allocation410_spill] sm:$0xff] }
0x2142   : > { %v4073_v58 = vsel %vm4072_vm14, %v13781_v37, %v13780_v8  ;;  %v4020_v39 = vadd.f32 %v4004_v27, %v3947_v44  ;;  %v4075_v59 = vsel %vm4072_vm14, %v13779_v50, %v13782_v46  ;;  %v4076_v29 = vsel %vm4072_vm14, %v13782_v46, %v13783_v57  ;;  %v13786_v44 = vld [vmem:[#allocation519_spill] sm:$0xff]  ;;  %v13790_v27 = vld [vmem:[#allocation417_spill] sm:$0xff]  ;;  %v13792_v50 = vld [vmem:[#allocation522_spill] sm:$0xff] }
0x2143   : > { %vm4145_vm13 = vcmask 637952   ;;  %v4021_v15 = vadd.f32 %v4005_v24, %v3948_v20  ;;  %v4023_v6 = vadd.f32 %v4007_v21, %v3950_v16  ;;  %v4090_v61 = vadd.f32 %v4074_v52, %v4017_v60  ;;  %v13789_v60 = vld [vmem:[#allocation416_spill] sm:$0xff]  ;;  %v13793_v52 = vld [vmem:[#allocation418_spill] sm:$0xff]  ;;  %v13794_v46 = vld [vmem:[#allocation421_spill] sm:$0xff] }
0x2144   : > { %v4079_v13 = vsel %vm4072_vm14, %v13785_v51, %v13784_v53  ;;  %v4089_v32 = vadd.f32 %v4073_v58, %v4016_v33  ;;  %v4077_v45 = vsel %vm4072_vm14, %v13787_v22, %v13786_v44  ;;  %v4078_v31 = vsel %vm4072_vm14, %v13786_v44, %v13785_v51  ;;  %v13791_v33 = vld [vmem:[#allocation521_spill] sm:$0xff]  ;;  %v13796_v51 = vld [vmem:[#allocation523_spill] sm:$0xff] }
0x2145   : > { %v4080_v48 = vsel %vm4072_vm14, %v13784_v53, %v13788_v43  ;;  %v4091_v20 = vadd.f32 %v4075_v59, %v4018_v40  ;;  %v4092_v16 = vadd.f32 %v4076_v29, %v4019_v28  ;;  %v4147_v24 = vsel %vm4145_vm13, %v13790_v27, %v13789_v60  ;;  %v13795_v59 = vld [vmem:[#allocation420_spill] sm:$0xff] }
0x2146   : > { %v4146_v23 = vsel %vm4145_vm13, %v13791_v33, %v13790_v27  ;;  %v4095_v21 = vadd.f32 %v4079_v13, %v4022_v25  ;;  %v4148_v8 = vsel %vm4145_vm13, %v13789_v60, %v13792_v50  ;;  %v4149_v37 = vsel %vm4145_vm13, %v13792_v50, %v13793_v52  ;;  %v13797_v25 = vld [vmem:[#allocation419_spill] sm:$0xff]  ;;  %v13798_v60 = vld [vmem:[#allocation524_spill] sm:$0xff]  ;;  %v13805_v50 = vld [vmem:[#allocation430_spill] sm:$0xff] }
0x2147   : > { %vm4218_vm14 = vcmask 629760   ;;  %v4093_v40 = vadd.f32 %v4077_v45, %v4020_v39  ;;  %v4094_v28 = vadd.f32 %v4078_v31, %v4021_v15  ;;  %v4096_v58 = vadd.f32 %v4080_v48, %v4023_v6  ;;  %v13799_v15 = vld [vmem:[#allocation426_spill] sm:$0xff]  ;;  %v13800_v6 = vld [vmem:[#allocation427_spill] sm:$0xff] }
0x2148   : > { %v4152_v57 = vsel %vm4145_vm13, %v13795_v59, %v13794_v46  ;;  %v4163_v29 = vadd.f32 %v4147_v24, %v4090_v61  ;;  %v4162_v53 = vadd.f32 %v4146_v23, %v4089_v32  ;;  %v4150_v13 = vsel %vm4145_vm13, %v13797_v25, %v13796_v51  ;;  %v13801_v32 = vld [vmem:[#allocation525_spill] sm:$0xff]  ;;  %v13802_v48 = vld [vmem:[#allocation526_spill] sm:$0xff]  ;;  %v13803_v24 = vld [vmem:[#allocation428_spill] sm:$0xff] }
0x2149   : > { %v4151_v44 = vsel %vm4145_vm13, %v13796_v51, %v13795_v59  ;;  %v4164_v22 = vadd.f32 %v4148_v8, %v4091_v20  ;;  %v4165_v43 = vadd.f32 %v4149_v37, %v4092_v16  ;;  %v4153_v39 = vsel %vm4145_vm13, %v13794_v46, %v13798_v60  ;;  %v13804_v23 = vld [vmem:[#allocation431_spill] sm:$0xff]  ;;  %v13807_v46 = vld [vmem:[#allocation429_spill] sm:$0xff]  ;;  %v13808_v25 = vld [vmem:[#allocation528_spill] sm:$0xff] }
0x214a   : > { %v4220_v45 = vsel %vm4218_vm14, %v13800_v6, %v13799_v15  ;;  %v4168_v61 = vadd.f32 %v4152_v57, %v4095_v21  ;;  %v4219_v31 = vsel %vm4218_vm14, %v13801_v32, %v13800_v6  ;;  %v4221_v27 = vsel %vm4218_vm14, %v13799_v15, %v13802_v48  ;;  %v13806_v37 = vld [vmem:[#allocation527_spill] sm:$0xff]  ;;  %v13810_v60 = vld [vmem:[#allocation437_spill] sm:$0xff] }
0x214b   : > { %vm12773_vm0 = vcmask 621568   ;;  %v4166_v20 = vadd.f32 %v4150_v13, %v4093_v40  ;;  %v4167_v16 = vadd.f32 %v4151_v44, %v4094_v28  ;;  %v4222_v33 = vsel %vm4218_vm14, %v13802_v48, %v13803_v24  ;;  %v11031_v40 = vpop.permute.xlu0 %5007  ;;  %v13809_v44 = vld [vmem:[#allocation436_spill] sm:$0xff]  ;;  %v13811_v15 = vld [vmem:[#allocation531_spill] sm:$0xff]  ;;  %v13812_v48 = vld [vmem:[#allocation534_spill] sm:$0xff] }
0x214c   : > { %v4225_v8 = vsel %vm4218_vm14, %v13805_v50, %v13804_v23  ;;  %v4169_v21 = vadd.f32 %v4153_v39, %v4096_v58  ;;  %v4236_v52 = vadd.f32 %v4220_v45, %v4163_v29  ;;  %v4223_v59 = vsel %vm4218_vm14, %v13807_v46, %v13806_v37 }
0x214d   : > { %v4224_v57 = vsel %vm4218_vm14, %v13806_v37, %v13805_v50  ;;  %v4235_v28 = vadd.f32 %v4219_v31, %v4162_v53  ;;  %v4237_v51 = vadd.f32 %v4221_v27, %v4164_v22  ;;  %v4226_v13 = vsel %vm4218_vm14, %v13804_v23, %v13808_v25  ;;  %v13813_v22 = vld [vmem:[#allocation438_spill] sm:$0xff]  ;;  %v13814_v23 = vld [vmem:[#allocation441_spill] sm:$0xff]  ;;  %v13817_v50 = vld [vmem:[#allocation439_spill] sm:$0xff] }
0x214e   : > { %v4293_v58 = vsel %vm12773_vm0, %v13810_v60, %v13809_v44  ;;  %v4238_v29 = vadd.f32 %v4222_v33, %v4165_v43  ;;  %v4241_v39 = vadd.f32 %v4225_v8, %v4168_v61  ;;  %v4292_v6 = vsel %vm12773_vm0, %v13811_v15, %v13810_v60  ;;  %v13815_v43 = vld [vmem:[#allocation440_spill] sm:$0xff]  ;;  %v13816_v33 = vld [vmem:[#allocation537_spill] sm:$0xff]  ;;  %v13818_v37 = vld [vmem:[#allocation538_spill] sm:$0xff] }
0x214f   : > { %vm4364_vm13 = vcmask 613376   ;;  %v4239_v45 = vadd.f32 %v4223_v59, %v4166_v20  ;;  %v4240_v32 = vadd.f32 %v4224_v57, %v4167_v16  ;;  %v4294_v53 = vsel %vm12773_vm0, %v13809_v44, %v13812_v48  ;;  %v13819_v59 = vld [vmem:[#allocation446_spill] sm:$0xff]  ;;  %v13822_v60 = vld [vmem:[#allocation540_spill] sm:$0xff] }
0x2150   : > { %v4295_v31 = vsel %vm12773_vm0, %v13812_v48, %v13813_v22  ;;  %v4242_v27 = vadd.f32 %v4226_v13, %v4169_v21  ;;  %v4309_v24 = vadd.f32 %v4293_v58, %v4236_v52  ;;  %v4298_v61 = vsel %vm12773_vm0, %v13815_v43, %v13814_v23  ;;  %v13820_v21 = vld [vmem:[#allocation447_spill] sm:$0xff] }
0x2151   : > { %v4296_v8 = vsel %vm12773_vm0, %v13817_v50, %v13816_v33  ;;  %v4308_v20 = vadd.f32 %v4292_v6, %v4235_v28  ;;  %v4297_v16 = vsel %vm12773_vm0, %v13816_v33, %v13815_v43  ;;  %v4299_v46 = vsel %vm12773_vm0, %v13814_v23, %v13818_v37  ;;  %v13821_v13 = vld [vmem:[#allocation539_spill] sm:$0xff]  ;;  %v13823_v6 = vld [vmem:[#allocation448_spill] sm:$0xff]  ;;  %v13826_v50 = vld [vmem:[#allocation541_spill] sm:$0xff] }
0x2152   : > { %v4366_v52 = vsel %vm4364_vm13, %v13820_v21, %v13819_v59  ;;  %v4310_v57 = vadd.f32 %v4294_v53, %v4237_v51  ;;  %v4311_v25 = vadd.f32 %v4295_v31, %v4238_v29  ;;  %v4365_v44 = vsel %vm4364_vm13, %v13821_v13, %v13820_v21  ;;  %v13824_v51 = vld [vmem:[#allocation451_spill] sm:$0xff]  ;;  %v13825_v29 = vld [vmem:[#allocation450_spill] sm:$0xff]  ;;  %v13827_v37 = vld [vmem:[#allocation449_spill] sm:$0xff] }
0x2153   : > { %v4367_v28 = vsel %vm4364_vm13, %v13819_v59, %v13822_v60  ;;  %v4314_v58 = vadd.f32 %v4298_v61, %v4241_v39  ;;  %v4312_v15 = vadd.f32 %v4296_v8, %v4239_v45  ;;  %v4368_v48 = vsel %vm4364_vm13, %v13822_v60, %v13823_v6  ;;  %v13828_v61 = vld [vmem:[#allocation542_spill] sm:$0xff]  ;;  %v13835_v6 = vld [vmem:[#allocation460_spill] sm:$0xff] }
0x2154   : > { %vm4437_vm14 = vcmask 605184   ;;  %v4313_v22 = vadd.f32 %v4297_v16, %v4240_v32  ;;  %v4315_v23 = vadd.f32 %v4299_v46, %v4242_v27  ;;  %v4382_v43 = vadd.f32 %v4366_v52, %v4309_v24  ;;  %v13829_v27 = vld [vmem:[#allocation456_spill] sm:$0xff]  ;;  %v13830_v24 = vld [vmem:[#allocation457_spill] sm:$0xff]  ;;  %v11090_v46 = vpop.permute.xlu0 %5013 }
0x2155   : > { %v4371_v53 = vsel %vm4364_vm13, %v13825_v29, %v13824_v51  ;;  %v4381_v31 = vadd.f32 %v4365_v44, %v4308_v20  ;;  %v4383_v33 = vadd.f32 %v4367_v28, %v4310_v57  ;;  %v4369_v59 = vsel %vm4364_vm13, %v13827_v37, %v13826_v50  ;;  %v13831_v20 = vld [vmem:[#allocation543_spill] sm:$0xff]  ;;  %v13832_v52 = vld [vmem:[#allocation544_spill] sm:$0xff]  ;;  %v13834_v28 = vld [vmem:[#allocation461_spill] sm:$0xff] }
0x2156   : > { %v4370_v39 = vsel %vm4364_vm13, %v13826_v50, %v13825_v29  ;;  %v4384_v45 = vadd.f32 %v4368_v48, %v4311_v25  ;;  %v4372_v32 = vsel %vm4364_vm13, %v13824_v51, %v13828_v61  ;;  %v4439_v8 = vsel %vm4437_vm14, %v13830_v24, %v13829_v27  ;;  %v13833_v25 = vld [vmem:[#allocation458_spill] sm:$0xff]  ;;  %v13836_v51 = vld [vmem:[#allocation545_spill] sm:$0xff]  ;;  %v13837_v29 = vld [vmem:[#allocation459_spill] sm:$0xff] }
0x2157   : > { %v4438_v16 = vsel %vm4437_vm14, %v13831_v20, %v13830_v24  ;;  %v4387_v21 = vadd.f32 %v4371_v53, %v4314_v58  ;;  %v4440_v57 = vsel %vm4437_vm14, %v13829_v27, %v13832_v52  ;;  %v4441_v13 = vsel %vm4437_vm14, %v13832_v52, %v13833_v25  ;;  %v13838_v20 = vld [vmem:[#allocation546_spill] sm:$0xff] }
0x2158   : > { %vm4510_vm13 = vcmask 596992   ;;  %v4385_v44 = vadd.f32 %v4369_v59, %v4312_v15  ;;  %v4386_v60 = vadd.f32 %v4370_v39, %v4313_v22  ;;  %v4444_v48 = vsel %vm4437_vm14, %v13835_v6, %v13834_v28  ;;  %v13839_v22 = vld [vmem:[#allocation466_spill] sm:$0xff]  ;;  %v13840_v59 = vld [vmem:[#allocation467_spill] sm:$0xff] }
0x2159   : > { %v4442_v50 = vsel %vm4437_vm14, %v13837_v29, %v13836_v51  ;;  %v4388_v58 = vadd.f32 %v4372_v32, %v4315_v23  ;;  %v4455_v53 = vadd.f32 %v4439_v8, %v4382_v43  ;;  %v4454_v37 = vadd.f32 %v4438_v16, %v4381_v31  ;;  %v13841_v23 = vld [vmem:[#allocation547_spill] sm:$0xff]  ;;  %v13842_v32 = vld [vmem:[#allocation548_spill] sm:$0xff] }
0x215a   : > { %v4443_v61 = vsel %vm4437_vm14, %v13836_v51, %v13835_v6  ;;  %v4456_v27 = vadd.f32 %v4440_v57, %v4383_v33  ;;  %v4457_v24 = vadd.f32 %v4441_v13, %v4384_v45  ;;  %v4445_v15 = vsel %vm4437_vm14, %v13834_v28, %v13838_v20  ;;  %v13843_v45 = vld [vmem:[#allocation468_spill] sm:$0xff]  ;;  %v13844_v16 = vld [vmem:[#allocation471_spill] sm:$0xff]  ;;  %v13845_v57 = vld [vmem:[#allocation470_spill] sm:$0xff] }
0x215b   : > { %v4512_v39 = vsel %vm4510_vm13, %v13840_v59, %v13839_v22  ;;  %v4460_v52 = vadd.f32 %v4444_v48, %v4387_v21  ;;  %v4458_v25 = vadd.f32 %v4442_v50, %v4385_v44  ;;  %v4511_v43 = vsel %vm4510_vm13, %v13841_v23, %v13840_v59  ;;  %v13846_v28 = vld [vmem:[#allocation549_spill] sm:$0xff]  ;;  %v13848_v29 = vld [vmem:[#allocation552_spill] sm:$0xff] }
0x215c   : > { %vm12774_vm0 = vcmask 588800   ;;  %v4459_v31 = vadd.f32 %v4443_v61, %v4386_v60  ;;  %v4513_v33 = vsel %vm4510_vm13, %v13839_v22, %v13842_v32  ;;  %v4514_v8 = vsel %vm4510_vm13, %v13842_v32, %v13843_v45  ;;  %v13847_v6 = vld [vmem:[#allocation469_spill] sm:$0xff]  ;;  %v13849_v61 = vld [vmem:[#allocation476_spill] sm:$0xff]  ;;  %v13852_v45 = vld [vmem:[#allocation558_spill] sm:$0xff] }
0x215d   : > { %v4517_v13 = vsel %vm4510_vm13, %v13845_v57, %v13844_v16  ;;  %v4461_v21 = vadd.f32 %v4445_v15, %v4388_v58  ;;  %v4528_v44 = vadd.f32 %v4512_v39, %v4455_v53  ;;  %v4515_v48 = vsel %vm4510_vm13, %v13847_v6, %v13846_v28  ;;  %v13850_v20 = vld [vmem:[#allocation477_spill] sm:$0xff]  ;;  %v13851_v58 = vld [vmem:[#allocation555_spill] sm:$0xff] }
0x215e   : > { %v4516_v60 = vsel %vm4510_vm13, %v13846_v28, %v13845_v57  ;;  %v4527_v51 = vadd.f32 %v4511_v43, %v4454_v37  ;;  %v4518_v50 = vsel %vm4510_vm13, %v13844_v16, %v13848_v29  ;;  %v4585_v22 = vsel %vm12774_vm0, %v13850_v20, %v13849_v61  ;;  %v13853_v43 = vld [vmem:[#allocation478_spill] sm:$0xff]  ;;  %v11146_v57 = vpop.permute.xlu0 %5019 }
0x215f   : > { %v4584_v53 = vsel %vm12774_vm0, %v13851_v58, %v13850_v20  ;;  %v4529_v15 = vadd.f32 %v4513_v33, %v4456_v27  ;;  %v4530_v59 = vadd.f32 %v4514_v8, %v4457_v24  ;;  %v4533_v39 = vadd.f32 %v4517_v13, %v4460_v52  ;;  %v13854_v20 = vld [vmem:[#allocation481_spill] sm:$0xff]  ;;  %v13855_v27 = vld [vmem:[#allocation480_spill] sm:$0xff]  ;;  %v11151_v52 = vpop.permute.xlu2 %5078 }
0x2160   : > { %vm4656_vm14 = vcmask 580608   ;;  %v4531_v23 = vadd.f32 %v4515_v48, %v4458_v25  ;;  %v4532_v32 = vadd.f32 %v4516_v60, %v4459_v31  ;;  %v4586_v37 = vsel %vm12774_vm0, %v13849_v61, %v13852_v45  ;;  %v13856_v25 = vld [vmem:[#allocation559_spill] sm:$0xff]  ;;  %v13860_v58 = vld [vmem:[#allocation488_spill] sm:$0xff] }
0x2161   : > { %v4587_v16 = vsel %vm12774_vm0, %v13852_v45, %v13853_v43  ;;  %v4534_v28 = vadd.f32 %v4518_v50, %v4461_v21  ;;  %v4601_v6 = vadd.f32 %v4585_v22, %v4528_v44  ;;  %v4600_v29 = vadd.f32 %v4584_v53, %v4527_v51  ;;  %v13857_v31 = vld [vmem:[#allocation479_spill] sm:$0xff]  ;;  %v13858_v21 = vld [vmem:[#allocation486_spill] sm:$0xff] }
0x2162   : > { %v4590_v24 = vsel %vm12774_vm0, %v13855_v27, %v13854_v20  ;;  %v4588_v33 = vsel %vm12774_vm0, %v13857_v31, %v13856_v25  ;;  %v4589_v8 = vsel %vm12774_vm0, %v13856_v25, %v13855_v27  ;;  %v4591_v13 = vsel %vm12774_vm0, %v13854_v20, %v9769_v26  ;;  %v13859_v44 = vld [vmem:[#allocation487_spill] sm:$0xff]  ;;  %v13862_v45 = vld [vmem:[#allocation490_spill] sm:$0xff]  ;;  %v13863_v27 = vld [vmem:[#allocation489_spill] sm:$0xff] }
0x2163   : > { %v4658_v48 = vsel %vm4656_vm14, %v13859_v44, %v13858_v21  ;;  %v4602_v60 = vadd.f32 %v4586_v37, %v4529_v15  ;;  %v4603_v51 = vadd.f32 %v4587_v16, %v4530_v59  ;;  %v4657_v50 = vsel %vm4656_vm14, %v9821_v56, %v13859_v44  ;;  %v13861_v26 = vld [vmem:[#allocation491_spill] sm:$0xff]  ;;  %v13867_v44 = vld [vmem:[#allocation501_spill] sm:$0xff] }
0x2164   : > { %v4659_v61 = vsel %vm4656_vm14, %v13858_v21, %v9886_v17  ;;  %v4606_v22 = vadd.f32 %v4590_v24, %v4533_v39  ;;  %v4660_v53 = vsel %vm4656_vm14, %v9886_v17, %v13860_v58  ;;  %v4663_v43 = vsel %vm4656_vm14, %v13862_v45, %v13861_v26 }
0x2165   : > { %vm4729_vm13 = vcmask 572416   ;;  %v4604_v15 = vadd.f32 %v4588_v33, %v4531_v23  ;;  %v4605_v59 = vadd.f32 %v4589_v8, %v4532_v32  ;;  %v4607_v37 = vadd.f32 %v4591_v13, %v4534_v28  ;;  %v13864_v23 = vld [vmem:[#allocation496_spill] sm:$0xff]  ;;  %v13865_v32 = vld [vmem:[#allocation497_spill] sm:$0xff]  ;;  %v13866_v33 = vld [vmem:[#allocation498_spill] sm:$0xff] }
0x2166   : > { %v4674_v16 = vadd.f32 %v4658_v48, %v4601_v6  ;;  %v4673_v20 = vadd.f32 %v4657_v50, %v4600_v29  ;;  %v4675_v56 = vadd.f32 %v4659_v61, %v4602_v60  ;;  %v4661_v25 = vsel %vm4656_vm14, %v13863_v27, %v9945_v18  ;;  %v13868_v48 = vld [vmem:[#allocation500_spill] sm:$0xff] }
0x2167   : > { %v4662_v39 = vsel %vm4656_vm14, %v9945_v18, %v13862_v45  ;;  %v4676_v17 = vadd.f32 %v4660_v53, %v4603_v51  ;;  %v4679_v24 = vadd.f32 %v4663_v43, %v4606_v22  ;;  %v4664_v31 = vsel %vm4656_vm14, %v13861_v26, %v10001_v9  ;;  %v13869_v51 = vld [vmem:[#allocation499_spill] sm:$0xff]  ;;  %v13870_v45 = vld [vmem:[#allocation508_spill] sm:$0xff]  ;;  %v13871_v43 = vld [vmem:[#allocation509_spill] sm:$0xff] }
0x2168   : > { %v4731_v28 = vsel %vm4729_vm13, %v13865_v32, %v13864_v23  ;;  %v4730_v29 = vsel %vm4729_vm13, %v10051_v11, %v13865_v32  ;;  %v4732_v18 = vsel %vm4729_vm13, %v13864_v23, %v10107_v4  ;;  %v4733_v8 = vsel %vm4729_vm13, %v10107_v4, %v13866_v33  ;;  %v13875_v23 = vld [vmem:[#allocation512_spill] sm:$0xff] }
0x2169   : > { %vm4802_vm0 = vcmask 564224   ;;  %v4677_v13 = vadd.f32 %v4661_v25, %v4604_v15  ;;  %v4678_v21 = vadd.f32 %v4662_v39, %v4605_v59  ;;  %v4736_v60 = vsel %vm4729_vm13, %v13868_v48, %v13867_v44  ;;  %v5085_v59 = vpop.permute.xlu2 %5084 }
0x216a   : > { %v4734_v11 = vsel %vm4729_vm13, %v13869_v51, %v10169_v1  ;;  %v4680_v50 = vadd.f32 %v4664_v31, %v4607_v37  ;;  %v4747_v61 = vadd.f32 %v4731_v28, %v4674_v16  ;;  %v4735_v22 = vsel %vm4729_vm13, %v10169_v1, %v13868_v48  ;;  %v13874_v31 = vld [vmem:[#allocation514_spill] sm:$0xff] }
0x216b   : > { %v4737_v4 = vsel %vm4729_vm13, %v13867_v44, %v10225_v36  ;;  %v4746_v58 = vadd.f32 %v4730_v29, %v4673_v20  ;;  %v4748_v53 = vadd.f32 %v4732_v18, %v4675_v56  ;;  %v4749_v26 = vadd.f32 %v4733_v8, %v4676_v17  ;;  %v13872_v20 = vld [vmem:[#allocation511_spill] sm:$0xff]  ;;  %v13876_v18 = vld [vmem:[#allocation529_spill] sm:$0xff] }
0x216c   : > { %v11189_v6 = vpop.permute.xlu1 %5076  ;;  %v4804_v15 = vsel %vm4802_vm0, %v13871_v43, %v13870_v45  ;;  %v4752_v27 = vadd.f32 %v4736_v60, %v4679_v24  ;;  %v4750_v25 = vadd.f32 %v4734_v11, %v4677_v13  ;;  %v4803_v37 = vsel %vm4802_vm0, %v10275_v30, %v13871_v43  ;;  %v13873_v17 = vld [vmem:[#allocation515_spill] sm:$0xff]  ;;  %v13878_v11 = vld [vmem:[#allocation532_spill] sm:$0xff]  ;;  %v13881_v43 = vld [vmem:[#allocation550_spill] sm:$0xff] }
0x216d   : > { %v11200_v9 = vpop.permute.xlu0 %5074  ;;  %vm12775_vm14 = vcmask 556032   ;;  %v4751_v1 = vadd.f32 %v4735_v22, %v4678_v21  ;;  %v4753_v16 = vadd.f32 %v4737_v4, %v4680_v50  ;;  %v4805_v36 = vsel %vm4802_vm0, %v13870_v45, %v10331_v47 }
0x216e   : > { %v4806_v56 = vsel %vm4802_vm0, %v10331_v47, %v13872_v20  ;;  %v4820_v39 = vadd.f32 %v4804_v15, %v4747_v61  ;;  %v4809_v24 = vsel %vm4802_vm0, %v13874_v31, %v13873_v17  ;;  %v4807_v30 = vsel %vm4802_vm0, %v13875_v23, %v10399_v7  ;;  %v13877_v47 = vld [vmem:[#allocation530_spill] sm:$0xff]  ;;  %v13882_v15 = vld [vmem:[#allocation551_spill] sm:$0xff] }
0x216f   : > { %v4808_v32 = vsel %vm4802_vm0, %v10399_v7, %v13874_v31  ;;  %v4819_v28 = vadd.f32 %v4803_v37, %v4746_v58  ;;  %v4810_v29 = vsel %vm4802_vm0, %v13873_v17, %v10462_v12  ;;  %v4877_v33 = vsel %vm12775_vm14, %v13877_v47, %v13876_v18  ;;  %v13883_v37 = vld [vmem:[#allocation536_spill] sm:$0xff] }
0x2170   : > { %v4876_v8 = vsel %vm12775_vm14, %v10513_v19, %v13877_v47  ;;  %v4821_v21 = vadd.f32 %v4805_v36, %v4748_v53  ;;  %v4822_v44 = vadd.f32 %v4806_v56, %v4749_v26  ;;  %v4878_v7 = vsel %vm12775_vm14, %v13876_v18, %v10576_v38  ;;  %v13879_v19 = vld [vmem:[#allocation533_spill] sm:$0xff]  ;;  %v13880_v26 = vld [vmem:[#allocation535_spill] sm:$0xff]  ;;  %v13885_v56 = vld [vmem:[#allocation554_spill] sm:$0xff] }
0x2171   : > { %vm4948_vm13 = vcmask 547840   ;;  %v4825_v60 = vadd.f32 %v4809_v24, %v4752_v27  ;;  %v4823_v51 = vadd.f32 %v4807_v30, %v4750_v25  ;;  %v4824_v12 = vadd.f32 %v4808_v32, %v4751_v1  ;;  %v5091_v31 = vpop.permute.xlu2 %5090 }
0x2172   : > { %v4879_v50 = vsel %vm12775_vm14, %v10576_v38, %v13878_v11  ;;  %v4826_v61 = vadd.f32 %v4810_v29, %v4753_v16  ;;  %v4893_v22 = vadd.f32 %v4877_v33, %v4820_v39  ;;  %v4892_v4 = vadd.f32 %v4876_v8, %v4819_v28 }
0x2173   : > { %v4880_v58 = vsel %vm12775_vm14, %v13879_v19, %v10635_v14  ;;  %v4894_v53 = vadd.f32 %v4878_v7, %v4821_v21  ;;  %v4881_v45 = vsel %vm12775_vm14, %v10635_v14, %v13880_v26  ;;  %v4950_v27 = vsel %vm4948_vm13, %v13882_v15, %v13881_v43  ;;  %v13884_v14 = vld [vmem:[#allocation553_spill] sm:$0xff] }
0x2174   : > { %v5083_v13 = vpop.permute.xlu1 %5082  ;;  %v4949_v38 = vsel %vm4948_vm13, %v10751_v2, %v13882_v15  ;;  %v4895_v25 = vadd.f32 %v4879_v50, %v4822_v44  ;;  %v4882_v1 = vsel %vm12775_vm14, %v13880_v26, %v13883_v37  ;;  %v4951_v16 = vsel %vm4948_vm13, %v13881_v43, %v10807_v35  ;;  %v13886_v2 = vld [vmem:[#allocation556_spill] sm:$0xff]  ;;  %v13887_v21 = vld [vmem:[#allocation557_spill] sm:$0xff] }
0x2175   : > { %v5081_v48 = vpop.permute.xlu0 %5080  ;;  %vm5021_vm0 = vcmask 539648   ;;  %v4896_v36 = vadd.f32 %v4880_v58, %v4823_v51  ;;  %v4952_v20 = vsel %vm4948_vm13, %v10807_v35, %v13884_v14  ;;  %v4953_v39 = vsel %vm4948_vm13, %v13885_v56, %v10866_v55 }
0x2176   : > { %v4954_v17 = vsel %vm4948_vm13, %v10866_v55, %v13886_v2  ;;  %v4897_v24 = vadd.f32 %v4881_v45, %v4824_v12  ;;  %v4883_v23 = vsel %vm12775_vm14, %v13883_v37, %v10700_v34  ;;  %v4966_v30 = vadd.f32 %v4950_v27, %v4893_v22 }
0x2177   : > { %v4965_v32 = vadd.f32 %v4949_v38, %v4892_v4  ;;  %v4967_v28 = vadd.f32 %v4951_v16, %v4894_v53  ;;  %v5023_v35 = vsel %vm5021_vm0, %v10338_v49, %v10336_v42  ;;  %v5022_v29 = vsel %vm5021_vm0, %v10972_v5, %v10338_v49 }
0x2178   : > { %v5026_v55 = vsel %vm5021_vm0, %v10401_v62, %v11090_v46  ;;  %v4968_v47 = vadd.f32 %v4952_v20, %v4895_v25  ;;  %v4969_v33 = vadd.f32 %v4953_v39, %v4896_v36  ;;  %v4970_v8 = vadd.f32 %v4954_v17, %v4897_v24 }
0x2179   : > { %vm5094_vm14 = vcmask 531456   ;;  %v4956_v44 = vsel %vm4948_vm13, %v13887_v21, %v10925_v3  ;;  %v5024_v7 = vsel %vm5021_vm0, %v10336_v42, %v11031_v40  ;;  %v5027_v49 = vsel %vm5021_vm0, %v11090_v46, %v10436_v10  ;;  %v5129_v26 = vpop.permute.xlu2 %5128 }
0x217a   : > { %v5039_v5 = vadd.f32 %v5023_v35, %v4966_v30  ;;  %v5038_v51 = vadd.f32 %v5022_v29, %v4965_v32  ;;  %v5025_v12 = vsel %vm5021_vm0, %v11031_v40, %v10385_v54  ;;  %v5042_v11 = vadd.f32 %v5026_v55, %v4969_v33 }
0x217b   : > { %v5096_v3 = vsel %vm5094_vm14, %v11189_v6, %v11151_v52  ;;  %v5095_v42 = vsel %vm5094_vm14, %v11200_v9, %v11189_v6  ;;  %v5097_v46 = vsel %vm5094_vm14, %v11151_v52, %v5081_v48  ;;  %v5040_v50 = vadd.f32 %v5024_v7, %v4967_v28 }
0x217c   : > { %v5089_v18 = vpop.permute.xlu1 %5088  ;;  %v5043_v22 = vadd.f32 %v5027_v49, %v4970_v8  ;;  %v5098_v4 = vsel %vm5094_vm14, %v5081_v48, %v5083_v13  ;;  %v4898_v54 = vadd.f32 %v4882_v1, %v4825_v60  ;;  %v4899_v40 = vadd.f32 %v4883_v23, %v4826_v61 }
0x217d   : > { %v5087_v34 = vpop.permute.xlu0 %5086  ;;  %v4955_v58 = vsel %vm4948_vm13, %v13886_v2, %v13887_v21  ;;  %v5041_v53 = vadd.f32 %v5025_v12, %v4968_v47  ;;  %v5112_v45 = vadd.f32 %v5096_v3, %v5039_v5  ;;  %v5111_v6 = vadd.f32 %v5095_v42, %v5038_v51 }
0x217e   : > { %v5099_v62 = vsel %vm5094_vm14, %v5085_v59, %v5087_v34  ;;  %v5100_v59 = vsel %vm5094_vm14, %v5087_v34, %v5089_v18  ;;  %v5113_v9 = vadd.f32 %v5097_v46, %v5040_v50  ;;  %v4972_v52 = vadd.f32 %v4956_v44, %v4899_v40  ;;  %v11390_v40 = vld [vmem:[%s12378_s4] sm:$0xff] }
0x217f   : > { %v5115_v19 = vadd.f32 %v5099_v62, %v5042_v11  ;;  %v5116_v43 = vadd.f32 %v5100_v59, %v5043_v22  ;;  %v5028_v15 = vsel %vm5021_vm0, %v10436_v10, %v10464_v0  ;;  %v5029_v13 = vsel %vm5021_vm0, %v10464_v0, %v11146_v57 }
0x2180   : > { %v5114_v48 = vadd.f32 %v5098_v4, %v5041_v53  ;;  %v4971_v1 = vadd.f32 %v4955_v58, %v4898_v54  ;;  %v5045_v14 = vadd.f32 %v5029_v13, %v4972_v52  ;;  %v5101_v20 = vsel %vm5094_vm14, %v5089_v18, %v5091_v31  ;;  %v11385_v54 = vld [vmem:[%s12378_s4 + $0x8] sm:$0xff] }
0x2181   : > { %v5135_v37 = vadd.f32 %v5129_v26, %v5115_v19  ;;  %v5136_v10 = vadd.f32 %v5129_v26, %v5116_v43  ;;  %v13888_v58 = vmov 2  }
0x2182   : > { %v5044_v39 = vadd.f32 %v5028_v15, %v4971_v1 }
0x2183   : > { %v5155_v57 = vmul.f32 1.442695, %v5135_v37  ;;  %v5157_v30 = vmul.f32 1.442695, %v5136_v10 }
0x2184   : > { %v5124_v60 = vpop.permute.xlu1 %5123  ;;  %v5117_v24 = vadd.f32 %v5101_v20, %v5044_v39 }
0x2185   : > { %v5093_v61 = vpop.permute.xlu0 %5092  ;;  %v5132_v27 = vadd.f32 %v5124_v60, %v5112_v45  ;;  %v5131_v38 = vadd.f32 %v5124_v60, %v5111_v6  ;;  %v5133_v25 = vadd.f32 %v5124_v60, %v5113_v9  ;;  %v5134_v36 = vadd.f32 %v5124_v60, %v5114_v48 }
0x2186   : > { %v5102_v16 = vsel %vm5094_vm14, %v5091_v31, %v5093_v61  ;;  %v5137_v28 = vadd.f32 %v5129_v26, %v5117_v24 }
0x2187   : > { %v5149_v56 = vmul.f32 1.442695, %v5132_v27  ;;  %v5147_v2 = vmul.f32 1.442695, %v5131_v38  ;;  %v5151_v17 = vmul.f32 1.442695, %v5133_v25  ;;  %v5118_v0 = vadd.f32 %v5102_v16, %v5045_v14 }
0x2188   : > { %v5153_v23 = vmul.f32 1.442695, %v5134_v36  ;;  %vm5140_vm14 = vcmp.gt.f32.partialorder %v5132_v27, 0.0  ;;  %vm5139_vm13 = vcmp.gt.f32.partialorder %v5131_v38, 0.0  ;;  %v5159_v34 = vmul.f32 1.442695, %v5137_v28 }
0x2189   : > { %7067 = vpow2.f32 %v5149_v56  ;;  %v5138_v32 = vadd.f32 %v5129_v26, %v5118_v0  ;;  %vm5141_vm0 = vcmp.gt.f32.partialorder %v5133_v25, 0.0  ;;  %vm5142_vm9 = vcmp.gt.f32.partialorder %v5134_v36, 0.0 }
0x218a   : > { %7069 = vpow2.f32 %v5147_v2 }
0x218b   : > { %7071 = vpow2.f32 %v5151_v17  ;;  %v5161_v18 = vmul.f32 1.442695, %v5138_v32 }
0x218c   : > { %7073 = vpow2.f32 %v5155_v57 }
0x218d   : > { %7075 = vpow2.f32 %v5153_v23 }
0x218e   : > { %7077 = vpow2.f32 %v5157_v30 }
0x218f   : > { %v7068_v35 = vpop.eup %7067  ;;  %7079 = vpow2.f32 %v5161_v18 }
0x2190   : > { %v7070_v31 = vpop.eup %7069  ;;  %v6720_v29 = vadd.f32 -1.0, %v7068_v35  ;;  %7081 = vpow2.f32 %v5159_v34 }
0x2191   : > { %v7072_v55 = vpop.eup %7071  ;;  %v6719_v47 = vadd.f32 -1.0, %v7070_v31 }
0x2192   : > { %v11323_v33 = vsel %vm5140_vm14, %v5132_v27, %v6720_v29  ;;  %v6721_v8 = vadd.f32 -1.0, %v7072_v55  ;;  %v7074_v21 = vpop.eup %7073  ;;  %vm5143_vm14 = vcmp.gt.f32.partialorder %v5135_v37, 0.0 }
0x2193   : > { %5205 = vrot.lane.b32.xlu1 %v11323_v33, %s7167_s23  ;;  %v11327_v44 = vsel %vm5139_vm13, %v5131_v38, %v6719_v47  ;;  %v7076_v7 = vpop.eup %7075  ;;  %v6723_v5 = vadd.f32 -1.0, %v7074_v21  ;;  %vm5144_vm13 = vcmp.gt.f32.partialorder %v5136_v10, 0.0 }
0x2194   : > { %5203 = vrot.lane.b32.xlu0 %v11327_v44, %s7167_s23  ;;  %v11331_v49 = vsel %vm5141_vm0, %v5133_v25, %v6721_v8  ;;  %v7078_v62 = vpop.eup %7077  ;;  %v6722_v51 = vadd.f32 -1.0, %v7076_v7  ;;  %vm5146_vm0 = vcmp.gt.f32.partialorder %v5138_v32, 0.0  ;;  %v5317_v25 = vlaneseq }
0x2195   : > { %5207 = vrot.lane.b32.xlu2 %v11331_v49, %s7167_s23  ;;  %v6724_v12 = vadd.f32 -1.0, %v7078_v62  ;;  %v11335_v11 = vsel %vm5143_vm14, %v5135_v37, %v6723_v5  ;;  %v7080_v3 = vpop.eup %7079  ;;  %vm5145_vm14 = vcmp.gt.f32.partialorder %v5137_v28, 0.0 }
0x2196   : > { %v11337_v42 = vsel %vm5142_vm9, %v5134_v36, %v6722_v51  ;;  %v7082_v46 = vpop.eup %7081  ;;  %v6726_v50 = vadd.f32 -1.0, %v7080_v3  ;;  %v11403_v14 = vand.u32 127, %v5317_v25 }
0x2197   : > { %v11343_v59 = vsel %vm5144_vm13, %v5136_v10, %v6724_v12  ;;  %v6725_v22 = vadd.f32 -1.0, %v7082_v46 }
0x2198   : > { %v5178_v4 = vsel %vm5146_vm0, %v5138_v32, %v6726_v50  ;;  %13889 = vst [vmem:[#allocation9_spill] sm:$0xff] %v11403_v14  ;;  %v5321_v10 = vadd.s32 384, %v11403_v14  ;;  %vm5322_vm9 = vcmp.ge.s32.totalorder %v11403_v14, 32  ;;  %vm5345_vm0 = vcmask 523264  }
0x2199   : > { %v11347_v19 = vsel %vm5145_vm14, %v5137_v28, %v6725_v22  ;;  %vm13929_vm14 = vcmask 687104  }
0x219a   : > { %vm5329_vm13 = vcmp.lt.s32.totalorder %v5321_v10, 432 }
0x219b   : > { %5211 = vrot.lane.b32.xlu1 %v11335_v11, %s7167_s23 }
0x219c   : > { %5209 = vrot.lane.b32.xlu0 %v11337_v42, %s7167_s23 }
0x219d   : > { %5213 = vrot.lane.b32.xlu2 %v11343_v59, %s7167_s23 }
0x21a3   : > { %5217 = vrot.lane.b32.xlu1 %v5178_v4, %s7167_s23 }
0x21a4   : > { %5215 = vrot.lane.b32.xlu0 %v11347_v19, %s7167_s23  ;;  %s13910_s23 = smov 88  }
0x21a5   : > { %5241 = vrot.lane.b32.xlu2 %v11327_v44, %s7166_s22 }
0x21ab   : > { %5245 = vrot.lane.b32.xlu1 %v11331_v49, %s7166_s22 }
0x21ac   : > { %5243 = vrot.lane.b32.xlu0 %v11323_v33, %s7166_s22 }
0x21ad   : > { %5247 = vrot.lane.b32.xlu2 %v11337_v42, %s7166_s22 }
0x21b3   : > { %5251 = vrot.lane.b32.xlu1 %v11343_v59, %s7166_s22 }
0x21b4   : > { %5249 = vrot.lane.b32.xlu0 %v11335_v11, %s7166_s22 }
0x21b5   : > { %5253 = vrot.lane.b32.xlu2 %v11347_v19, %s7166_s22 }
0x21bb   : > { %5279 = vrot.lane.b32.xlu1 %v11327_v44, %s7169_s25 }
0x21bc   : > { %5255 = vrot.lane.b32.xlu0 %v5178_v4, %s7166_s22  ;;  %s13908_s22 = smov 92  }
0x21bd   : > { %5281 = vrot.lane.b32.xlu2 %v11323_v33, %s7169_s25 }
0x21c3   : > { %5285 = vrot.lane.b32.xlu1 %v11337_v42, %s7169_s25 }
0x21c4   : > { %5283 = vrot.lane.b32.xlu0 %v11331_v49, %s7169_s25 }
0x21c5   : > { %5287 = vrot.lane.b32.xlu2 %v11335_v11, %s7169_s25 }
0x21cb   : > { %5291 = vrot.lane.b32.xlu1 %v11347_v19, %s7169_s25 }
0x21cc   : > { %5289 = vrot.lane.b32.xlu0 %v11343_v59, %s7169_s25 }
0x21cd   : > { %5293 = vrot.lane.b32.xlu2 %v5178_v4, %s7169_s25  ;;  %s13895_s25 = smov 108  }
0x21d3   : > { %5366 = vperm.xlu1 %7034, %v11385_v54  }
0x21d5   : > { %5390 = vperm.xlu2 %7036, %v11390_v40  }
0x21db   : > { %7037 = vset.pattern.permute.xlu1 %v13677_v41 }
0x21dc   : > { %5394 = vperm.xlu1 %7037, %v11385_v54  }
0x21dd   : > { %7039 = vset.pattern.permute.xlu2 %v13888_v58 }
0x21e4   : > { %7038 = vset.pattern.permute.xlu1 %v13888_v58 }
0x21ef   : > { %v5208_v53 = vpop.permute.xlu2 %5207 }
0x21f7   : > { %v5214_v26 = vpop.permute.xlu2 %5213 }
0x21ff   : > { %v5242_v45 = vpop.permute.xlu2 %5241 }
0x2205   : > { %v5206_v6 = vpop.permute.xlu1 %5205 }
0x2206   : > { %v5204_v9 = vpop.permute.xlu0 %5203  ;;  %v5220_v32 = vsel %vm568_vm1, %v5206_v6, %v5208_v53 }
0x2207   : > { %v5248_v43 = vpop.permute.xlu2 %5247  ;;  %v5219_v36 = vsel %vm568_vm1, %v5204_v9, %v5206_v6  ;;  %v5234_v34 = vmax.f32 %v11323_v33, %v5220_v32 }
0x2208   : > { %v5233_v56 = vmax.f32 %v11327_v44, %v5219_v36 }
0x220d   : > { %v5212_v52 = vpop.permute.xlu1 %5211 }
0x220e   : > { %v5210_v15 = vpop.permute.xlu0 %5209  ;;  %v5222_v22 = vsel %vm568_vm1, %v5212_v52, %v5214_v26 }
0x220f   : > { %v5254_v13 = vpop.permute.xlu2 %5253  ;;  %v5236_v28 = vmax.f32 %v11337_v42, %v5210_v15  ;;  %v5221_v35 = vsel %vm568_vm1, %v5208_v53, %v5210_v15 }
0x2210   : > { %v5235_v21 = vmax.f32 %v11331_v49, %v5221_v35 }
0x2211   : > { %v5274_v44 = vmax.f32 %v5236_v28, %v5248_v43 }
0x2215   : > { %v5218_v48 = vpop.permute.xlu1 %5217 }
0x2216   : > { %v5216_v60 = vpop.permute.xlu0 %5215  ;;  %v5240_v39 = vmax.f32 %v5178_v4, %v5218_v48 }
0x2217   : > { %v5282_v61 = vpop.permute.xlu2 %5281  ;;  %v5224_v46 = vsel %vm568_vm1, %v5216_v60, %v5218_v48  ;;  %v5223_v4 = vsel %vm568_vm1, %v5214_v26, %v5216_v60  ;;  %v5237_v26 = vmax.f32 %v11335_v11, %v5222_v22  ;;  %vm13914_vm1 = vcmask 719872  }
0x2218   : > { %v5239_v6 = vmax.f32 %v11347_v19, %v5224_v46  ;;  %v5238_v52 = vmax.f32 %v11343_v59, %v5223_v4 }
0x221d   : > { %v5246_v27 = vpop.permute.xlu1 %5245 }
0x221e   : > { %v5244_v41 = vpop.permute.xlu0 %5243  ;;  %v5259_v18 = vsel %vm641_vm2, %v5246_v27, %v5248_v43 }
0x221f   : > { %v11398_v38 = vpop.permute.xlu2 %5287  ;;  %v5257_v20 = vsel %vm641_vm2, %v5242_v45, %v5244_v41  ;;  %v5258_v47 = vsel %vm641_vm2, %v5244_v41, %v5246_v27  ;;  %v5273_v62 = vmax.f32 %v5235_v21, %v5259_v18 }
0x2220   : > { %v5271_v2 = vmax.f32 %v5233_v56, %v5257_v20  ;;  %v5272_v5 = vmax.f32 %v5234_v34, %v5258_v47 }
0x2225   : > { %v5252_v37 = vpop.permute.xlu1 %5251 }
0x2226   : > { %v5250_v1 = vpop.permute.xlu0 %5249  ;;  %v5261_v9 = vsel %vm641_vm2, %v5252_v37, %v5254_v13 }
0x2227   : > { %v11400_v16 = vpop.permute.xlu2 %5293  ;;  %v5260_v43 = vsel %vm641_vm2, %v5250_v1, %v5252_v37  ;;  %v5276_v60 = vmax.f32 %v5238_v52, %v5261_v9 }
0x222d   : > { %v5280_v17 = vpop.permute.xlu1 %5279 }
0x222e   : > { %v5295_v0 = vsel %vm714_vm3, %v5280_v17, %v5282_v61  ;;  %v5256_v57 = vpop.permute.xlu0 %5255  ;;  %v13890_v17 = vmov 3  }
0x222f   : > { %v5309_v24 = vmax.f32 %v5271_v2, %v5295_v0  ;;  %v5278_v23 = vmax.f32 %v5240_v39, %v5256_v57  ;;  %v5391_v30 = vpop.permute.xlu2 %5390  ;;  %v5262_v58 = vsel %vm641_vm2, %v5254_v13, %v5256_v57  ;;  %v13891_v0 = vmov 4   ;;  %vm13915_vm2 = vmmov %vm13914_vm1 }
0x2230   : > { %v5277_v15 = vmax.f32 %v5239_v6, %v5262_v58 }
0x2231   : > { %v11415_v31 = vsel %vm5322_vm9, %v5309_v24, 0.0  ;;  %v5316_v29 = vmax.f32 %v5278_v23, %v11400_v16 }
0x2232   : > { %5342 = vst [vmem:[#allocation4] sm:$0xff] %v11415_v31  ;;  %v5397_v55 = vmul.f32 %v5391_v30, %v11415_v31 }
0x2233   : > { %v5341_v8 = vsel %vm5329_vm13, %v5316_v29, 0.0 }
0x2234   : > { %5350 = vst.msk [vmem:[#allocation4 + $0x38] sm:$0xff] %vm5345_vm0, %v5341_v8  ;;  %5413 = vrot.lane.b32.xlu2 %v5397_v55, %s7168_s24 }
0x2235   : > { %v5286_v7 = vpop.permute.xlu1 %5285 }
0x2236   : > { %v5312_v51 = vmax.f32 %v5274_v44, %v5286_v7  ;;  %v5284_v12 = vpop.permute.xlu0 %5283 }
0x2237   : > { %v5296_v3 = vsel %vm714_vm3, %v5282_v61, %v5284_v12  ;;  %v5297_v42 = vsel %vm714_vm3, %v5284_v12, %v5286_v7  ;;  %v5275_v61 = vmax.f32 %v5237_v26, %v5260_v43  ;;  %v13892_v7 = vmov 5  }
0x2238   : > { %v5337_v33 = vsel %vm5329_vm13, %v5312_v51, 0.0  ;;  %v11431_v50 = vmax.f32 %v5272_v5, %v5296_v3  ;;  %v11433_v49 = vmax.f32 %v5273_v62, %v5297_v42 }
0x2239   : > { %5346 = vst.msk [vmem:[#allocation4 + $0x18] sm:$0xff] %vm5345_vm0, %v5337_v33 }
0x223a   : > { %5343 = vst [vmem:[#allocation4 + $0x8] sm:$0xff] %v11431_v50  ;;  %v5399_v53 = vmul.f32 %v5391_v30, %v11433_v49  ;;  %v5398_v45 = vmul.f32 %v5391_v30, %v11431_v50 }
0x223b   : > { %5344 = vst [vmem:[#allocation4 + $0x10] sm:$0xff] %v11433_v49  ;;  %v11476_v39 = vld [vmem:[#allocation4 + $0x38] sm:$0xff] }
0x223c   : > { %5417 = vrot.lane.b32.xlu1 %v5399_v53, %s7168_s24  ;;  %5415 = vrot.lane.b32.xlu0 %v5398_v45, %s7168_s24 }
0x223d   : > { %v5292_v48 = vpop.permute.xlu1 %5291 }
0x223e   : > { %v5300_v19 = vsel %vm714_vm3, %v5292_v48, %v11400_v16  ;;  %v5290_v13 = vpop.permute.xlu0 %5289 }
0x223f   : > { %v11452_v27 = vmax.f32 %v5277_v15, %v5300_v19  ;;  %v5298_v41 = vsel %vm714_vm3, %v11398_v38, %v5290_v13  ;;  %v5299_v11 = vsel %vm714_vm3, %v5290_v13, %v5292_v48  ;;  %v13893_v15 = vmov 6   ;;  %vm13924_vm3 = vmmov %vm13914_vm1 }
0x2240   : > { %v11457_v59 = vld [vmem:[#allocation4 + $0x18] sm:$0xff]  ;;  %v5313_v25 = vmax.f32 %v5275_v61, %v5298_v41  ;;  %v11459_v37 = vmax.f32 %v5276_v60, %v5299_v11 }
0x2241   : > { %v5400_v1 = vmul.f32 %v5391_v30, %v11457_v59 }
0x2242   : > { %v11464_v36 = vsel %vm5322_vm9, %v5313_v25, 0.0  ;;  %vm13930_vm9 = vmmov %vm13929_vm14 }
0x2243   : > { %5347 = vst [vmem:[#allocation4 + $0x20] sm:$0xff] %v11464_v36  ;;  %5419 = vrot.lane.b32.xlu2 %v5400_v1, %s7168_s24  ;;  %vm13931_vm13 = vmmov %vm13930_vm9 }
0x2244   : > { %vm13932_vm0 = vmmov %vm13930_vm9 }
0x2245   : > { %v11468_v16 = vpop.permute.xlu1 %5366 }
0x224e   : > { %v5395_v38 = vpop.permute.xlu1 %5394 }
0x224f   : > { %v5403_v20 = vmul.f32 %v5395_v38, %v11452_v27  ;;  %v5402_v56 = vmul.f32 %v5395_v38, %v11459_v37  ;;  %v5401_v10 = vmul.f32 %v5395_v38, %v11464_v36  ;;  %v5404_v2 = vmul.f32 %v5395_v38, %v11476_v39 }
0x2251   : > { %5425 = vrot.lane.b32.xlu2 %v5403_v20, %s7168_s24  ;;  %5423 = vrot.lane.b32.xlu1 %v5402_v56, %s7168_s24 }
0x2252   : > { %5421 = vrot.lane.b32.xlu0 %v5401_v10, %s7168_s24 }
0x2259   : > { %5452 = vperm.xlu2 %7039, %v11385_v54   ;;  %5448 = vperm.xlu1 %7038, %v11390_v40  }
0x225a   : > { %5427 = vrot.lane.b32.xlu0 %v5404_v2, %s7168_s24 }
0x2261   : > { %7040 = vset.pattern.permute.xlu2 %v13890_v17  ;;  %7041 = vset.pattern.permute.xlu1 %v13891_v0 }
0x228e   : > { %v11484_v57 = vpop.permute.xlu2 %5413 }
0x229d   : > { %v11488_v23 = vpop.permute.xlu2 %5419 }
0x22ab   : > { %v11492_v32 = vpop.permute.xlu2 %5425 }
0x22ae   : > { %v11486_v24 = vpop.permute.xlu1 %5417  ;;  %v11514_v62 = vpop.permute.xlu0 %5415 }
0x22b3   : > { %v5453_v18 = vpop.permute.xlu2 %5452 }
0x22b4   : > { %v5460_v47 = vmul.f32 %v5453_v18, %v11459_v37  ;;  %v5459_v8 = vmul.f32 %v5453_v18, %v11464_v36  ;;  %v5462_v21 = vmul.f32 %v5453_v18, %v11476_v39  ;;  %v5461_v44 = vmul.f32 %v5453_v18, %v11452_v27 }
0x22c3   : > { %v11490_v30 = vpop.permute.xlu1 %5423 }
0x22c4   : > { %v11518_v51 = vpop.permute.xlu0 %5421 }
0x22cb   : > { %v5449_v28 = vpop.permute.xlu1 %5448 }
0x22cc   : > { %v5457_v35 = vmul.f32 %v5449_v28, %v11433_v49  ;;  %v5456_v29 = vmul.f32 %v5449_v28, %v11431_v50  ;;  %v5455_v55 = vmul.f32 %v5449_v28, %v11415_v31  ;;  %v5458_v34 = vmul.f32 %v5449_v28, %v11457_v59  ;;  %v11522_v42 = vpop.permute.xlu0 %5427 }
0x22ce   : > { %5475 = vrot.lane.b32.xlu2 %v5457_v35, %s7177_s29  ;;  %5473 = vrot.lane.b32.xlu1 %v5456_v29, %s7177_s29 }
0x22cf   : > { %5471 = vrot.lane.b32.xlu0 %v5455_v55, %s7177_s29  ;;  %v13894_v55 = vmov 7  }
0x22d6   : > { %5481 = vrot.lane.b32.xlu2 %v5460_v47, %s7177_s29  ;;  %5479 = vrot.lane.b32.xlu1 %v5459_v8, %s7177_s29 }
0x22d7   : > { %5477 = vrot.lane.b32.xlu0 %v5458_v34, %s7177_s29 }
0x22de   : > { %5506 = vperm.xlu2 %7040, %v11390_v40   ;;  %5485 = vrot.lane.b32.xlu1 %v5462_v21, %s7177_s29 }
0x22df   : > { %5483 = vrot.lane.b32.xlu0 %v5461_v44, %s7177_s29 }
0x22e6   : > { %7042 = vset.pattern.permute.xlu2 %v13891_v0 }
0x22e7   : > { %5510 = vperm.xlu0 %6912, %v11385_v54  }
0x22ef   : > { %7044 = vset.pattern.permute.xlu0 %v13892_v7 }
0x2328   : > { %v11516_v5 = vpop.permute.xlu2 %5475 }
0x2330   : > { %v11520_v12 = vpop.permute.xlu2 %5481 }
0x2338   : > { %v5507_v3 = vpop.permute.xlu2 %5506 }
0x2339   : > { %v5514_v46 = vmul.f32 %v5507_v3, %v11431_v50  ;;  %v5513_v33 = vmul.f32 %v5507_v3, %v11415_v31  ;;  %v5516_v4 = vmul.f32 %v5507_v3, %v11457_v59  ;;  %v5515_v58 = vmul.f32 %v5507_v3, %v11433_v49 }
0x233b   : > { %5531 = vrot.lane.b32.xlu2 %v5514_v46, %s7185_s21  ;;  %5529 = vrot.lane.b32.xlu1 %v5513_v33, %s7185_s21 }
0x2340   : > { %v11550_v48 = vpop.permute.xlu1 %5473 }
0x2341   : > { %v11528_v22 = vpop.permute.xlu0 %5471 }
0x2343   : > { %5535 = vrot.lane.b32.xlu2 %v5516_v4, %s7185_s21  ;;  %5533 = vrot.lane.b32.xlu1 %v5515_v58, %s7185_s21 }
0x2348   : > { %v11552_v60 = vpop.permute.xlu1 %5479 }
0x2349   : > { %v11534_v53 = vpop.permute.xlu0 %5477 }
0x2350   : > { %v11554_v61 = vpop.permute.xlu1 %5485 }
0x2351   : > { %v11536_v45 = vpop.permute.xlu0 %5483 }
0x2359   : > { %v5511_v6 = vpop.permute.xlu0 %5510 }
0x235a   : > { %v5519_v9 = vmul.f32 %v5511_v6, %v11452_v27  ;;  %v5518_v43 = vmul.f32 %v5511_v6, %v11459_v37  ;;  %v5517_v26 = vmul.f32 %v5511_v6, %v11464_v36  ;;  %v5520_v52 = vmul.f32 %v5511_v6, %v11476_v39 }
0x235c   : > { %5541 = vrot.lane.b32.xlu2 %v5519_v9, %s7185_s21  ;;  %5539 = vrot.lane.b32.xlu1 %v5518_v43, %s7185_s21 }
0x235d   : > { %5537 = vrot.lane.b32.xlu0 %v5517_v26, %s7185_s21 }
0x2364   : > { %5568 = vperm.xlu2 %7042, %v11385_v54   ;;  %5564 = vperm.xlu1 %7041, %v11390_v40  }
0x2365   : > { %5543 = vrot.lane.b32.xlu0 %v5520_v52, %s7185_s21 }
0x236c   : > { %7043 = vset.pattern.permute.xlu2 %v13892_v7  ;;  %7045 = vset.pattern.permute.xlu1 %v13893_v15 }
0x2395   : > { %v11558_v13 = vpop.permute.xlu2 %5531 }
0x239d   : > { %v11562_v11 = vpop.permute.xlu2 %5535 }
0x23ad   : > { %v11556_v19 = vpop.permute.xlu1 %5529 }
0x23b5   : > { %v11560_v41 = vpop.permute.xlu1 %5533 }
0x23b6   : > { %v11566_v1 = vpop.permute.xlu2 %5541 }
0x23be   : > { %v5569_v2 = vpop.permute.xlu2 %5568 }
0x23bf   : > { %v5576_v17 = vmul.f32 %v5569_v2, %v11459_v37  ;;  %v5575_v0 = vmul.f32 %v5569_v2, %v11464_v36  ;;  %v5578_v35 = vmul.f32 %v5569_v2, %v11476_v39  ;;  %v5577_v29 = vmul.f32 %v5569_v2, %v11452_v27 }
0x23ce   : > { %v11564_v25 = vpop.permute.xlu1 %5539 }
0x23cf   : > { %v11590_v47 = vpop.permute.xlu0 %5537 }
0x23d6   : > { %v5565_v38 = vpop.permute.xlu1 %5564 }
0x23d7   : > { %v5573_v20 = vmul.f32 %v5565_v38, %v11433_v49  ;;  %v5572_v56 = vmul.f32 %v5565_v38, %v11431_v50  ;;  %v5571_v10 = vmul.f32 %v5565_v38, %v11415_v31  ;;  %v5574_v28 = vmul.f32 %v5565_v38, %v11457_v59  ;;  %v11594_v21 = vpop.permute.xlu0 %5543 }
0x23d9   : > { %5591 = vrot.lane.b32.xlu2 %v5573_v20, %s7193_s27  ;;  %5589 = vrot.lane.b32.xlu1 %v5572_v56, %s7193_s27 }
0x23da   : > { %5587 = vrot.lane.b32.xlu0 %v5571_v10, %s7193_s27 }
0x23e1   : > { %5597 = vrot.lane.b32.xlu2 %v5576_v17, %s7193_s27  ;;  %5595 = vrot.lane.b32.xlu1 %v5575_v0, %s7193_s27 }
0x23e2   : > { %5593 = vrot.lane.b32.xlu0 %v5574_v28, %s7193_s27 }
0x23e9   : > { %5622 = vperm.xlu2 %7043, %v11390_v40   ;;  %5601 = vrot.lane.b32.xlu1 %v5578_v35, %s7193_s27 }
0x23ea   : > { %5599 = vrot.lane.b32.xlu0 %v5577_v29, %s7193_s27 }
0x23f1   : > { %7046 = vset.pattern.permute.xlu2 %v13893_v15  ;;  %v13896_v15 = vmov 8  }
0x23f2   : > { %5626 = vperm.xlu0 %7044, %v11385_v54  }
0x23fa   : > { %7048 = vset.pattern.permute.xlu0 %v13894_v55 }
0x2433   : > { %v11588_v18 = vpop.permute.xlu2 %5591 }
0x243b   : > { %v11592_v8 = vpop.permute.xlu2 %5597 }
0x2443   : > { %v5623_v34 = vpop.permute.xlu2 %5622 }
0x2444   : > { %v5630_v44 = vmul.f32 %v5623_v34, %v11431_v50  ;;  %v5629_v7 = vmul.f32 %v5623_v34, %v11415_v31  ;;  %v5632_v46 = vmul.f32 %v5623_v34, %v11457_v59  ;;  %v5631_v33 = vmul.f32 %v5623_v34, %v11433_v49 }
0x2446   : > { %5647 = vrot.lane.b32.xlu2 %v5630_v44, %s13895_s25  ;;  %5645 = vrot.lane.b32.xlu1 %v5629_v7, %s13895_s25 }
0x244b   : > { %v11622_v38 = vpop.permute.xlu1 %5589 }
0x244c   : > { %v11600_v3 = vpop.permute.xlu0 %5587 }
0x244e   : > { %5651 = vrot.lane.b32.xlu2 %v5632_v46, %s13895_s25  ;;  %5649 = vrot.lane.b32.xlu1 %v5631_v33, %s13895_s25 }
0x2453   : > { %v5596_v20 = vpop.permute.xlu1 %5595 }
0x2454   : > { %v11606_v4 = vpop.permute.xlu0 %5593 }
0x245b   : > { %v11624_v56 = vpop.permute.xlu1 %5601 }
0x245c   : > { %v11608_v58 = vpop.permute.xlu0 %5599 }
0x2464   : > { %v5627_v6 = vpop.permute.xlu0 %5626 }
0x2465   : > { %v5633_v9 = vmul.f32 %v5627_v6, %v11464_v36  ;;  %v5634_v43 = vmul.f32 %v5627_v6, %v11459_v37  ;;  %v5635_v26 = vmul.f32 %v5627_v6, %v11452_v27  ;;  %v5636_v52 = vmul.f32 %v5627_v6, %v11476_v39 }
0x2467   : > { %5657 = vrot.lane.b32.xlu2 %v5635_v26, %s13895_s25  ;;  %5655 = vrot.lane.b32.xlu1 %v5634_v43, %s13895_s25  ;;  %v13900_v26 = vmov 9  }
0x2468   : > { %5653 = vrot.lane.b32.xlu0 %v5633_v9, %s13895_s25 }
0x246f   : > { %5684 = vperm.xlu2 %7046, %v11385_v54   ;;  %5680 = vperm.xlu1 %7045, %v11390_v40  }
0x2470   : > { %5659 = vrot.lane.b32.xlu0 %v5636_v52, %s13895_s25 }
0x2477   : > { %7047 = vset.pattern.permute.xlu2 %v13894_v55  ;;  %7049 = vset.pattern.permute.xlu1 %v13896_v15 }
0x24a0   : > { %v11628_v2 = vpop.permute.xlu2 %5647 }
0x24a8   : > { %v11632_v0 = vpop.permute.xlu2 %5651 }
0x24a9   : > { %13898 = vst [vmem:[#allocation78_spill] sm:$0xff] %v11632_v0  ;;  %v5606_v0 = vsel %vm1663_vm5, %v5596_v20, %v11592_v8 }
0x24b8   : > { %v11626_v10 = vpop.permute.xlu1 %5645 }
0x24c0   : > { %v11630_v17 = vpop.permute.xlu1 %5649 }
0x24c1   : > { %13897 = vst [vmem:[#allocation71_spill] sm:$0xff] %v11630_v17  ;;  %v11636_v35 = vpop.permute.xlu2 %5657 }
0x24c9   : > { %v5685_v7 = vpop.permute.xlu2 %5684 }
0x24ca   : > { %v5692_v46 = vmul.f32 %v5685_v7, %v11459_v37  ;;  %v5691_v33 = vmul.f32 %v5685_v7, %v11464_v36  ;;  %v5694_v9 = vmul.f32 %v5685_v7, %v11476_v39  ;;  %v5693_v43 = vmul.f32 %v5685_v7, %v11452_v27 }
0x24d9   : > { %v11634_v28 = vpop.permute.xlu1 %5655 }
0x24e1   : > { %v5681_v29 = vpop.permute.xlu1 %5680 }
0x24e2   : > { %v5689_v55 = vmul.f32 %v5681_v29, %v11433_v49  ;;  %v5688_v34 = vmul.f32 %v5681_v29, %v11431_v50  ;;  %v5687_v44 = vmul.f32 %v5681_v29, %v11415_v31  ;;  %v5690_v6 = vmul.f32 %v5681_v29, %v11457_v59  ;;  %v5654_v29 = vpop.permute.xlu0 %5653 }
0x24e4   : > { %5707 = vrot.lane.b32.xlu2 %v5689_v55, %s13899_s17  ;;  %5705 = vrot.lane.b32.xlu1 %v5688_v34, %s13899_s17 }
0x24e5   : > { %5703 = vrot.lane.b32.xlu0 %v5687_v44, %s13899_s17 }
0x24ea   : > { %v11662_v44 = vpop.permute.xlu0 %5659 }
0x24ec   : > { %5713 = vrot.lane.b32.xlu2 %v5692_v46, %s13899_s17  ;;  %5711 = vrot.lane.b32.xlu1 %v5691_v33, %s13899_s17  ;;  %v5372_v33 = vmul.f32 %v11468_v16, %v11464_v36 }
0x24ed   : > { %5709 = vrot.lane.b32.xlu0 %v5690_v6, %s13899_s17  ;;  %v5490_v6 = vsel %vm1079_vm8, %v11552_v60, %v11520_v12 }
0x24f4   : > { %5738 = vperm.xlu2 %7047, %v11390_v40   ;;  %5717 = vrot.lane.b32.xlu1 %v5694_v9, %s13899_s17 }
0x24f5   : > { %5715 = vrot.lane.b32.xlu0 %v5693_v43, %s13899_s17 }
0x24fc   : > { %7050 = vset.pattern.permute.xlu2 %v13896_v15  ;;  %v5432_v15 = vsel %vm787_vm4, %v11518_v51, %v11490_v30 }
0x24fd   : > { %5742 = vperm.xlu0 %7048, %v11385_v54   ;;  %v5444_v9 = vadd.f32 %v5432_v15, %v5372_v33  ;;  %v5664_v15 = vsel %vm1955_vm10, %v5654_v29, %v11634_v28  ;;  %v13905_v29 = vmov 10  }
0x24ff   : > { %v5502_v51 = vadd.f32 %v5490_v6, %v5444_v9 }
0x2505   : > { %7052 = vset.pattern.permute.xlu0 %v13900_v26 }
0x253e   : > { %v11658_v52 = vpop.permute.xlu2 %5707 }
0x253f   : > { %13901 = vst [vmem:[#allocation10_spill] sm:$0xff] %v11658_v52 }
0x2546   : > { %v11660_v55 = vpop.permute.xlu2 %5713 }
0x254e   : > { %v5739_v34 = vpop.permute.xlu2 %5738 }
0x254f   : > { %v5745_v7 = vmul.f32 %v5739_v34, %v11415_v31  ;;  %v5746_v46 = vmul.f32 %v5739_v34, %v11431_v50  ;;  %v5748_v14 = vmul.f32 %v5739_v34, %v11457_v59 }
0x2551   : > { %5763 = vrot.lane.b32.xlu2 %v5746_v46, %s13902_s14  ;;  %5761 = vrot.lane.b32.xlu1 %v5745_v7, %s13902_s14  ;;  %v5548_v46 = vsel %vm1371_vm12, %v11590_v47, %v11564_v25  ;;  %v5747_v7 = vmul.f32 %v5739_v34, %v11433_v49 }
0x2552   : > { %v5560_v60 = vadd.f32 %v5548_v46, %v5502_v51 }
0x2554   : > { %v5618_v33 = vadd.f32 %v5606_v0, %v5560_v60 }
0x2556   : > { %v11676_v43 = vpop.permute.xlu1 %5705  ;;  %v5676_v47 = vadd.f32 %v5664_v15, %v5618_v33 }
0x2557   : > { %13903 = vst [vmem:[#allocation11_spill] sm:$0xff] %v11676_v43  ;;  %v11683_v52 = vpop.permute.xlu0 %5703 }
0x2558   : > { %13904 = vst [vmem:[#allocation13_spill] sm:$0xff] %v11683_v52 }
0x2559   : > { %5767 = vrot.lane.b32.xlu2 %v5748_v14, %s13902_s14  ;;  %5765 = vrot.lane.b32.xlu1 %v5747_v7, %s13902_s14 }
0x255e   : > { %v5712_v43 = vpop.permute.xlu1 %5711 }
0x255f   : > { %v5722_v34 = vsel %vm2247_vm15, %v5712_v43, %v11660_v55  ;;  %v11693_v17 = vpop.permute.xlu0 %5709 }
0x2560   : > { %v5734_v6 = vadd.f32 %v5722_v34, %v5676_v47  ;;  %v5373_v34 = vmul.f32 %v11468_v16, %v11459_v37 }
0x2566   : > { %v5718_v43 = vpop.permute.xlu1 %5717 }
0x2567   : > { %v5716_v9 = vpop.permute.xlu0 %5715 }
0x256f   : > { %v5743_v52 = vpop.permute.xlu0 %5742 }
0x2570   : > { %v5749_v20 = vmul.f32 %v5743_v52, %v11464_v36  ;;  %v5750_v14 = vmul.f32 %v5743_v52, %v11459_v37  ;;  %v5751_v46 = vmul.f32 %v5743_v52, %v11452_v27  ;;  %v5752_v0 = vmul.f32 %v5743_v52, %v11476_v39 }
0x2572   : > { %5773 = vrot.lane.b32.xlu2 %v5751_v46, %s13902_s14  ;;  %5771 = vrot.lane.b32.xlu1 %v5750_v14, %s13902_s14  ;;  %v5549_v46 = vsel %vm1371_vm12, %v11564_v25, %v11566_v1  ;;  %v5723_v25 = vsel %vm2247_vm15, %v11660_v55, %v5716_v9  ;;  %v5608_v55 = vsel %vm1663_vm5, %v11608_v58, %v11624_v56 }
0x2573   : > { %5769 = vrot.lane.b32.xlu0 %v5749_v20, %s13902_s14  ;;  %v5491_v20 = vsel %vm1079_vm8, %v11520_v12, %v11536_v45 }
0x257a   : > { %5800 = vperm.xlu2 %7050, %v11385_v54   ;;  %5796 = vperm.xlu1 %7049, %v11390_v40  }
0x257b   : > { %5775 = vrot.lane.b32.xlu0 %v5752_v0, %s13902_s14 }
0x2582   : > { %7051 = vset.pattern.permute.xlu2 %v13900_v26  ;;  %7053 = vset.pattern.permute.xlu1 %v13905_v29  ;;  %v5433_v26 = vsel %vm787_vm4, %v11490_v30, %v11492_v32  ;;  %v5665_v30 = vsel %vm1955_vm10, %v11634_v28, %v11636_v35  ;;  %v5550_v28 = vsel %vm1371_vm12, %v11566_v1, %v11594_v21 }
0x2583   : > { %v5445_v14 = vadd.f32 %v5433_v26, %v5373_v34  ;;  %v5666_v1 = vsel %vm1955_vm10, %v11636_v35, %v11662_v44 }
0x2585   : > { %v5503_v0 = vadd.f32 %v5491_v20, %v5445_v14 }
0x25ab   : > { %v5764_v7 = vpop.permute.xlu2 %5763 }
0x25b3   : > { %v5768_v15 = vpop.permute.xlu2 %5767 }
0x25c3   : > { %v5762_v51 = vpop.permute.xlu1 %5761 }
0x25c4   : > { %v11708_v60 = vsel %vm2539_vm11, %v5762_v51, %v5764_v7  ;;  %v5561_v51 = vadd.f32 %v5549_v46, %v5503_v0 }
0x25cb   : > { %v5766_v33 = vpop.permute.xlu1 %5765 }
0x25cc   : > { %v11711_v52 = vsel %vm2539_vm11, %v5764_v7, %v5766_v33  ;;  %v11714_v47 = vsel %vm2539_vm11, %v5766_v33, %v5768_v15  ;;  %v5607_v7 = vsel %vm1663_vm5, %v11592_v8, %v11608_v58  ;;  %v5434_v15 = vsel %vm787_vm4, %v11492_v32, %v11522_v42  ;;  %v5774_v14 = vpop.permute.xlu2 %5773 }
0x25cd   : > { %v5619_v12 = vadd.f32 %v5607_v7, %v5561_v51  ;;  %v5374_v33 = vmul.f32 %v11468_v16, %v11452_v27  ;;  %v5492_v8 = vsel %vm1079_vm8, %v11536_v45, %v11554_v61  ;;  %v5724_v51 = vsel %vm2247_vm15, %v5716_v9, %v5718_v43 }
0x25cf   : > { %v5677_v26 = vadd.f32 %v5665_v30, %v5619_v12  ;;  %v5446_v34 = vadd.f32 %v5434_v15, %v5374_v33 }
0x25d1   : > { %v5735_v20 = vadd.f32 %v5723_v25, %v5677_v26  ;;  %v5504_v42 = vadd.f32 %v5492_v8, %v5446_v34 }
0x25d3   : > { %v5562_v61 = vadd.f32 %v5550_v28, %v5504_v42  ;;  %v13907_v28 = vmov 11  }
0x25d4   : > { %v5801_v35 = vpop.permute.xlu2 %5800 }
0x25d5   : > { %v5620_v21 = vadd.f32 %v5608_v55, %v5562_v61  ;;  %v5807_v44 = vmul.f32 %v5801_v35, %v11464_v36  ;;  %v5808_v9 = vmul.f32 %v5801_v35, %v11459_v37  ;;  %v5810_v26 = vmul.f32 %v5801_v35, %v11476_v39 }
0x25d6   : > { %v5809_v34 = vmul.f32 %v5801_v35, %v11452_v27 }
0x25d7   : > { %v5678_v30 = vadd.f32 %v5666_v1, %v5620_v21 }
0x25d9   : > { %v5736_v12 = vadd.f32 %v5724_v51, %v5678_v30 }
0x25e4   : > { %v5772_v32 = vpop.permute.xlu1 %5771 }
0x25e5   : > { %v5781_v46 = vsel %vm2539_vm11, %v5772_v32, %v5774_v14  ;;  %v5770_v16 = vpop.permute.xlu0 %5769 }
0x25e6   : > { %v5793_v0 = vadd.f32 %v5781_v46, %v5735_v20  ;;  %v5780_v45 = vsel %vm2539_vm11, %v5770_v16, %v5772_v32 }
0x25e7   : > { %v5792_v7 = vadd.f32 %v5780_v45, %v5734_v6 }
0x25ec   : > { %v5797_v15 = vpop.permute.xlu1 %5796 }
0x25ed   : > { %v5803_v33 = vmul.f32 %v5797_v15, %v11415_v31  ;;  %v5804_v25 = vmul.f32 %v5797_v15, %v11431_v50  ;;  %v5805_v58 = vmul.f32 %v5797_v15, %v11433_v49  ;;  %v5776_v56 = vpop.permute.xlu0 %5775  ;;  %v5806_v43 = vmul.f32 %v5797_v15, %v11457_v59 }
0x25ee   : > { %v5782_v8 = vsel %vm2539_vm11, %v5774_v14, %v5776_v56 }
0x25ef   : > { %v5794_v6 = vadd.f32 %v5782_v8, %v5736_v12  ;;  %5823 = vrot.lane.b32.xlu2 %v5805_v58, %s13906_s26  ;;  %5821 = vrot.lane.b32.xlu1 %v5804_v25, %s13906_s26 }
0x25f0   : > { %5819 = vrot.lane.b32.xlu0 %v5803_v33, %s13906_s26 }
0x25f7   : > { %5829 = vrot.lane.b32.xlu2 %v5808_v9, %s13906_s26  ;;  %5827 = vrot.lane.b32.xlu1 %v5807_v44, %s13906_s26 }
0x25f8   : > { %5825 = vrot.lane.b32.xlu0 %v5806_v43, %s13906_s26 }
0x25ff   : > { %5854 = vperm.xlu2 %7051, %v11390_v40   ;;  %5833 = vrot.lane.b32.xlu1 %v5810_v26, %s13906_s26 }
0x2600   : > { %5831 = vrot.lane.b32.xlu0 %v5809_v34, %s13906_s26  ;;  %s13923_s26 = smov 76  }
0x2607   : > { %7054 = vset.pattern.permute.xlu2 %v13905_v29 }
0x2608   : > { %5858 = vperm.xlu0 %7052, %v11385_v54  }
0x2610   : > { %7055 = vset.pattern.permute.xlu0 %v13907_v28 }
0x2649   : > { %v5824_v20 = vpop.permute.xlu2 %5823 }
0x2651   : > { %v5830_v14 = vpop.permute.xlu2 %5829 }
0x2659   : > { %v5855_v32 = vpop.permute.xlu2 %5854 }
0x265a   : > { %v5861_v42 = vmul.f32 %v5855_v32, %v11415_v31  ;;  %v5862_v46 = vmul.f32 %v5855_v32, %v11431_v50  ;;  %v5863_v55 = vmul.f32 %v5855_v32, %v11433_v49  ;;  %v5864_v29 = vmul.f32 %v5855_v32, %v11457_v59 }
0x265c   : > { %5879 = vrot.lane.b32.xlu2 %v5862_v46, %s13908_s22  ;;  %5877 = vrot.lane.b32.xlu1 %v5861_v42, %s13908_s22 }
0x2661   : > { %v5822_v16 = vpop.permute.xlu1 %5821 }
0x2662   : > { %v11783_v45 = vsel %vm2831_vm7, %v5822_v16, %v5824_v20  ;;  %v5820_v61 = vpop.permute.xlu0 %5819 }
0x2663   : > { %v11786_v1 = vsel %vm2831_vm7, %v5820_v61, %v5822_v16 }
0x2664   : > { %5883 = vrot.lane.b32.xlu2 %v5864_v29, %s13908_s22  ;;  %5881 = vrot.lane.b32.xlu1 %v5863_v55, %s13908_s22 }
0x2669   : > { %v5828_v21 = vpop.permute.xlu1 %5827 }
0x266a   : > { %v5838_v51 = vsel %vm2831_vm7, %v5828_v21, %v5830_v14  ;;  %v5826_v30 = vpop.permute.xlu0 %5825 }
0x266b   : > { %v5850_v15 = vadd.f32 %v5838_v51, %v5792_v7  ;;  %v11792_v12 = vsel %vm2831_vm7, %v5824_v20, %v5826_v30 }
0x2671   : > { %v5834_v33 = vpop.permute.xlu1 %5833 }
0x2672   : > { %v5832_v25 = vpop.permute.xlu0 %5831 }
0x2673   : > { %v5839_v58 = vsel %vm2831_vm7, %v5830_v14, %v5832_v25  ;;  %v5840_v56 = vsel %vm2831_vm7, %v5832_v25, %v5834_v33  ;;  %vm13925_vm7 = vmmov %vm13914_vm1 }
0x2674   : > { %v5851_v8 = vadd.f32 %v5839_v58, %v5793_v0  ;;  %v5852_v35 = vadd.f32 %v5840_v56, %v5794_v6  ;;  %v13909_v0 = vmov 12  }
0x267a   : > { %v5859_v44 = vpop.permute.xlu0 %5858 }
0x267b   : > { %v5865_v9 = vmul.f32 %v5859_v44, %v11464_v36  ;;  %v5866_v43 = vmul.f32 %v5859_v44, %v11459_v37  ;;  %v5867_v26 = vmul.f32 %v5859_v44, %v11452_v27  ;;  %v5868_v7 = vmul.f32 %v5859_v44, %v11476_v39 }
0x267d   : > { %5889 = vrot.lane.b32.xlu2 %v5867_v26, %s13908_s22  ;;  %5887 = vrot.lane.b32.xlu1 %v5866_v43, %s13908_s22  ;;  %v13913_v26 = vmov 15  }
0x267e   : > { %5885 = vrot.lane.b32.xlu0 %v5865_v9, %s13908_s22 }
0x2685   : > { %5916 = vperm.xlu2 %7054, %v11385_v54   ;;  %5912 = vperm.xlu1 %7053, %v11390_v40  }
0x2686   : > { %5891 = vrot.lane.b32.xlu0 %v5868_v7, %s13908_s22  ;;  %s13926_s22 = smov 72  }
0x268d   : > { %7057 = vset.pattern.permute.xlu2 %v13909_v0  ;;  %7056 = vset.pattern.permute.xlu1 %v13907_v28 }
0x26b6   : > { %v5880_v6 = vpop.permute.xlu2 %5879 }
0x26be   : > { %v5884_v14 = vpop.permute.xlu2 %5883 }
0x26ce   : > { %v5878_v34 = vpop.permute.xlu1 %5877 }
0x26cf   : > { %v11809_v20 = vsel %vm3123_vm6, %v5878_v34, %v5880_v6 }
0x26d6   : > { %v5882_v32 = vpop.permute.xlu1 %5881 }
0x26d7   : > { %v11812_v42 = vsel %vm3123_vm6, %v5880_v6, %v5882_v32  ;;  %v11815_v46 = vsel %vm3123_vm6, %v5882_v32, %v5884_v14  ;;  %v5890_v16 = vpop.permute.xlu2 %5889 }
0x26ef   : > { %v5888_v55 = vpop.permute.xlu1 %5887 }
0x26f0   : > { %v5897_v29 = vsel %vm3123_vm6, %v5888_v55, %v5890_v16  ;;  %v5886_v61 = vpop.permute.xlu0 %5885 }
0x26f1   : > { %v11818_v21 = vadd.f32 %v5897_v29, %v5851_v8  ;;  %v5896_v28 = vsel %vm3123_vm6, %v5886_v61, %v5888_v55  ;;  %v13912_v8 = vmov 14  }
0x26f2   : > { %v11821_v51 = vadd.f32 %v5896_v28, %v5850_v15  ;;  %v13911_v15 = vmov 13  }
0x26f7   : > { %v5913_v30 = vpop.permute.xlu1 %5912 }
0x26f8   : > { %v5919_v33 = vmul.f32 %v5913_v30, %v11415_v31  ;;  %v5920_v25 = vmul.f32 %v5913_v30, %v11431_v50  ;;  %v5921_v58 = vmul.f32 %v5913_v30, %v11433_v49  ;;  %v5892_v56 = vpop.permute.xlu0 %5891 }
0x26f9   : > { %v5898_v44 = vsel %vm3123_vm6, %v5890_v16, %v5892_v56  ;;  %vm13928_vm6 = vmmov %vm13914_vm1 }
0x26fa   : > { %v11827_v9 = vadd.f32 %v5898_v44, %v5852_v35  ;;  %5939 = vrot.lane.b32.xlu2 %v5921_v58, %s13910_s23  ;;  %5937 = vrot.lane.b32.xlu1 %v5920_v25, %s13910_s23  ;;  %v11847_v35 = vpop.permute.xlu2 %5916 }
0x26fb   : > { %5935 = vrot.lane.b32.xlu0 %v5919_v33, %s13910_s23  ;;  %v5924_v43 = vmul.f32 %v11847_v35, %v11459_v37  ;;  %v5926_v7 = vmul.f32 %v11847_v35, %v11476_v39  ;;  %v5925_v6 = vmul.f32 %v11847_v35, %v11452_v27 }
0x2702   : > { %6032 = vperm.xlu2 %7057, %v11385_v54   ;;  %5970 = vperm.xlu1 %7056, %v11390_v40  }
0x2703   : > { %5974 = vperm.xlu0 %7055, %v11385_v54  }
0x270a   : > { %7059 = vset.pattern.permute.xlu2 %v13911_v15  ;;  %7058 = vset.pattern.permute.xlu1 %v13909_v0  ;;  %v5922_v0 = vmul.f32 %v5913_v30, %v11457_v59 }
0x270b   : > { %7060 = vset.pattern.permute.xlu0 %v13911_v15  ;;  %6090 = vperm.xlu2 %7059, %v11385_v54  }
0x270c   : > { %6028 = vperm.xlu1 %7058, %v11390_v40   ;;  %6086 = vperm.xlu0 %7060, %v11390_v40  }
0x2713   : > { %7063 = vset.pattern.permute.xlu2 %v13912_v8 }
0x2714   : > { %7062 = vset.pattern.permute.xlu1 %v13912_v8  ;;  %7061 = vset.pattern.permute.xlu0 %v13354_v63 }
0x2715   : > { %6144 = vperm.xlu2 %7063, %v11390_v40   ;;  %6148 = vperm.xlu1 %7062, %v11385_v54  }
0x2716   : > { %5361 = vperm.xlu0 %7061, %v11390_v40  }
0x271d   : > { %7065 = vset.pattern.permute.xlu2 %v13913_v26  ;;  %7064 = vset.pattern.permute.xlu1 %v13913_v26 }
0x271e   : > { %5945 = vrot.lane.b32.xlu0 %v5924_v43, %s13910_s23  ;;  %6202 = vperm.xlu2 %7065, %v11390_v40  }
0x271f   : > { %6206 = vperm.xlu1 %7064, %v11385_v54  }
0x2726   : > { %5941 = vrot.lane.b32.xlu0 %v5922_v0, %s13910_s23  ;;  %5949 = vrot.lane.b32.xlu2 %v5926_v7, %s13910_s23 }
0x2727   : > { %5947 = vrot.lane.b32.xlu1 %v5925_v6, %s13910_s23 }
0x2728   : > { %7066 = vset.pattern.permute.xlu1 %v13354_v63 }
0x2754   : > { %v11865_v34 = vpop.permute.xlu2 %5939 }
0x275c   : > { %v11874_v16 = vpop.permute.xlu2 %6032 }
0x275d   : > { %v6042_v8 = vmul.f32 %v11874_v16, %v11476_v39  ;;  %v6040_v43 = vmul.f32 %v11874_v16, %v11459_v37  ;;  %v6041_v26 = vmul.f32 %v11874_v16, %v11452_v27 }
0x2765   : > { %v11889_v30 = vpop.permute.xlu2 %6090 }
0x276c   : > { %v5938_v40 = vpop.permute.xlu1 %5937 }
0x276d   : > { %v11869_v54 = vsel %vm13914_vm1, %v5938_v40, %v11865_v34  ;;  %v5936_v14 = vpop.permute.xlu0 %5935 }
0x276e   : > { %v11872_v32 = vsel %vm13915_vm2, %v5936_v14, %v5938_v40  ;;  %vm13933_vm2 = vmmov %vm13932_vm0 }
0x276f   : > { %v11904_v15 = vpop.permute.xlu2 %6144 }
0x2774   : > { %v11876_v55 = vpop.permute.xlu1 %5970 }
0x2775   : > { %v11878_v29 = vpop.permute.xlu0 %5974  ;;  %v5980_v33 = vmul.f32 %v11876_v55, %v11457_v59  ;;  %v5978_v56 = vmul.f32 %v11876_v55, %v11431_v50  ;;  %v5979_v44 = vmul.f32 %v11876_v55, %v11433_v49 }
0x2776   : > { %v5982_v63 = vmul.f32 %v11878_v29, %v11459_v37  ;;  %v5983_v61 = vmul.f32 %v11878_v29, %v11452_v27  ;;  %v5984_v28 = vmul.f32 %v11878_v29, %v11476_v39 }
0x2778   : > { %6007 = vrot.lane.b32.xlu0 %v5984_v28, %s13916_s16  ;;  %6005 = vrot.lane.b32.xlu2 %v5983_v61, %s13916_s16  ;;  %v5429_v61 = vsel %vm787_vm4, %v11484_v57, %v11514_v62  ;;  %v5545_v57 = vsel %vm1371_vm12, %v11556_v19, %v11558_v13 }
0x2779   : > { %6003 = vrot.lane.b32.xlu1 %v5982_v63, %s13916_s16  ;;  %v5431_v63 = vsel %vm787_vm4, %v11486_v24, %v11488_v23  ;;  %v5489_v23 = vsel %vm1079_vm8, %v11516_v5, %v11534_v53 }
0x277e   : > { %v11893_v25 = vpop.permute.xlu1 %6028  ;;  %v11895_v58 = vpop.permute.xlu0 %6086 }
0x277f   : > { %v6036_v53 = vmul.f32 %v11893_v25, %v11431_v50 }
0x2780   : > { %5999 = vrot.lane.b32.xlu0 %v5980_v33, %s13916_s16  ;;  %5997 = vrot.lane.b32.xlu2 %v5979_v44, %s13916_s16  ;;  %v5488_v44 = vsel %vm1079_vm8, %v11550_v48, %v11516_v5  ;;  %v6037_v5 = vmul.f32 %v11893_v25, %v11433_v49 }
0x2781   : > { %5995 = vrot.lane.b32.xlu1 %v5978_v56, %s13916_s16 }
0x2787   : > { %v11912_v7 = vpop.permute.xlu1 %6148 }
0x2788   : > { %v5362_v0 = vpop.permute.xlu0 %5361  ;;  %6065 = vrot.lane.b32.xlu0 %v6042_v8, %s13917_s28  ;;  %6063 = vrot.lane.b32.xlu2 %v6041_v26, %s13917_s28  ;;  %v5487_v8 = vsel %vm1079_vm8, %v11528_v22, %v11550_v48  ;;  %v5546_v26 = vsel %vm1371_vm12, %v11558_v13, %v11560_v41  ;;  %v5923_v22 = vmul.f32 %v11847_v35, %v11464_v36  ;;  %v11949_v48 = vpop.permute.xlu2 %6202 }
0x2789   : > { %v5369_v6 = vmul.f32 %v5362_v0, %v11415_v31  ;;  %v5370_v40 = vmul.f32 %v5362_v0, %v11431_v50  ;;  %v5371_v14 = vmul.f32 %v5362_v0, %v11433_v49  ;;  %6061 = vrot.lane.b32.xlu1 %v6040_v43, %s13917_s28  ;;  %v5430_v31 = vsel %vm787_vm4, %v11514_v62, %v11486_v24 }
0x278a   : > { %v5547_v0 = vsel %vm1371_vm12, %v11560_v41, %v11562_v11  ;;  %v5604_v13 = vsel %vm1663_vm5, %v11622_v38, %v11588_v18  ;;  %v5603_v41 = vsel %vm1663_vm5, %v11600_v3, %v11622_v38  ;;  %v5605_v11 = vsel %vm1663_vm5, %v11588_v18, %v11606_v4  ;;  %v13918_v38 = vld [vmem:[#allocation71_spill] sm:$0xff]  ;;  %v13919_v4 = vld [vmem:[#allocation78_spill] sm:$0xff] }
0x278b   : > { %v5441_v28 = vadd.f32 %v5429_v61, %v5369_v6  ;;  %v5442_v33 = vadd.f32 %v5430_v31, %v5370_v40  ;;  %v5443_v56 = vadd.f32 %v5431_v63, %v5371_v14  ;;  %v5661_v3 = vsel %vm1955_vm10, %v11626_v10, %v11628_v2 }
0x278c   : > { %v5662_v18 = vsel %vm1955_vm10, %v11628_v2, %v13918_v38 }
0x278d   : > { %v5499_v24 = vadd.f32 %v5487_v8, %v5441_v28  ;;  %v5500_v62 = vadd.f32 %v5488_v44, %v5442_v33  ;;  %v5501_v43 = vadd.f32 %v5489_v23, %v5443_v56  ;;  %v5663_v28 = vsel %vm1955_vm10, %v13918_v38, %v13919_v4  ;;  %v13920_v8 = vld [vmem:[#allocation10_spill] sm:$0xff]  ;;  %v13921_v23 = vld [vmem:[#allocation11_spill] sm:$0xff] }
0x278e   : > { %v5721_v10 = vsel %vm2247_vm15, %v13920_v8, %v11693_v17  ;;  %v6158_v38 = vmul.f32 %v11912_v7, %v11476_v39  ;;  %v6039_v4 = vmul.f32 %v11874_v16, %v11464_v36  ;;  %v6097_v16 = vmul.f32 %v11889_v30, %v11464_v36 }
0x278f   : > { %v5557_v19 = vadd.f32 %v5545_v57, %v5499_v24  ;;  %v5558_v6 = vadd.f32 %v5546_v26, %v5500_v62  ;;  %v5559_v40 = vadd.f32 %v5547_v0, %v5501_v43  ;;  %v5720_v57 = vsel %vm2247_vm15, %v13921_v23, %v13920_v8  ;;  %v13922_v24 = vld [vmem:[#allocation13_spill] sm:$0xff] }
0x2790   : > { %v11964_v35 = vpop.permute.xlu0 %5945  ;;  %6055 = vrot.lane.b32.xlu0 %v6037_v5, %s13917_s28  ;;  %6053 = vrot.lane.b32.xlu2 %v6036_v53, %s13917_s28  ;;  %v5719_v62 = vsel %vm2247_vm15, %v13922_v24, %v13921_v23  ;;  %v6098_v0 = vmul.f32 %v11889_v30, %v11459_v37  ;;  %v6038_v5 = vmul.f32 %v11893_v25, %v11457_v59  ;;  %v7094_v23 = vld [vmem:[#allocation4 + $0x10] sm:$0xff] }
0x2791   : > { %v5615_v14 = vadd.f32 %v5603_v41, %v5557_v19  ;;  %v5616_v63 = vadd.f32 %v5604_v13, %v5558_v6  ;;  %v5617_v61 = vadd.f32 %v5605_v11, %v5559_v40  ;;  %v11967_v31 = vpop.permute.xlu1 %6206  ;;  %5943 = vrot.lane.b32.xlu1 %v5923_v22, %s13910_s23  ;;  %v6099_v22 = vmul.f32 %v11889_v30, %v11452_v27  ;;  %v5950_v40 = vpop.permute.xlu2 %5949  ;;  %s13927_s23 = smov 68  }
0x2793   : > { %v5673_v33 = vadd.f32 %v5661_v3, %v5615_v14  ;;  %v5674_v56 = vadd.f32 %v5662_v18, %v5616_v63  ;;  %v5675_v44 = vadd.f32 %v5663_v28, %v5617_v61  ;;  %v6153_v18 = vmul.f32 %v11904_v15, %v11433_v49  ;;  %v7092_v28 = vld [vmem:[#allocation4 + $0x8] sm:$0xff] }
0x2794   : > { %v6210_v8 = vmul.f32 %v7092_v28, %v11949_v48 }
0x2795   : > { %v5733_v2 = vadd.f32 %v5721_v10, %v5675_v44  ;;  %v5732_v43 = vadd.f32 %v5720_v57, %v5674_v56  ;;  %v5731_v26 = vadd.f32 %v5719_v62, %v5673_v33  ;;  %v6215_v33 = vmul.f32 %v11967_v31, %v11452_v27  ;;  %v6261_v10 = vld [vmem:[%s12380_s6] sm:$0xff] }
0x2796   : > { %v6154_v56 = vmul.f32 %v11904_v15, %v11457_v59  ;;  %v6211_v57 = vmul.f32 %v7094_v23, %v11949_v48 }
0x2797   : > { %v5791_v53 = vadd.f32 %v11714_v47, %v5733_v2  ;;  %v5790_v19 = vadd.f32 %v11711_v52, %v5732_v43  ;;  %v5789_v6 = vadd.f32 %v11708_v60, %v5731_v26 }
0x2798   : > { %6121 = vrot.lane.b32.xlu0 %v6099_v22, %s13923_s26  ;;  %v5942_v13 = vpop.permute.xlu0 %5941  ;;  %6119 = vrot.lane.b32.xlu2 %v6098_v0, %s13923_s26 }
0x2799   : > { %v5849_v17 = vadd.f32 %v11792_v12, %v5791_v53  ;;  %v12000_v41 = vpop.permute.xlu1 %5947  ;;  %6057 = vrot.lane.b32.xlu1 %v6038_v5, %s13917_s28  ;;  %v5848_v11 = vadd.f32 %v11783_v45, %v5790_v19  ;;  %v5847_v52 = vadd.f32 %v11786_v1, %v5789_v6  ;;  %v5953_v63 = vsel %vm13925_vm7, %v11865_v34, %v5942_v13 }
0x279a   : > { %v5956_v47 = vsel %vm13924_vm3, %v12000_v41, %v5950_v40  ;;  %v6094_v1 = vmul.f32 %v11895_v58, %v11431_v50  ;;  %v6095_v50 = vmul.f32 %v11895_v58, %v11433_v49  ;;  %v6096_v34 = vmul.f32 %v11895_v58, %v11457_v59  ;;  %v7093_v59 = vld [vmem:[#allocation4 + $0x18] sm:$0xff]  ;;  %vm13934_vm3 = vmmov %vm13932_vm0 }
0x279b   : > { %v5907_v60 = vadd.f32 %v11815_v46, %v5849_v17  ;;  %v12010_v14 = vadd.f32 %v5956_v47, %v11827_v9  ;;  %v5906_v12 = vadd.f32 %v11812_v42, %v5848_v11  ;;  %v5905_v61 = vadd.f32 %v11809_v20, %v5847_v52 }
0x279c   : > { %v6100_v9 = vmul.f32 %v11889_v30, %v11476_v39  ;;  %v5981_v42 = vmul.f32 %v11878_v29, %v11464_v36  ;;  %v6156_v20 = vmul.f32 %v11912_v7, %v11459_v37  ;;  %v6157_v29 = vmul.f32 %v11912_v7, %v11452_v27 }
0x279d   : > { %v12016_v3 = vadd.f32 %v5953_v63, %v5907_v60  ;;  %v12019_v45 = vadd.f32 %v11869_v54, %v5906_v12  ;;  %v12024_v46 = vadd.f32 %v11872_v32, %v5905_v61  ;;  %v7091_v54 = vld [vmem:[#allocation4] sm:$0xff]  ;;  %v6214_v49 = vmul.f32 %v11967_v31, %v11459_v37 }
0x279e   : > { %v5977_v32 = vmul.f32 %v7091_v54, %v11876_v55  ;;  %v6152_v55 = vmul.f32 %v7092_v28, %v11904_v15  ;;  %v6035_v44 = vmul.f32 %v7091_v54, %v11893_v25  ;;  %v6216_v27 = vmul.f32 %v11967_v31, %v11476_v39  ;;  %v7095_v25 = vld [vmem:[#allocation4 + $0x20] sm:$0xff] }
0x279f   : > { %v6212_v37 = vmul.f32 %v7093_v59, %v11949_v48  ;;  %v6151_v39 = vmul.f32 %v7091_v54, %v11904_v15  ;;  %v6093_v30 = vmul.f32 %v7091_v54, %v11895_v58  ;;  %v6155_v24 = vmul.f32 %v7095_v25, %v11912_v7 }
0x27a0   : > { %6111 = vrot.lane.b32.xlu0 %v6094_v1, %s13923_s26  ;;  %6001 = vrot.lane.b32.xlu2 %v5981_v42, %s13916_s16  ;;  %v6209_v2 = vmul.f32 %v7091_v54, %v11949_v48  ;;  %v6213_v15 = vmul.f32 %v7095_v25, %v11967_v31  ;;  %v5955_v7 = vsel %vm13928_vm6, %v11964_v35, %v12000_v41  ;;  %vm13935_vm7 = vcmask 654336  }
0x27a1   : > { %6123 = vrot.lane.b32.xlu1 %v6100_v9, %s13923_s26  ;;  %v5967_v26 = vadd.f32 %v5955_v7, %v11818_v21  ;;  %vm13936_vm6 = vmmov %vm13935_vm7 }
0x27a8   : > { %6177 = vrot.lane.b32.xlu0 %v6156_v20, %s13926_s22  ;;  %6115 = vrot.lane.b32.xlu2 %v6096_v34, %s13923_s26 }
0x27a9   : > { %6113 = vrot.lane.b32.xlu1 %v6095_v50, %s13923_s26 }
0x27b0   : > { %5993 = vrot.lane.b32.xlu0 %v5977_v32, %s13916_s16  ;;  %6181 = vrot.lane.b32.xlu2 %v6158_v38, %s13926_s22 }
0x27b1   : > { %6179 = vrot.lane.b32.xlu1 %v6157_v29, %s13926_s22 }
0x27b8   : > { %6171 = vrot.lane.b32.xlu0 %v6153_v18, %s13926_s22  ;;  %6169 = vrot.lane.b32.xlu2 %v6152_v55, %s13926_s22 }
0x27b9   : > { %6059 = vrot.lane.b32.xlu1 %v6039_v4, %s13917_s28 }
0x27c0   : > { %6237 = vrot.lane.b32.xlu0 %v6215_v33, %s13927_s23  ;;  %6235 = vrot.lane.b32.xlu2 %v6214_v49, %s13927_s23 }
0x27c1   : > { %6173 = vrot.lane.b32.xlu1 %v6154_v56, %s13926_s22 }
0x27c8   : > { %6117 = vrot.lane.b32.xlu0 %v6097_v16, %s13923_s26  ;;  %6051 = vrot.lane.b32.xlu2 %v6035_v44, %s13917_s28 }
0x27c9   : > { %6239 = vrot.lane.b32.xlu1 %v6216_v27, %s13927_s23 }
0x27d0   : > { %6231 = vrot.lane.b32.xlu0 %v6212_v37, %s13927_s23  ;;  %6229 = vrot.lane.b32.xlu2 %v6211_v57, %s13927_s23 }
0x27d1   : > { %6227 = vrot.lane.b32.xlu1 %v6210_v8, %s13927_s23 }
0x27d2   : > { %v6006_v36 = vpop.permute.xlu2 %6005 }
0x27d8   : > { %6167 = vrot.lane.b32.xlu0 %v6151_v39, %s13926_s22  ;;  %6175 = vrot.lane.b32.xlu2 %v6155_v24, %s13926_s22 }
0x27d9   : > { %6109 = vrot.lane.b32.xlu1 %v6093_v30, %s13923_s26 }
0x27da   : > { %v5998_v62 = vpop.permute.xlu2 %5997 }
0x27e0   : > { %6265 = vperm.xlu0 %7061, %v6261_v10   ;;  %6225 = vrot.lane.b32.xlu2 %v6209_v2, %s13927_s23 }
0x27e1   : > { %6233 = vrot.lane.b32.xlu1 %v6213_v15, %s13927_s23  ;;  %v6262_v15 = vld [vmem:[%s12380_s6 + $0x8] sm:$0xff] }
0x27e2   : > { %v6064_v58 = vpop.permute.xlu2 %6063 }
0x27e9   : > { %6270 = vperm.xlu1 %7066, %v6262_v15  }
0x27ea   : > { %v6008_v43 = vpop.permute.xlu0 %6007  ;;  %v12098_v0 = vpop.permute.xlu2 %6053 }
0x27eb   : > { %v6004_v22 = vpop.permute.xlu1 %6003  ;;  %v6014_v48 = vsel %vm13929_vm14, %v6006_v36, %v6008_v43  ;;  %vm13937_vm14 = vmmov %vm13936_vm6 }
0x27ec   : > { %v6013_v31 = vsel %vm13930_vm9, %v6004_v22, %v6006_v36  ;;  %v6026_v5 = vadd.f32 %v6014_v48, %v12010_v14  ;;  %vm13938_vm9 = vcmask 621568  }
0x27ed   : > { %v6025_v53 = vadd.f32 %v6013_v31, %v5967_v26 }
0x27f2   : > { %v6000_v19 = vpop.permute.xlu0 %5999  ;;  %v6120_v6 = vpop.permute.xlu2 %6119 }
0x27f3   : > { %v5996_v40 = vpop.permute.xlu1 %5995  ;;  %v6011_v17 = vsel %vm13931_vm13, %v5998_v62, %v6000_v19  ;;  %vm13939_vm13 = vcmask 588800  }
0x27f4   : > { %v6010_v13 = vsel %vm13932_vm0, %v5996_v40, %v5998_v62  ;;  %v6023_v41 = vadd.f32 %v6011_v17, %v12016_v3  ;;  %vm13940_vm0 = vcmask 556032  }
0x27f5   : > { %v6022_v21 = vadd.f32 %v6010_v13, %v12019_v45 }
0x27fa   : > { %v6066_v11 = vpop.permute.xlu0 %6065  ;;  %v6002_v52 = vpop.permute.xlu2 %6001 }
0x27fb   : > { %v6062_v47 = vpop.permute.xlu1 %6061  ;;  %v6012_v1 = vsel %vm13933_vm2, %v6002_v52, %v6004_v22  ;;  %vm13942_vm2 = vmmov %vm13938_vm9 }
0x27fc   : > { %v6071_v56 = vsel %vm13936_vm6, %v6062_v47, %v6064_v58 }
0x27fd   : > { %v6083_v59 = vadd.f32 %v6071_v56, %v6025_v53 }
0x2802   : > { %v6056_v60 = vpop.permute.xlu0 %6055  ;;  %v6116_v63 = vpop.permute.xlu2 %6115 }
0x2803   : > { %v5944_v12 = vpop.permute.xlu1 %5943 }
0x2804   : > { %v5954_v14 = vsel %vm13914_vm1, %v5944_v12, %v11964_v35  ;;  %vm13941_vm1 = vmmov %vm13936_vm6 }
0x2805   : > { %v5966_v61 = vadd.f32 %v5954_v14, %v11821_v51  ;;  %v6072_v39 = vsel %vm13941_vm1, %v6064_v58, %v6066_v11  ;;  %vm13945_vm6 = vmmov %vm13942_vm2 }
0x2806   : > { %v6084_v24 = vadd.f32 %v6072_v39, %v6026_v5 }
0x2807   : > { %v6024_v9 = vadd.f32 %v6012_v1, %v5966_v61 }
0x280a   : > { %v6122_v42 = vpop.permute.xlu0 %6121  ;;  %v6182_v50 = vpop.permute.xlu2 %6181 }
0x280b   : > { %v6058_v20 = vpop.permute.xlu1 %6057  ;;  %v6129_v44 = vsel %vm13938_vm9, %v6120_v6, %v6122_v42  ;;  %vm13947_vm9 = vmmov %vm13940_vm0 }
0x280c   : > { %v6141_v8 = vadd.f32 %v6129_v44, %v6083_v59 }
0x2812   : > { %v12111_v3 = vpop.permute.xlu0 %6111  ;;  %v12113_v34 = vpop.permute.xlu2 %6169 }
0x2813   : > { %v6124_v45 = vpop.permute.xlu1 %6123 }
0x2814   : > { %v6130_v25 = vsel %vm13942_vm2, %v6122_v42, %v6124_v45 }
0x2815   : > { %v6142_v10 = vadd.f32 %v6130_v25, %v6084_v24 }
0x281a   : > { %v12115_v54 = vpop.permute.xlu0 %6177  ;;  %v12117_v32 = vpop.permute.xlu2 %6235 }
0x281b   : > { %v6114_v29 = vpop.permute.xlu1 %6113 }
0x2822   : > { %v5994_v38 = vpop.permute.xlu0 %5993  ;;  %v6052_v35 = vpop.permute.xlu2 %6051 }
0x2823   : > { %v6180_v18 = vpop.permute.xlu1 %6179  ;;  %v6009_v51 = vsel %vm13934_vm3, %v5994_v38, %v5996_v40  ;;  %v6067_v28 = vsel %vm13935_vm7, %v6052_v35, %v12098_v0  ;;  %vm13943_vm3 = vmmov %vm13939_vm13 }
0x2824   : > { %v6021_v4 = vadd.f32 %v6009_v51, %v12024_v46  ;;  %v6187_v37 = vsel %vm13939_vm13, %v12115_v54, %v6180_v18  ;;  %v6188_v62 = vsel %vm13943_vm3, %v6180_v18, %v6182_v50  ;;  %vm13944_vm7 = vmmov %vm13941_vm1  ;;  %v6260_v50 = vld [vmem:[%s12379_s5 + $0x8] sm:$0xff] }
0x2825   : > { %v6199_v23 = vadd.f32 %v6187_v37, %v6141_v8  ;;  %v6069_v7 = vsel %vm13944_vm7, %v6056_v60, %v6058_v20  ;;  %v6200_v43 = vadd.f32 %v6188_v62, %v6142_v10  ;;  %vm13948_vm13 = vmmov %vm13942_vm2 }
0x2826   : > { %v6079_v55 = vadd.f32 %v6067_v28, %v6021_v4  ;;  %v6127_v5 = vsel %vm13948_vm13, %v6114_v29, %v6116_v63  ;;  %v6081_v19 = vadd.f32 %v6069_v7, %v6023_v41 }
0x2828   : > { %v6139_v11 = vadd.f32 %v6127_v5, %v6081_v19 }
0x282a   : > { %v6172_v33 = vpop.permute.xlu0 %6171 }
0x282b   : > { %v6060_v49 = vpop.permute.xlu1 %6059 }
0x282c   : > { %v6070_v16 = vsel %vm13937_vm14, %v6060_v49, %v6062_v47  ;;  %vm13946_vm14 = vmmov %vm13941_vm1 }
0x282d   : > { %v6082_v27 = vadd.f32 %v6070_v16, %v6024_v9  ;;  %v6068_v58 = vsel %vm13946_vm14, %v12098_v0, %v6056_v60  ;;  %vm13950_vm1 = vmmov %vm13943_vm3  ;;  %v6230_v0 = vpop.permute.xlu2 %6229 }
0x282e   : > { %v6080_v17 = vadd.f32 %v6068_v58, %v6022_v21  ;;  %vm13952_vm3 = vmmov %vm13947_vm9  ;;  %v6259_v21 = vld [vmem:[%s12379_s5] sm:$0xff] }
0x282f   : > { %vm13953_vm7 = vmmov %vm13952_vm3 }
0x2832   : > { %v6238_v46 = vpop.permute.xlu0 %6237 }
0x2833   : > { %v6174_v57 = vpop.permute.xlu1 %6173  ;;  %v6245_v36 = vsel %vm13940_vm0, %v12117_v32, %v6238_v46  ;;  %vm13949_vm0 = vmmov %vm13942_vm2 }
0x2834   : > { %v6257_v30 = vadd.f32 %v6245_v36, %v6199_v23  ;;  %v6126_v40 = vsel %vm13949_vm0, %v12111_v3, %v6114_v29  ;;  %v6185_v13 = vsel %vm13950_vm1, %v6172_v33, %v6174_v57  ;;  %vm13951_vm2 = vmmov %vm13950_vm1 }
0x2835   : > { %v6138_v47 = vadd.f32 %v6126_v40, %v6080_v17  ;;  %v6197_v52 = vadd.f32 %v6185_v13, %v6139_v11  ;;  %v6176_v9 = vpop.permute.xlu2 %6175 }
0x2836   : > { %6316 = vmatpush.msrb.mxu2 %v6257_v30  ;;  %v6186_v38 = vsel %vm13950_vm1, %v6176_v9, %v12115_v54 }
0x283a   : > { %v6118_v2 = vpop.permute.xlu0 %6117 }
0x283b   : > { %v6240_v26 = vpop.permute.xlu1 %6239  ;;  %v6128_v22 = vsel %vm13945_vm6, %v6118_v2, %v6120_v6  ;;  %v6184_v6 = vsel %vm13951_vm2, %v12113_v34, %v6172_v33  ;;  %vm13954_vm6 = vcmask 130048   ;;  %vm13959_vm2 = vmmov %vm13950_vm1 }
0x283c   : > { %v6246_v48 = vsel %vm13947_vm9, %v6238_v46, %v6240_v26  ;;  %v6140_v31 = vadd.f32 %v6128_v22, %v6082_v27  ;;  %v6196_v12 = vadd.f32 %v6184_v6, %v6138_v47  ;;  %vm13955_vm14 = vmmov %vm13954_vm6 }
0x283d   : > { %v6258_v53 = vadd.f32 %v6246_v48, %v6200_v43  ;;  %vm13956_vm9 = vmmov %vm13949_vm0  ;;  %v6226_v28 = vpop.permute.xlu2 %6225 }
0x283e   : > { %vm13957_vm13 = vmmov %vm13954_vm6  ;;  %v6198_v4 = vadd.f32 %v6186_v38, %v6140_v31 }
0x283f   : > { %6339 = vmatpush.msrb.mxu3 %v6258_v53  ;;  %vm13958_vm0 = vmmov %vm13954_vm6 }
0x2842   : > { %v6232_v60 = vpop.permute.xlu0 %6231 }
0x2843   : > { %v6228_v14 = vpop.permute.xlu1 %6227  ;;  %v6243_v63 = vsel %vm13952_vm3, %v6230_v0, %v6232_v60 }
0x2844   : > { %v6242_v41 = vsel %vm13953_vm7, %v6228_v14, %v6230_v0  ;;  %v6255_v61 = vadd.f32 %v6243_v63, %v6197_v52  ;;  %vm13960_vm7 = vmmov %vm13952_vm3 }
0x2845   : > { %v6254_v1 = vadd.f32 %v6242_v41, %v6196_v12 }
0x2846   : > { %6340 = vmatpush.msrb.mxu3 %v6255_v61 }
0x2847   : > { %6317 = vmatpush.msrb.mxu2 %v6254_v1  ;;  %6731 = vmatmul.msk.f32.vlgmr.msrb.gmra.mxu3 %vm13954_vm6, %v6259_v21  ;;  %vm13961_vm6 = vmmov %vm13958_vm0 }
0x2848   : > { %6729 = vmatmul.msk.f32.vlgmr.msrb.gmra.mxu2 %vm13955_vm14, %v6259_v21  ;;  %vm13962_vm14 = vmmov %vm13958_vm0 }
0x284a   : > { %v6168_v29 = vpop.permute.xlu0 %6167 }
0x284b   : > { %v6110_v42 = vpop.permute.xlu1 %6109  ;;  %v6183_v35 = vsel %vm13959_vm2, %v6168_v29, %v12113_v34 }
0x284c   : > { %v6125_v20 = vsel %vm13956_vm9, %v6110_v42, %v12111_v3 }
0x284d   : > { %v6137_v45 = vadd.f32 %v6125_v20, %v6079_v55  ;;  %v6241_v55 = vsel %vm13960_vm7, %v6226_v28, %v6228_v14 }
0x284f   : > { %6732 = vmatmul.msk.f32.gmra.mxu3 %vm13957_vm13, %v6260_v50  ;;  %v6195_v18 = vadd.f32 %v6183_v35, %v6137_v45 }
0x2850   : > { %6730 = vmatmul.msk.f32.gmra.mxu2 %vm13958_vm0, %v6260_v50 }
0x2851   : > { %v6253_v56 = vadd.f32 %v6241_v55, %v6195_v18 }
0x2852   : > { %v6266_v54 = vpop.permute.xlu0 %6265 }
0x2853   : > { %v6234_v51 = vpop.permute.xlu1 %6233 }
0x2854   : > { %v6244_v3 = vsel %vm13952_vm3, %v6234_v51, %v12117_v32 }
0x2855   : > { %v6256_v33 = vadd.f32 %v6244_v3, %v6198_v4 }
0x2857   : > { %6293 = vmatpush.msrb.mxu1 %v6256_v33 }
0x2859   : > { %6294 = vmatpush.msrb.mxu1 %v6253_v56 }
0x285a   : > { %6727 = vmatmul.msk.f32.vlgmr.msrb.gmra.mxu1 %vm13961_vm6, %v6259_v21 }
0x285b   : > { %v6271_v32 = vpop.permute.xlu1 %6270 }
0x2862   : > { %6728 = vmatmul.msk.f32.gmra.mxu1 %vm13962_vm14, %v6260_v50 }
0x28ca   : > { %v6342_v46 = vpop.f32.mrf.mxu3 }
0x28cb   : > { %v6319_v49 = vpop.f32.mrf.mxu2  ;;  %v6343_v57 = vadd.f32 %v6342_v46, %v6266_v54 }
0x28cc   : > { %v6320_v34 = vadd.f32 %v6319_v49, %v6266_v54 }
0x28cd   : > { %v6350_v30 = vmax.f32 %v6343_v57, 0.0 }
0x28ce   : > { %v12170_v16 = vmax.f32 %v6320_v34, 0.0 }
0x28d0   : > { %6374 = vrot.lane.b32.xlu1 %v12170_v16, %s7168_s24 }
0x28d2   : > { %v6345_v24 = vpop.f32.mrf.mxu3 }
0x28d3   : > { %v6322_v44 = vpop.f32.mrf.mxu2  ;;  %v6346_v62 = vadd.f32 %v6345_v24, %v6271_v32 }
0x28d4   : > { %v6323_v27 = vadd.f32 %v6322_v44, %v6271_v32 }
0x28d5   : > { %v6353_v10 = vmax.f32 %v6346_v62, 0.0 }
0x28d6   : > { %v12174_v59 = vmax.f32 %v6323_v27, 0.0 }
0x28d7   : > { %v6296_v37 = vpop.f32.mrf.mxu1 }
0x28d8   : > { %v6297_v8 = vadd.f32 %v6296_v37, %v6266_v54  ;;  %6380 = vrot.lane.b32.xlu1 %v12174_v59, %s7168_s24 }
0x28da   : > { %v12178_v23 = vmax.f32 %v6297_v8, 0.0 }
0x28dc   : > { %6372 = vrot.lane.b32.xlu2 %v12178_v23, %s7168_s24 }
0x28df   : > { %v6299_v36 = vpop.f32.mrf.mxu1 }
0x28e0   : > { %v6300_v39 = vadd.f32 %v6299_v36, %v6271_v32  ;;  %6402 = vrot.lane.b32.xlu1 %v12170_v16, %s7177_s29 }
0x28e2   : > { %v12184_v25 = vmax.f32 %v6300_v39, 0.0 }
0x28e4   : > { %6378 = vrot.lane.b32.xlu0 %v12184_v25, %s7168_s24  ;;  %6376 = vrot.lane.b32.xlu2 %v6350_v30, %s7168_s24 }
0x28e8   : > { %6408 = vrot.lane.b32.xlu1 %v12174_v59, %s7177_s29 }
0x28ec   : > { %6400 = vrot.lane.b32.xlu0 %v12178_v23, %s7177_s29  ;;  %6382 = vrot.lane.b32.xlu2 %v6353_v10, %s7168_s24  ;;  %s323_s24 = sand.u32 1, %s7150_s10  }
0x28f0   : > { %6430 = vrot.lane.b32.xlu1 %v12170_v16, %s7185_s21 }
0x28f4   : > { %6406 = vrot.lane.b32.xlu0 %v12184_v25, %s7177_s29  ;;  %6404 = vrot.lane.b32.xlu2 %v6350_v30, %s7177_s29 }
0x28f8   : > { %6436 = vrot.lane.b32.xlu1 %v12174_v59, %s7185_s21 }
0x28fc   : > { %6428 = vrot.lane.b32.xlu0 %v12178_v23, %s7185_s21  ;;  %6410 = vrot.lane.b32.xlu2 %v6353_v10, %s7177_s29 }
0x2900   : > { %6458 = vrot.lane.b32.xlu1 %v12170_v16, %s7193_s27 }
0x2904   : > { %6434 = vrot.lane.b32.xlu0 %v12184_v25, %s7185_s21  ;;  %6432 = vrot.lane.b32.xlu2 %v6350_v30, %s7185_s21 }
0x2908   : > { %6464 = vrot.lane.b32.xlu1 %v12174_v59, %s7193_s27 }
0x290c   : > { %6456 = vrot.lane.b32.xlu0 %v12178_v23, %s7193_s27  ;;  %6438 = vrot.lane.b32.xlu2 %v6353_v10, %s7185_s21  ;;  %s7116_s21 = scalar_lea.hbm %s12383_s9, 2 }
0x2910   : > { %6486 = vrot.lane.b32.xlu1 %v12170_v16, %s13895_s25 }
0x2914   : > { %6462 = vrot.lane.b32.xlu0 %v12184_v25, %s7193_s27  ;;  %6460 = vrot.lane.b32.xlu2 %v6350_v30, %s7193_s27 }
0x2918   : > { %6492 = vrot.lane.b32.xlu1 %v12174_v59, %s13895_s25 }
0x291c   : > { %6484 = vrot.lane.b32.xlu0 %v12178_v23, %s13895_s25  ;;  %6466 = vrot.lane.b32.xlu2 %v6353_v10, %s7193_s27  ;;  %s6645_s27 = scalar_lea.hbm %s12383_s9, %s7358_s13  ;;  %s6637_s13 = scalar_lea.sflag [#allocation7], %s323_s24 }
0x291d   : > { %s6649_s23 = sshll.u32 %s6645_s27, 4  ;;  %s6650_s23 = int_to_ptr.hbm [resolvable:$true] %s6649_s23 }
0x291e   : > { %s7110_s16 = sshra.s32 %s6650_s23, 4  ;;  %s7111_s16 = int_to_ptr.hbm [resolvable:$true] %s7110_s16 }
0x291f   : > { %s7112_s28 = scalar_lea.hbm %s7111_s16, 1  ;;  %p7117_p0 = scmp.lt.s32.totalorder %s7111_s16, %s12383_s9 }
0x2920   : > { %6514 = vrot.lane.b32.xlu1 %v12170_v16, %s13899_s17  ;;  %p7113_p11 = scmp.ne.s32.totalorder %s7111_s16, %s7112_s28  ;;  %p7118_p1 = scmp.lt.s32.totalorder %s7116_s21, %s7112_s28 }
0x2922   : > { %p7114_p12 = pnand %p7113_p11, %p7375_p5  ;;  %p7119_p2 = por %p7118_p1, %p7117_p0 }
0x2924   : > { %6490 = vrot.lane.b32.xlu0 %v12184_v25, %s13895_s25  ;;  %6488 = vrot.lane.b32.xlu2 %v6350_v30, %s13895_s25  ;;  %p7115_p13 = pneg %p7114_p12 }
0x2926   : > { %p7120_p3 = pnand %p7119_p2, %p7115_p13 }
0x2928   : > { %6520 = vrot.lane.b32.xlu1 %v12174_v59, %s13899_s17 }
0x292c   : > { %6512 = vrot.lane.b32.xlu0 %v12178_v23, %s13899_s17  ;;  %6494 = vrot.lane.b32.xlu2 %v6353_v10, %s13895_s25 }
0x2930   : > { %6542 = vrot.lane.b32.xlu1 %v12170_v16, %s13902_s14 }
0x2934   : > { %6518 = vrot.lane.b32.xlu0 %v12184_v25, %s13899_s17  ;;  %6516 = vrot.lane.b32.xlu2 %v6350_v30, %s13899_s17 }
0x2936   : > { %v6373_v2 = vpop.permute.xlu2 %6372 }
0x2938   : > { %6548 = vrot.lane.b32.xlu1 %v12174_v59, %s13902_s14 }
0x293c   : > { %6540 = vrot.lane.b32.xlu0 %v12178_v23, %s13902_s14  ;;  %6522 = vrot.lane.b32.xlu2 %v6353_v10, %s13899_s17 }
0x293e   : > { %v6377_v15 = vpop.permute.xlu2 %6376 }
0x293f   : > { %v6396_v31 = vmax.f32 %v6350_v30, %v6377_v15 }
0x2942   : > { %v6375_v7 = vpop.permute.xlu1 %6374 }
0x2943   : > { %v6384_v43 = vsel %vm787_vm4, %v6373_v2, %v6375_v7  ;;  %v6385_v26 = vsel %vm787_vm4, %v6375_v7, %v6377_v15 }
0x2944   : > { %6546 = vrot.lane.b32.xlu0 %v12184_v25, %s13902_s14  ;;  %6544 = vrot.lane.b32.xlu2 %v6350_v30, %s13902_s14  ;;  %v6395_v19 = vmax.f32 %v12170_v16, %v6385_v26  ;;  %v6394_v41 = vmax.f32 %v12178_v23, %v6384_v43 }
0x2946   : > { %v6383_v22 = vpop.permute.xlu2 %6382 }
0x2947   : > { %v6399_v11 = vmax.f32 %v6353_v10, %v6383_v22 }
0x294a   : > { %v6381_v58 = vpop.permute.xlu1 %6380 }
0x294b   : > { %v6387_v48 = vsel %vm787_vm4, %v6381_v58, %v6383_v22 }
0x294c   : > { %6550 = vrot.lane.b32.xlu2 %v6353_v10, %s13902_s14  ;;  %v6398_v60 = vmax.f32 %v12174_v59, %v6387_v48  ;;  %s324_s14 = scalar_lea.vmem [#allocation6], %s323_s24 }
0x294d   : > { %s6647_s22 = sshll.u32 %s324_s14, 4  ;;  %s6648_s22 = int_to_ptr.vmem [resolvable:$true] %s6647_s22 }
0x294e   : > { %v6405_v5 = vpop.permute.xlu2 %6404 }
0x294f   : > { %v6424_v53 = vmax.f32 %v6396_v31, %v6405_v5 }
0x2952   : > { %v6403_v40 = vpop.permute.xlu1 %6402 }
0x2953   : > { %v6413_v17 = vsel %vm1079_vm8, %v6403_v40, %v6405_v5 }
0x2954   : > { %v6423_v13 = vmax.f32 %v6395_v19, %v6413_v17 }
0x2956   : > { %v6411_v6 = vpop.permute.xlu2 %6410  ;;  %v6379_v47 = vpop.permute.xlu0 %6378 }
0x2957   : > { %v12253_v0 = vmax.f32 %v6399_v11, %v6411_v6  ;;  %v6386_v52 = vsel %vm787_vm4, %v6379_v47, %v6381_v58 }
0x2958   : > { %v6397_v20 = vmax.f32 %v12184_v25, %v6386_v52 }
0x295a   : > { %v6409_v12 = vpop.permute.xlu1 %6408 }
0x295b   : > { %v6415_v14 = vsel %vm1079_vm8, %v6409_v12, %v6411_v6 }
0x295c   : > { %v12258_v63 = vmax.f32 %v6398_v60, %v6415_v14 }
0x295e   : > { %v6433_v61 = vpop.permute.xlu2 %6432  ;;  %v6401_v21 = vpop.permute.xlu0 %6400 }
0x295f   : > { %v6412_v1 = vsel %vm1079_vm8, %v6401_v21, %v6403_v40  ;;  %v6452_v57 = vmax.f32 %v6424_v53, %v6433_v61  ;;  %v6571_v21 = vld [vmem:[%s12381_s7 + $0x10] sm:$0xff] }
0x2960   : > { %v6422_v9 = vmax.f32 %v6394_v41, %v6412_v1 }
0x2962   : > { %v6431_v42 = vpop.permute.xlu1 %6430 }
0x2963   : > { %v6441_v46 = vsel %vm1371_vm12, %v6431_v42, %v6433_v61 }
0x2964   : > { %v6451_v30 = vmax.f32 %v6423_v13, %v6441_v46 }
0x2966   : > { %v6439_v50 = vpop.permute.xlu2 %6438  ;;  %v6407_v45 = vpop.permute.xlu0 %6406 }
0x2967   : > { %v6414_v29 = vsel %vm1079_vm8, %v6407_v45, %v6409_v12  ;;  %v6455_v31 = vmax.f32 %v12253_v0, %v6439_v50  ;;  %v6569_v45 = vld [vmem:[%s12381_s7] sm:$0xff] }
0x2968   : > { %v12264_v38 = vmax.f32 %v6397_v20, %v6414_v29  ;;  %v6733_v29 = vld [vmem:[%s12381_s7 + $0x30] sm:$0xff] }
0x296a   : > { %v6437_v35 = vpop.permute.xlu1 %6436 }
0x296b   : > { %v6443_v26 = vsel %vm1371_vm12, %v6437_v35, %v6439_v50  ;;  %v6734_v50 = vld [vmem:[%s12381_s7 + $0x38] sm:$0xff] }
0x296c   : > { %v6454_v6 = vmax.f32 %v12258_v63, %v6443_v26  ;;  %v6735_v63 = vld [vmem:[%s12381_s7 + $0x40] sm:$0xff]  ;;  %v6572_v26 = vld [vmem:[%s12381_s7 + $0x18] sm:$0xff] }
0x296e   : > { %v6461_v18 = vpop.permute.xlu2 %6460  ;;  %v6429_v51 = vpop.permute.xlu0 %6428 }
0x296f   : > { %v6440_v36 = vsel %vm1371_vm12, %v6429_v51, %v6431_v42  ;;  %v6480_v62 = vmax.f32 %v6452_v57, %v6461_v18 }
0x2970   : > { %v6450_v15 = vmax.f32 %v6422_v9, %v6440_v36  ;;  %v6570_v9 = vld [vmem:[%s12381_s7 + $0x8] sm:$0xff] }
0x2972   : > { %v6459_v4 = vpop.permute.xlu1 %6458 }
0x2973   : > { %v6469_v39 = vsel %vm1663_vm5, %v6459_v4, %v6461_v18 }
0x2974   : > { %v6479_v7 = vmax.f32 %v6451_v30, %v6469_v39 }
0x2976   : > { %v6467_v3 = vpop.permute.xlu2 %6466  ;;  %v6435_v28 = vpop.permute.xlu0 %6434 }
0x2977   : > { %v6442_v5 = vsel %vm1371_vm12, %v6435_v28, %v6437_v35  ;;  %v6483_v60 = vmax.f32 %v6455_v31, %v6467_v3  ;;  %vm6634_vm12 = vcmask 8192  }
0x2978   : > { %v6453_v41 = vmax.f32 %v12264_v38, %v6442_v5 }
0x297a   : > { %v6465_v33 = vpop.permute.xlu1 %6464 }
0x297b   : > { %v6471_v40 = vsel %vm1663_vm5, %v6465_v33, %v6467_v3 }
0x297c   : > { %v6482_v61 = vmax.f32 %v6454_v6, %v6471_v40 }
0x297e   : > { %v6457_v55 = vpop.permute.xlu0 %6456  ;;  %v6489_v56 = vpop.permute.xlu2 %6488 }
0x297f   : > { %v6468_v10 = vsel %vm1663_vm5, %v6457_v55, %v6459_v4  ;;  %v6508_v22 = vmax.f32 %v6480_v62, %v6489_v56  ;;  %v6574_v62 = vld [vmem:[%s12381_s7 + $0x28] sm:$0xff] }
0x2980   : > { %v6478_v53 = vmax.f32 %v6450_v15, %v6468_v10 }
0x2982   : > { %v6487_v54 = vpop.permute.xlu1 %6486 }
0x2983   : > { %v6497_v2 = vsel %vm1955_vm10, %v6487_v54, %v6489_v56 }
0x2984   : > { %v6507_v19 = vmax.f32 %v6479_v7, %v6497_v2 }
0x2986   : > { %v6463_v49 = vpop.permute.xlu0 %6462  ;;  %v12266_v34 = vpop.permute.xlu2 %6494 }
0x2987   : > { %v6470_v12 = vsel %vm1663_vm5, %v6463_v49, %v6465_v33  ;;  %v6511_v35 = vmax.f32 %v6483_v60, %v12266_v34 }
0x2988   : > { %v6481_v18 = vmax.f32 %v6453_v41, %v6470_v12 }
0x298a   : > { %v6493_v16 = vpop.permute.xlu1 %6492 }
0x298b   : > { %v6499_v0 = vsel %vm1955_vm10, %v6493_v16, %v12266_v34 }
0x298c   : > { %v6510_v51 = vmax.f32 %v6482_v61, %v6499_v0 }
0x298e   : > { %v6485_v32 = vpop.permute.xlu0 %6484  ;;  %v6517_v27 = vpop.permute.xlu2 %6516 }
0x298f   : > { %v6496_v58 = vsel %vm1955_vm10, %v6485_v32, %v6487_v54  ;;  %v6536_v17 = vmax.f32 %v6508_v22, %v6517_v27  ;;  %v6736_v22 = vld [vmem:[%s12381_s7 + $0x48] sm:$0xff] }
0x2990   : > { %v6506_v47 = vmax.f32 %v6478_v53, %v6496_v58 }
0x2992   : > { %v6515_v44 = vpop.permute.xlu1 %6514 }
0x2993   : > { %v6525_v48 = vsel %vm2247_vm15, %v6515_v44, %v6517_v27 }
0x2994   : > { %v6535_v52 = vmax.f32 %v6507_v19, %v6525_v48 }
0x2996   : > { %v6491_v59 = vpop.permute.xlu0 %6490  ;;  %v6523_v8 = vpop.permute.xlu2 %6522 }
0x2997   : > { %v6498_v28 = vsel %vm1955_vm10, %v6491_v59, %v6493_v16 }
0x2998   : > { %v6509_v57 = vmax.f32 %v6481_v18, %v6498_v28  ;;  %v13963_v18 = vld [vmem:[#allocation9_spill] sm:$0xff] }
0x2999   : > { %vm6598_vm4 = vcmp.eq.s32.totalorder %v13963_v18, 0  ;;  %vm6631_vm8 = vcmp.eq.s32.totalorder %v13963_v18, 1 }
0x299a   : > { %v12268_v37 = vpop.permute.xlu1 %6520 }
0x299b   : > { %v6527_v33 = vsel %vm2247_vm15, %v12268_v37, %v6523_v8 }
0x299c   : > { %v6538_v36 = vmax.f32 %v6510_v51, %v6527_v33 }
0x299e   : > { %v6513_v23 = vpop.permute.xlu0 %6512  ;;  %v6545_v43 = vpop.permute.xlu2 %6544 }
0x299f   : > { %v6524_v13 = vsel %vm2247_vm15, %v6513_v23, %v6515_v44  ;;  %v6564_v14 = vmax.f32 %v6536_v17, %v6545_v43  ;;  %v6539_v23 = vmax.f32 %v6511_v35, %v6523_v8  ;;  %v6738_v8 = vld [vmem:[%s12381_s7 + $0x58] sm:$0xff] }
0x29a0   : > { %v6534_v1 = vmax.f32 %v6506_v47, %v6524_v13 }
0x29a1   : > { %v6577_v55 = vmul.f32 %v6571_v21, %v6564_v14  ;;  %v6610_v56 = vmul.f32 %v6735_v63, %v6564_v14 }
0x29a2   : > { %v6543_v25 = vpop.permute.xlu1 %6542 }
0x29a3   : > { %v6553_v11 = vsel %vm2539_vm11, %v6543_v25, %v6545_v43  ;;  %v6615_v30 = vsel %vm2539_vm11, %v6610_v56, 0.0  ;;  %v6737_v43 = vld [vmem:[%s12381_s7 + $0x50] sm:$0xff] }
0x29a4   : > { %v6563_v42 = vmax.f32 %v6535_v52, %v6553_v11 }
0x29a6   : > { %v6519_v24 = vpop.permute.xlu0 %6518  ;;  %v6576_v54 = vmul.f32 %v6570_v9, %v6563_v42  ;;  %v6609_v49 = vmul.f32 %v6734_v50, %v6563_v42  ;;  %v6551_v32 = vpop.permute.xlu2 %6550 }
0x29a7   : > { %v6526_v34 = vsel %vm2247_vm15, %v6519_v24, %v12268_v37  ;;  %v6567_v59 = vmax.f32 %v6539_v23, %v6551_v32  ;;  %v6573_v24 = vld [vmem:[%s12381_s7 + $0x20] sm:$0xff] }
0x29a8   : > { %v6537_v37 = vmax.f32 %v6509_v57, %v6526_v34 }
0x29a9   : > { %v6580_v31 = vmul.f32 %v6574_v62, %v6567_v59  ;;  %v6613_v5 = vmul.f32 %v6738_v8, %v6567_v59 }
0x29aa   : > { %v6549_v4 = vpop.permute.xlu1 %6548 }
0x29ab   : > { %v6555_v46 = vsel %vm2539_vm11, %v6549_v4, %v6551_v32  ;;  %v6620_v6 = vsel %vm2539_vm11, %v6613_v5, 0.0  ;;  %v6587_v47 = vsel %vm2539_vm11, %v6580_v31, 0.0 }
0x29ac   : > { %v6566_v10 = vmax.f32 %v6538_v36, %v6555_v46 }
0x29ae   : > { %v6541_v20 = vpop.permute.xlu0 %6540  ;;  %v6579_v53 = vmul.f32 %v6573_v24, %v6566_v10  ;;  %v6612_v19 = vmul.f32 %v6737_v43, %v6566_v10 }
0x29af   : > { %v6552_v38 = vsel %vm2539_vm11, %v6541_v20, %v6543_v25  ;;  %v6582_v25 = vsel %vm2539_vm11, %v6577_v55, 0.0 }
0x29b0   : > { %v6562_v3 = vmax.f32 %v6534_v1, %v6552_v38 }
0x29b2   : > { %v6575_v44 = vmul.f32 %v6569_v45, %v6562_v3  ;;  %v6608_v27 = vmul.f32 %v6733_v29, %v6562_v3 }
0x29b4   : > { %v6614_v39 = vadd.f32 %v6609_v49, %v6608_v27  ;;  %v6581_v16 = vadd.f32 %v6576_v54, %v6575_v44 }
0x29b6   : > { %v6547_v2 = vpop.permute.xlu0 %6546  ;;  %v6616_v15 = vadd.f32 %v6615_v30, %v6614_v39  ;;  %v6583_v7 = vadd.f32 %v6582_v25, %v6581_v16 }
0x29b7   : > { %v6554_v58 = vsel %vm2539_vm11, %v6547_v2, %v6549_v4  ;;  %v6568_v4 = vld [vmem:[%s12382_s8] sm:$0x1] }
0x29b8   : > { %v6565_v48 = vmax.f32 %v6537_v37, %v6554_v58  ;;  %6617 = vadd.xlane.f32.xlu2 %v6616_v15  ;;  %6584 = vadd.xlane.f32.xlu0 %v6583_v7 }
0x29ba   : > { %v6578_v40 = vmul.f32 %v6572_v26, %v6565_v48  ;;  %v6611_v17 = vmul.f32 %v6736_v22, %v6565_v48 }
0x29bc   : > { %v6619_v13 = vadd.f32 %v6612_v19, %v6611_v17  ;;  %v6586_v11 = vadd.f32 %v6579_v53, %v6578_v40 }
0x29be   : > { %v6621_v52 = vadd.f32 %v6620_v6, %v6619_v13  ;;  %v6588_v60 = vadd.f32 %v6587_v47, %v6586_v11 }
0x29c0   : > { %6622 = vadd.xlane.f32.xlu2 %v6621_v52  ;;  %6589 = vadd.xlane.f32.xlu1 %v6588_v60 }
0x2a2b   : > { %v6618_v12 = vpop.xlane.xlu2 %6617  ;;  %v6585_v0 = vpop.xlane.xlu0 %6584 }
0x2a33   : > { %v6623_v14 = vpop.xlane.xlu2 %6622  ;;  %v6590_v41 = vpop.xlane.xlu1 %6589 }
0x2a34   : > { %v6624_v61 = vadd.f32 %v6623_v14, %v6618_v12  ;;  %v6591_v21 = vadd.f32 %v6590_v41, %v6585_v0 }
0x2a36   : > { %v6625_v63 = vrot.slane %v6624_v61, 4  ;;  %v6592_v1 = vrot.slane %v6591_v21, 4 }
0x2a38   : > { %v6626_v9 = vadd.f32 %v6625_v63, %v6624_v61  ;;  %v6593_v42 = vadd.f32 %v6592_v1, %v6591_v21 }
0x2a3a   : > { %v6627_v20 = vrot.slane %v6626_v9, 2  ;;  %v6594_v50 = vrot.slane %v6593_v42, 2 }
0x2a3c   : > { %v6628_v45 = vadd.f32 %v6627_v20, %v6626_v9  ;;  %v6595_v29 = vadd.f32 %v6594_v50, %v6593_v42 }
0x2a3e   : > { %v6629_v38 = vrot.slane %v6628_v45, 1  ;;  %v6596_v35 = vrot.slane %v6595_v29, 1 }
0x2a40   : > { %v6630_v51 = vadd.f32 %v6629_v38, %v6628_v45  ;;  %v6597_v3 = vadd.f32 %v6596_v35, %v6595_v29 }
0x2a42   : > { %v6599_v28 = vsel %vm6598_vm4, %v6597_v3, 0.0  ;;  %v6632_v55 = vsel %vm6631_vm8, %v6630_v51, 0.0 }
0x2a43   : > { %v6600_v33 = vadd.f32 %v6599_v28, %v6568_v4 }
0x2a45   : > { %v6633_v56 = vadd.f32 %v6632_v55, %v6600_v33 }
0x2a47   : > { %6635 = vst.msk [vmem:[%s324_s14] sm:$0x1] %vm6634_vm12, %v6633_v56 }
0x2a48   : > { %7123 = shalt.err (!%p7120_p3)
}
0x2a49   : > { %6742 = dma.vmem_to_hbm [thread:$0]  (%p7375_p5), %s6648_s22, 16, %s6650_s23, %s6637_s13  }
0x2a4a PF: > { %p6748_p4 = scmp.ge.s32.totalorder %s7158_s12, 2  ;;  %s6661_s24 = sand.u32 1, %s7146_s30  }
0x2a4b   : > { %s6662_s17 = scalar_lea.sflag [#allocation7], %s6661_s24 }
0x2a4c   : > { %p6745_p7 = pnand %p6748_p4, %p7379_p6 }
0x2a4e   : > { %p6746_p8 = pneg %p6745_p7 }
0x2a50   : > { %7141 = dma.done.wait (%p6746_p8), %s6662_s17, 16  }
0x2a51   : > { %7143 = vsyncadd (%p6746_p8), %s6662_s17, 4294967280  ;;  %p19_p9 = scmp.ge.s32.totalorder %s7362_s15, 4   ;;  %s13964_s30 = smov %s7150_s10 }
0x2a52   : > { %s13965_s10 = smov %s7154_s11  ;;  %s13966_s11 = smov %s7373_s18 }
0x2a53   : > { %s13967_s12 = smov %s7362_s15  ;;  %21 = sbr.rel (!%p19_p9) target bundleno = 3 (0x3), region = 92 }
0x2a58   :  { %6667 = vsyncpa [#allocation7], 1 }
0x2a59   :  { %6669 = vsyncpa [#allocation7 + $0x1], 1 }

</bundles_post_ra>
